<compile_context>
chip_gen: v5e
topology: v5e:2x2
jax: 0.10.0
libtpu: 0.0.40
codegen_flags: <defaults>
</compile_context>

<pallas_src>
import jax
import jax.numpy as jnp
from jax.experimental import pallas as pl
from jax.experimental.pallas import tpu as pltpu

EPS = 1e-5


def conv1x1_bn_kernel(w_ref, x_ref, gamma_ref, beta_ref, o_ref, acc_ref):
    # Grid axis 0 walks Cin chunks (reduction axis).
    k = pl.program_id(0)

    @pl.when(k == 0)
    def _init():
        acc_ref[...] = jnp.zeros_like(acc_ref)

    # (Cout, tk) @ (tk, M) -> (Cout, M), MXU with f32 accumulation.
    acc_ref[...] += jnp.dot(
        w_ref[...], x_ref[...], preferred_element_type=jnp.float32
    )

    @pl.when(k == pl.num_programs(0) - 1)
    def _epilogue():
        y = acc_ref[...]                                        # (Cout, M) f32
        # BatchNorm2d training-mode forward: per-channel stats over the M positions.
        mean = jnp.mean(y, axis=1, keepdims=True)               # (Cout, 1)
        var = jnp.mean(jnp.square(y - mean), axis=1, keepdims=True)  # biased variance
        inv = jax.lax.rsqrt(var + EPS)
        scale = gamma_ref[...] * inv                            # (Cout, 1)
        shift = beta_ref[...] - mean * scale                    # (Cout, 1)
        o_ref[...] = (y * scale + shift).astype(o_ref.dtype)    # single FMA-style pass


def conv1x1_batchnorm(x_nchw, w_oi, gamma, beta, *, tk=896):
    """x_nchw: (N, Cin, H, W); w_oi: (Cout, Cin) = conv weight squeezed (native layout)."""
    N, Cin, H, W = x_nchw.shape
    Cout = w_oi.shape[0]
    M = N * H * W

    # For N == 1 this transpose is over a size-1 axis -> a free reshape (no HBM traffic).
    x_cm = jnp.transpose(x_nchw, (1, 0, 2, 3)).reshape(Cin, M)   # (Cin, M)
    gamma2 = gamma.reshape(Cout, 1)
    beta2 = beta.reshape(Cout, 1)

    # Cin chunking: tk must divide Cin and be a multiple of 128 (lane axis of w block).
    if Cin % tk != 0 or tk % 128 != 0:
        tk = Cin
    nk = Cin // tk

    out_cm = pl.pallas_call(
        conv1x1_bn_kernel,
        out_shape=jax.ShapeDtypeStruct((Cout, M), jnp.float32),
        grid_spec=pltpu.PrefetchScalarGridSpec(
            num_scalar_prefetch=0,
            grid=(nk,),
            in_specs=[
                pl.BlockSpec((Cout, tk), lambda k: (0, k)),   # weight, native (Cout, Cin)
                pl.BlockSpec((tk, M), lambda k: (k, 0)),      # activation (Cin, M)
                pl.BlockSpec((Cout, 1), lambda k: (0, 0)),    # gamma
                pl.BlockSpec((Cout, 1), lambda k: (0, 0)),    # beta
            ],
            out_specs=pl.BlockSpec((Cout, M), lambda k: (0, 0)),
            scratch_shapes=[pltpu.VMEM((Cout, M), jnp.float32)],
        ),
        compiler_params=pltpu.CompilerParams(
            dimension_semantics=("arbitrary",),   # reduction axis
            vmem_limit_bytes=32 << 20,            # fits v5e/v6e/v7x; actual footprint ~5 MB
        ),
    )(w_oi, x_cm, gamma2, beta2)

    # (Cout, M) -> (N, Cout, H, W) is a contiguous reshape for N == 1 (free).
    return out_cm.reshape(N, Cout, H, W)


if __name__ == "__main__":
    # Shapes implied by the module's forward: x491 is (1, 2688, 7, 7).
    N, Cin, Cout, H, W = 1, 2688, 448, 7, 7

    key = jax.random.PRNGKey(0)
    kx, kw, kg, kb = jax.random.split(key, 4)
    x = jax.random.normal(kx, (N, Cin, H, W), dtype=jnp.float32)
    # Conv2d weight (Cout, Cin, 1, 1) squeezed to (Cout, Cin), kept f32 in native layout.
    w = jax.random.normal(kw, (Cout, Cin), dtype=jnp.float32) * 0.02
    # Non-trivial affine params so the BN epilogue is actually exercised.
    gamma = 1.0 + 0.1 * jax.random.normal(kg, (Cout,), dtype=jnp.float32)
    beta = 0.1 * jax.random.normal(kb, (Cout,), dtype=jnp.float32)

    out = jax.block_until_ready(conv1x1_batchnorm(x, w, gamma, beta))
    assert out.shape == (N, Cout, H, W), out.shape

    # Pure-JAX reference (same math) for a sanity check.
    x_cm = x.reshape(Cin, H * W)
    y_ref = w @ x_cm                                             # (Cout, M)
    mu = jnp.mean(y_ref, axis=1, keepdims=True)
    var = jnp.mean((y_ref - mu) ** 2, axis=1, keepdims=True)
    y_ref = gamma[:, None] * (y_ref - mu) * jax.lax.rsqrt(var + EPS) + beta[:, None]
    ref = y_ref.reshape(N, Cout, H, W)

    err = float(jnp.max(jnp.abs(out - ref)))
    assert jnp.allclose(out, ref, rtol=1e-3, atol=1e-3), err
    print("KERNEL_OK")

    # TODO(synk): BatchNorm2d running_mean/running_var buffer updates (momentum=0.1)
    # are module state, not part of the returned tensor, and are not computed here.
</pallas_src>

<mosaic_0001>
module attributes {stable_mosaic.version = 11 : i64} {
  func.func @conv1x1_bn_kernel(%arg0: i32, %arg1: memref<448x896xf32, #tpu.memory_space<vmem>>, %arg2: memref<896x49xf32, #tpu.memory_space<vmem>>, %arg3: memref<448x1xf32, #tpu.memory_space<vmem>>, %arg4: memref<448x1xf32, #tpu.memory_space<vmem>>, %arg5: memref<448x49xf32, #tpu.memory_space<vmem>>, %arg6: memref<448x49xf32, #tpu.memory_space<vmem>>) attributes {dimension_semantics = [#tpu.dimension_semantics<arbitrary>], iteration_bounds = array<i64: 3>, scalar_prefetch = 0 : i64, scratch_operands = 1 : i64, tpu.core_type = #tpu.core_type<tc>, window_params = [{transform_indices = @transform_0, window_bounds = array<i64: 448, 896>}, {transform_indices = @transform_1, window_bounds = array<i64: 896, 49>}, {pipeline_mode = #tpu.pipeline_mode<synchronous>, transform_indices = @transform_2, window_bounds = array<i64: 448, 1>}, {pipeline_mode = #tpu.pipeline_mode<synchronous>, transform_indices = @transform_3, window_bounds = array<i64: 448, 1>}, {pipeline_mode = #tpu.pipeline_mode<synchronous>, transform_indices = @transform_4, window_bounds = array<i64: 448, 49>}]} {
    %c0_i32 = arith.constant 0 : i32
    %0 = arith.cmpi eq, %arg0, %c0_i32 : i32
    %1 = arith.extui %0 : i1 to i32
    %c0_i32_0 = arith.constant 0 : i32
    %2 = arith.cmpi ne, %1, %c0_i32_0 : i32
    scf.if %2 {
      %cst_9 = arith.constant 0.000000e+00 : f32
      %12 = vector.broadcast %cst_9 : f32 to vector<448x49xf32>
      %c0_10 = arith.constant 0 : index
      %c0_11 = arith.constant 0 : index
      %13 = vector.load %arg6[%c0_10, %c0_11] : memref<448x49xf32, #tpu.memory_space<vmem>>, vector<448x49xf32>
      tpu.vector_store %arg6[%c0_10, %c0_11], %12 {strides = array<i32>} : memref<448x49xf32, #tpu.memory_space<vmem>>, vector<448x49xf32>,
    } else {
    }
    %c0 = arith.constant 0 : index
    %c0_1 = arith.constant 0 : index
    %3 = vector.load %arg6[%c0, %c0_1] : memref<448x49xf32, #tpu.memory_space<vmem>>, vector<448x49xf32>
    %c0_2 = arith.constant 0 : index
    %c0_3 = arith.constant 0 : index
    %4 = vector.load %arg1[%c0_2, %c0_3] : memref<448x896xf32, #tpu.memory_space<vmem>>, vector<448x896xf32>
    %c0_4 = arith.constant 0 : index
    %c0_5 = arith.constant 0 : index
    %5 = vector.load %arg2[%c0_4, %c0_5] : memref<896x49xf32, #tpu.memory_space<vmem>>, vector<896x49xf32>
    %cst = arith.constant dense<0.000000e+00> : vector<448x49xf32>
    %6 = tpu.matmul %4, %5, %cst {dimension_numbers = #tpu.dot_dimension_numbers<[1], [0], [0], [1], [0, 0, 1, 1], [], []>} : vector<448x896xf32>, vector<896x49xf32>, vector<448x49xf32> -> vector<448x49xf32>
    %7 = arith.addf %3, %6 : vector<448x49xf32>
    %c0_6 = arith.constant 0 : index
    %c0_7 = arith.constant 0 : index
    %8 = vector.load %arg6[%c0_6, %c0_7] : memref<448x49xf32, #tpu.memory_space<vmem>>, vector<448x49xf32>
    tpu.vector_store %arg6[%c0_6, %c0_7], %7 {strides = array<i32>} : memref<448x49xf32, #tpu.memory_space<vmem>>, vector<448x49xf32>,
    %c2_i32 = arith.constant 2 : i32
    %9 = arith.cmpi eq, %arg0, %c2_i32 : i32
    %10 = arith.extui %9 : i1 to i32
    %c0_i32_8 = arith.constant 0 : i32
    %11 = arith.cmpi ne, %10, %c0_i32_8 : i32
    scf.if %11 {
      %c0_9 = arith.constant 0 : index
      %c0_10 = arith.constant 0 : index
      %12 = vector.load %arg6[%c0_9, %c0_10] : memref<448x49xf32, #tpu.memory_space<vmem>>, vector<448x49xf32>
      %cst_11 = arith.constant dense<0.000000e+00> : vector<448xf32>
      %13 = vector.multi_reduction <add>, %12, %cst_11 [1] : vector<448x49xf32> to vector<448xf32>
      %14 = vector.shape_cast %13 : vector<448xf32> to vector<448x1xf32>
      %cst_12 = arith.constant 4.900000e+01 : f32
      %15 = vector.broadcast %cst_12 : f32 to vector<448x1xf32>
      %16 = arith.divf %14, %15 : vector<448x1xf32>
      %17 = vector.broadcast %16 : vector<448x1xf32> to vector<448x49xf32>
      %18 = arith.subf %12, %17 : vector<448x49xf32>
      %19 = arith.mulf %18, %18 : vector<448x49xf32>
      %cst_13 = arith.constant dense<0.000000e+00> : vector<448xf32>
      %20 = vector.multi_reduction <add>, %19, %cst_13 [1] : vector<448x49xf32> to vector<448xf32>
      %21 = vector.shape_cast %20 : vector<448xf32> to vector<448x1xf32>
      %cst_14 = arith.constant 4.900000e+01 : f32
      %22 = vector.broadcast %cst_14 : f32 to vector<448x1xf32>
      %23 = arith.divf %21, %22 : vector<448x1xf32>
      %cst_15 = arith.constant 9.99999974E-6 : f32
      %24 = vector.broadcast %cst_15 : f32 to vector<448x1xf32>
      %25 = arith.addf %23, %24 : vector<448x1xf32>
      %26 = math.rsqrt %25 : vector<448x1xf32>
      %c0_16 = arith.constant 0 : index
      %c0_17 = arith.constant 0 : index
      %27 = vector.load %arg3[%c0_16, %c0_17] : memref<448x1xf32, #tpu.memory_space<vmem>>, vector<448x1xf32>
      %28 = arith.mulf %27, %26 : vector<448x1xf32>
      %c0_18 = arith.constant 0 : index
      %c0_19 = arith.constant 0 : index
      %29 = vector.load %arg4[%c0_18, %c0_19] : memref<448x1xf32, #tpu.memory_space<vmem>>, vector<448x1xf32>
      %30 = arith.mulf %16, %28 : vector<448x1xf32>
      %31 = arith.subf %29, %30 : vector<448x1xf32>
      %32 = vector.broadcast %28 : vector<448x1xf32> to vector<448x49xf32>
      %33 = arith.mulf %12, %32 : vector<448x49xf32>
      %34 = vector.broadcast %31 : vector<448x1xf32> to vector<448x49xf32>
      %35 = arith.addf %33, %34 : vector<448x49xf32>
      %c0_20 = arith.constant 0 : index
      %c0_21 = arith.constant 0 : index
      %36 = vector.load %arg5[%c0_20, %c0_21] : memref<448x49xf32, #tpu.memory_space<vmem>>, vector<448x49xf32>
      tpu.vector_store %arg5[%c0_20, %c0_21], %35 {strides = array<i32>} : memref<448x49xf32, #tpu.memory_space<vmem>>, vector<448x49xf32>,
    } else {
    }
    return
  }
  func.func @transform_0(%arg0: i32) -> (i32, i32) {
    %c0_i32 = arith.constant 0 : i32
    %c0_i32_0 = arith.constant 0 : i32
    return %c0_i32, %arg0 : i32, i32
  }
  func.func @transform_1(%arg0: i32) -> (i32, i32) {
    %c0_i32 = arith.constant 0 : i32
    %c0_i32_0 = arith.constant 0 : i32
    return %arg0, %c0_i32 : i32, i32
  }
  func.func @transform_2(%arg0: i32) -> (i32, i32) {
    %c0_i32 = arith.constant 0 : i32
    %c0_i32_0 = arith.constant 0 : i32
    %c0_i32_1 = arith.constant 0 : i32
    return %c0_i32, %c0_i32_0 : i32, i32
  }
  func.func @transform_3(%arg0: i32) -> (i32, i32) {
    %c0_i32 = arith.constant 0 : i32
    %c0_i32_0 = arith.constant 0 : i32
    %c0_i32_1 = arith.constant 0 : i32
    return %c0_i32, %c0_i32_0 : i32, i32
  }
  func.func @transform_4(%arg0: i32) -> (i32, i32) {
    %c0_i32 = arith.constant 0 : i32
    %c0_i32_0 = arith.constant 0 : i32
    %c0_i32_1 = arith.constant 0 : i32
    return %c0_i32, %c0_i32_0 : i32, i32
  }
}

</mosaic_0001>

<bundles_post_ra>
// kernel: tpu_custom_call.1
= control target key start
LH: loop header
LB: loop body
LE: loop exit
PB: predicated region body
PF: predicated region fallthrough
CT: control target
= control target key end

     0   :  { %9 = vsyncpa [#allocation4], 0  ;;  %s9044_s0 = inlined_call_operand.hbm [shape: f32[448,2688], index: 0, kind: input, shape index: {}]   ;;  %s9045_s1 = inlined_call_operand.vmem [shape: f32[2688,49], index: 1, kind: input, shape index: {}]   ;;  %s9046_s2 = inlined_call_operand.vmem [shape: f32[448,1], index: 2, kind: input, shape index: {}]   ;;  %s9047_s3 = inlined_call_operand.vmem [shape: f32[448,1], index: 3, kind: input, shape index: {}]   ;;  %s9048_s4 = inlined_call_operand.vmem [shape: f32[448,49], index: 4, kind: output, shape index: {}]  }
   0x1   :  { %11 = vsyncpa [#allocation4 + $0x1], 0  ;;  %s4935_s15 = smov 0   ;;  %s4937_s16 = smov 0  }
   0x2   :  { %s4939_s17 = smov 0   ;;  %s4941_s18 = smov 0  }
   0x3 LB: > { %s4954_s19 = sadd.s32 4294967295, %s4902_s18   ;;  %s4957_s20 = sadd.s32 1, %s4902_s18   ;;  %s4902_s18 = sphi %s4941_s18, %s9625_s18   ;;  %s4898_s17 = sphi %s4939_s17, %s9624_s17   ;;  %s4894_s16 = sphi %s4937_s16, %s9623_s16   ;;  %s4890_s15 = sphi %s4935_s15, %s9622_s15  }
   0x4   : > { %s21_s21 = ssub.s32 %s4902_s18, %s4957_s20  ;;  %s24_s22 = sadd.s32 1, %s4898_s17 }
   0x5   : > { %p22_p0 = scmp.eq.s32.totalorder %s21_s21, 0  ;;  %p31_p1 = scmp.ne.s32.totalorder %s4898_s17, %s4894_s16 }
   0x6   : > { %p32_p2 = scmp.eq.s32.totalorder %s4902_s18, 0  ;;  %p37_p3 = scmp.ne.s32.totalorder %s4894_s16, %s4890_s15 }
   0x7   : > { %s4967_s23 = scalar_select %p22_p0, %s4898_s17, %s24_s22  }
   0x8   : > { %p33_p4 = por %p32_p2, %p31_p1  ;;  %p38_p5 = scmp.eq.s32.totalorder %s4954_s19, 0 }
   0x9   : > { %p4626_p6 = scmp.lt.s32.totalorder %s4902_s18, 3  ;;  %s156_s25 = sand.u32 1, %s4898_s17  }
   0xa   : > { %p4971_p7 = por %p38_p5, %p37_p3  ;;  %s4618_s26 = smul.u32 3136, %s156_s25 }
   0xb   : > { %s4569_s27 = smul.u32 56, %s4902_s18  ;;  %p4977_p8 = pnand %p4626_p6, %p33_p4 }
   0xc   : > { %s160_s6 = scalar_lea.vmem [#allocation3], %s4618_s26  ;;  %s157_s9 = scalar_lea.sflag [#allocation4], %s156_s25 }
   0xd   : > { %s165_s5 = scalar_lea.hbm %s9044_s0, %s4569_s27  ;;  %s168_s7 = sshll.u32 %s160_s6, 4  ;;  %s169_s7 = int_to_ptr.vmem [resolvable:$true] %s168_s7 }
   0xe   : > { %s166_s8 = sshll.u32 %s165_s5, 4  ;;  %p4842_p10 = pneg %p4977_p8  ;;  %s167_s8 = int_to_ptr.hbm [resolvable:$true] %s166_s8 }
   0xf   : > { %s4838_s10 = sshra.s32 %s167_s8, 4  ;;  %s4845_s14 = scalar_lea.hbm %s9044_s0, 9408  ;;  %s4839_s10 = int_to_ptr.hbm [resolvable:$true] %s4838_s10 }
  0x10   : > { %s4840_s11 = scalar_lea.hbm %s4839_s10, 3136  ;;  %p4846_p13 = scmp.lt.s32.totalorder %s4839_s10, %s9044_s0 }
  0x11   : > { %p4841_p9 = scmp.ne.s32.totalorder %s4839_s10, %s4840_s11  ;;  %p4847_p0 = scmp.lt.s32.totalorder %s4845_s14, %s4840_s11 }
  0x13   : > { %p4843_p11 = pnand %p4842_p10, %p4841_p9  ;;  %p4848_p1 = por %p4847_p0, %p4846_p13 }
  0x15   : > { %p4844_p12 = pneg %p4843_p11 }
  0x17   : > { %p4849_p2 = pnand %p4848_p1, %p4844_p12 }
  0x19   : > { %4852 = shalt.err (!%p4849_p2)
}
  0x1a   : > { %s4904_s22 = smov 2688   ;;  %s4905_s25 = smov 896  }
  0x1b   : > { %s4906_s26 = smov 56   ;;  %p4563_p3 = scmp.ge.s32.totalorder %s4902_s18, 1 }
  0x1c   : > { %4625 = dma.hbm_to_vmem [thread:$0]  (!%p4977_p8), %s167_s8, 50176, %s169_s7, %s157_s9, %s4904_s22, %s4905_s25, %s4906_s26  }
  0x1d   : > { %p185_p4 = scmp.lt.s32.totalorder %s4902_s18, 4 }
  0x1f   : > { %p186_p5 = pnand %p4563_p3, %p185_p4 }
  0x21   : > { %189 = sbr.rel (%p186_p5) target bundleno = 1800 (0x708), region = 36 }
  0x26   : > { %s191_s27 = sand.u32 1, %s4894_s16  }
  0x27   : > { %s4619_s29 = smul.u32 3136, %s191_s27  ;;  %s192_s30 = scalar_lea.sflag [#allocation4], %s191_s27 }
  0x29   : > { %s4997_s5 = scalar_lea.vmem [#allocation3], %s4619_s29 }
  0x2a   : > { %4885 = dma.done.wait (%p4971_p7), %s192_s30, 50176  }
  0x2b   : > { %4887 = vsyncadd (%p4971_p7), %s192_s30, 4294917120  ;;  %s222_s6 = smul.u32 112, %s4954_s19  ;;  %p4565_p8 = scmp.ne.s32.totalorder %s4954_s19, 0 }
  0x2d   : > { %p223_p6 = scmp.lt.s32.totalorder %s222_s6, 335  ;;  %231 = sbr.rel (%p4565_p8) target bundleno = 107 (0x6b), region = 44 }
  0x2f   : > { %s9627_s6 = smov (!%p223_p6, %s222_s6), 335 }
  0x30   : > { %s4564_s28 = sshll.u32 %s9627_s6, 3 }
  0x31   : > { %s5007_s8 = scalar_lea.vmem %s9045_s1, %s4564_s28 }
  0x32   : > { %vm232_vm0 = vcmask 400384   ;;  %v4907_v0 = vmov 0.0  }
  0x33   : > { %233 = vst.msk [vmem:[#allocation2] sm:$0xff] %vm232_vm0, %v4907_v0 }
  0x34   : > { %234 = vst.msk [vmem:[#allocation2 + $0x8] sm:$0xff] %vm232_vm0, %v4907_v0 }
  0x35   : > { %235 = vst.msk [vmem:[#allocation2 + $0x10] sm:$0xff] %vm232_vm0, %v4907_v0 }
  0x36   : > { %236 = vst.msk [vmem:[#allocation2 + $0x18] sm:$0xff] %vm232_vm0, %v4907_v0 }
  0x37   : > { %237 = vst.msk [vmem:[#allocation2 + $0x20] sm:$0xff] %vm232_vm0, %v4907_v0 }
  0x38   : > { %238 = vst.msk [vmem:[#allocation2 + $0x28] sm:$0xff] %vm232_vm0, %v4907_v0 }
  0x39   : > { %239 = vst.msk [vmem:[#allocation2 + $0x30] sm:$0xff] %vm232_vm0, %v4907_v0 }
  0x3a   : > { %240 = vst.msk [vmem:[#allocation2 + $0x38] sm:$0xff] %vm232_vm0, %v4907_v0 }
  0x3b   : > { %241 = vst.msk [vmem:[#allocation2 + $0x40] sm:$0xff] %vm232_vm0, %v4907_v0 }
  0x3c   : > { %242 = vst.msk [vmem:[#allocation2 + $0x48] sm:$0xff] %vm232_vm0, %v4907_v0 }
  0x3d   : > { %243 = vst.msk [vmem:[#allocation2 + $0x50] sm:$0xff] %vm232_vm0, %v4907_v0 }
  0x3e   : > { %244 = vst.msk [vmem:[#allocation2 + $0x58] sm:$0xff] %vm232_vm0, %v4907_v0 }
  0x3f   : > { %245 = vst.msk [vmem:[#allocation2 + $0x60] sm:$0xff] %vm232_vm0, %v4907_v0 }
  0x40   : > { %246 = vst.msk [vmem:[#allocation2 + $0x68] sm:$0xff] %vm232_vm0, %v4907_v0 }
  0x41   : > { %247 = vst.msk [vmem:[#allocation2 + $0x70] sm:$0xff] %vm232_vm0, %v4907_v0 }
  0x42   : > { %248 = vst.msk [vmem:[#allocation2 + $0x78] sm:$0xff] %vm232_vm0, %v4907_v0 }
  0x43   : > { %249 = vst.msk [vmem:[#allocation2 + $0x80] sm:$0xff] %vm232_vm0, %v4907_v0 }
  0x44   : > { %250 = vst.msk [vmem:[#allocation2 + $0x88] sm:$0xff] %vm232_vm0, %v4907_v0 }
  0x45   : > { %251 = vst.msk [vmem:[#allocation2 + $0x90] sm:$0xff] %vm232_vm0, %v4907_v0 }
  0x46   : > { %252 = vst.msk [vmem:[#allocation2 + $0x98] sm:$0xff] %vm232_vm0, %v4907_v0 }
  0x47   : > { %253 = vst.msk [vmem:[#allocation2 + $0xa0] sm:$0xff] %vm232_vm0, %v4907_v0 }
  0x48   : > { %254 = vst.msk [vmem:[#allocation2 + $0xa8] sm:$0xff] %vm232_vm0, %v4907_v0 }
  0x49   : > { %255 = vst.msk [vmem:[#allocation2 + $0xb0] sm:$0xff] %vm232_vm0, %v4907_v0 }
  0x4a   : > { %256 = vst.msk [vmem:[#allocation2 + $0xb8] sm:$0xff] %vm232_vm0, %v4907_v0 }
  0x4b   : > { %257 = vst.msk [vmem:[#allocation2 + $0xc0] sm:$0xff] %vm232_vm0, %v4907_v0 }
  0x4c   : > { %258 = vst.msk [vmem:[#allocation2 + $0xc8] sm:$0xff] %vm232_vm0, %v4907_v0 }
  0x4d   : > { %259 = vst.msk [vmem:[#allocation2 + $0xd0] sm:$0xff] %vm232_vm0, %v4907_v0 }
  0x4e   : > { %260 = vst.msk [vmem:[#allocation2 + $0xd8] sm:$0xff] %vm232_vm0, %v4907_v0 }
  0x4f   : > { %261 = vst.msk [vmem:[#allocation2 + $0xe0] sm:$0xff] %vm232_vm0, %v4907_v0 }
  0x50   : > { %262 = vst.msk [vmem:[#allocation2 + $0xe8] sm:$0xff] %vm232_vm0, %v4907_v0 }
  0x51   : > { %263 = vst.msk [vmem:[#allocation2 + $0xf0] sm:$0xff] %vm232_vm0, %v4907_v0 }
  0x52   : > { %264 = vst.msk [vmem:[#allocation2 + $0xf8] sm:$0xff] %vm232_vm0, %v4907_v0 }
  0x53   : > { %265 = vst.msk [vmem:[#allocation2 + $0x100] sm:$0xff] %vm232_vm0, %v4907_v0 }
  0x54   : > { %266 = vst.msk [vmem:[#allocation2 + $0x108] sm:$0xff] %vm232_vm0, %v4907_v0 }
  0x55   : > { %267 = vst.msk [vmem:[#allocation2 + $0x110] sm:$0xff] %vm232_vm0, %v4907_v0 }
  0x56   : > { %268 = vst.msk [vmem:[#allocation2 + $0x118] sm:$0xff] %vm232_vm0, %v4907_v0 }
  0x57   : > { %269 = vst.msk [vmem:[#allocation2 + $0x120] sm:$0xff] %vm232_vm0, %v4907_v0 }
  0x58   : > { %270 = vst.msk [vmem:[#allocation2 + $0x128] sm:$0xff] %vm232_vm0, %v4907_v0 }
  0x59   : > { %271 = vst.msk [vmem:[#allocation2 + $0x130] sm:$0xff] %vm232_vm0, %v4907_v0 }
  0x5a   : > { %272 = vst.msk [vmem:[#allocation2 + $0x138] sm:$0xff] %vm232_vm0, %v4907_v0 }
  0x5b   : > { %273 = vst.msk [vmem:[#allocation2 + $0x140] sm:$0xff] %vm232_vm0, %v4907_v0 }
  0x5c   : > { %274 = vst.msk [vmem:[#allocation2 + $0x148] sm:$0xff] %vm232_vm0, %v4907_v0 }
  0x5d   : > { %275 = vst.msk [vmem:[#allocation2 + $0x150] sm:$0xff] %vm232_vm0, %v4907_v0 }
  0x5e   : > { %276 = vst.msk [vmem:[#allocation2 + $0x158] sm:$0xff] %vm232_vm0, %v4907_v0 }
  0x5f   : > { %277 = vst.msk [vmem:[#allocation2 + $0x160] sm:$0xff] %vm232_vm0, %v4907_v0 }
  0x60   : > { %278 = vst.msk [vmem:[#allocation2 + $0x168] sm:$0xff] %vm232_vm0, %v4907_v0 }
  0x61   : > { %279 = vst.msk [vmem:[#allocation2 + $0x170] sm:$0xff] %vm232_vm0, %v4907_v0 }
  0x62   : > { %280 = vst.msk [vmem:[#allocation2 + $0x178] sm:$0xff] %vm232_vm0, %v4907_v0 }
  0x63   : > { %281 = vst.msk [vmem:[#allocation2 + $0x180] sm:$0xff] %vm232_vm0, %v4907_v0 }
  0x64   : > { %282 = vst.msk [vmem:[#allocation2 + $0x188] sm:$0xff] %vm232_vm0, %v4907_v0 }
  0x65   : > { %283 = vst.msk [vmem:[#allocation2 + $0x190] sm:$0xff] %vm232_vm0, %v4907_v0 }
  0x66   : > { %284 = vst.msk [vmem:[#allocation2 + $0x198] sm:$0xff] %vm232_vm0, %v4907_v0 }
  0x67   : > { %285 = vst.msk [vmem:[#allocation2 + $0x1a0] sm:$0xff] %vm232_vm0, %v4907_v0 }
  0x68   : > { %286 = vst.msk [vmem:[#allocation2 + $0x1a8] sm:$0xff] %vm232_vm0, %v4907_v0 }
  0x69   : > { %287 = vst.msk [vmem:[#allocation2 + $0x1b0] sm:$0xff] %vm232_vm0, %v4907_v0 }
  0x6a   : > { %288 = vst.msk [vmem:[#allocation2 + $0x1b8] sm:$0xff] %vm232_vm0, %v4907_v0 }
  0x6b PF: > { %v752_v1 = vld [vmem:[%s5007_s8 + $0x78] sm:$0xff]  ;;  %v751_v2 = vld [vmem:[%s5007_s8 + $0x70] sm:$0xff]  ;;  %v750_v5 = vld [vmem:[%s5007_s8 + $0x68] sm:$0xff]  ;;  %vm2200_vm1 = vcmask 400384   ;;  %p4566_p7 = scmp.ne.s32.totalorder %s4954_s19, 2 }
  0x6c   : > { %4570 = vmatpush.msra.mxu3 %v752_v1  ;;  %v5069_v3 = vld [vmem:[%s5007_s8 + $0x178] sm:$0xff]  ;;  %v5072_v4 = vld [vmem:[%s5007_s8 + $0x170] sm:$0xff]  ;;  %849 = vmatpush.msra.mxu0 %v752_v1  ;;  %v5081_v7 = vld [vmem:[%s5007_s8 + $0x168] sm:$0xff] }
  0x6d   : > { %1219 = vmatpush.msra.mxu2 %v5069_v3  ;;  %v5077_v6 = vld [vmem:[%s5007_s8 + $0xf8] sm:$0xff]  ;;  %v5084_v8 = vld [vmem:[%s5007_s8 + $0xf0] sm:$0xff]  ;;  %v749_v9 = vld [vmem:[%s5007_s8 + $0x60] sm:$0xff] }
  0x6e   : > { %4571 = vmatpush.msra.mxu3 %v751_v2  ;;  %1034 = vmatpush.msra.mxu1 %v5077_v6  ;;  %v5089_v10 = vld [vmem:[%s5007_s8 + $0xe8] sm:$0xff]  ;;  %v5093_v11 = vld [vmem:[%s5007_s8 + $0x160] sm:$0xff]  ;;  %v748_v12 = vld [vmem:[%s5007_s8 + $0x58] sm:$0xff] }
  0x6f   : > { %1220 = vmatpush.msra.mxu2 %v5072_v4  ;;  %850 = vmatpush.msra.mxu0 %v751_v2  ;;  %v5098_v13 = vld [vmem:[%s5007_s8 + $0xe0] sm:$0xff]  ;;  %v5102_v14 = vld [vmem:[%s5007_s8 + $0x158] sm:$0xff]  ;;  %v747_v15 = vld [vmem:[%s5007_s8 + $0x50] sm:$0xff] }
  0x70   : > { %4572 = vmatpush.msra.mxu3 %v750_v5  ;;  %1035 = vmatpush.msra.mxu1 %v5084_v8  ;;  %v5107_v16 = vld [vmem:[%s5007_s8 + $0xd8] sm:$0xff]  ;;  %v5111_v17 = vld [vmem:[%s5007_s8 + $0x150] sm:$0xff]  ;;  %v746_v18 = vld [vmem:[%s5007_s8 + $0x48] sm:$0xff] }
  0x71   : > { %1221 = vmatpush.msra.mxu2 %v5081_v7  ;;  %851 = vmatpush.msra.mxu0 %v750_v5  ;;  %v5116_v19 = vld [vmem:[%s5007_s8 + $0xd0] sm:$0xff]  ;;  %v5120_v20 = vld [vmem:[%s5007_s8 + $0x148] sm:$0xff]  ;;  %v745_v21 = vld [vmem:[%s5007_s8 + $0x40] sm:$0xff] }
  0x72   : > { %4573 = vmatpush.msra.mxu3 %v749_v9  ;;  %1036 = vmatpush.msra.mxu1 %v5089_v10  ;;  %v5125_v22 = vld [vmem:[%s5007_s8 + $0xc8] sm:$0xff]  ;;  %v5129_v23 = vld [vmem:[%s5007_s8 + $0x140] sm:$0xff]  ;;  %v744_v24 = vld [vmem:[%s5007_s8 + $0x38] sm:$0xff] }
  0x73   : > { %1222 = vmatpush.msra.mxu2 %v5093_v11  ;;  %852 = vmatpush.msra.mxu0 %v749_v9  ;;  %v5134_v25 = vld [vmem:[%s5007_s8 + $0xc0] sm:$0xff]  ;;  %v5138_v26 = vld [vmem:[%s5007_s8 + $0x138] sm:$0xff]  ;;  %v743_v27 = vld [vmem:[%s5007_s8 + $0x30] sm:$0xff] }
  0x74   : > { %4574 = vmatpush.msra.mxu3 %v748_v12  ;;  %1037 = vmatpush.msra.mxu1 %v5098_v13  ;;  %v5143_v28 = vld [vmem:[%s5007_s8 + $0xb8] sm:$0xff]  ;;  %v5147_v29 = vld [vmem:[%s5007_s8 + $0x130] sm:$0xff]  ;;  %v742_v30 = vld [vmem:[%s5007_s8 + $0x28] sm:$0xff] }
  0x75   : > { %1223 = vmatpush.msra.mxu2 %v5102_v14  ;;  %853 = vmatpush.msra.mxu0 %v748_v12  ;;  %v5152_v31 = vld [vmem:[%s5007_s8 + $0xb0] sm:$0xff]  ;;  %v5156_v32 = vld [vmem:[%s5007_s8 + $0x128] sm:$0xff]  ;;  %v741_v33 = vld [vmem:[%s5007_s8 + $0x20] sm:$0xff] }
  0x76   : > { %4575 = vmatpush.msra.mxu3 %v747_v15  ;;  %1038 = vmatpush.msra.mxu1 %v5107_v16  ;;  %v5161_v34 = vld [vmem:[%s5007_s8 + $0xa8] sm:$0xff]  ;;  %v5165_v35 = vld [vmem:[%s5007_s8 + $0x120] sm:$0xff]  ;;  %v740_v36 = vld [vmem:[%s5007_s8 + $0x18] sm:$0xff] }
  0x77   : > { %1224 = vmatpush.msra.mxu2 %v5111_v17  ;;  %854 = vmatpush.msra.mxu0 %v747_v15  ;;  %v5170_v37 = vld [vmem:[%s5007_s8 + $0xa0] sm:$0xff]  ;;  %v5174_v38 = vld [vmem:[%s5007_s8 + $0x118] sm:$0xff]  ;;  %v739_v39 = vld [vmem:[%s5007_s8 + $0x10] sm:$0xff] }
  0x78   : > { %4576 = vmatpush.msra.mxu3 %v746_v18  ;;  %1039 = vmatpush.msra.mxu1 %v5116_v19  ;;  %v5179_v40 = vld [vmem:[%s5007_s8 + $0x98] sm:$0xff]  ;;  %v5183_v41 = vld [vmem:[%s5007_s8 + $0x110] sm:$0xff]  ;;  %v738_v42 = vld [vmem:[%s5007_s8 + $0x8] sm:$0xff] }
  0x79   : > { %1225 = vmatpush.msra.mxu2 %v5120_v20  ;;  %855 = vmatpush.msra.mxu0 %v746_v18  ;;  %v5188_v43 = vld [vmem:[%s5007_s8 + $0x90] sm:$0xff]  ;;  %v5192_v44 = vld [vmem:[%s5007_s8 + $0x108] sm:$0xff]  ;;  %v737_v45 = vld [vmem:[%s5007_s8] sm:$0xff] }
  0x7a   : > { %4577 = vmatpush.msra.mxu3 %v745_v21  ;;  %1040 = vmatpush.msra.mxu1 %v5125_v22  ;;  %v5197_v46 = vld [vmem:[%s5007_s8 + $0x88] sm:$0xff]  ;;  %v639_v47 = vld [vmem:[%s4997_s5 + $0x930] sm:$0xff]  ;;  %v5202_v48 = vld [vmem:[%s5007_s8 + $0x100] sm:$0xff] }
  0x7b   : > { %1226 = vmatpush.msra.mxu2 %v5129_v23  ;;  %856 = vmatpush.msra.mxu0 %v745_v21  ;;  %v347_v49 = vld [vmem:[%s4997_s5 + $0x10] sm:$0xff]  ;;  %v848_v50 = vld [vmem:[%s5007_s8 + $0x378] sm:$0xff]  ;;  %v5210_v51 = vld [vmem:[%s5007_s8 + $0x80] sm:$0xff] }
  0x7c   : > { %4578 = vmatpush.msra.mxu3 %v744_v24  ;;  %1041 = vmatpush.msra.mxu1 %v5134_v25  ;;  %v345_v52 = vld [vmem:[%s4997_s5] sm:$0xff]  ;;  %v346_v53 = vld [vmem:[%s4997_s5 + $0x8] sm:$0xff]  ;;  %v816_v54 = vld [vmem:[%s5007_s8 + $0x278] sm:$0xff] }
  0x7d   : > { %1227 = vmatpush.msra.mxu2 %v5138_v26  ;;  %857 = vmatpush.msra.mxu0 %v744_v24  ;;  %v832_v55 = vld [vmem:[%s5007_s8 + $0x2f8] sm:$0xff]  ;;  %v847_v56 = vld [vmem:[%s5007_s8 + $0x370] sm:$0xff]  ;;  %v646_v59 = vld [vmem:[%s4997_s5 + $0x968] sm:$0xff] }
  0x7e   : > { %4579 = vmatpush.msra.mxu3 %v743_v27  ;;  %1042 = vmatpush.msra.mxu1 %v5143_v28  ;;  %v815_v57 = vld [vmem:[%s5007_s8 + $0x270] sm:$0xff]  ;;  %v354_v60 = vld [vmem:[%s4997_s5 + $0x48] sm:$0xff]  ;;  %v352_v61 = vld [vmem:[%s4997_s5 + $0x38] sm:$0xff] }
  0x7f   : > { %1228 = vmatpush.msra.mxu2 %v5147_v29  ;;  %858 = vmatpush.msra.mxu0 %v743_v27  ;;  %v831_v58 = vld [vmem:[%s5007_s8 + $0x2f0] sm:$0xff]  ;;  %v353_v62 = vld [vmem:[%s4997_s5 + $0x40] sm:$0xff]  ;;  %v846_v1 = vld [vmem:[%s5007_s8 + $0x368] sm:$0xff] }
  0x80   : > { %4580 = vmatpush.msra.mxu3 %v742_v30  ;;  %1043 = vmatpush.msra.mxu1 %v5152_v31  ;;  %v653_v63 = vld [vmem:[%s4997_s5 + $0x9a0] sm:$0xff]  ;;  %v814_v2 = vld [vmem:[%s5007_s8 + $0x268] sm:$0xff]  ;;  %v359_v5 = vld [vmem:[%s4997_s5 + $0x70] sm:$0xff] }
  0x81   : > { %1229 = vmatpush.msra.mxu2 %v5156_v32  ;;  %859 = vmatpush.msra.mxu0 %v742_v30  ;;  %v361_v0 = vld [vmem:[%s4997_s5 + $0x80] sm:$0xff]  ;;  %v660_v9 = vld [vmem:[%s4997_s5 + $0x9d8] sm:$0xff]  ;;  %v366_v12 = vld [vmem:[%s4997_s5 + $0xa8] sm:$0xff] }
  0x82   : > { %4581 = vmatpush.msra.mxu3 %v741_v33  ;;  %1044 = vmatpush.msra.mxu1 %v5161_v34  ;;  %v667_v15 = vld [vmem:[%s4997_s5 + $0xa10] sm:$0xff]  ;;  %v373_v18 = vld [vmem:[%s4997_s5 + $0xe0] sm:$0xff]  ;;  %v674_v24 = vld [vmem:[%s4997_s5 + $0xa48] sm:$0xff] }
  0x83   : > { %1230 = vmatpush.msra.mxu2 %v5165_v35  ;;  %860 = vmatpush.msra.mxu0 %v741_v33  ;;  %v845_v21 = vld [vmem:[%s5007_s8 + $0x360] sm:$0xff]  ;;  %v844_v33 = vld [vmem:[%s5007_s8 + $0x358] sm:$0xff] }
  0x84   : > { %4582 = vmatpush.msra.mxu3 %v740_v36  ;;  %1045 = vmatpush.msra.mxu1 %v5170_v37  ;;  %v829_v27 = vld [vmem:[%s5007_s8 + $0x2e0] sm:$0xff] }
  0x85   : > { %1231 = vmatpush.msra.mxu2 %v5174_v38  ;;  %861 = vmatpush.msra.mxu0 %v740_v36  ;;  %v381_v30 = vld [vmem:[%s4997_s5 + $0x120] sm:$0xff]  ;;  %v812_v36 = vld [vmem:[%s5007_s8 + $0x258] sm:$0xff] }
  0x86   : > { %4583 = vmatpush.msra.mxu3 %v739_v39  ;;  %1046 = vmatpush.msra.mxu1 %v5179_v40 }
  0x87   : > { %1232 = vmatpush.msra.mxu2 %v5183_v41  ;;  %862 = vmatpush.msra.mxu0 %v739_v39  ;;  %v409_v39 = vld [vmem:[%s4997_s5 + $0x200] sm:$0xff] }
  0x88   : > { %4584 = vmatpush.msra.mxu3 %v738_v42  ;;  %1047 = vmatpush.msra.mxu1 %v5188_v43 }
  0x89   : > { %1233 = vmatpush.msra.mxu2 %v5192_v44  ;;  %863 = vmatpush.msra.mxu0 %v738_v42  ;;  %v417_v42 = vld [vmem:[%s4997_s5 + $0x240] sm:$0xff] }
  0x8a   : > { %4585 = vmatpush.msra.mxu3 %v737_v45  ;;  %1048 = vmatpush.msra.mxu1 %v5197_v46 }
  0x8b   : > { %991 = vmatmul.f32.vlgmr.msra.gmra.mxu3 %v639_v47  ;;  %1234 = vmatpush.msra.mxu2 %v5202_v48  ;;  %v716_v47 = vld [vmem:[%s4997_s5 + $0xb98] sm:$0xff] }
  0x8c   : > { %4586 = vmatpush.msrb.mxu3 %v5077_v6  ;;  %1235 = vmatmul.f32.vlgmr.msra.gmra.mxu2 %v347_v49  ;;  %v360_v6 = vld [vmem:[%s4997_s5 + $0x78] sm:$0xff]  ;;  %v422_v49 = vld [vmem:[%s4997_s5 + $0x268] sm:$0xff] }
  0x8d   : > { %1959 = vmatpush.msrb.mxu2 %v848_v50  ;;  %864 = vmatpush.msra.mxu0 %v737_v45  ;;  %v415_v45 = vld [vmem:[%s4997_s5 + $0x230] sm:$0xff] }
  0x8e   : > { %4587 = vmatpush.msrb.mxu3 %v5084_v8  ;;  %1049 = vmatpush.msra.mxu1 %v5210_v51  ;;  %v830_v8 = vld [vmem:[%s5007_s8 + $0x2e8] sm:$0xff]  ;;  %v423_v50 = vld [vmem:[%s4997_s5 + $0x270] sm:$0xff] }
  0x8f   : > { %865 = vmatmul.f32.vlgmr.msra.gmra.mxu0 %v345_v52  ;;  %1050 = vmatmul.f32.vlgmr.msra.gmra.mxu1 %v346_v53  ;;  %v431_v52 = vld [vmem:[%s4997_s5 + $0x2b0] sm:$0xff]  ;;  %v429_v53 = vld [vmem:[%s4997_s5 + $0x2a0] sm:$0xff] }
  0x90   : > { %1589 = vmatpush.msrb.mxu0 %v816_v54  ;;  %1774 = vmatpush.msrb.mxu1 %v832_v55  ;;  %v430_v54 = vld [vmem:[%s4997_s5 + $0x2a8] sm:$0xff] }
  0x91   : > { %4588 = vmatpush.msrb.mxu3 %v5089_v10  ;;  %1960 = vmatpush.msrb.mxu2 %v847_v56  ;;  %v368_v10 = vld [vmem:[%s4997_s5 + $0xb8] sm:$0xff]  ;;  %v842_v55 = vld [vmem:[%s5007_s8 + $0x348] sm:$0xff] }
  0x92   : > { %1590 = vmatpush.msrb.mxu0 %v815_v57  ;;  %1775 = vmatpush.msrb.mxu1 %v831_v58  ;;  %v810_v56 = vld [vmem:[%s5007_s8 + $0x248] sm:$0xff] }
  0x93   : > { %994 = vmatmul.f32.gmra.mxu3 %v646_v59  ;;  %1961 = vmatpush.msrb.mxu2 %v846_v1  ;;  %v730_v57 = vld [vmem:[%s4997_s5 + $0xc08] sm:$0xff]  ;;  %v444_v1 = vld [vmem:[%s4997_s5 + $0x318] sm:$0xff] }
  0x94   : > { %1238 = vmatmul.f32.gmra.mxu2 %v354_v60  ;;  %4589 = vmatpush.msrb.mxu3 %v5098_v13  ;;  %v367_v13 = vld [vmem:[%s4997_s5 + $0xb0] sm:$0xff]  ;;  %v438_v58 = vld [vmem:[%s4997_s5 + $0x2e8] sm:$0xff]  ;;  %v436_v60 = vld [vmem:[%s4997_s5 + $0x2d8] sm:$0xff] }
  0x95   : > { %1591 = vmatpush.msrb.mxu0 %v814_v2  ;;  %1776 = vmatpush.msrb.mxu1 %v830_v8  ;;  %v826_v59 = vld [vmem:[%s5007_s8 + $0x2c8] sm:$0xff]  ;;  %v647_v2 = vld [vmem:[%s4997_s5 + $0x970] sm:$0xff] }
  0x96   : > { %4590 = vmatpush.msrb.mxu3 %v5107_v16  ;;  %v375_v16 = vld [vmem:[%s4997_s5 + $0xf0] sm:$0xff]  ;;  %1962 = vmatpush.msrb.mxu2 %v845_v21  ;;  %v450_v8 = vld [vmem:[%s4997_s5 + $0x348] sm:$0xff] }
  0x97   : > { %868 = vmatmul.f32.gmra.mxu0 %v352_v61  ;;  %1053 = vmatmul.f32.gmra.mxu1 %v353_v62  ;;  %v437_v61 = vld [vmem:[%s4997_s5 + $0x2e0] sm:$0xff]  ;;  %v640_v62 = vld [vmem:[%s4997_s5 + $0x938] sm:$0xff]  ;;  %v458_v21 = vld [vmem:[%s4997_s5 + $0x388] sm:$0xff] }
  0x98   : > { %4591 = vmatpush.msrb.mxu3 %v5116_v19  ;;  %v374_v19 = vld [vmem:[%s4997_s5 + $0xe8] sm:$0xff]  ;;  %1777 = vmatpush.msrb.mxu1 %v829_v27 }
  0x99   : > { %1963 = vmatpush.msrb.mxu2 %v844_v33  ;;  %v466_v27 = vld [vmem:[%s4997_s5 + $0x3c8] sm:$0xff]  ;;  %v808_v33 = vld [vmem:[%s5007_s8 + $0x238] sm:$0xff] }
  0x9a   : > { %4592 = vmatpush.msrb.mxu3 %v5125_v22  ;;  %v813_v22 = vld [vmem:[%s5007_s8 + $0x260] sm:$0xff] }
  0x9b   : > { %997 = vmatmul.f32.gmra.mxu3 %v653_v63  ;;  %1592 = vmatpush.msrb.mxu0 %v813_v22  ;;  %v445_v63 = vld [vmem:[%s4997_s5 + $0x320] sm:$0xff] }
  0x9c   : > { %1241 = vmatmul.f32.gmra.mxu2 %v361_v0  ;;  %4593 = vmatpush.msrb.mxu3 %v5134_v25  ;;  %v382_v25 = vld [vmem:[%s4997_s5 + $0x128] sm:$0xff]  ;;  %v443_v0 = vld [vmem:[%s4997_s5 + $0x310] sm:$0xff] }
  0x9d   : > { %1593 = vmatpush.msrb.mxu0 %v812_v36 }
  0x9e   : > { %4594 = vmatpush.msrb.mxu3 %v5143_v28  ;;  %v380_v28 = vld [vmem:[%s4997_s5 + $0x118] sm:$0xff] }
  0x9f   : > { %871 = vmatmul.f32.gmra.mxu0 %v359_v5  ;;  %1056 = vmatmul.f32.gmra.mxu1 %v360_v6  ;;  %v452_v5 = vld [vmem:[%s4997_s5 + $0x358] sm:$0xff]  ;;  %v841_v6 = vld [vmem:[%s5007_s8 + $0x340] sm:$0xff] }
  0xa0   : > { %4595 = vmatpush.msrb.mxu3 %v5152_v31  ;;  %v388_v31 = vld [vmem:[%s4997_s5 + $0x158] sm:$0xff] }
  0xa2   : > { %4596 = vmatpush.msrb.mxu3 %v5161_v34  ;;  %v395_v34 = vld [vmem:[%s4997_s5 + $0x190] sm:$0xff] }
  0xa3   : > { %1000 = vmatmul.f32.gmra.mxu3 %v660_v9  ;;  %v451_v9 = vld [vmem:[%s4997_s5 + $0x350] sm:$0xff] }
  0xa4   : > { %1244 = vmatmul.f32.gmra.mxu2 %v368_v10  ;;  %4597 = vmatpush.msrb.mxu3 %v5170_v37  ;;  %v410_v37 = vld [vmem:[%s4997_s5 + $0x208] sm:$0xff]  ;;  %v809_v10 = vld [vmem:[%s5007_s8 + $0x240] sm:$0xff] }
  0xa6   : > { %4598 = vmatpush.msrb.mxu3 %v5179_v40  ;;  %v843_v40 = vld [vmem:[%s5007_s8 + $0x350] sm:$0xff] }
  0xa7   : > { %874 = vmatmul.f32.gmra.mxu0 %v366_v12  ;;  %1059 = vmatmul.f32.gmra.mxu1 %v367_v13  ;;  %v825_v12 = vld [vmem:[%s5007_s8 + $0x2c0] sm:$0xff]  ;;  %v654_v13 = vld [vmem:[%s4997_s5 + $0x9a8] sm:$0xff] }
  0xa8   : > { %4599 = vmatpush.msrb.mxu3 %v5188_v43  ;;  %1964 = vmatpush.msrb.mxu2 %v843_v40  ;;  %v811_v43 = vld [vmem:[%s5007_s8 + $0x250] sm:$0xff]  ;;  %v478_v40 = vld [vmem:[%s4997_s5 + $0x428] sm:$0xff] }
  0xa9   : > { %1594 = vmatpush.msrb.mxu0 %v811_v43 }
  0xaa   : > { %4600 = vmatpush.msrb.mxu3 %v5197_v46  ;;  %v416_v46 = vld [vmem:[%s4997_s5 + $0x238] sm:$0xff]  ;;  %1965 = vmatpush.msrb.mxu2 %v842_v55  ;;  %v823_v55 = vld [vmem:[%s5007_s8 + $0x2b0] sm:$0xff] }
  0xab   : > { %1003 = vmatmul.f32.gmra.mxu3 %v667_v15  ;;  %1595 = vmatpush.msrb.mxu0 %v810_v56  ;;  %v459_v15 = vld [vmem:[%s4997_s5 + $0x390] sm:$0xff]  ;;  %v494_v56 = vld [vmem:[%s4997_s5 + $0x4a8] sm:$0xff] }
  0xac   : > { %1247 = vmatmul.f32.gmra.mxu2 %v375_v16  ;;  %4601 = vmatpush.msrb.mxu3 %v5210_v51  ;;  %v723_v51 = vld [vmem:[%s4997_s5 + $0xbd0] sm:$0xff] }
  0xad   : > { %1966 = vmatpush.msrb.mxu2 %v841_v6  ;;  %1596 = vmatpush.msrb.mxu0 %v809_v10  ;;  %v500_v6 = vld [vmem:[%s4997_s5 + $0x4d8] sm:$0xff]  ;;  %v703_v10 = vld [vmem:[%s4997_s5 + $0xb30] sm:$0xff] }
  0xae   : > { %4602 = vmatpush.msra.mxu3 %v5069_v3  ;;  %v681_v3 = vld [vmem:[%s4997_s5 + $0xa80] sm:$0xff] }
  0xaf   : > { %877 = vmatmul.f32.gmra.mxu0 %v373_v18  ;;  %1062 = vmatmul.f32.gmra.mxu1 %v374_v19  ;;  %v457_v19 = vld [vmem:[%s4997_s5 + $0x380] sm:$0xff] }
  0xb0   : > { %4603 = vmatpush.msra.mxu3 %v5072_v4  ;;  %v389_v4 = vld [vmem:[%s4997_s5 + $0x160] sm:$0xff]  ;;  %1597 = vmatpush.msrb.mxu0 %v808_v33  ;;  %v800_v33 = vld [vmem:[%s5007_s8 + $0x1f8] sm:$0xff] }
  0xb2   : > { %4604 = vmatpush.msra.mxu3 %v5081_v7  ;;  %v387_v7 = vld [vmem:[%s4997_s5 + $0x150] sm:$0xff] }
  0xb3   : > { %1006 = vmatmul.f32.gmra.mxu3 %v674_v24 }
  0xb4   : > { %1250 = vmatmul.f32.gmra.mxu2 %v382_v25  ;;  %4605 = vmatpush.msra.mxu3 %v5093_v11  ;;  %v688_v11 = vld [vmem:[%s4997_s5 + $0xab8] sm:$0xff]  ;;  %v661_v25 = vld [vmem:[%s4997_s5 + $0x9e0] sm:$0xff] }
  0xb6   : > { %4606 = vmatpush.msra.mxu3 %v5102_v14  ;;  %v396_v14 = vld [vmem:[%s4997_s5 + $0x198] sm:$0xff] }
  0xb7   : > { %880 = vmatmul.f32.gmra.mxu0 %v380_v28  ;;  %1065 = vmatmul.f32.gmra.mxu1 %v381_v30 }
  0xb8   : > { %4607 = vmatpush.msra.mxu3 %v5111_v17  ;;  %v394_v17 = vld [vmem:[%s4997_s5 + $0x188] sm:$0xff] }
  0xba   : > { %4608 = vmatpush.msra.mxu3 %v5120_v20  ;;  %v828_v20 = vld [vmem:[%s5007_s8 + $0x2d8] sm:$0xff] }
  0xbb   : > { %1009 = vmatmul.f32.gmra.mxu3 %v681_v3  ;;  %1778 = vmatpush.msrb.mxu1 %v828_v20  ;;  %v464_v3 = vld [vmem:[%s4997_s5 + $0x3b8] sm:$0xff] }
  0xbc   : > { %1253 = vmatmul.f32.gmra.mxu2 %v389_v4  ;;  %4609 = vmatpush.msra.mxu3 %v5129_v23  ;;  %v695_v23 = vld [vmem:[%s4997_s5 + $0xaf0] sm:$0xff]  ;;  %v465_v4 = vld [vmem:[%s4997_s5 + $0x3c0] sm:$0xff] }
  0xbe   : > { %4610 = vmatpush.msra.mxu3 %v5138_v26  ;;  %v403_v26 = vld [vmem:[%s4997_s5 + $0x1d0] sm:$0xff] }
  0xbf   : > { %883 = vmatmul.f32.gmra.mxu0 %v387_v7  ;;  %1068 = vmatmul.f32.gmra.mxu1 %v388_v31  ;;  %v840_v31 = vld [vmem:[%s5007_s8 + $0x338] sm:$0xff] }
  0xc0   : > { %4611 = vmatpush.msra.mxu3 %v5147_v29  ;;  %v401_v29 = vld [vmem:[%s4997_s5 + $0x1c0] sm:$0xff]  ;;  %1967 = vmatpush.msrb.mxu2 %v840_v31 }
  0xc2   : > { %4612 = vmatpush.msra.mxu3 %v5156_v32  ;;  %v402_v32 = vld [vmem:[%s4997_s5 + $0x1c8] sm:$0xff] }
  0xc3   : > { %1012 = vmatmul.f32.gmra.mxu3 %v688_v11 }
  0xc4   : > { %1256 = vmatmul.f32.gmra.mxu2 %v396_v14  ;;  %4613 = vmatpush.msra.mxu3 %v5165_v35  ;;  %v702_v35 = vld [vmem:[%s4997_s5 + $0xb28] sm:$0xff]  ;;  %v668_v14 = vld [vmem:[%s4997_s5 + $0xa18] sm:$0xff] }
  0xc6   : > { %4614 = vmatpush.msra.mxu3 %v5174_v38  ;;  %v408_v38 = vld [vmem:[%s4997_s5 + $0x1f8] sm:$0xff] }
  0xc7   : > { %886 = vmatmul.f32.gmra.mxu0 %v394_v17  ;;  %1071 = vmatmul.f32.gmra.mxu1 %v395_v34  ;;  %v473_v17 = vld [vmem:[%s4997_s5 + $0x400] sm:$0xff]  ;;  %v824_v34 = vld [vmem:[%s5007_s8 + $0x2b8] sm:$0xff] }
  0xc8   : > { %4615 = vmatpush.msra.mxu3 %v5183_v41  ;;  %v709_v41 = vld [vmem:[%s4997_s5 + $0xb60] sm:$0xff] }
  0xca   : > { %4616 = vmatpush.msra.mxu3 %v5192_v44  ;;  %v827_v44 = vld [vmem:[%s5007_s8 + $0x2d0] sm:$0xff] }
  0xcb   : > { %1015 = vmatmul.f32.gmra.mxu3 %v695_v23  ;;  %1779 = vmatpush.msrb.mxu1 %v827_v44  ;;  %v471_v23 = vld [vmem:[%s4997_s5 + $0x3f0] sm:$0xff]  ;;  %v682_v44 = vld [vmem:[%s4997_s5 + $0xa88] sm:$0xff] }
  0xcc   : > { %1259 = vmatmul.f32.gmra.mxu2 %v403_v26  ;;  %4617 = vmatpush.msra.mxu3 %v5202_v48  ;;  %v424_v48 = vld [vmem:[%s4997_s5 + $0x278] sm:$0xff] }
  0xcd   : > { %1780 = vmatpush.msrb.mxu1 %v826_v59  ;;  %v472_v26 = vld [vmem:[%s4997_s5 + $0x3f8] sm:$0xff] }
  0xce   : > { %v492_v59 = vld [vmem:[%s4997_s5 + $0x498] sm:$0xff] }
  0xcf   : > { %889 = vmatmul.f32.gmra.mxu0 %v401_v29  ;;  %1074 = vmatmul.f32.gmra.mxu1 %v402_v32 }
  0xd0   : > { %1781 = vmatpush.msrb.mxu1 %v825_v12  ;;  %v508_v12 = vld [vmem:[%s4997_s5 + $0x518] sm:$0xff] }
  0xd2   : > { %1782 = vmatpush.msrb.mxu1 %v824_v34 }
  0xd3   : > { %1018 = vmatmul.f32.gmra.mxu3 %v702_v35  ;;  %v675_v35 = vld [vmem:[%s4997_s5 + $0xa50] sm:$0xff] }
  0xd4   : > { %1262 = vmatmul.f32.gmra.mxu2 %v410_v37  ;;  %v480_v37 = vld [vmem:[%s4997_s5 + $0x438] sm:$0xff]  ;;  %1783 = vmatpush.msrb.mxu1 %v823_v55  ;;  %v837_v55 = vld [vmem:[%s5007_s8 + $0x320] sm:$0xff] }
  0xd7   : > { %892 = vmatmul.f32.gmra.mxu0 %v408_v38  ;;  %1077 = vmatmul.f32.gmra.mxu1 %v409_v39 }
  0xdb   : > { %1021 = vmatmul.f32.gmra.mxu3 %v709_v41  ;;  %v479_v41 = vld [vmem:[%s4997_s5 + $0x430] sm:$0xff] }
  0xdc   : > { %1265 = vmatmul.f32.gmra.mxu2 %v417_v42 }
  0xdf   : > { %895 = vmatmul.f32.gmra.mxu0 %v415_v45  ;;  %1080 = vmatmul.f32.gmra.mxu1 %v416_v46  ;;  %v487_v45 = vld [vmem:[%s4997_s5 + $0x470] sm:$0xff] }
  0xe3   : > { %1024 = vmatmul.f32.gmra.mxu3 %v716_v47 }
  0xe4   : > { %1268 = vmatmul.f32.gmra.mxu2 %v424_v48  ;;  %v485_v48 = vld [vmem:[%s4997_s5 + $0x460] sm:$0xff] }
  0xe7   : > { %898 = vmatmul.f32.gmra.mxu0 %v422_v49  ;;  %1083 = vmatmul.f32.gmra.mxu1 %v423_v50  ;;  %v486_v49 = vld [vmem:[%s4997_s5 + $0x468] sm:$0xff] }
  0xeb   : > { %1027 = vmatmul.f32.gmra.mxu3 %v723_v51  ;;  %v839_v51 = vld [vmem:[%s5007_s8 + $0x330] sm:$0xff] }
  0xec   : > { %1271 = vmatmul.f32.gmra.mxu2 %v431_v52  ;;  %v807_v52 = vld [vmem:[%s5007_s8 + $0x230] sm:$0xff] }
  0xed   : > { %1968 = vmatpush.msrb.mxu2 %v839_v51  ;;  %1598 = vmatpush.msrb.mxu0 %v807_v52  ;;  %v520_v51 = vld [vmem:[%s4997_s5 + $0x578] sm:$0xff]  ;;  %v521_v52 = vld [vmem:[%s4997_s5 + $0x580] sm:$0xff] }
  0xef   : > { %901 = vmatmul.f32.gmra.mxu0 %v429_v53  ;;  %1086 = vmatmul.f32.gmra.mxu1 %v430_v54  ;;  %v689_v54 = vld [vmem:[%s4997_s5 + $0xac0] sm:$0xff] }
  0xf3   : > { %1030 = vmatmul.f32.gmra.mxu3 %v730_v57 }
  0xf4   : > { %1274 = vmatmul.f32.gmra.mxu2 %v438_v58 }
  0xf7   : > { %904 = vmatmul.f32.gmra.mxu0 %v436_v60  ;;  %1089 = vmatmul.f32.gmra.mxu1 %v437_v61  ;;  %v493_v60 = vld [vmem:[%s4997_s5 + $0x4a0] sm:$0xff] }
  0xfb   : > { %1176 = vmatmul.f32.vlgmr.msrb.gmra.mxu3 %v640_v62 }
  0xfc   : > { %1277 = vmatmul.f32.gmra.mxu2 %v445_v63  ;;  %v696_v63 = vld [vmem:[%s4997_s5 + $0xaf8] sm:$0xff]  ;;  %1404 = vmatpush.msrb.mxu3 %v800_v33 }
  0xff   : > { %907 = vmatmul.f32.gmra.mxu0 %v443_v0  ;;  %1092 = vmatmul.f32.gmra.mxu1 %v444_v1  ;;  %v501_v0 = vld [vmem:[%s4997_s5 + $0x4e0] sm:$0xff] }
 0x103   : > { %1179 = vmatmul.f32.gmra.mxu3 %v647_v2 }
 0x104   : > { %1280 = vmatmul.f32.gmra.mxu2 %v452_v5  ;;  %v499_v5 = vld [vmem:[%s4997_s5 + $0x4d0] sm:$0xff] }
 0x107   : > { %910 = vmatmul.f32.gmra.mxu0 %v450_v8  ;;  %1095 = vmatmul.f32.gmra.mxu1 %v451_v9 }
 0x10b   : > { %1182 = vmatmul.f32.gmra.mxu3 %v654_v13  ;;  %v838_v13 = vld [vmem:[%s5007_s8 + $0x328] sm:$0xff] }
 0x10c   : > { %1283 = vmatmul.f32.gmra.mxu2 %v459_v15  ;;  %v5332_v16 = vpop.f32.mrf.mxu0  ;;  %v5334_v18 = vpop.f32.mrf.mxu1  ;;  %v806_v15 = vld [vmem:[%s5007_s8 + $0x228] sm:$0xff] }
 0x10d   : > { %1599 = vmatpush.msrb.mxu0 %v806_v15  ;;  %1969 = vmatpush.msrb.mxu2 %v838_v13  ;;  %v528_v13 = vld [vmem:[%s4997_s5 + $0x5b8] sm:$0xff] }
 0x10e   : > { %v5338_v22 = vpop.f32.mrf.mxu3 }
 0x10f   : > { %v5340_v24 = vpop.f32.mrf.mxu2  ;;  %913 = vmatmul.f32.gmra.mxu0 %v457_v19  ;;  %1098 = vmatmul.f32.gmra.mxu1 %v458_v21 }
 0x110   : > { %1970 = vmatpush.msrb.mxu2 %v837_v55  ;;  %v836_v55 = vld [vmem:[%s5007_s8 + $0x318] sm:$0xff] }
 0x112   : > { %1971 = vmatpush.msrb.mxu2 %v836_v55  ;;  %v549_v55 = vld [vmem:[%s4997_s5 + $0x660] sm:$0xff] }
 0x113   : > { %1185 = vmatmul.f32.gmra.mxu3 %v661_v25  ;;  %v506_v25 = vld [vmem:[%s4997_s5 + $0x508] sm:$0xff] }
 0x114   : > { %1286 = vmatmul.f32.gmra.mxu2 %v466_v27  ;;  %v5344_v28 = vpop.f32.mrf.mxu0  ;;  %v5346_v30 = vpop.f32.mrf.mxu1  ;;  %v507_v27 = vld [vmem:[%s4997_s5 + $0x510] sm:$0xff] }
 0x116   : > { %v5350_v7 = vpop.f32.mrf.mxu3 }
 0x117   : > { %v5353_v11 = vpop.f32.mrf.mxu2  ;;  %916 = vmatmul.f32.gmra.mxu0 %v464_v3  ;;  %1101 = vmatmul.f32.gmra.mxu1 %v465_v4  ;;  %v822_v4 = vld [vmem:[%s5007_s8 + $0x2a8] sm:$0xff] }
 0x118   : > { %1784 = vmatpush.msrb.mxu1 %v822_v4  ;;  %v731_v4 = vld [vmem:[%s4997_s5 + $0xc10] sm:$0xff] }
 0x11b   : > { %1188 = vmatmul.f32.gmra.mxu3 %v668_v14  ;;  %v710_v14 = vld [vmem:[%s4997_s5 + $0xb68] sm:$0xff] }
 0x11c   : > { %1289 = vmatmul.f32.gmra.mxu2 %v473_v17  ;;  %v5359_v36 = vpop.f32.mrf.mxu0  ;;  %v5361_v20 = vpop.f32.mrf.mxu1  ;;  %v515_v17 = vld [vmem:[%s4997_s5 + $0x550] sm:$0xff] }
 0x11e   : > { %v5365_v29 = vpop.f32.mrf.mxu3 }
 0x11f   : > { %v5367_v32 = vpop.f32.mrf.mxu2  ;;  %919 = vmatmul.f32.gmra.mxu0 %v471_v23  ;;  %1104 = vmatmul.f32.gmra.mxu1 %v472_v26  ;;  %v513_v26 = vld [vmem:[%s4997_s5 + $0x540] sm:$0xff] }
 0x123   : > { %1191 = vmatmul.f32.gmra.mxu3 %v675_v35  ;;  %v514_v35 = vld [vmem:[%s4997_s5 + $0x548] sm:$0xff] }
 0x124   : > { %1292 = vmatmul.f32.gmra.mxu2 %v480_v37  ;;  %v5371_v38 = vpop.f32.mrf.mxu0  ;;  %v5373_v39 = vpop.f32.mrf.mxu1 }
 0x126   : > { %v5377_v42 = vpop.f32.mrf.mxu3 }
 0x127   : > { %v5379_v43 = vpop.f32.mrf.mxu2  ;;  %922 = vmatmul.f32.gmra.mxu0 %v478_v40  ;;  %1107 = vmatmul.f32.gmra.mxu1 %v479_v41  ;;  %v717_v41 = vld [vmem:[%s4997_s5 + $0xba0] sm:$0xff] }
 0x12b   : > { %1194 = vmatmul.f32.gmra.mxu3 %v682_v44  ;;  %v799_v44 = vld [vmem:[%s5007_s8 + $0x1f0] sm:$0xff] }
 0x12c   : > { %1295 = vmatmul.f32.gmra.mxu2 %v487_v45  ;;  %v5383_v46 = vpop.f32.mrf.mxu0  ;;  %v5385_v47 = vpop.f32.mrf.mxu1  ;;  %v522_v45 = vld [vmem:[%s4997_s5 + $0x588] sm:$0xff]  ;;  %1405 = vmatpush.msrb.mxu3 %v799_v44 }
 0x12e   : > { %v5389_v50 = vpop.f32.mrf.mxu3 }
 0x12f   : > { %v5393_v53 = vpop.f32.mrf.mxu2  ;;  %925 = vmatmul.f32.gmra.mxu0 %v485_v48  ;;  %1110 = vmatmul.f32.gmra.mxu1 %v486_v49 }
 0x133   : > { %1197 = vmatmul.f32.gmra.mxu3 %v689_v54 }
 0x134   : > { %1298 = vmatmul.f32.gmra.mxu2 %v494_v56  ;;  %v5398_v57 = vpop.f32.mrf.mxu0  ;;  %v5400_v58 = vpop.f32.mrf.mxu1  ;;  %v798_v56 = vld [vmem:[%s5007_s8 + $0x1e8] sm:$0xff] }
 0x135   : > { %1406 = vmatpush.msrb.mxu3 %v798_v56 }
 0x136   : > { %v5404_v61 = vpop.f32.mrf.mxu3 }
 0x137   : > { %v5406_v62 = vpop.f32.mrf.mxu2  ;;  %928 = vmatmul.f32.gmra.mxu0 %v492_v59  ;;  %1113 = vmatmul.f32.gmra.mxu1 %v493_v60  ;;  %v724_v60 = vld [vmem:[%s4997_s5 + $0xbd8] sm:$0xff] }
 0x13b   : > { %1200 = vmatmul.f32.gmra.mxu3 %v696_v63  ;;  %v805_v63 = vld [vmem:[%s5007_s8 + $0x220] sm:$0xff] }
 0x13c   : > { %1301 = vmatmul.f32.gmra.mxu2 %v501_v0  ;;  %v5410_v1 = vpop.f32.mrf.mxu0  ;;  %v5412_v2 = vpop.f32.mrf.mxu1  ;;  %v529_v0 = vld [vmem:[%s4997_s5 + $0x5c0] sm:$0xff]  ;;  %1600 = vmatpush.msrb.mxu0 %v805_v63 }
 0x13d   : > { %v541_v63 = vld [vmem:[%s4997_s5 + $0x620] sm:$0xff] }
 0x13e   : > { %v5416_v8 = vpop.f32.mrf.mxu3 }
 0x13f   : > { %v5418_v9 = vpop.f32.mrf.mxu2  ;;  %931 = vmatmul.f32.gmra.mxu0 %v499_v5  ;;  %1116 = vmatmul.f32.gmra.mxu1 %v500_v6  ;;  %v821_v5 = vld [vmem:[%s5007_s8 + $0x2a0] sm:$0xff] }
 0x140   : > { %1785 = vmatpush.msrb.mxu1 %v821_v5 }
 0x143   : > { %1203 = vmatmul.f32.gmra.mxu3 %v703_v10 }
 0x144   : > { %1304 = vmatmul.f32.gmra.mxu2 %v508_v12  ;;  %v5424_v19 = vpop.f32.mrf.mxu0  ;;  %v5426_v21 = vpop.f32.mrf.mxu1  ;;  %v527_v12 = vld [vmem:[%s4997_s5 + $0x5b0] sm:$0xff] }
 0x146   : > { %v5430_v3 = vpop.f32.mrf.mxu3 }
 0x147   : > { %v5433_v31 = vpop.f32.mrf.mxu2  ;;  %934 = vmatmul.f32.gmra.mxu0 %v506_v25  ;;  %1119 = vmatmul.f32.gmra.mxu1 %v507_v27  ;;  %v797_v27 = vld [vmem:[%s5007_s8 + $0x1e0] sm:$0xff] }
 0x148   : > { %1407 = vmatpush.msrb.mxu3 %v797_v27  ;;  %v804_v27 = vld [vmem:[%s5007_s8 + $0x218] sm:$0xff] }
 0x149   : > { %1601 = vmatpush.msrb.mxu0 %v804_v27  ;;  %v557_v27 = vld [vmem:[%s4997_s5 + $0x6a0] sm:$0xff] }
 0x14b   : > { %1206 = vmatmul.f32.gmra.mxu3 %v710_v14  ;;  %v536_v14 = vld [vmem:[%s4997_s5 + $0x5f8] sm:$0xff] }
 0x14c   : > { %1307 = vmatmul.f32.gmra.mxu2 %v515_v17  ;;  %v5438_v34 = vpop.f32.mrf.mxu0  ;;  %v5440_v23 = vpop.f32.mrf.mxu1 }
 0x14e   : > { %v5444_v37 = vpop.f32.mrf.mxu3 }
 0x14f   : > { %v5446_v40 = vpop.f32.mrf.mxu2  ;;  %937 = vmatmul.f32.gmra.mxu0 %v513_v26  ;;  %1122 = vmatmul.f32.gmra.mxu1 %v514_v35  ;;  %v534_v26 = vld [vmem:[%s4997_s5 + $0x5e8] sm:$0xff]  ;;  %v535_v35 = vld [vmem:[%s4997_s5 + $0x5f0] sm:$0xff] }
 0x150   : > { %9144 = vst [vmem:[#allocation6_spill] sm:$0xff] %v5446_v40 }
 0x153   : > { %1209 = vmatmul.f32.gmra.mxu3 %v717_v41 }
 0x154   : > { %1310 = vmatmul.f32.gmra.mxu2 %v522_v45  ;;  %v5451_v48 = vpop.f32.mrf.mxu0  ;;  %v5453_v49 = vpop.f32.mrf.mxu1  ;;  %v796_v45 = vld [vmem:[%s5007_s8 + $0x1d8] sm:$0xff] }
 0x155   : > { %9145 = vst [vmem:[#allocation7_spill] sm:$0xff] %v5451_v48  ;;  %1408 = vmatpush.msrb.mxu3 %v796_v45 }
 0x156   : > { %9146 = vst [vmem:[#allocation8_spill] sm:$0xff] %v5453_v49  ;;  %v5457_v54 = vpop.f32.mrf.mxu3 }
 0x157   : > { %v5461_v59 = vpop.f32.mrf.mxu2  ;;  %940 = vmatmul.f32.gmra.mxu0 %v520_v51  ;;  %1125 = vmatmul.f32.gmra.mxu1 %v521_v52  ;;  %v641_v51 = vld [vmem:[%s4997_s5 + $0x940] sm:$0xff]  ;;  %v543_v52 = vld [vmem:[%s4997_s5 + $0x630] sm:$0xff] }
 0x158   : > { %9147 = vst [vmem:[#allocation9_spill] sm:$0xff] %v5461_v59 }
 0x15b   : > { %1212 = vmatmul.f32.gmra.mxu3 %v724_v60 }
 0x15c   : > { %1313 = vmatmul.f32.gmra.mxu2 %v529_v0  ;;  %v5467_v6 = vpop.f32.mrf.mxu0  ;;  %v5469_v10 = vpop.f32.mrf.mxu1  ;;  %v542_v0 = vld [vmem:[%s4997_s5 + $0x628] sm:$0xff] }
 0x15d   : > { %9148 = vst [vmem:[#allocation10_spill] sm:$0xff] %v5467_v6 }
 0x15e   : > { %9149 = vst [vmem:[#allocation11_spill] sm:$0xff] %v5469_v10  ;;  %v5473_v15 = vpop.f32.mrf.mxu3 }
 0x15f   : > { %v5475_v25 = vpop.f32.mrf.mxu2  ;;  %943 = vmatmul.f32.gmra.mxu0 %v527_v12  ;;  %1128 = vmatmul.f32.gmra.mxu1 %v528_v13  ;;  %v795_v13 = vld [vmem:[%s5007_s8 + $0x1d0] sm:$0xff] }
 0x160   : > { %9150 = vst [vmem:[#allocation12_spill] sm:$0xff] %v5475_v25  ;;  %1409 = vmatpush.msrb.mxu3 %v795_v13  ;;  %v655_v13 = vld [vmem:[%s4997_s5 + $0x9b0] sm:$0xff] }
 0x163   : > { %1215 = vmatmul.f32.gmra.mxu3 %v731_v4  ;;  %v820_v4 = vld [vmem:[%s5007_s8 + $0x298] sm:$0xff] }
 0x164   : > { %1316 = vmatmul.f32.gmra.mxu2 %v536_v14  ;;  %v5480_v17 = vpop.f32.mrf.mxu0  ;;  %v5482_v33 = vpop.f32.mrf.mxu1  ;;  %v648_v14 = vld [vmem:[%s4997_s5 + $0x978] sm:$0xff]  ;;  %1786 = vmatpush.msrb.mxu1 %v820_v4  ;;  %v793_v4 = vld [vmem:[%s5007_s8 + $0x1c0] sm:$0xff] }
 0x165   : > { %9151 = vst [vmem:[#allocation13_spill] sm:$0xff] %v5480_v17  ;;  %v704_v17 = vld [vmem:[%s4997_s5 + $0xb38] sm:$0xff] }
 0x166   : > { %9152 = vst [vmem:[#allocation14_spill] sm:$0xff] %v5482_v33  ;;  %v5486_v41 = vpop.f32.mrf.mxu3 }
 0x167   : > { %v5488_v44 = vpop.f32.mrf.mxu2  ;;  %946 = vmatmul.f32.gmra.mxu0 %v534_v26  ;;  %1131 = vmatmul.f32.gmra.mxu1 %v535_v35  ;;  %v550_v26 = vld [vmem:[%s4997_s5 + $0x668] sm:$0xff] }
 0x168   : > { %9153 = vst [vmem:[#allocation15_spill] sm:$0xff] %v5488_v44  ;;  %v794_v35 = vld [vmem:[%s5007_s8 + $0x1c8] sm:$0xff] }
 0x169   : > { %1410 = vmatpush.msrb.mxu3 %v794_v35  ;;  %v555_v35 = vld [vmem:[%s4997_s5 + $0x690] sm:$0xff] }
 0x16b   : > { %1361 = vmatmul.f32.vlgmr.msra.gmra.mxu3 %v641_v51 }
 0x16c   : > { %1319 = vmatmul.f32.gmra.mxu2 %v543_v52  ;;  %v5494_v56 = vpop.f32.mrf.mxu0  ;;  %v5496_v60 = vpop.f32.mrf.mxu1  ;;  %v548_v52 = vld [vmem:[%s4997_s5 + $0x658] sm:$0xff]  ;;  %1411 = vmatpush.msrb.mxu3 %v793_v4 }
 0x16d   : > { %9154 = vst [vmem:[#allocation16_spill] sm:$0xff] %v5494_v56  ;;  %v683_v56 = vld [vmem:[%s4997_s5 + $0xa90] sm:$0xff] }
 0x16e   : > { %9155 = vst [vmem:[#allocation17_spill] sm:$0xff] %v5496_v60  ;;  %v5500_v5 = vpop.f32.mrf.mxu3  ;;  %v789_v60 = vld [vmem:[%s5007_s8 + $0x1a0] sm:$0xff] }
 0x16f   : > { %v5502_v12 = vpop.f32.mrf.mxu2  ;;  %949 = vmatmul.f32.gmra.mxu0 %v541_v63  ;;  %1134 = vmatmul.f32.gmra.mxu1 %v542_v0 }
 0x170   : > { %9156 = vst [vmem:[#allocation18_spill] sm:$0xff] %v5502_v12  ;;  %v562_v12 = vld [vmem:[%s4997_s5 + $0x6c8] sm:$0xff] }
 0x173   : > { %1364 = vmatmul.f32.gmra.mxu3 %v648_v14 }
 0x174   : > { %1322 = vmatmul.f32.gmra.mxu2 %v550_v26  ;;  %v5510_v45 = vpop.f32.mrf.mxu0  ;;  %v5512_v51 = vpop.f32.mrf.mxu1 }
 0x175   : > { %9157 = vst [vmem:[#allocation19_spill] sm:$0xff] %v5510_v45  ;;  %v564_v45 = vld [vmem:[%s4997_s5 + $0x6d8] sm:$0xff] }
 0x176   : > { %9158 = vst [vmem:[#allocation20_spill] sm:$0xff] %v5512_v51  ;;  %v5516_v63 = vpop.f32.mrf.mxu3  ;;  %v556_v51 = vld [vmem:[%s4997_s5 + $0x698] sm:$0xff] }
 0x177   : > { %v5518_v0 = vpop.f32.mrf.mxu2  ;;  %952 = vmatmul.f32.gmra.mxu0 %v548_v52  ;;  %1137 = vmatmul.f32.gmra.mxu1 %v549_v55 }
 0x178   : > { %9159 = vst [vmem:[#allocation21_spill] sm:$0xff] %v5518_v0  ;;  %v835_v0 = vld [vmem:[%s5007_s8 + $0x310] sm:$0xff] }
 0x179   : > { %1972 = vmatpush.msrb.mxu2 %v835_v0 }
 0x17b   : > { %1367 = vmatmul.f32.gmra.mxu3 %v655_v13  ;;  %v662_v13 = vld [vmem:[%s4997_s5 + $0x9e8] sm:$0xff] }
 0x17c   : > { %1325 = vmatmul.f32.gmra.mxu2 %v557_v27  ;;  %v5523_v14 = vpop.f32.mrf.mxu0  ;;  %v5525_v26 = vpop.f32.mrf.mxu1  ;;  %v792_v27 = vld [vmem:[%s5007_s8 + $0x1b8] sm:$0xff] }
 0x17d   : > { %9160 = vst [vmem:[#allocation22_spill] sm:$0xff] %v5523_v14  ;;  %1412 = vmatpush.msrb.mxu3 %v792_v27 }
 0x17e   : > { %9161 = vst [vmem:[#allocation23_spill] sm:$0xff] %v5525_v26  ;;  %v5529_v52 = vpop.f32.mrf.mxu3  ;;  %v803_v26 = vld [vmem:[%s5007_s8 + $0x210] sm:$0xff] }
 0x17f   : > { %v5531_v55 = vpop.f32.mrf.mxu2  ;;  %955 = vmatmul.f32.gmra.mxu0 %v555_v35  ;;  %1140 = vmatmul.f32.gmra.mxu1 %v556_v51  ;;  %v819_v35 = vld [vmem:[%s5007_s8 + $0x290] sm:$0xff] }
 0x180   : > { %9162 = vst [vmem:[#allocation24_spill] sm:$0xff] %v5531_v55  ;;  %v563_v55 = vld [vmem:[%s4997_s5 + $0x6d0] sm:$0xff]  ;;  %1602 = vmatpush.msrb.mxu0 %v803_v26  ;;  %1787 = vmatpush.msrb.mxu1 %v819_v35  ;;  %v790_v35 = vld [vmem:[%s5007_s8 + $0x1a8] sm:$0xff] }
 0x183   : > { %1370 = vmatmul.f32.gmra.mxu3 %v662_v13  ;;  %v669_v13 = vld [vmem:[%s4997_s5 + $0xa20] sm:$0xff] }
 0x184   : > { %1328 = vmatmul.f32.gmra.mxu2 %v564_v45  ;;  %v5538_v4 = vpop.f32.mrf.mxu0  ;;  %v5540_v14 = vpop.f32.mrf.mxu1  ;;  %v791_v45 = vld [vmem:[%s5007_s8 + $0x1b0] sm:$0xff] }
 0x185   : > { %9163 = vst [vmem:[#allocation25_spill] sm:$0xff] %v5538_v4  ;;  %1413 = vmatpush.msrb.mxu3 %v791_v45 }
 0x186   : > { %9164 = vst [vmem:[#allocation26_spill] sm:$0xff] %v5540_v14  ;;  %v5544_v51 = vpop.f32.mrf.mxu3  ;;  %v571_v14 = vld [vmem:[%s4997_s5 + $0x710] sm:$0xff] }
 0x187   : > { %v5546_v0 = vpop.f32.mrf.mxu2  ;;  %958 = vmatmul.f32.gmra.mxu0 %v562_v12  ;;  %1143 = vmatmul.f32.gmra.mxu1 %v563_v55  ;;  %v570_v12 = vld [vmem:[%s4997_s5 + $0x708] sm:$0xff] }
 0x188   : > { %9165 = vst [vmem:[#allocation27_spill] sm:$0xff] %v5546_v0  ;;  %v569_v0 = vld [vmem:[%s4997_s5 + $0x700] sm:$0xff]  ;;  %1414 = vmatpush.msrb.mxu3 %v790_v35  ;;  %v834_v35 = vld [vmem:[%s5007_s8 + $0x308] sm:$0xff] }
 0x189   : > { %1973 = vmatpush.msrb.mxu2 %v834_v35 }
 0x18a   : > { %1415 = vmatpush.msrb.mxu3 %v789_v60  ;;  %v690_v60 = vld [vmem:[%s4997_s5 + $0xac8] sm:$0xff] }
 0x18b   : > { %1373 = vmatmul.f32.gmra.mxu3 %v669_v13  ;;  %v676_v13 = vld [vmem:[%s4997_s5 + $0xa58] sm:$0xff] }
 0x18c   : > { %1331 = vmatmul.f32.gmra.mxu2 %v571_v14  ;;  %v5552_v27 = vpop.f32.mrf.mxu0  ;;  %v5554_v26 = vpop.f32.mrf.mxu1  ;;  %v578_v14 = vld [vmem:[%s4997_s5 + $0x748] sm:$0xff] }
 0x18d   : > { %9166 = vst [vmem:[#allocation28_spill] sm:$0xff] %v5552_v27  ;;  %v576_v27 = vld [vmem:[%s4997_s5 + $0x738] sm:$0xff] }
 0x18e   : > { %9167 = vst [vmem:[#allocation29_spill] sm:$0xff] %v5554_v26  ;;  %v5558_v55 = vpop.f32.mrf.mxu3 }
 0x18f   : > { %v5560_v4 = vpop.f32.mrf.mxu2  ;;  %961 = vmatmul.f32.gmra.mxu0 %v569_v0  ;;  %1146 = vmatmul.f32.gmra.mxu1 %v570_v12 }
 0x190   : > { %9168 = vst [vmem:[#allocation30_spill] sm:$0xff] %v5560_v4  ;;  %v577_v4 = vld [vmem:[%s4997_s5 + $0x740] sm:$0xff] }
 0x193   : > { %1376 = vmatmul.f32.gmra.mxu3 %v676_v13  ;;  %v802_v13 = vld [vmem:[%s5007_s8 + $0x208] sm:$0xff] }
 0x194   : > { %1334 = vmatmul.f32.gmra.mxu2 %v578_v14  ;;  %v5565_v45 = vpop.f32.mrf.mxu0  ;;  %v5567_v26 = vpop.f32.mrf.mxu1  ;;  %v585_v14 = vld [vmem:[%s4997_s5 + $0x780] sm:$0xff]  ;;  %1603 = vmatpush.msrb.mxu0 %v802_v13  ;;  %v592_v13 = vld [vmem:[%s4997_s5 + $0x7b8] sm:$0xff] }
 0x195   : > { %9169 = vst [vmem:[#allocation31_spill] sm:$0xff] %v5565_v45 }
 0x196   : > { %9170 = vst [vmem:[#allocation32_spill] sm:$0xff] %v5567_v26  ;;  %v5571_v0 = vpop.f32.mrf.mxu3  ;;  %v818_v26 = vld [vmem:[%s5007_s8 + $0x288] sm:$0xff] }
 0x197   : > { %v5573_v12 = vpop.f32.mrf.mxu2  ;;  %964 = vmatmul.f32.gmra.mxu0 %v576_v27  ;;  %1149 = vmatmul.f32.gmra.mxu1 %v577_v4  ;;  %v583_v4 = vld [vmem:[%s4997_s5 + $0x770] sm:$0xff]  ;;  %v584_v27 = vld [vmem:[%s4997_s5 + $0x778] sm:$0xff] }
 0x198   : > { %9171 = vst [vmem:[#allocation33_spill] sm:$0xff] %v5573_v12  ;;  %1788 = vmatpush.msrb.mxu1 %v818_v26 }
 0x19b   : > { %1379 = vmatmul.f32.gmra.mxu3 %v683_v56  ;;  %v788_v56 = vld [vmem:[%s5007_s8 + $0x198] sm:$0xff] }
 0x19c   : > { %1337 = vmatmul.f32.gmra.mxu2 %v585_v14  ;;  %v5581_v45 = vpop.f32.mrf.mxu0  ;;  %v5583_v12 = vpop.f32.mrf.mxu1  ;;  %1416 = vmatpush.msrb.mxu3 %v788_v56  ;;  %v787_v56 = vld [vmem:[%s5007_s8 + $0x190] sm:$0xff] }
 0x19d   : > { %9172 = vst [vmem:[#allocation34_spill] sm:$0xff] %v5581_v45  ;;  %v697_v45 = vld [vmem:[%s4997_s5 + $0xb00] sm:$0xff] }
 0x19e   : > { %9173 = vst [vmem:[#allocation35_spill] sm:$0xff] %v5583_v12  ;;  %v5587_v44 = vpop.f32.mrf.mxu3  ;;  %v590_v12 = vld [vmem:[%s4997_s5 + $0x7a8] sm:$0xff]  ;;  %1417 = vmatpush.msrb.mxu3 %v787_v56 }
 0x19f   : > { %v5589_v35 = vpop.f32.mrf.mxu2  ;;  %967 = vmatmul.f32.gmra.mxu0 %v583_v4  ;;  %1152 = vmatmul.f32.gmra.mxu1 %v584_v27 }
 0x1a0   : > { %9174 = vst [vmem:[#allocation36_spill] sm:$0xff] %v5589_v35  ;;  %v591_v35 = vld [vmem:[%s4997_s5 + $0x7b0] sm:$0xff] }
 0x1a3   : > { %1382 = vmatmul.f32.gmra.mxu3 %v690_v60  ;;  %v599_v60 = vld [vmem:[%s4997_s5 + $0x7f0] sm:$0xff] }
 0x1a4   : > { %1340 = vmatmul.f32.gmra.mxu2 %v592_v13  ;;  %v5594_v14 = vpop.f32.mrf.mxu0  ;;  %v5596_v26 = vpop.f32.mrf.mxu1  ;;  %v833_v13 = vld [vmem:[%s5007_s8 + $0x300] sm:$0xff] }
 0x1a5   : > { %9175 = vst [vmem:[#allocation37_spill] sm:$0xff] %v5594_v14  ;;  %1974 = vmatpush.msrb.mxu2 %v833_v13 }
 0x1a6   : > { %9176 = vst [vmem:[#allocation38_spill] sm:$0xff] %v5596_v26  ;;  %v5600_v4 = vpop.f32.mrf.mxu3  ;;  %v786_v26 = vld [vmem:[%s5007_s8 + $0x188] sm:$0xff] }
 0x1a7   : > { %v5602_v27 = vpop.f32.mrf.mxu2  ;;  %970 = vmatmul.f32.gmra.mxu0 %v590_v12  ;;  %1155 = vmatmul.f32.gmra.mxu1 %v591_v35  ;;  %v598_v12 = vld [vmem:[%s4997_s5 + $0x7e8] sm:$0xff] }
 0x1a8   : > { %9177 = vst [vmem:[#allocation39_spill] sm:$0xff] %v5602_v27  ;;  %v597_v27 = vld [vmem:[%s4997_s5 + $0x7e0] sm:$0xff]  ;;  %1418 = vmatpush.msrb.mxu3 %v786_v26 }
 0x1ab   : > { %1385 = vmatmul.f32.gmra.mxu3 %v697_v45  ;;  %v801_v45 = vld [vmem:[%s5007_s8 + $0x200] sm:$0xff] }
 0x1ac   : > { %1343 = vmatmul.f32.gmra.mxu2 %v599_v60  ;;  %v5609_v14 = vpop.f32.mrf.mxu0  ;;  %v5611_v33 = vpop.f32.mrf.mxu1  ;;  %v817_v60 = vld [vmem:[%s5007_s8 + $0x280] sm:$0xff]  ;;  %1604 = vmatpush.msrb.mxu0 %v801_v45 }
 0x1ad   : > { %9178 = vst [vmem:[#allocation40_spill] sm:$0xff] %v5609_v14  ;;  %1789 = vmatpush.msrb.mxu1 %v817_v60  ;;  %v785_v14 = vld [vmem:[%s5007_s8 + $0x180] sm:$0xff] }
 0x1ae   : > { %9179 = vst [vmem:[#allocation41_spill] sm:$0xff] %v5611_v33  ;;  %v5615_v35 = vpop.f32.mrf.mxu3  ;;  %v606_v33 = vld [vmem:[%s4997_s5 + $0x828] sm:$0xff]  ;;  %1419 = vmatpush.msrb.mxu3 %v785_v14  ;;  %v613_v45 = vld [vmem:[%s4997_s5 + $0x860] sm:$0xff]  ;;  %v612_v14 = vld [vmem:[%s4997_s5 + $0x858] sm:$0xff] }
 0x1af   : > { %v5617_v56 = vpop.f32.mrf.mxu2  ;;  %973 = vmatmul.f32.gmra.mxu0 %v597_v27  ;;  %1158 = vmatmul.f32.gmra.mxu1 %v598_v12  ;;  %v605_v27 = vld [vmem:[%s4997_s5 + $0x820] sm:$0xff] }
 0x1b0   : > { %9180 = vst [vmem:[#allocation42_spill] sm:$0xff] %v5617_v56  ;;  %v604_v56 = vld [vmem:[%s4997_s5 + $0x818] sm:$0xff] }
 0x1b3   : > { %1388 = vmatmul.f32.gmra.mxu3 %v704_v17  ;;  %v711_v17 = vld [vmem:[%s4997_s5 + $0xb70] sm:$0xff] }
 0x1b4   : > { %1346 = vmatmul.f32.gmra.mxu2 %v606_v33  ;;  %v5624_v26 = vpop.f32.mrf.mxu0  ;;  %v5626_v13 = vpop.f32.mrf.mxu1 }
 0x1b5   : > { %9181 = vst [vmem:[#allocation43_spill] sm:$0xff] %v5624_v26 }
 0x1b6   : > { %9182 = vst [vmem:[#allocation44_spill] sm:$0xff] %v5626_v13  ;;  %v5630_v12 = vpop.f32.mrf.mxu3  ;;  %v611_v13 = vld [vmem:[%s4997_s5 + $0x850] sm:$0xff] }
 0x1b7   : > { %v5632_v25 = vpop.f32.mrf.mxu2  ;;  %976 = vmatmul.f32.gmra.mxu0 %v604_v56  ;;  %1161 = vmatmul.f32.gmra.mxu1 %v605_v27  ;;  %v718_v56 = vld [vmem:[%s4997_s5 + $0xba8] sm:$0xff]  ;;  %v620_v27 = vld [vmem:[%s4997_s5 + $0x898] sm:$0xff] }
 0x1b8   : > { %9183 = vst [vmem:[#allocation45_spill] sm:$0xff] %v5632_v25 }
 0x1bb   : > { %1391 = vmatmul.f32.gmra.mxu3 %v711_v17 }
 0x1bc   : > { %1349 = vmatmul.f32.gmra.mxu2 %v613_v45  ;;  %v5636_v33 = vpop.f32.mrf.mxu0  ;;  %v5638_v60 = vpop.f32.mrf.mxu1 }
 0x1bd   : > { %9184 = vst [vmem:[#allocation46_spill] sm:$0xff] %v5636_v33  ;;  %v619_v33 = vld [vmem:[%s4997_s5 + $0x890] sm:$0xff] }
 0x1be   : > { %9185 = vst [vmem:[#allocation47_spill] sm:$0xff] %v5638_v60  ;;  %v5642_v26 = vpop.f32.mrf.mxu3  ;;  %v618_v60 = vld [vmem:[%s4997_s5 + $0x888] sm:$0xff] }
 0x1bf   : > { %v5644_v10 = vpop.f32.mrf.mxu2  ;;  %979 = vmatmul.f32.gmra.mxu0 %v611_v13  ;;  %1164 = vmatmul.f32.gmra.mxu1 %v612_v14  ;;  %v725_v13 = vld [vmem:[%s4997_s5 + $0xbe0] sm:$0xff]  ;;  %v627_v14 = vld [vmem:[%s4997_s5 + $0x8d0] sm:$0xff] }
 0x1c0   : > { %9186 = vst [vmem:[#allocation48_spill] sm:$0xff] %v5644_v10 }
 0x1c3   : > { %1394 = vmatmul.f32.gmra.mxu3 %v718_v56 }
 0x1c4   : > { %1352 = vmatmul.f32.gmra.mxu2 %v620_v27  ;;  %v5648_v17 = vpop.f32.mrf.mxu0  ;;  %v5650_v45 = vpop.f32.mrf.mxu1 }
 0x1c5   : > { %9187 = vst [vmem:[#allocation49_spill] sm:$0xff] %v5648_v17  ;;  %v626_v17 = vld [vmem:[%s4997_s5 + $0x8c8] sm:$0xff] }
 0x1c6   : > { %9188 = vst [vmem:[#allocation50_spill] sm:$0xff] %v5650_v45  ;;  %v5654_v25 = vpop.f32.mrf.mxu3  ;;  %v625_v45 = vld [vmem:[%s4997_s5 + $0x8c0] sm:$0xff] }
 0x1c7   : > { %v5656_v6 = vpop.f32.mrf.mxu2  ;;  %982 = vmatmul.f32.gmra.mxu0 %v618_v60  ;;  %1167 = vmatmul.f32.gmra.mxu1 %v619_v33  ;;  %v732_v33 = vld [vmem:[%s4997_s5 + $0xc18] sm:$0xff]  ;;  %v634_v60 = vld [vmem:[%s4997_s5 + $0x908] sm:$0xff] }
 0x1c8   : > { %9189 = vst [vmem:[#allocation51_spill] sm:$0xff] %v5656_v6 }
 0x1cb   : > { %1397 = vmatmul.f32.gmra.mxu3 %v725_v13 }
 0x1cc   : > { %1355 = vmatmul.f32.gmra.mxu2 %v627_v14  ;;  %v5660_v56 = vpop.f32.mrf.mxu0  ;;  %v5662_v27 = vpop.f32.mrf.mxu1 }
 0x1cd   : > { %9190 = vst [vmem:[#allocation52_spill] sm:$0xff] %v5660_v56  ;;  %v633_v56 = vld [vmem:[%s4997_s5 + $0x900] sm:$0xff] }
 0x1ce   : > { %9191 = vst [vmem:[#allocation53_spill] sm:$0xff] %v5662_v27  ;;  %v5666_v10 = vpop.f32.mrf.mxu3  ;;  %v632_v27 = vld [vmem:[%s4997_s5 + $0x8f8] sm:$0xff] }
 0x1cf   : > { %v5668_v59 = vpop.f32.mrf.mxu2  ;;  %985 = vmatmul.f32.gmra.mxu0 %v625_v45  ;;  %1170 = vmatmul.f32.gmra.mxu1 %v626_v17  ;;  %v348_v17 = vld [vmem:[%s4997_s5 + $0x18] sm:$0xff]  ;;  %v351_v45 = vld [vmem:[%s4997_s5 + $0x30] sm:$0xff] }
 0x1d0   : > { %9192 = vst [vmem:[#allocation54_spill] sm:$0xff] %v5668_v59 }
 0x1d3   : > { %1400 = vmatmul.f32.gmra.mxu3 %v732_v33 }
 0x1d4   : > { %1358 = vmatmul.f32.gmra.mxu2 %v634_v60  ;;  %v5672_v13 = vpop.f32.mrf.mxu0  ;;  %v5674_v14 = vpop.f32.mrf.mxu1 }
 0x1d5   : > { %9193 = vst [vmem:[#allocation55_spill] sm:$0xff] %v5672_v13  ;;  %v350_v13 = vld [vmem:[%s4997_s5 + $0x28] sm:$0xff] }
 0x1d6   : > { %9194 = vst [vmem:[#allocation56_spill] sm:$0xff] %v5674_v14  ;;  %v5678_v6 = vpop.f32.mrf.mxu3  ;;  %v349_v14 = vld [vmem:[%s4997_s5 + $0x20] sm:$0xff] }
 0x1d7   : > { %v5680_v49 = vpop.f32.mrf.mxu2  ;;  %988 = vmatmul.f32.gmra.mxu0 %v632_v27  ;;  %1173 = vmatmul.f32.gmra.mxu1 %v633_v56  ;;  %v355_v56 = vld [vmem:[%s4997_s5 + $0x50] sm:$0xff]  ;;  %v358_v27 = vld [vmem:[%s4997_s5 + $0x68] sm:$0xff] }
 0x1d8   : > { %9195 = vst [vmem:[#allocation57_spill] sm:$0xff] %v5680_v49 }
 0x1db   : > { %1420 = vmatmul.f32.vlgmr.msrb.gmra.mxu3 %v348_v17 }
 0x1dc   : > { %v5684_v33 = vpop.f32.mrf.mxu0  ;;  %v5686_v60 = vpop.f32.mrf.mxu1  ;;  %1975 = vmatmul.f32.vlgmr.msrb.gmra.mxu2 %v351_v45  ;;  %v356_v45 = vld [vmem:[%s4997_s5 + $0x58] sm:$0xff] }
 0x1dd   : > { %9196 = vst [vmem:[#allocation58_spill] sm:$0xff] %v5684_v33 }
 0x1de   : > { %9197 = vst [vmem:[#allocation59_spill] sm:$0xff] %v5686_v60  ;;  %v5690_v59 = vpop.f32.mrf.mxu3  ;;  %v357_v60 = vld [vmem:[%s4997_s5 + $0x60] sm:$0xff] }
 0x1df   : > { %v5692_v48 = vpop.f32.mrf.mxu2  ;;  %1605 = vmatmul.f32.vlgmr.msrb.gmra.mxu0 %v349_v14  ;;  %1790 = vmatmul.f32.vlgmr.msrb.gmra.mxu1 %v350_v13  ;;  %v362_v13 = vld [vmem:[%s4997_s5 + $0x88] sm:$0xff]  ;;  %v365_v14 = vld [vmem:[%s4997_s5 + $0xa0] sm:$0xff] }
 0x1e0   : > { %9198 = vst [vmem:[#allocation60_spill] sm:$0xff] %v5692_v48  ;;  %v1178_v48 = vadd.f32 %v5529_v52, %v5338_v22  ;;  %v370_v22 = vld [vmem:[%s4997_s5 + $0xc8] sm:$0xff]  ;;  %v371_v52 = vld [vmem:[%s4997_s5 + $0xd0] sm:$0xff] }
 0x1e3   : > { %1423 = vmatmul.f32.gmra.mxu3 %v355_v56 }
 0x1e4   : > { %v5696_v17 = vpop.f32.mrf.mxu0  ;;  %v5698_v33 = vpop.f32.mrf.mxu1  ;;  %1978 = vmatmul.f32.gmra.mxu2 %v358_v27  ;;  %v363_v27 = vld [vmem:[%s4997_s5 + $0x90] sm:$0xff] }
 0x1e5   : > { %9199 = vst [vmem:[#allocation61_spill] sm:$0xff] %v5696_v17 }
 0x1e6   : > { %9200 = vst [vmem:[#allocation62_spill] sm:$0xff] %v5698_v33  ;;  %v5702_v49 = vpop.f32.mrf.mxu3  ;;  %v364_v33 = vld [vmem:[%s4997_s5 + $0x98] sm:$0xff] }
 0x1e7   : > { %v5704_v40 = vpop.f32.mrf.mxu2  ;;  %1608 = vmatmul.f32.gmra.mxu0 %v356_v45  ;;  %1793 = vmatmul.f32.gmra.mxu1 %v357_v60 }
 0x1e8   : > { %9201 = vst [vmem:[#allocation63_spill] sm:$0xff] %v5704_v40 }
 0x1eb   : > { %1426 = vmatmul.f32.gmra.mxu3 %v362_v13  ;;  %v369_v13 = vld [vmem:[%s4997_s5 + $0xc0] sm:$0xff] }
 0x1ec   : > { %v5708_v56 = vpop.f32.mrf.mxu0  ;;  %v5710_v17 = vpop.f32.mrf.mxu1  ;;  %1981 = vmatmul.f32.gmra.mxu2 %v365_v14 }
 0x1ed   : > { %9202 = vst [vmem:[#allocation64_spill] sm:$0xff] %v5708_v56  ;;  %v372_v56 = vld [vmem:[%s4997_s5 + $0xd8] sm:$0xff] }
 0x1ee   : > { %9203 = vst [vmem:[#allocation65_spill] sm:$0xff] %v5710_v17  ;;  %v1362_v40 = vpop.f32.mrf.mxu3 }
 0x1ef   : > { %v5716_v45 = vadd.f32 %v1362_v40, %v1178_v48  ;;  %v5718_v60 = vpop.f32.mrf.mxu2  ;;  %1611 = vmatmul.f32.gmra.mxu0 %v363_v27  ;;  %1796 = vmatmul.f32.gmra.mxu1 %v364_v33  ;;  %v1181_v40 = vadd.f32 %v5544_v51, %v5350_v7  ;;  %v377_v7 = vld [vmem:[%s4997_s5 + $0x100] sm:$0xff]  ;;  %v378_v51 = vld [vmem:[%s4997_s5 + $0x108] sm:$0xff] }
 0x1f1   : > { %9204 = vst [vmem:[#allocation66_spill] sm:$0xff] %v5716_v45  ;;  %v379_v45 = vld [vmem:[%s4997_s5 + $0x110] sm:$0xff] }
 0x1f3   : > { %1429 = vmatmul.f32.gmra.mxu3 %v369_v13  ;;  %v376_v13 = vld [vmem:[%s4997_s5 + $0xf8] sm:$0xff] }
 0x1f4   : > { %v5722_v17 = vpop.f32.mrf.mxu0  ;;  %v5724_v14 = vpop.f32.mrf.mxu1  ;;  %1984 = vmatmul.f32.gmra.mxu2 %v372_v56 }
 0x1f5   : > { %9205 = vst [vmem:[#allocation67_spill] sm:$0xff] %v5724_v14 }
 0x1f6   : > { %v1365_v48 = vpop.f32.mrf.mxu3 }
 0x1f7   : > { %v5730_v27 = vadd.f32 %v1365_v48, %v1181_v40  ;;  %v5732_v33 = vpop.f32.mrf.mxu2  ;;  %1614 = vmatmul.f32.gmra.mxu0 %v370_v22  ;;  %1799 = vmatmul.f32.gmra.mxu1 %v371_v52  ;;  %v1184_v40 = vadd.f32 %v5558_v55, %v5365_v29  ;;  %v384_v29 = vld [vmem:[%s4997_s5 + $0x138] sm:$0xff]  ;;  %v385_v55 = vld [vmem:[%s4997_s5 + $0x140] sm:$0xff] }
 0x1f9   : > { %9206 = vst [vmem:[#allocation68_spill] sm:$0xff] %v5730_v27  ;;  %v386_v27 = vld [vmem:[%s4997_s5 + $0x148] sm:$0xff] }
 0x1fb   : > { %1432 = vmatmul.f32.gmra.mxu3 %v376_v13  ;;  %v383_v13 = vld [vmem:[%s4997_s5 + $0x130] sm:$0xff] }
 0x1fc   : > { %v5736_v14 = vpop.f32.mrf.mxu0  ;;  %v5738_v56 = vpop.f32.mrf.mxu1  ;;  %1987 = vmatmul.f32.gmra.mxu2 %v379_v45 }
 0x1fd   : > { %9207 = vst [vmem:[#allocation69_spill] sm:$0xff] %v5738_v56 }
 0x1fe   : > { %v1368_v48 = vpop.f32.mrf.mxu3 }
 0x1ff   : > { %v5744_v22 = vadd.f32 %v1368_v48, %v1184_v40  ;;  %v5746_v52 = vpop.f32.mrf.mxu2  ;;  %1617 = vmatmul.f32.gmra.mxu0 %v377_v7  ;;  %1802 = vmatmul.f32.gmra.mxu1 %v378_v51  ;;  %v1187_v40 = vadd.f32 %v5571_v0, %v5377_v42  ;;  %v391_v42 = vld [vmem:[%s4997_s5 + $0x170] sm:$0xff]  ;;  %v392_v0 = vld [vmem:[%s4997_s5 + $0x178] sm:$0xff] }
 0x201   : > { %9208 = vst [vmem:[#allocation70_spill] sm:$0xff] %v5744_v22  ;;  %v393_v22 = vld [vmem:[%s4997_s5 + $0x180] sm:$0xff] }
 0x203   : > { %1435 = vmatmul.f32.gmra.mxu3 %v383_v13  ;;  %v390_v13 = vld [vmem:[%s4997_s5 + $0x168] sm:$0xff] }
 0x204   : > { %v5750_v56 = vpop.f32.mrf.mxu0  ;;  %v5752_v45 = vpop.f32.mrf.mxu1  ;;  %1990 = vmatmul.f32.gmra.mxu2 %v386_v27 }
 0x205   : > { %9209 = vst [vmem:[#allocation71_spill] sm:$0xff] %v5752_v45 }
 0x206   : > { %v1371_v48 = vpop.f32.mrf.mxu3 }
 0x207   : > { %v5758_v7 = vadd.f32 %v1371_v48, %v1187_v40  ;;  %v5760_v51 = vpop.f32.mrf.mxu2  ;;  %1620 = vmatmul.f32.gmra.mxu0 %v384_v29  ;;  %1805 = vmatmul.f32.gmra.mxu1 %v385_v55  ;;  %v1190_v40 = vadd.f32 %v5587_v44, %v5389_v50  ;;  %v398_v50 = vld [vmem:[%s4997_s5 + $0x1a8] sm:$0xff]  ;;  %v399_v44 = vld [vmem:[%s4997_s5 + $0x1b0] sm:$0xff] }
 0x209   : > { %9210 = vst [vmem:[#allocation72_spill] sm:$0xff] %v5758_v7  ;;  %v400_v7 = vld [vmem:[%s4997_s5 + $0x1b8] sm:$0xff] }
 0x20b   : > { %1438 = vmatmul.f32.gmra.mxu3 %v390_v13  ;;  %v397_v13 = vld [vmem:[%s4997_s5 + $0x1a0] sm:$0xff] }
 0x20c   : > { %v5764_v45 = vpop.f32.mrf.mxu0  ;;  %v5766_v27 = vpop.f32.mrf.mxu1  ;;  %1993 = vmatmul.f32.gmra.mxu2 %v393_v22 }
 0x20d   : > { %9211 = vst [vmem:[#allocation73_spill] sm:$0xff] %v5766_v27 }
 0x20e   : > { %v1374_v48 = vpop.f32.mrf.mxu3 }
 0x20f   : > { %v5772_v29 = vadd.f32 %v1374_v48, %v1190_v40  ;;  %v5774_v55 = vpop.f32.mrf.mxu2  ;;  %1623 = vmatmul.f32.gmra.mxu0 %v391_v42  ;;  %1808 = vmatmul.f32.gmra.mxu1 %v392_v0  ;;  %v1193_v40 = vadd.f32 %v5600_v4, %v5404_v61  ;;  %v405_v61 = vld [vmem:[%s4997_s5 + $0x1e0] sm:$0xff]  ;;  %v406_v4 = vld [vmem:[%s4997_s5 + $0x1e8] sm:$0xff] }
 0x211   : > { %9212 = vst [vmem:[#allocation74_spill] sm:$0xff] %v5772_v29  ;;  %v407_v29 = vld [vmem:[%s4997_s5 + $0x1f0] sm:$0xff] }
 0x213   : > { %1441 = vmatmul.f32.gmra.mxu3 %v397_v13  ;;  %v404_v13 = vld [vmem:[%s4997_s5 + $0x1d8] sm:$0xff] }
 0x214   : > { %v5778_v27 = vpop.f32.mrf.mxu0  ;;  %v5780_v22 = vpop.f32.mrf.mxu1  ;;  %1996 = vmatmul.f32.gmra.mxu2 %v400_v7 }
 0x215   : > { %9213 = vst [vmem:[#allocation75_spill] sm:$0xff] %v5780_v22 }
 0x216   : > { %v1377_v48 = vpop.f32.mrf.mxu3 }
 0x217   : > { %v5786_v42 = vadd.f32 %v1377_v48, %v1193_v40  ;;  %v5788_v0 = vpop.f32.mrf.mxu2  ;;  %1626 = vmatmul.f32.gmra.mxu0 %v398_v50  ;;  %1811 = vmatmul.f32.gmra.mxu1 %v399_v44  ;;  %v1196_v40 = vadd.f32 %v5615_v35, %v5416_v8  ;;  %v412_v8 = vld [vmem:[%s4997_s5 + $0x218] sm:$0xff]  ;;  %v413_v35 = vld [vmem:[%s4997_s5 + $0x220] sm:$0xff] }
 0x219   : > { %9214 = vst [vmem:[#allocation76_spill] sm:$0xff] %v5786_v42  ;;  %v414_v42 = vld [vmem:[%s4997_s5 + $0x228] sm:$0xff] }
 0x21b   : > { %1444 = vmatmul.f32.gmra.mxu3 %v404_v13  ;;  %v411_v13 = vld [vmem:[%s4997_s5 + $0x210] sm:$0xff] }
 0x21c   : > { %v5792_v22 = vpop.f32.mrf.mxu0  ;;  %v5794_v7 = vpop.f32.mrf.mxu1  ;;  %1999 = vmatmul.f32.gmra.mxu2 %v407_v29 }
 0x21d   : > { %9215 = vst [vmem:[#allocation77_spill] sm:$0xff] %v5794_v7 }
 0x21e   : > { %v1380_v48 = vpop.f32.mrf.mxu3 }
 0x21f   : > { %v5800_v50 = vadd.f32 %v1380_v48, %v1196_v40  ;;  %v5802_v44 = vpop.f32.mrf.mxu2  ;;  %1629 = vmatmul.f32.gmra.mxu0 %v405_v61  ;;  %1814 = vmatmul.f32.gmra.mxu1 %v406_v4  ;;  %v1199_v40 = vadd.f32 %v5630_v12, %v5430_v3  ;;  %v419_v3 = vld [vmem:[%s4997_s5 + $0x250] sm:$0xff]  ;;  %v420_v12 = vld [vmem:[%s4997_s5 + $0x258] sm:$0xff] }
 0x221   : > { %9216 = vst [vmem:[#allocation78_spill] sm:$0xff] %v5800_v50  ;;  %v421_v50 = vld [vmem:[%s4997_s5 + $0x260] sm:$0xff] }
 0x223   : > { %1447 = vmatmul.f32.gmra.mxu3 %v411_v13  ;;  %v418_v13 = vld [vmem:[%s4997_s5 + $0x248] sm:$0xff] }
 0x224   : > { %v5806_v7 = vpop.f32.mrf.mxu0  ;;  %v5808_v29 = vpop.f32.mrf.mxu1  ;;  %2002 = vmatmul.f32.gmra.mxu2 %v414_v42 }
 0x225   : > { %9217 = vst [vmem:[#allocation79_spill] sm:$0xff] %v5808_v29 }
 0x226   : > { %v1383_v48 = vpop.f32.mrf.mxu3 }
 0x227   : > { %v5814_v61 = vadd.f32 %v1383_v48, %v1199_v40  ;;  %v5816_v4 = vpop.f32.mrf.mxu2  ;;  %1632 = vmatmul.f32.gmra.mxu0 %v412_v8  ;;  %1817 = vmatmul.f32.gmra.mxu1 %v413_v35  ;;  %v1202_v40 = vadd.f32 %v5642_v26, %v5444_v37  ;;  %v426_v37 = vld [vmem:[%s4997_s5 + $0x288] sm:$0xff]  ;;  %v427_v26 = vld [vmem:[%s4997_s5 + $0x290] sm:$0xff] }
 0x229   : > { %9218 = vst [vmem:[#allocation80_spill] sm:$0xff] %v5814_v61  ;;  %v428_v61 = vld [vmem:[%s4997_s5 + $0x298] sm:$0xff] }
 0x22b   : > { %1450 = vmatmul.f32.gmra.mxu3 %v418_v13  ;;  %v425_v13 = vld [vmem:[%s4997_s5 + $0x280] sm:$0xff] }
 0x22c   : > { %v5820_v29 = vpop.f32.mrf.mxu0  ;;  %v5822_v42 = vpop.f32.mrf.mxu1  ;;  %2005 = vmatmul.f32.gmra.mxu2 %v421_v50 }
 0x22d   : > { %9219 = vst [vmem:[#allocation81_spill] sm:$0xff] %v5822_v42 }
 0x22e   : > { %v1386_v48 = vpop.f32.mrf.mxu3 }
 0x22f   : > { %v5828_v8 = vadd.f32 %v1386_v48, %v1202_v40  ;;  %v5830_v35 = vpop.f32.mrf.mxu2  ;;  %1635 = vmatmul.f32.gmra.mxu0 %v419_v3  ;;  %1820 = vmatmul.f32.gmra.mxu1 %v420_v12  ;;  %v1205_v40 = vadd.f32 %v5654_v25, %v5457_v54  ;;  %v433_v54 = vld [vmem:[%s4997_s5 + $0x2c0] sm:$0xff]  ;;  %v434_v25 = vld [vmem:[%s4997_s5 + $0x2c8] sm:$0xff] }
 0x231   : > { %9220 = vst [vmem:[#allocation82_spill] sm:$0xff] %v5828_v8  ;;  %v435_v8 = vld [vmem:[%s4997_s5 + $0x2d0] sm:$0xff] }
 0x233   : > { %1453 = vmatmul.f32.gmra.mxu3 %v425_v13  ;;  %v432_v13 = vld [vmem:[%s4997_s5 + $0x2b8] sm:$0xff] }
 0x234   : > { %v5834_v42 = vpop.f32.mrf.mxu0  ;;  %v5836_v50 = vpop.f32.mrf.mxu1  ;;  %2008 = vmatmul.f32.gmra.mxu2 %v428_v61 }
 0x235   : > { %9221 = vst [vmem:[#allocation83_spill] sm:$0xff] %v5836_v50 }
 0x236   : > { %v1389_v48 = vpop.f32.mrf.mxu3 }
 0x237   : > { %v5842_v3 = vadd.f32 %v1389_v48, %v1205_v40  ;;  %v5844_v12 = vpop.f32.mrf.mxu2  ;;  %1638 = vmatmul.f32.gmra.mxu0 %v426_v37  ;;  %1823 = vmatmul.f32.gmra.mxu1 %v427_v26  ;;  %v1208_v40 = vadd.f32 %v5666_v10, %v5473_v15  ;;  %v440_v10 = vld [vmem:[%s4997_s5 + $0x2f8] sm:$0xff]  ;;  %v441_v15 = vld [vmem:[%s4997_s5 + $0x300] sm:$0xff] }
 0x239   : > { %9222 = vst [vmem:[#allocation84_spill] sm:$0xff] %v5842_v3  ;;  %v442_v3 = vld [vmem:[%s4997_s5 + $0x308] sm:$0xff] }
 0x23b   : > { %1456 = vmatmul.f32.gmra.mxu3 %v432_v13  ;;  %v439_v13 = vld [vmem:[%s4997_s5 + $0x2f0] sm:$0xff] }
 0x23c   : > { %v5848_v50 = vpop.f32.mrf.mxu0  ;;  %v5850_v61 = vpop.f32.mrf.mxu1  ;;  %2011 = vmatmul.f32.gmra.mxu2 %v435_v8 }
 0x23d   : > { %9223 = vst [vmem:[#allocation85_spill] sm:$0xff] %v5850_v61 }
 0x23e   : > { %v1392_v48 = vpop.f32.mrf.mxu3 }
 0x23f   : > { %v5856_v37 = vadd.f32 %v1392_v48, %v1208_v40  ;;  %v5858_v26 = vpop.f32.mrf.mxu2  ;;  %1641 = vmatmul.f32.gmra.mxu0 %v433_v54  ;;  %1826 = vmatmul.f32.gmra.mxu1 %v434_v25  ;;  %v1211_v40 = vadd.f32 %v5678_v6, %v5486_v41  ;;  %v447_v6 = vld [vmem:[%s4997_s5 + $0x330] sm:$0xff]  ;;  %v448_v41 = vld [vmem:[%s4997_s5 + $0x338] sm:$0xff] }
 0x241   : > { %9224 = vst [vmem:[#allocation86_spill] sm:$0xff] %v5856_v37  ;;  %v449_v37 = vld [vmem:[%s4997_s5 + $0x340] sm:$0xff] }
 0x243   : > { %1459 = vmatmul.f32.gmra.mxu3 %v439_v13  ;;  %v446_v13 = vld [vmem:[%s4997_s5 + $0x328] sm:$0xff] }
 0x244   : > { %v5862_v61 = vpop.f32.mrf.mxu0  ;;  %v5864_v8 = vpop.f32.mrf.mxu1  ;;  %2014 = vmatmul.f32.gmra.mxu2 %v442_v3 }
 0x245   : > { %9225 = vst [vmem:[#allocation87_spill] sm:$0xff] %v5864_v8 }
 0x246   : > { %v1395_v48 = vpop.f32.mrf.mxu3 }
 0x247   : > { %v5870_v54 = vadd.f32 %v1395_v48, %v1211_v40  ;;  %v5872_v25 = vpop.f32.mrf.mxu2  ;;  %1644 = vmatmul.f32.gmra.mxu0 %v440_v10  ;;  %1829 = vmatmul.f32.gmra.mxu1 %v441_v15  ;;  %v1214_v40 = vadd.f32 %v5690_v59, %v5500_v5  ;;  %v455_v59 = vld [vmem:[%s4997_s5 + $0x370] sm:$0xff]  ;;  %v1217_v5 = vadd.f32 %v5702_v49, %v5516_v63  ;;  %v462_v49 = vld [vmem:[%s4997_s5 + $0x3a8] sm:$0xff] }
 0x249   : > { %9226 = vst [vmem:[#allocation88_spill] sm:$0xff] %v5870_v54  ;;  %v456_v54 = vld [vmem:[%s4997_s5 + $0x378] sm:$0xff] }
 0x24b   : > { %1462 = vmatmul.f32.gmra.mxu3 %v446_v13  ;;  %v453_v13 = vld [vmem:[%s4997_s5 + $0x360] sm:$0xff] }
 0x24c   : > { %v5876_v8 = vpop.f32.mrf.mxu0  ;;  %v5878_v3 = vpop.f32.mrf.mxu1  ;;  %2017 = vmatmul.f32.gmra.mxu2 %v449_v37 }
 0x24d   : > { %9227 = vst [vmem:[#allocation89_spill] sm:$0xff] %v5876_v8  ;;  %v454_v8 = vld [vmem:[%s4997_s5 + $0x368] sm:$0xff] }
 0x24e   : > { %9228 = vst [vmem:[#allocation90_spill] sm:$0xff] %v5878_v3  ;;  %v1398_v48 = vpop.f32.mrf.mxu3 }
 0x24f   : > { %v5884_v10 = vadd.f32 %v1398_v48, %v1214_v40  ;;  %v5886_v15 = vpop.f32.mrf.mxu2  ;;  %1647 = vmatmul.f32.gmra.mxu0 %v447_v6  ;;  %1832 = vmatmul.f32.gmra.mxu1 %v448_v41  ;;  %v460_v48 = vld [vmem:[%s4997_s5 + $0x398] sm:$0xff] }
 0x250   : > { %9230 = vst [vmem:[#allocation92_spill] sm:$0xff] %v5886_v15  ;;  %v469_v15 = vld [vmem:[%s4997_s5 + $0x3e0] sm:$0xff] }
 0x251   : > { %9229 = vst [vmem:[#allocation91_spill] sm:$0xff] %v5884_v10 }
 0x253   : > { %1465 = vmatmul.f32.gmra.mxu3 %v453_v13  ;;  %v1052_v13 = vadd.f32 %v5334_v18, %v5332_v16  ;;  %v1055_v16 = vadd.f32 %v5346_v30, %v5344_v28 }
 0x254   : > { %v5890_v3 = vpop.f32.mrf.mxu0  ;;  %v5892_v37 = vpop.f32.mrf.mxu1  ;;  %2020 = vmatmul.f32.gmra.mxu2 %v456_v54  ;;  %v463_v54 = vld [vmem:[%s4997_s5 + $0x3b0] sm:$0xff] }
 0x255   : > { %9231 = vst [vmem:[#allocation93_spill] sm:$0xff] %v5890_v3  ;;  %v461_v3 = vld [vmem:[%s4997_s5 + $0x3a0] sm:$0xff]  ;;  %v1237_v63 = vadd.f32 %v5340_v24, %v1052_v13  ;;  %v468_v13 = vld [vmem:[%s4997_s5 + $0x3d8] sm:$0xff] }
 0x256   : > { %9232 = vst [vmem:[#allocation94_spill] sm:$0xff] %v5892_v37  ;;  %v1401_v40 = vpop.f32.mrf.mxu3 }
 0x257   : > { %v5898_v6 = vadd.f32 %v1401_v40, %v1217_v5  ;;  %v5900_v41 = vpop.f32.mrf.mxu2  ;;  %1650 = vmatmul.f32.gmra.mxu0 %v454_v8  ;;  %1835 = vmatmul.f32.gmra.mxu1 %v455_v59  ;;  %v467_v40 = vld [vmem:[%s4997_s5 + $0x3d0] sm:$0xff] }
 0x258   : > { %9234 = vst [vmem:[#allocation96_spill] sm:$0xff] %v5900_v41 }
 0x259   : > { %9233 = vst [vmem:[#allocation95_spill] sm:$0xff] %v5898_v6 }
 0x25b   : > { %1468 = vmatmul.f32.gmra.mxu3 %v460_v48  ;;  %v470_v48 = vld [vmem:[%s4997_s5 + $0x3e8] sm:$0xff] }
 0x25c   : > { %v1606_v10 = vpop.f32.mrf.mxu0  ;;  %2023 = vmatmul.f32.gmra.mxu2 %v463_v54  ;;  %v1791_v37 = vpop.f32.mrf.mxu1  ;;  %v289_v54 = vld [vmem:[#allocation2] sm:$0xff] }
 0x25e   : > { %v1421_v5 = vpop.f32.mrf.mxu3 }
 0x25f   : > { %v1422_v8 = vadd.f32 %v1421_v5, %v1237_v63  ;;  %1653 = vmatmul.f32.gmra.mxu0 %v461_v3  ;;  %v1976_v59 = vpop.f32.mrf.mxu2  ;;  %1838 = vmatmul.f32.gmra.mxu1 %v462_v49  ;;  %v1240_v3 = vadd.f32 %v5353_v11, %v1055_v16  ;;  %v290_v11 = vld [vmem:[#allocation2 + $0x8] sm:$0xff]  ;;  %v475_v16 = vld [vmem:[%s4997_s5 + $0x410] sm:$0xff] }
 0x261   : > { %v1607_v18 = vadd.f32 %v1606_v10, %v1422_v8  ;;  %v474_v10 = vld [vmem:[%s4997_s5 + $0x408] sm:$0xff] }
 0x263   : > { %v1792_v6 = vadd.f32 %v1791_v37, %v1607_v18  ;;  %1471 = vmatmul.f32.gmra.mxu3 %v467_v40  ;;  %v1058_v37 = vadd.f32 %v5361_v20, %v5359_v36  ;;  %v477_v40 = vld [vmem:[%s4997_s5 + $0x420] sm:$0xff] }
 0x264   : > { %v1609_v41 = vpop.f32.mrf.mxu0  ;;  %2026 = vmatmul.f32.gmra.mxu2 %v470_v48  ;;  %v1794_v24 = vpop.f32.mrf.mxu1  ;;  %v476_v48 = vld [vmem:[%s4997_s5 + $0x418] sm:$0xff] }
 0x265   : > { %v1977_v63 = vadd.f32 %v1976_v59, %v1792_v6 }
 0x266   : > { %v1424_v49 = vpop.f32.mrf.mxu3 }
 0x267   : > { %v2144_v5 = vadd.f32 %v1977_v63, %v289_v54  ;;  %v1425_v28 = vadd.f32 %v1424_v49, %v1240_v3  ;;  %1656 = vmatmul.f32.gmra.mxu0 %v468_v13  ;;  %v1979_v30 = vpop.f32.mrf.mxu2  ;;  %1841 = vmatmul.f32.gmra.mxu1 %v469_v15  ;;  %v1243_v15 = vadd.f32 %v5367_v32, %v1058_v37  ;;  %v484_v49 = vld [vmem:[%s4997_s5 + $0x458] sm:$0xff]  ;;  %v291_v32 = vld [vmem:[#allocation2 + $0x10] sm:$0xff] }
 0x268   : > { %v483_v37 = vld [vmem:[%s4997_s5 + $0x450] sm:$0xff] }
 0x269   : > { %2201 = vst.msk [vmem:[#allocation2] sm:$0xff] %vm2200_vm1, %v2144_v5  ;;  %v1610_v8 = vadd.f32 %v1609_v41, %v1425_v28  ;;  %v481_v41 = vld [vmem:[%s4997_s5 + $0x440] sm:$0xff] }
 0x26b   : > { %v1795_v18 = vadd.f32 %v1794_v24, %v1610_v8  ;;  %1474 = vmatmul.f32.gmra.mxu3 %v474_v10  ;;  %v1061_v24 = vadd.f32 %v5373_v39, %v5371_v38  ;;  %v482_v10 = vld [vmem:[%s4997_s5 + $0x448] sm:$0xff] }
 0x26c   : > { %v1612_v6 = vpop.f32.mrf.mxu0  ;;  %2029 = vmatmul.f32.gmra.mxu2 %v477_v40  ;;  %v1797_v59 = vpop.f32.mrf.mxu1 }
 0x26d   : > { %v1980_v54 = vadd.f32 %v1979_v30, %v1795_v18  ;;  %v1246_v8 = vadd.f32 %v5379_v43, %v1061_v24  ;;  %v292_v43 = vld [vmem:[#allocation2 + $0x18] sm:$0xff] }
 0x26e   : > { %v1427_v13 = vpop.f32.mrf.mxu3 }
 0x26f   : > { %v2145_v3 = vadd.f32 %v1980_v54, %v290_v11  ;;  %v1428_v36 = vadd.f32 %v1427_v13, %v1243_v15  ;;  %1659 = vmatmul.f32.gmra.mxu0 %v475_v16  ;;  %v1982_v20 = vpop.f32.mrf.mxu2  ;;  %1844 = vmatmul.f32.gmra.mxu1 %v476_v48  ;;  %v491_v48 = vld [vmem:[%s4997_s5 + $0x490] sm:$0xff] }
 0x271   : > { %2202 = vst.msk [vmem:[#allocation2 + $0x8] sm:$0xff] %vm2200_vm1, %v2145_v3  ;;  %v1613_v63 = vadd.f32 %v1612_v6, %v1428_v36  ;;  %v488_v6 = vld [vmem:[%s4997_s5 + $0x478] sm:$0xff]  ;;  %v489_v3 = vld [vmem:[%s4997_s5 + $0x480] sm:$0xff]  ;;  %v490_v36 = vld [vmem:[%s4997_s5 + $0x488] sm:$0xff] }
 0x273   : > { %v1798_v5 = vadd.f32 %v1797_v59, %v1613_v63  ;;  %1477 = vmatmul.f32.gmra.mxu3 %v481_v41  ;;  %v1064_v59 = vadd.f32 %v5385_v47, %v5383_v46 }
 0x274   : > { %v1615_v28 = vpop.f32.mrf.mxu0  ;;  %2032 = vmatmul.f32.gmra.mxu2 %v484_v49  ;;  %v1800_v30 = vpop.f32.mrf.mxu1  ;;  %v495_v49 = vld [vmem:[%s4997_s5 + $0x4b0] sm:$0xff] }
 0x275   : > { %v1983_v40 = vadd.f32 %v1982_v20, %v1798_v5  ;;  %v1249_v20 = vadd.f32 %v5393_v53, %v1064_v59  ;;  %v1067_v5 = vadd.f32 %v5400_v58, %v5398_v57  ;;  %v293_v53 = vld [vmem:[#allocation2 + $0x20] sm:$0xff]  ;;  %v1070_v59 = vadd.f32 %v5412_v2, %v5410_v1 }
 0x276   : > { %v1430_v18 = vpop.f32.mrf.mxu3 }
 0x277   : > { %v2146_v11 = vadd.f32 %v1983_v40, %v291_v32  ;;  %v1431_v38 = vadd.f32 %v1430_v18, %v1246_v8  ;;  %1662 = vmatmul.f32.gmra.mxu0 %v482_v10  ;;  %v1985_v39 = vpop.f32.mrf.mxu2  ;;  %1847 = vmatmul.f32.gmra.mxu1 %v483_v37  ;;  %v496_v8 = vld [vmem:[%s4997_s5 + $0x4b8] sm:$0xff]  ;;  %v497_v40 = vld [vmem:[%s4997_s5 + $0x4c0] sm:$0xff]  ;;  %v1252_v18 = vadd.f32 %v5406_v62, %v1067_v5  ;;  %v294_v62 = vld [vmem:[#allocation2 + $0x28] sm:$0xff] }
 0x279   : > { %2203 = vst.msk [vmem:[#allocation2 + $0x10] sm:$0xff] %vm2200_vm1, %v2146_v11  ;;  %v1616_v16 = vadd.f32 %v1615_v28, %v1431_v38  ;;  %v498_v28 = vld [vmem:[%s4997_s5 + $0x4c8] sm:$0xff] }
 0x27b   : > { %v1801_v15 = vadd.f32 %v1800_v30, %v1616_v16  ;;  %1480 = vmatmul.f32.gmra.mxu3 %v488_v6  ;;  %v502_v6 = vld [vmem:[%s4997_s5 + $0x4e8] sm:$0xff] }
 0x27c   : > { %v1618_v54 = vpop.f32.mrf.mxu0  ;;  %2035 = vmatmul.f32.gmra.mxu2 %v491_v48  ;;  %v1803_v13 = vpop.f32.mrf.mxu1  ;;  %v505_v48 = vld [vmem:[%s4997_s5 + $0x500] sm:$0xff] }
 0x27d   : > { %v1986_v41 = vadd.f32 %v1985_v39, %v1801_v15 }
 0x27e   : > { %v1433_v24 = vpop.f32.mrf.mxu3 }
 0x27f   : > { %v2147_v63 = vadd.f32 %v1986_v41, %v292_v43  ;;  %v1434_v46 = vadd.f32 %v1433_v24, %v1249_v20  ;;  %1665 = vmatmul.f32.gmra.mxu0 %v489_v3  ;;  %v1988_v47 = vpop.f32.mrf.mxu2  ;;  %1850 = vmatmul.f32.gmra.mxu1 %v490_v36  ;;  %v504_v3 = vld [vmem:[%s4997_s5 + $0x4f8] sm:$0xff]  ;;  %v1255_v36 = vadd.f32 %v5418_v9, %v1070_v59  ;;  %v295_v9 = vld [vmem:[#allocation2 + $0x30] sm:$0xff]  ;;  %v517_v59 = vld [vmem:[%s4997_s5 + $0x560] sm:$0xff] }
 0x281   : > { %2204 = vst.msk [vmem:[#allocation2 + $0x18] sm:$0xff] %vm2200_vm1, %v2147_v63  ;;  %v1619_v32 = vadd.f32 %v1618_v54, %v1434_v46  ;;  %v509_v63 = vld [vmem:[%s4997_s5 + $0x520] sm:$0xff]  ;;  %v1073_v46 = vadd.f32 %v5426_v21, %v5424_v19 }
 0x283   : > { %v1804_v30 = vadd.f32 %v1803_v13, %v1619_v32  ;;  %1483 = vmatmul.f32.gmra.mxu3 %v495_v49  ;;  %v503_v13 = vld [vmem:[%s4997_s5 + $0x4f0] sm:$0xff]  ;;  %v512_v49 = vld [vmem:[%s4997_s5 + $0x538] sm:$0xff] }
 0x284   : > { %v1621_v10 = vpop.f32.mrf.mxu0  ;;  %2038 = vmatmul.f32.gmra.mxu2 %v498_v28  ;;  %v1806_v37 = vpop.f32.mrf.mxu1 }
 0x285   : > { %v1989_v11 = vadd.f32 %v1988_v47, %v1804_v30  ;;  %v510_v30 = vld [vmem:[%s4997_s5 + $0x528] sm:$0xff] }
 0x286   : > { %v1436_v38 = vpop.f32.mrf.mxu3 }
 0x287   : > { %v2148_v39 = vadd.f32 %v1989_v11, %v293_v53  ;;  %v1437_v57 = vadd.f32 %v1436_v38, %v1252_v18  ;;  %1668 = vmatmul.f32.gmra.mxu0 %v496_v8  ;;  %v1991_v58 = vpop.f32.mrf.mxu2  ;;  %1853 = vmatmul.f32.gmra.mxu1 %v497_v40  ;;  %v511_v53 = vld [vmem:[%s4997_s5 + $0x530] sm:$0xff]  ;;  %v516_v18 = vld [vmem:[%s4997_s5 + $0x558] sm:$0xff]  ;;  %v1076_v11 = vadd.f32 %v5440_v23, %v5438_v34 }
 0x289   : > { %2205 = vst.msk [vmem:[#allocation2 + $0x20] sm:$0xff] %vm2200_vm1, %v2148_v39  ;;  %v1622_v16 = vadd.f32 %v1621_v10, %v1437_v57  ;;  %v1258_v10 = vadd.f32 %v5433_v31, %v1073_v46  ;;  %v519_v39 = vld [vmem:[%s4997_s5 + $0x570] sm:$0xff]  ;;  %v296_v31 = vld [vmem:[#allocation2 + $0x38] sm:$0xff] }
 0x28b   : > { %v1807_v15 = vadd.f32 %v1806_v37, %v1622_v16  ;;  %1486 = vmatmul.f32.gmra.mxu3 %v502_v6  ;;  %v518_v16 = vld [vmem:[%s4997_s5 + $0x568] sm:$0xff] }
 0x28c   : > { %v1624_v43 = vpop.f32.mrf.mxu0  ;;  %2041 = vmatmul.f32.gmra.mxu2 %v505_v48  ;;  %v1809_v54 = vpop.f32.mrf.mxu1  ;;  %v9235_v48 = vld [vmem:[#allocation6_spill] sm:$0xff] }
 0x28d   : > { %v1992_v20 = vadd.f32 %v1991_v58, %v1807_v15  ;;  %v1261_v15 = vadd.f32 %v9235_v48, %v1076_v11 }
 0x28e   : > { %v1439_v41 = vpop.f32.mrf.mxu3 }
 0x28f   : > { %v2149_v24 = vadd.f32 %v1992_v20, %v294_v62  ;;  %v1440_v1 = vadd.f32 %v1439_v41, %v1255_v36  ;;  %1671 = vmatmul.f32.gmra.mxu0 %v503_v13  ;;  %v1994_v2 = vpop.f32.mrf.mxu2  ;;  %1856 = vmatmul.f32.gmra.mxu1 %v504_v3  ;;  %v523_v13 = vld [vmem:[%s4997_s5 + $0x590] sm:$0xff]  ;;  %v9236_v3 = vld [vmem:[#allocation7_spill] sm:$0xff] }
 0x290   : > { %v9237_v36 = vld [vmem:[#allocation8_spill] sm:$0xff] }
 0x291   : > { %2206 = vst.msk [vmem:[#allocation2 + $0x28] sm:$0xff] %vm2200_vm1, %v2149_v24  ;;  %v1625_v47 = vadd.f32 %v1624_v43, %v1440_v1  ;;  %v1079_v20 = vadd.f32 %v9237_v36, %v9236_v3  ;;  %v526_v24 = vld [vmem:[%s4997_s5 + $0x5a8] sm:$0xff]  ;;  %v540_v36 = vld [vmem:[%s4997_s5 + $0x618] sm:$0xff] }
 0x293   : > { %v1810_v5 = vadd.f32 %v1809_v54, %v1625_v47  ;;  %1489 = vmatmul.f32.gmra.mxu3 %v509_v63  ;;  %v524_v47 = vld [vmem:[%s4997_s5 + $0x598] sm:$0xff] }
 0x294   : > { %v1627_v32 = vpop.f32.mrf.mxu0  ;;  %2044 = vmatmul.f32.gmra.mxu2 %v512_v49  ;;  %v1812_v28 = vpop.f32.mrf.mxu1  ;;  %v525_v49 = vld [vmem:[%s4997_s5 + $0x5a0] sm:$0xff] }
 0x295   : > { %v1995_v37 = vadd.f32 %v1994_v2, %v1810_v5  ;;  %v297_v2 = vld [vmem:[#allocation2 + $0x40] sm:$0xff]  ;;  %v9238_v5 = vld [vmem:[#allocation9_spill] sm:$0xff] }
 0x296   : > { %v1442_v8 = vpop.f32.mrf.mxu3 }
 0x297   : > { %v2150_v40 = vadd.f32 %v1995_v37, %v295_v9  ;;  %v1443_v19 = vadd.f32 %v1442_v8, %v1258_v10  ;;  %1674 = vmatmul.f32.gmra.mxu0 %v510_v30  ;;  %v1997_v21 = vpop.f32.mrf.mxu2  ;;  %1859 = vmatmul.f32.gmra.mxu1 %v511_v53  ;;  %v1264_v9 = vadd.f32 %v9238_v5, %v1079_v20  ;;  %v530_v37 = vld [vmem:[%s4997_s5 + $0x5c8] sm:$0xff]  ;;  %v9239_v8 = vld [vmem:[#allocation10_spill] sm:$0xff] }
 0x299   : > { %2207 = vst.msk [vmem:[#allocation2 + $0x30] sm:$0xff] %vm2200_vm1, %v2150_v40  ;;  %v1628_v38 = vadd.f32 %v1627_v32, %v1443_v19  ;;  %v9240_v40 = vld [vmem:[#allocation11_spill] sm:$0xff] }
 0x29a   : > { %v1082_v19 = vadd.f32 %v9240_v40, %v9239_v8  ;;  %v547_v40 = vld [vmem:[%s4997_s5 + $0x650] sm:$0xff] }
 0x29b   : > { %v1813_v57 = vadd.f32 %v1812_v28, %v1628_v38  ;;  %1492 = vmatmul.f32.gmra.mxu3 %v516_v18  ;;  %v533_v18 = vld [vmem:[%s4997_s5 + $0x5e0] sm:$0xff]  ;;  %v298_v38 = vld [vmem:[#allocation2 + $0x48] sm:$0xff] }
 0x29c   : > { %v1630_v58 = vpop.f32.mrf.mxu0  ;;  %2047 = vmatmul.f32.gmra.mxu2 %v519_v39  ;;  %v1815_v6 = vpop.f32.mrf.mxu1 }
 0x29d   : > { %v1998_v62 = vadd.f32 %v1997_v21, %v1813_v57 }
 0x29e   : > { %v1445_v43 = vpop.f32.mrf.mxu3 }
 0x29f   : > { %v2151_v54 = vadd.f32 %v1998_v62, %v296_v31  ;;  %v1446_v34 = vadd.f32 %v1445_v43, %v1261_v15  ;;  %1677 = vmatmul.f32.gmra.mxu0 %v517_v59  ;;  %v2000_v23 = vpop.f32.mrf.mxu2  ;;  %1862 = vmatmul.f32.gmra.mxu1 %v518_v16  ;;  %v531_v31 = vld [vmem:[%s4997_s5 + $0x5d0] sm:$0xff] }
 0x2a1   : > { %2208 = vst.msk [vmem:[#allocation2 + $0x38] sm:$0xff] %vm2200_vm1, %v2151_v54  ;;  %v1631_v41 = vadd.f32 %v1630_v58, %v1446_v34  ;;  %v532_v58 = vld [vmem:[%s4997_s5 + $0x5d8] sm:$0xff]  ;;  %v537_v54 = vld [vmem:[%s4997_s5 + $0x600] sm:$0xff] }
 0x2a2   : > { %v9242_v34 = vld [vmem:[#allocation13_spill] sm:$0xff] }
 0x2a3   : > { %v1816_v1 = vadd.f32 %v1815_v6, %v1631_v41  ;;  %1495 = vmatmul.f32.gmra.mxu3 %v523_v13  ;;  %v9241_v6 = vld [vmem:[#allocation12_spill] sm:$0xff] }
 0x2a4   : > { %v1633_v63 = vpop.f32.mrf.mxu0  ;;  %2050 = vmatmul.f32.gmra.mxu2 %v526_v24  ;;  %v1818_v46 = vpop.f32.mrf.mxu1  ;;  %v1267_v59 = vadd.f32 %v9241_v6, %v1082_v19  ;;  %v299_v41 = vld [vmem:[#allocation2 + $0x50] sm:$0xff] }
 0x2a5   : > { %v2001_v32 = vadd.f32 %v2000_v23, %v1816_v1  ;;  %v9243_v23 = vld [vmem:[#allocation14_spill] sm:$0xff] }
 0x2a6   : > { %v1448_v28 = vpop.f32.mrf.mxu3  ;;  %v1085_v13 = vadd.f32 %v9243_v23, %v9242_v34  ;;  %v554_v23 = vld [vmem:[%s4997_s5 + $0x688] sm:$0xff] }
 0x2a7   : > { %v2152_v30 = vadd.f32 %v2001_v32, %v297_v2  ;;  %v1449_v53 = vadd.f32 %v1448_v28, %v1264_v9  ;;  %1680 = vmatmul.f32.gmra.mxu0 %v524_v47  ;;  %v2003_v10 = vpop.f32.mrf.mxu2  ;;  %1865 = vmatmul.f32.gmra.mxu1 %v525_v49  ;;  %v538_v2 = vld [vmem:[%s4997_s5 + $0x608] sm:$0xff] }
 0x2a9   : > { %2209 = vst.msk [vmem:[#allocation2 + $0x40] sm:$0xff] %vm2200_vm1, %v2152_v30  ;;  %v1634_v21 = vadd.f32 %v1633_v63, %v1449_v53  ;;  %v539_v63 = vld [vmem:[%s4997_s5 + $0x610] sm:$0xff]  ;;  %v544_v30 = vld [vmem:[%s4997_s5 + $0x638] sm:$0xff] }
 0x2aa   : > { %v9245_v53 = vld [vmem:[#allocation16_spill] sm:$0xff] }
 0x2ab   : > { %v1819_v11 = vadd.f32 %v1818_v46, %v1634_v21  ;;  %1498 = vmatmul.f32.gmra.mxu3 %v530_v37  ;;  %v9244_v46 = vld [vmem:[#allocation15_spill] sm:$0xff]  ;;  %v300_v21 = vld [vmem:[#allocation2 + $0x58] sm:$0xff] }
 0x2ac   : > { %v1636_v39 = vpop.f32.mrf.mxu0  ;;  %2053 = vmatmul.f32.gmra.mxu2 %v533_v18  ;;  %v1821_v57 = vpop.f32.mrf.mxu1  ;;  %v1270_v47 = vadd.f32 %v9244_v46, %v1085_v13 }
 0x2ad   : > { %v2004_v16 = vadd.f32 %v2003_v10, %v1819_v11  ;;  %v9246_v10 = vld [vmem:[#allocation17_spill] sm:$0xff] }
 0x2ae   : > { %v1451_v48 = vpop.f32.mrf.mxu3  ;;  %v1088_v37 = vadd.f32 %v9246_v10, %v9245_v53  ;;  %v561_v10 = vld [vmem:[%s4997_s5 + $0x6c0] sm:$0xff] }
 0x2af   : > { %v2153_v15 = vadd.f32 %v2004_v16, %v298_v38  ;;  %v1452_v62 = vadd.f32 %v1451_v48, %v1267_v59  ;;  %1683 = vmatmul.f32.gmra.mxu0 %v531_v31  ;;  %v2006_v43 = vpop.f32.mrf.mxu2  ;;  %1868 = vmatmul.f32.gmra.mxu1 %v532_v58  ;;  %v545_v38 = vld [vmem:[%s4997_s5 + $0x640] sm:$0xff] }
 0x2b1   : > { %2210 = vst.msk [vmem:[#allocation2 + $0x48] sm:$0xff] %vm2200_vm1, %v2153_v15  ;;  %v1637_v3 = vadd.f32 %v1636_v39, %v1452_v62  ;;  %v546_v39 = vld [vmem:[%s4997_s5 + $0x648] sm:$0xff]  ;;  %v551_v15 = vld [vmem:[%s4997_s5 + $0x670] sm:$0xff] }
 0x2b2   : > { %v9248_v62 = vld [vmem:[#allocation19_spill] sm:$0xff] }
 0x2b3   : > { %v1822_v20 = vadd.f32 %v1821_v57, %v1637_v3  ;;  %1501 = vmatmul.f32.gmra.mxu3 %v537_v54  ;;  %v9247_v57 = vld [vmem:[#allocation18_spill] sm:$0xff] }
 0x2b4   : > { %v1639_v24 = vpop.f32.mrf.mxu0  ;;  %2056 = vmatmul.f32.gmra.mxu2 %v540_v36  ;;  %v1824_v1 = vpop.f32.mrf.mxu1  ;;  %v1273_v31 = vadd.f32 %v9247_v57, %v1088_v37  ;;  %v301_v3 = vld [vmem:[#allocation2 + $0x60] sm:$0xff] }
 0x2b5   : > { %v2007_v49 = vadd.f32 %v2006_v43, %v1822_v20  ;;  %v9249_v43 = vld [vmem:[#allocation20_spill] sm:$0xff] }
 0x2b6   : > { %v1454_v5 = vpop.f32.mrf.mxu3  ;;  %v1091_v54 = vadd.f32 %v9249_v43, %v9248_v62  ;;  %v568_v43 = vld [vmem:[%s4997_s5 + $0x6f8] sm:$0xff] }
 0x2b7   : > { %v2154_v9 = vadd.f32 %v2007_v49, %v299_v41  ;;  %v1455_v32 = vadd.f32 %v1454_v5, %v1270_v47  ;;  %1686 = vmatmul.f32.gmra.mxu0 %v538_v2  ;;  %v2009_v28 = vpop.f32.mrf.mxu2  ;;  %1871 = vmatmul.f32.gmra.mxu1 %v539_v63  ;;  %v552_v41 = vld [vmem:[%s4997_s5 + $0x678] sm:$0xff] }
 0x2b9   : > { %2211 = vst.msk [vmem:[#allocation2 + $0x50] sm:$0xff] %vm2200_vm1, %v2154_v9  ;;  %v1640_v8 = vadd.f32 %v1639_v24, %v1455_v32  ;;  %v553_v24 = vld [vmem:[%s4997_s5 + $0x680] sm:$0xff]  ;;  %v558_v9 = vld [vmem:[%s4997_s5 + $0x6a8] sm:$0xff] }
 0x2ba   : > { %v9251_v32 = vld [vmem:[#allocation22_spill] sm:$0xff] }
 0x2bb   : > { %v1825_v19 = vadd.f32 %v1824_v1, %v1640_v8  ;;  %1504 = vmatmul.f32.gmra.mxu3 %v544_v30  ;;  %v9250_v1 = vld [vmem:[#allocation21_spill] sm:$0xff]  ;;  %v302_v8 = vld [vmem:[#allocation2 + $0x68] sm:$0xff] }
 0x2bc   : > { %v1642_v18 = vpop.f32.mrf.mxu0  ;;  %2059 = vmatmul.f32.gmra.mxu2 %v547_v40  ;;  %v1827_v11 = vpop.f32.mrf.mxu1  ;;  %v1276_v2 = vadd.f32 %v9250_v1, %v1091_v54 }
 0x2bd   : > { %v2010_v58 = vadd.f32 %v2009_v28, %v1825_v19  ;;  %v9252_v28 = vld [vmem:[#allocation23_spill] sm:$0xff] }
 0x2be   : > { %v1457_v6 = vpop.f32.mrf.mxu3  ;;  %v1094_v30 = vadd.f32 %v9252_v28, %v9251_v32  ;;  %v575_v28 = vld [vmem:[%s4997_s5 + $0x730] sm:$0xff] }
 0x2bf   : > { %v2155_v59 = vadd.f32 %v2010_v58, %v300_v21  ;;  %v1458_v16 = vadd.f32 %v1457_v6, %v1273_v31  ;;  %1689 = vmatmul.f32.gmra.mxu0 %v545_v38  ;;  %v2012_v48 = vpop.f32.mrf.mxu2  ;;  %1874 = vmatmul.f32.gmra.mxu1 %v546_v39  ;;  %v559_v21 = vld [vmem:[%s4997_s5 + $0x6b0] sm:$0xff] }
 0x2c1   : > { %2212 = vst.msk [vmem:[#allocation2 + $0x58] sm:$0xff] %vm2200_vm1, %v2155_v59  ;;  %v1643_v34 = vadd.f32 %v1642_v18, %v1458_v16  ;;  %v560_v18 = vld [vmem:[%s4997_s5 + $0x6b8] sm:$0xff]  ;;  %v565_v59 = vld [vmem:[%s4997_s5 + $0x6e0] sm:$0xff] }
 0x2c2   : > { %v9254_v16 = vld [vmem:[#allocation25_spill] sm:$0xff] }
 0x2c3   : > { %v1828_v13 = vadd.f32 %v1827_v11, %v1643_v34  ;;  %1507 = vmatmul.f32.gmra.mxu3 %v551_v15  ;;  %v9253_v11 = vld [vmem:[#allocation24_spill] sm:$0xff] }
 0x2c4   : > { %v1645_v36 = vpop.f32.mrf.mxu0  ;;  %2062 = vmatmul.f32.gmra.mxu2 %v554_v23  ;;  %v1830_v20 = vpop.f32.mrf.mxu1  ;;  %v1279_v38 = vadd.f32 %v9253_v11, %v1094_v30  ;;  %v303_v34 = vld [vmem:[#allocation2 + $0x70] sm:$0xff] }
 0x2c5   : > { %v2013_v63 = vadd.f32 %v2012_v48, %v1828_v13  ;;  %v9255_v48 = vld [vmem:[#allocation26_spill] sm:$0xff] }
 0x2c6   : > { %v1460_v46 = vpop.f32.mrf.mxu3  ;;  %v1097_v15 = vadd.f32 %v9255_v48, %v9254_v16  ;;  %v582_v48 = vld [vmem:[%s4997_s5 + $0x768] sm:$0xff] }
 0x2c7   : > { %v2156_v47 = vadd.f32 %v2013_v63, %v301_v3  ;;  %v1461_v49 = vadd.f32 %v1460_v46, %v1276_v2  ;;  %1692 = vmatmul.f32.gmra.mxu0 %v552_v41  ;;  %v2015_v5 = vpop.f32.mrf.mxu2  ;;  %1877 = vmatmul.f32.gmra.mxu1 %v553_v24  ;;  %v566_v3 = vld [vmem:[%s4997_s5 + $0x6e8] sm:$0xff] }
 0x2c9   : > { %2213 = vst.msk [vmem:[#allocation2 + $0x60] sm:$0xff] %vm2200_vm1, %v2156_v47  ;;  %v1646_v53 = vadd.f32 %v1645_v36, %v1461_v49  ;;  %v567_v36 = vld [vmem:[%s4997_s5 + $0x6f0] sm:$0xff]  ;;  %v572_v47 = vld [vmem:[%s4997_s5 + $0x718] sm:$0xff] }
 0x2ca   : > { %v9257_v49 = vld [vmem:[#allocation28_spill] sm:$0xff] }
 0x2cb   : > { %v1831_v37 = vadd.f32 %v1830_v20, %v1646_v53  ;;  %1510 = vmatmul.f32.gmra.mxu3 %v558_v9  ;;  %v9256_v20 = vld [vmem:[#allocation27_spill] sm:$0xff]  ;;  %v304_v53 = vld [vmem:[#allocation2 + $0x78] sm:$0xff] }
 0x2cc   : > { %v1648_v40 = vpop.f32.mrf.mxu0  ;;  %2065 = vmatmul.f32.gmra.mxu2 %v561_v10  ;;  %v1833_v19 = vpop.f32.mrf.mxu1  ;;  %v1282_v41 = vadd.f32 %v9256_v20, %v1097_v15 }
 0x2cd   : > { %v2016_v39 = vadd.f32 %v2015_v5, %v1831_v37  ;;  %v9258_v5 = vld [vmem:[#allocation29_spill] sm:$0xff] }
 0x2ce   : > { %v1463_v57 = vpop.f32.mrf.mxu3  ;;  %v1100_v9 = vadd.f32 %v9258_v5, %v9257_v49  ;;  %v589_v5 = vld [vmem:[%s4997_s5 + $0x7a0] sm:$0xff] }
 0x2cf   : > { %v2157_v31 = vadd.f32 %v2016_v39, %v302_v8  ;;  %v1464_v58 = vadd.f32 %v1463_v57, %v1279_v38  ;;  %1695 = vmatmul.f32.gmra.mxu0 %v559_v21  ;;  %v2018_v6 = vpop.f32.mrf.mxu2  ;;  %1880 = vmatmul.f32.gmra.mxu1 %v560_v18  ;;  %v573_v8 = vld [vmem:[%s4997_s5 + $0x720] sm:$0xff] }
 0x2d1   : > { %2214 = vst.msk [vmem:[#allocation2 + $0x68] sm:$0xff] %vm2200_vm1, %v2157_v31  ;;  %v1649_v62 = vadd.f32 %v1648_v40, %v1464_v58  ;;  %v574_v40 = vld [vmem:[%s4997_s5 + $0x728] sm:$0xff]  ;;  %v579_v31 = vld [vmem:[%s4997_s5 + $0x750] sm:$0xff] }
 0x2d2   : > { %v9260_v58 = vld [vmem:[#allocation31_spill] sm:$0xff] }
 0x2d3   : > { %v1834_v54 = vadd.f32 %v1833_v19, %v1649_v62  ;;  %1513 = vmatmul.f32.gmra.mxu3 %v565_v59  ;;  %v9259_v19 = vld [vmem:[#allocation30_spill] sm:$0xff] }
 0x2d4   : > { %v1651_v23 = vpop.f32.mrf.mxu0  ;;  %2068 = vmatmul.f32.gmra.mxu2 %v568_v43  ;;  %v1836_v13 = vpop.f32.mrf.mxu1  ;;  %v1285_v21 = vadd.f32 %v9259_v19, %v1100_v9  ;;  %v305_v62 = vld [vmem:[#allocation2 + $0x80] sm:$0xff] }
 0x2d5   : > { %v2019_v24 = vadd.f32 %v2018_v6, %v1834_v54  ;;  %v9261_v6 = vld [vmem:[#allocation32_spill] sm:$0xff] }
 0x2d6   : > { %v1466_v1 = vpop.f32.mrf.mxu3  ;;  %v1103_v59 = vadd.f32 %v9261_v6, %v9260_v58  ;;  %v596_v6 = vld [vmem:[%s4997_s5 + $0x7d8] sm:$0xff] }
 0x2d7   : > { %v2158_v2 = vadd.f32 %v2019_v24, %v303_v34  ;;  %v1467_v63 = vadd.f32 %v1466_v1, %v1282_v41  ;;  %1698 = vmatmul.f32.gmra.mxu0 %v566_v3  ;;  %v2021_v46 = vpop.f32.mrf.mxu2  ;;  %1883 = vmatmul.f32.gmra.mxu1 %v567_v36  ;;  %v580_v34 = vld [vmem:[%s4997_s5 + $0x758] sm:$0xff] }
 0x2d9   : > { %2215 = vst.msk [vmem:[#allocation2 + $0x70] sm:$0xff] %vm2200_vm1, %v2158_v2  ;;  %v1652_v32 = vadd.f32 %v1651_v23, %v1467_v63  ;;  %v581_v23 = vld [vmem:[%s4997_s5 + $0x760] sm:$0xff]  ;;  %v586_v2 = vld [vmem:[%s4997_s5 + $0x788] sm:$0xff] }
 0x2da   : > { %v9263_v63 = vld [vmem:[#allocation34_spill] sm:$0xff] }
 0x2db   : > { %v1837_v30 = vadd.f32 %v1836_v13, %v1652_v32  ;;  %1516 = vmatmul.f32.gmra.mxu3 %v572_v47  ;;  %v9262_v13 = vld [vmem:[#allocation33_spill] sm:$0xff]  ;;  %v306_v32 = vld [vmem:[#allocation2 + $0x88] sm:$0xff] }
 0x2dc   : > { %v1654_v10 = vpop.f32.mrf.mxu0  ;;  %2071 = vmatmul.f32.gmra.mxu2 %v575_v28  ;;  %v1839_v37 = vpop.f32.mrf.mxu1  ;;  %v1288_v3 = vadd.f32 %v9262_v13, %v1103_v59 }
 0x2dd   : > { %v2022_v18 = vadd.f32 %v2021_v46, %v1837_v30  ;;  %v9264_v46 = vld [vmem:[#allocation35_spill] sm:$0xff] }
 0x2de   : > { %v1469_v11 = vpop.f32.mrf.mxu3  ;;  %v1106_v47 = vadd.f32 %v9264_v46, %v9263_v63  ;;  %v603_v46 = vld [vmem:[%s4997_s5 + $0x810] sm:$0xff] }
 0x2df   : > { %v2159_v38 = vadd.f32 %v2022_v18, %v304_v53  ;;  %v1470_v39 = vadd.f32 %v1469_v11, %v1285_v21  ;;  %1701 = vmatmul.f32.gmra.mxu0 %v573_v8  ;;  %v2024_v57 = vpop.f32.mrf.mxu2  ;;  %1886 = vmatmul.f32.gmra.mxu1 %v574_v40  ;;  %v587_v53 = vld [vmem:[%s4997_s5 + $0x790] sm:$0xff] }
 0x2e1   : > { %2216 = vst.msk [vmem:[#allocation2 + $0x78] sm:$0xff] %vm2200_vm1, %v2159_v38  ;;  %v1655_v16 = vadd.f32 %v1654_v10, %v1470_v39  ;;  %v588_v10 = vld [vmem:[%s4997_s5 + $0x798] sm:$0xff]  ;;  %v593_v38 = vld [vmem:[%s4997_s5 + $0x7c0] sm:$0xff] }
 0x2e2   : > { %v9266_v39 = vld [vmem:[#allocation37_spill] sm:$0xff] }
 0x2e3   : > { %v1840_v15 = vadd.f32 %v1839_v37, %v1655_v16  ;;  %1519 = vmatmul.f32.gmra.mxu3 %v579_v31  ;;  %v9265_v37 = vld [vmem:[#allocation36_spill] sm:$0xff] }
 0x2e4   : > { %v1657_v43 = vpop.f32.mrf.mxu0  ;;  %2074 = vmatmul.f32.gmra.mxu2 %v582_v48  ;;  %v1842_v54 = vpop.f32.mrf.mxu1  ;;  %v1291_v8 = vadd.f32 %v9265_v37, %v1106_v47  ;;  %v307_v16 = vld [vmem:[#allocation2 + $0x90] sm:$0xff] }
 0x2e5   : > { %v2025_v36 = vadd.f32 %v2024_v57, %v1840_v15  ;;  %v9267_v57 = vld [vmem:[#allocation38_spill] sm:$0xff] }
 0x2e6   : > { %v1472_v20 = vpop.f32.mrf.mxu3  ;;  %v1109_v31 = vadd.f32 %v9267_v57, %v9266_v39  ;;  %v610_v57 = vld [vmem:[%s4997_s5 + $0x848] sm:$0xff] }
 0x2e7   : > { %v2160_v41 = vadd.f32 %v2025_v36, %v305_v62  ;;  %v1473_v24 = vadd.f32 %v1472_v20, %v1288_v3  ;;  %1704 = vmatmul.f32.gmra.mxu0 %v580_v34  ;;  %v2027_v1 = vpop.f32.mrf.mxu2  ;;  %1889 = vmatmul.f32.gmra.mxu1 %v581_v23  ;;  %v594_v62 = vld [vmem:[%s4997_s5 + $0x7c8] sm:$0xff] }
 0x2e9   : > { %2217 = vst.msk [vmem:[#allocation2 + $0x80] sm:$0xff] %vm2200_vm1, %v2160_v41  ;;  %v1658_v49 = vadd.f32 %v1657_v43, %v1473_v24  ;;  %v595_v43 = vld [vmem:[%s4997_s5 + $0x7d0] sm:$0xff]  ;;  %v600_v41 = vld [vmem:[%s4997_s5 + $0x7f8] sm:$0xff] }
 0x2ea   : > { %v9269_v24 = vld [vmem:[#allocation40_spill] sm:$0xff] }
 0x2eb   : > { %v1843_v9 = vadd.f32 %v1842_v54, %v1658_v49  ;;  %1522 = vmatmul.f32.gmra.mxu3 %v586_v2  ;;  %v9268_v54 = vld [vmem:[#allocation39_spill] sm:$0xff]  ;;  %v308_v49 = vld [vmem:[#allocation2 + $0x98] sm:$0xff] }
 0x2ec   : > { %v1660_v28 = vpop.f32.mrf.mxu0  ;;  %2077 = vmatmul.f32.gmra.mxu2 %v589_v5  ;;  %v1845_v30 = vpop.f32.mrf.mxu1  ;;  %v1294_v34 = vadd.f32 %v9268_v54, %v1109_v31 }
 0x2ed   : > { %v2028_v40 = vadd.f32 %v2027_v1, %v1843_v9  ;;  %v9270_v1 = vld [vmem:[#allocation41_spill] sm:$0xff] }
 0x2ee   : > { %v1475_v19 = vpop.f32.mrf.mxu3  ;;  %v1112_v2 = vadd.f32 %v9270_v1, %v9269_v24  ;;  %v617_v1 = vld [vmem:[%s4997_s5 + $0x880] sm:$0xff] }
 0x2ef   : > { %v2161_v21 = vadd.f32 %v2028_v40, %v306_v32  ;;  %v1476_v18 = vadd.f32 %v1475_v19, %v1291_v8  ;;  %1707 = vmatmul.f32.gmra.mxu0 %v587_v53  ;;  %v2030_v11 = vpop.f32.mrf.mxu2  ;;  %1892 = vmatmul.f32.gmra.mxu1 %v588_v10  ;;  %v601_v32 = vld [vmem:[%s4997_s5 + $0x800] sm:$0xff] }
 0x2f1   : > { %2218 = vst.msk [vmem:[#allocation2 + $0x88] sm:$0xff] %vm2200_vm1, %v2161_v21  ;;  %v1661_v58 = vadd.f32 %v1660_v28, %v1476_v18  ;;  %v602_v28 = vld [vmem:[%s4997_s5 + $0x808] sm:$0xff]  ;;  %v607_v21 = vld [vmem:[%s4997_s5 + $0x830] sm:$0xff] }
 0x2f2   : > { %v9272_v18 = vld [vmem:[#allocation43_spill] sm:$0xff] }
 0x2f3   : > { %v1846_v59 = vadd.f32 %v1845_v30, %v1661_v58  ;;  %1525 = vmatmul.f32.gmra.mxu3 %v593_v38  ;;  %v9271_v30 = vld [vmem:[#allocation42_spill] sm:$0xff] }
 0x2f4   : > { %v1663_v48 = vpop.f32.mrf.mxu0  ;;  %2080 = vmatmul.f32.gmra.mxu2 %v596_v6  ;;  %v1848_v15 = vpop.f32.mrf.mxu1  ;;  %v1297_v53 = vadd.f32 %v9271_v30, %v1112_v2  ;;  %v309_v58 = vld [vmem:[#allocation2 + $0xa0] sm:$0xff] }
 0x2f5   : > { %v2031_v23 = vadd.f32 %v2030_v11, %v1846_v59  ;;  %v9273_v11 = vld [vmem:[#allocation44_spill] sm:$0xff] }
 0x2f6   : > { %v1478_v13 = vpop.f32.mrf.mxu3  ;;  %v1115_v38 = vadd.f32 %v9273_v11, %v9272_v18  ;;  %v624_v11 = vld [vmem:[%s4997_s5 + $0x8b8] sm:$0xff] }
 0x2f7   : > { %v2162_v3 = vadd.f32 %v2031_v23, %v307_v16  ;;  %v1479_v36 = vadd.f32 %v1478_v13, %v1294_v34  ;;  %1710 = vmatmul.f32.gmra.mxu0 %v594_v62  ;;  %v2033_v20 = vpop.f32.mrf.mxu2  ;;  %1895 = vmatmul.f32.gmra.mxu1 %v595_v43  ;;  %v608_v16 = vld [vmem:[%s4997_s5 + $0x838] sm:$0xff] }
 0x2f9   : > { %2219 = vst.msk [vmem:[#allocation2 + $0x90] sm:$0xff] %vm2200_vm1, %v2162_v3  ;;  %v1664_v63 = vadd.f32 %v1663_v48, %v1479_v36  ;;  %v609_v48 = vld [vmem:[%s4997_s5 + $0x840] sm:$0xff]  ;;  %v614_v3 = vld [vmem:[%s4997_s5 + $0x868] sm:$0xff] }
 0x2fa   : > { %v9275_v36 = vld [vmem:[#allocation46_spill] sm:$0xff] }
 0x2fb   : > { %v1849_v47 = vadd.f32 %v1848_v15, %v1664_v63  ;;  %1528 = vmatmul.f32.gmra.mxu3 %v600_v41  ;;  %v9274_v15 = vld [vmem:[#allocation45_spill] sm:$0xff]  ;;  %v310_v63 = vld [vmem:[#allocation2 + $0xa8] sm:$0xff] }
 0x2fc   : > { %v1666_v5 = vpop.f32.mrf.mxu0  ;;  %2083 = vmatmul.f32.gmra.mxu2 %v603_v46  ;;  %v1851_v9 = vpop.f32.mrf.mxu1  ;;  %v1300_v62 = vadd.f32 %v9274_v15, %v1115_v38 }
 0x2fd   : > { %v2034_v10 = vadd.f32 %v2033_v20, %v1849_v47  ;;  %v9276_v20 = vld [vmem:[#allocation47_spill] sm:$0xff] }
 0x2fe   : > { %v1481_v37 = vpop.f32.mrf.mxu3  ;;  %v1118_v41 = vadd.f32 %v9276_v20, %v9275_v36  ;;  %v631_v20 = vld [vmem:[%s4997_s5 + $0x8f0] sm:$0xff] }
 0x2ff   : > { %v2163_v8 = vadd.f32 %v2034_v10, %v308_v49  ;;  %v1482_v40 = vadd.f32 %v1481_v37, %v1297_v53  ;;  %1713 = vmatmul.f32.gmra.mxu0 %v601_v32  ;;  %v2036_v19 = vpop.f32.mrf.mxu2  ;;  %1898 = vmatmul.f32.gmra.mxu1 %v602_v28  ;;  %v615_v49 = vld [vmem:[%s4997_s5 + $0x870] sm:$0xff] }
 0x301   : > { %2220 = vst.msk [vmem:[#allocation2 + $0x98] sm:$0xff] %vm2200_vm1, %v2163_v8  ;;  %v1667_v39 = vadd.f32 %v1666_v5, %v1482_v40  ;;  %v616_v5 = vld [vmem:[%s4997_s5 + $0x878] sm:$0xff]  ;;  %v621_v8 = vld [vmem:[%s4997_s5 + $0x8a0] sm:$0xff] }
 0x302   : > { %v9278_v40 = vld [vmem:[#allocation49_spill] sm:$0xff] }
 0x303   : > { %v1852_v31 = vadd.f32 %v1851_v9, %v1667_v39  ;;  %1531 = vmatmul.f32.gmra.mxu3 %v607_v21  ;;  %v9277_v9 = vld [vmem:[#allocation48_spill] sm:$0xff] }
 0x304   : > { %v1669_v6 = vpop.f32.mrf.mxu0  ;;  %2086 = vmatmul.f32.gmra.mxu2 %v610_v57  ;;  %v1854_v59 = vpop.f32.mrf.mxu1  ;;  %v1303_v32 = vadd.f32 %v9277_v9, %v1118_v41  ;;  %v311_v39 = vld [vmem:[#allocation2 + $0xb0] sm:$0xff] }
 0x305   : > { %v2037_v43 = vadd.f32 %v2036_v19, %v1852_v31  ;;  %v9279_v19 = vld [vmem:[#allocation50_spill] sm:$0xff] }
 0x306   : > { %v1484_v54 = vpop.f32.mrf.mxu3  ;;  %v1121_v21 = vadd.f32 %v9279_v19, %v9278_v40  ;;  %v638_v19 = vld [vmem:[%s4997_s5 + $0x928] sm:$0xff] }
 0x307   : > { %v2164_v34 = vadd.f32 %v2037_v43, %v309_v58  ;;  %v1485_v23 = vadd.f32 %v1484_v54, %v1300_v62  ;;  %1716 = vmatmul.f32.gmra.mxu0 %v608_v16  ;;  %v2039_v13 = vpop.f32.mrf.mxu2  ;;  %1901 = vmatmul.f32.gmra.mxu1 %v609_v48  ;;  %v622_v58 = vld [vmem:[%s4997_s5 + $0x8a8] sm:$0xff] }
 0x309   : > { %2221 = vst.msk [vmem:[#allocation2 + $0xa0] sm:$0xff] %vm2200_vm1, %v2164_v34  ;;  %v1670_v24 = vadd.f32 %v1669_v6, %v1485_v23  ;;  %v623_v6 = vld [vmem:[%s4997_s5 + $0x8b0] sm:$0xff]  ;;  %v628_v34 = vld [vmem:[%s4997_s5 + $0x8d8] sm:$0xff] }
 0x30a   : > { %v9281_v23 = vld [vmem:[#allocation52_spill] sm:$0xff] }
 0x30b   : > { %v1855_v2 = vadd.f32 %v1854_v59, %v1670_v24  ;;  %1534 = vmatmul.f32.gmra.mxu3 %v614_v3  ;;  %v9280_v59 = vld [vmem:[#allocation51_spill] sm:$0xff]  ;;  %v312_v24 = vld [vmem:[#allocation2 + $0xb8] sm:$0xff] }
 0x30c   : > { %v1672_v46 = vpop.f32.mrf.mxu0  ;;  %2089 = vmatmul.f32.gmra.mxu2 %v617_v1  ;;  %v1857_v47 = vpop.f32.mrf.mxu1  ;;  %v1306_v16 = vadd.f32 %v9280_v59, %v1121_v21 }
 0x30d   : > { %v2040_v28 = vadd.f32 %v2039_v13, %v1855_v2  ;;  %v9282_v13 = vld [vmem:[#allocation53_spill] sm:$0xff] }
 0x30e   : > { %v1487_v30 = vpop.f32.mrf.mxu3  ;;  %v1124_v3 = vadd.f32 %v9282_v13, %v9281_v23  ;;  %v645_v13 = vld [vmem:[%s4997_s5 + $0x960] sm:$0xff] }
 0x30f   : > { %v2165_v53 = vadd.f32 %v2040_v28, %v310_v63  ;;  %v1488_v10 = vadd.f32 %v1487_v30, %v1303_v32  ;;  %1719 = vmatmul.f32.gmra.mxu0 %v615_v49  ;;  %v2042_v37 = vpop.f32.mrf.mxu2  ;;  %1904 = vmatmul.f32.gmra.mxu1 %v616_v5  ;;  %v629_v63 = vld [vmem:[%s4997_s5 + $0x8e0] sm:$0xff] }
 0x311   : > { %2222 = vst.msk [vmem:[#allocation2 + $0xa8] sm:$0xff] %vm2200_vm1, %v2165_v53  ;;  %v1673_v18 = vadd.f32 %v1672_v46, %v1488_v10  ;;  %v630_v46 = vld [vmem:[%s4997_s5 + $0x8e8] sm:$0xff]  ;;  %v635_v53 = vld [vmem:[%s4997_s5 + $0x910] sm:$0xff] }
 0x312   : > { %v9284_v10 = vld [vmem:[#allocation55_spill] sm:$0xff] }
 0x313   : > { %v1858_v38 = vadd.f32 %v1857_v47, %v1673_v18  ;;  %1537 = vmatmul.f32.gmra.mxu3 %v621_v8  ;;  %v9283_v47 = vld [vmem:[#allocation54_spill] sm:$0xff] }
 0x314   : > { %v1675_v57 = vpop.f32.mrf.mxu0  ;;  %2092 = vmatmul.f32.gmra.mxu2 %v624_v11  ;;  %v1860_v31 = vpop.f32.mrf.mxu1  ;;  %v1309_v49 = vadd.f32 %v9283_v47, %v1124_v3  ;;  %v313_v18 = vld [vmem:[#allocation2 + $0xc0] sm:$0xff] }
 0x315   : > { %v2043_v48 = vadd.f32 %v2042_v37, %v1858_v38  ;;  %v9285_v37 = vld [vmem:[#allocation56_spill] sm:$0xff] }
 0x316   : > { %v1490_v15 = vpop.f32.mrf.mxu3  ;;  %v1127_v8 = vadd.f32 %v9285_v37, %v9284_v10  ;;  %v652_v37 = vld [vmem:[%s4997_s5 + $0x998] sm:$0xff] }
 0x317   : > { %v2166_v62 = vadd.f32 %v2043_v48, %v311_v39  ;;  %v1491_v43 = vadd.f32 %v1490_v15, %v1306_v16  ;;  %1722 = vmatmul.f32.gmra.mxu0 %v622_v58  ;;  %v2045_v54 = vpop.f32.mrf.mxu2  ;;  %1907 = vmatmul.f32.gmra.mxu1 %v623_v6  ;;  %v636_v39 = vld [vmem:[%s4997_s5 + $0x918] sm:$0xff] }
 0x319   : > { %2223 = vst.msk [vmem:[#allocation2 + $0xb0] sm:$0xff] %vm2200_vm1, %v2166_v62  ;;  %v1676_v36 = vadd.f32 %v1675_v57, %v1491_v43  ;;  %v637_v57 = vld [vmem:[%s4997_s5 + $0x920] sm:$0xff]  ;;  %v642_v62 = vld [vmem:[%s4997_s5 + $0x948] sm:$0xff] }
 0x31a   : > { %v9287_v43 = vld [vmem:[#allocation58_spill] sm:$0xff] }
 0x31b   : > { %v1861_v41 = vadd.f32 %v1860_v31, %v1676_v36  ;;  %1540 = vmatmul.f32.gmra.mxu3 %v628_v34  ;;  %v9286_v31 = vld [vmem:[#allocation57_spill] sm:$0xff]  ;;  %v314_v36 = vld [vmem:[#allocation2 + $0xc8] sm:$0xff] }
 0x31c   : > { %v1678_v1 = vpop.f32.mrf.mxu0  ;;  %2095 = vmatmul.f32.gmra.mxu2 %v631_v20  ;;  %v1863_v2 = vpop.f32.mrf.mxu1  ;;  %v1312_v58 = vadd.f32 %v9286_v31, %v1127_v8 }
 0x31d   : > { %v2046_v5 = vadd.f32 %v2045_v54, %v1861_v41  ;;  %v9288_v54 = vld [vmem:[#allocation59_spill] sm:$0xff] }
 0x31e   : > { %v1493_v9 = vpop.f32.mrf.mxu3  ;;  %v1130_v34 = vadd.f32 %v9288_v54, %v9287_v43  ;;  %v659_v54 = vld [vmem:[%s4997_s5 + $0x9d0] sm:$0xff] }
 0x31f   : > { %v2167_v32 = vadd.f32 %v2046_v5, %v312_v24  ;;  %v1494_v28 = vadd.f32 %v1493_v9, %v1309_v49  ;;  %1725 = vmatmul.f32.gmra.mxu0 %v629_v63  ;;  %v2048_v30 = vpop.f32.mrf.mxu2  ;;  %1910 = vmatmul.f32.gmra.mxu1 %v630_v46  ;;  %v643_v24 = vld [vmem:[%s4997_s5 + $0x950] sm:$0xff] }
 0x321   : > { %2224 = vst.msk [vmem:[#allocation2 + $0xb8] sm:$0xff] %vm2200_vm1, %v2167_v32  ;;  %v1679_v40 = vadd.f32 %v1678_v1, %v1494_v28  ;;  %v644_v1 = vld [vmem:[%s4997_s5 + $0x958] sm:$0xff]  ;;  %v649_v32 = vld [vmem:[%s4997_s5 + $0x980] sm:$0xff] }
 0x322   : > { %v9290_v28 = vld [vmem:[#allocation61_spill] sm:$0xff] }
 0x323   : > { %v1864_v21 = vadd.f32 %v1863_v2, %v1679_v40  ;;  %1543 = vmatmul.f32.gmra.mxu3 %v635_v53  ;;  %v9289_v2 = vld [vmem:[#allocation60_spill] sm:$0xff] }
 0x324   : > { %v1681_v11 = vpop.f32.mrf.mxu0  ;;  %2098 = vmatmul.f32.gmra.mxu2 %v638_v19  ;;  %v1866_v38 = vpop.f32.mrf.mxu1  ;;  %v1315_v63 = vadd.f32 %v9289_v2, %v1130_v34  ;;  %v315_v40 = vld [vmem:[#allocation2 + $0xd0] sm:$0xff] }
 0x325   : > { %v2049_v6 = vadd.f32 %v2048_v30, %v1864_v21  ;;  %v9291_v30 = vld [vmem:[#allocation62_spill] sm:$0xff] }
 0x326   : > { %v1496_v59 = vpop.f32.mrf.mxu3  ;;  %v1133_v53 = vadd.f32 %v9291_v30, %v9290_v28 }
 0x327   : > { %v2168_v16 = vadd.f32 %v2049_v6, %v313_v18  ;;  %v1497_v48 = vadd.f32 %v1496_v59, %v1312_v58  ;;  %1728 = vmatmul.f32.gmra.mxu0 %v636_v39  ;;  %v2051_v15 = vpop.f32.mrf.mxu2  ;;  %1913 = vmatmul.f32.gmra.mxu1 %v637_v57  ;;  %v650_v18 = vld [vmem:[%s4997_s5 + $0x988] sm:$0xff] }
 0x329   : > { %2225 = vst.msk [vmem:[#allocation2 + $0xc0] sm:$0xff] %vm2200_vm1, %v2168_v16  ;;  %v1682_v23 = vadd.f32 %v1681_v11, %v1497_v48  ;;  %v651_v11 = vld [vmem:[%s4997_s5 + $0x990] sm:$0xff]  ;;  %v656_v16 = vld [vmem:[%s4997_s5 + $0x9b8] sm:$0xff] }
 0x32a   : > { %v9293_v48 = vld [vmem:[#allocation64_spill] sm:$0xff] }
 0x32b   : > { %v1867_v3 = vadd.f32 %v1866_v38, %v1682_v23  ;;  %1546 = vmatmul.f32.gmra.mxu3 %v642_v62  ;;  %v9292_v38 = vld [vmem:[#allocation63_spill] sm:$0xff]  ;;  %v316_v23 = vld [vmem:[#allocation2 + $0xd8] sm:$0xff] }
 0x32c   : > { %v1684_v20 = vpop.f32.mrf.mxu0  ;;  %2101 = vmatmul.f32.gmra.mxu2 %v645_v13  ;;  %v1869_v41 = vpop.f32.mrf.mxu1  ;;  %v1318_v39 = vadd.f32 %v9292_v38, %v1133_v53  ;;  %v9296_v38 = vld [vmem:[#allocation69_spill] sm:$0xff] }
 0x32d   : > { %v2052_v46 = vadd.f32 %v2051_v15, %v1867_v3  ;;  %v9294_v15 = vld [vmem:[#allocation65_spill] sm:$0xff] }
 0x32e   : > { %v1499_v47 = vpop.f32.mrf.mxu3  ;;  %v1136_v62 = vadd.f32 %v9294_v15, %v9293_v48  ;;  %v672_v48 = vld [vmem:[%s4997_s5 + $0xa38] sm:$0xff] }
 0x32f   : > { %v2169_v49 = vadd.f32 %v2052_v46, %v314_v36  ;;  %v1500_v5 = vadd.f32 %v1499_v47, %v1315_v63  ;;  %1731 = vmatmul.f32.gmra.mxu0 %v643_v24  ;;  %v2054_v9 = vpop.f32.mrf.mxu2  ;;  %1916 = vmatmul.f32.gmra.mxu1 %v644_v1  ;;  %v657_v36 = vld [vmem:[%s4997_s5 + $0x9c0] sm:$0xff]  ;;  %v663_v47 = vld [vmem:[%s4997_s5 + $0x9f0] sm:$0xff] }
 0x331   : > { %2226 = vst.msk [vmem:[#allocation2 + $0xc8] sm:$0xff] %vm2200_vm1, %v2169_v49  ;;  %v1685_v10 = vadd.f32 %v1684_v20, %v1500_v5  ;;  %v658_v20 = vld [vmem:[%s4997_s5 + $0x9c8] sm:$0xff] }
 0x332   : > { %v9295_v49 = vld [vmem:[#allocation67_spill] sm:$0xff] }
 0x333   : > { %v1870_v8 = vadd.f32 %v1869_v41, %v1685_v10  ;;  %1549 = vmatmul.f32.gmra.mxu3 %v649_v32  ;;  %v1321_v41 = vadd.f32 %v5718_v60, %v1136_v62  ;;  %v1139_v5 = vadd.f32 %v9295_v49, %v5722_v17  ;;  %v666_v32 = vld [vmem:[%s4997_s5 + $0xa08] sm:$0xff]  ;;  %v317_v60 = vld [vmem:[#allocation2 + $0xe0] sm:$0xff]  ;;  %v664_v10 = vld [vmem:[%s4997_s5 + $0x9f8] sm:$0xff] }
 0x334   : > { %v1687_v19 = vpop.f32.mrf.mxu0  ;;  %2104 = vmatmul.f32.gmra.mxu2 %v652_v37  ;;  %v1872_v21 = vpop.f32.mrf.mxu1  ;;  %v665_v37 = vld [vmem:[%s4997_s5 + $0xa00] sm:$0xff] }
 0x335   : > { %v2055_v57 = vadd.f32 %v2054_v9, %v1870_v8  ;;  %v1324_v8 = vadd.f32 %v5732_v33, %v1139_v5  ;;  %v318_v33 = vld [vmem:[#allocation2 + $0xe8] sm:$0xff] }
 0x336   : > { %v1502_v31 = vpop.f32.mrf.mxu3 }
 0x337   : > { %v2170_v58 = vadd.f32 %v2055_v57, %v315_v40  ;;  %v1503_v6 = vadd.f32 %v1502_v31, %v1318_v39  ;;  %1734 = vmatmul.f32.gmra.mxu0 %v650_v18  ;;  %v2057_v59 = vpop.f32.mrf.mxu2  ;;  %1919 = vmatmul.f32.gmra.mxu1 %v651_v11  ;;  %v670_v11 = vld [vmem:[%s4997_s5 + $0xa28] sm:$0xff]  ;;  %v1142_v39 = vadd.f32 %v9296_v38, %v5736_v14  ;;  %v673_v31 = vld [vmem:[%s4997_s5 + $0xa40] sm:$0xff] }
 0x339   : > { %2227 = vst.msk [vmem:[#allocation2 + $0xd0] sm:$0xff] %vm2200_vm1, %v2170_v58  ;;  %v1688_v43 = vadd.f32 %v1687_v19, %v1503_v6  ;;  %v1327_v15 = vadd.f32 %v5746_v52, %v1142_v39  ;;  %v319_v52 = vld [vmem:[#allocation2 + $0xf0] sm:$0xff] }
 0x33a   : > { %v691_v39 = vld [vmem:[%s4997_s5 + $0xad0] sm:$0xff] }
 0x33b   : > { %v1873_v34 = vadd.f32 %v1872_v21, %v1688_v43  ;;  %1552 = vmatmul.f32.gmra.mxu3 %v656_v16  ;;  %v671_v16 = vld [vmem:[%s4997_s5 + $0xa30] sm:$0xff] }
 0x33c   : > { %v1690_v13 = vpop.f32.mrf.mxu0  ;;  %2107 = vmatmul.f32.gmra.mxu2 %v659_v54  ;;  %v1875_v3 = vpop.f32.mrf.mxu1 }
 0x33d   : > { %v2058_v24 = vadd.f32 %v2057_v59, %v1873_v34 }
 0x33e   : > { %v1505_v1 = vpop.f32.mrf.mxu3 }
 0x33f   : > { %v2171_v2 = vadd.f32 %v2058_v24, %v316_v23  ;;  %v1506_v63 = vadd.f32 %v1505_v1, %v1321_v41  ;;  %1737 = vmatmul.f32.gmra.mxu0 %v657_v36  ;;  %v2060_v46 = vpop.f32.mrf.mxu2  ;;  %1922 = vmatmul.f32.gmra.mxu1 %v658_v20  ;;  %v677_v23 = vld [vmem:[%s4997_s5 + $0xa60] sm:$0xff]  ;;  %v680_v20 = vld [vmem:[%s4997_s5 + $0xa78] sm:$0xff] }
 0x341   : > { %2228 = vst.msk [vmem:[#allocation2 + $0xd8] sm:$0xff] %vm2200_vm1, %v2171_v2  ;;  %v1691_v9 = vadd.f32 %v1690_v13, %v1506_v63  ;;  %v9297_v13 = vld [vmem:[#allocation71_spill] sm:$0xff]  ;;  %v679_v63 = vld [vmem:[%s4997_s5 + $0xa70] sm:$0xff] }
 0x342   : > { %v678_v2 = vld [vmem:[%s4997_s5 + $0xa68] sm:$0xff] }
 0x343   : > { %v1876_v28 = vadd.f32 %v1875_v3, %v1691_v9  ;;  %1555 = vmatmul.f32.gmra.mxu3 %v663_v47  ;;  %v1145_v3 = vadd.f32 %v9297_v13, %v5750_v56  ;;  %v9300_v13 = vld [vmem:[#allocation77_spill] sm:$0xff] }
 0x344   : > { %v1693_v30 = vpop.f32.mrf.mxu0  ;;  %2110 = vmatmul.f32.gmra.mxu2 %v666_v32  ;;  %v1878_v53 = vpop.f32.mrf.mxu1  ;;  %v684_v32 = vld [vmem:[%s4997_s5 + $0xa98] sm:$0xff] }
 0x345   : > { %v2061_v40 = vadd.f32 %v2060_v46, %v1876_v28  ;;  %v1330_v46 = vadd.f32 %v5760_v51, %v1145_v3  ;;  %v9298_v28 = vld [vmem:[#allocation73_spill] sm:$0xff]  ;;  %v1154_v3 = vadd.f32 %v9300_v13, %v5792_v22 }
 0x346   : > { %v1508_v19 = vpop.f32.mrf.mxu3  ;;  %v320_v51 = vld [vmem:[#allocation2 + $0xf8] sm:$0xff] }
 0x347   : > { %v2172_v21 = vadd.f32 %v2061_v40, %v317_v60  ;;  %v1509_v17 = vadd.f32 %v1508_v19, %v1324_v8  ;;  %1740 = vmatmul.f32.gmra.mxu0 %v664_v10  ;;  %v2063_v18 = vpop.f32.mrf.mxu2  ;;  %1925 = vmatmul.f32.gmra.mxu1 %v665_v37  ;;  %v1148_v60 = vadd.f32 %v9298_v28, %v5764_v45  ;;  %v685_v40 = vld [vmem:[%s4997_s5 + $0xaa0] sm:$0xff]  ;;  %v686_v19 = vld [vmem:[%s4997_s5 + $0xaa8] sm:$0xff] }
 0x349   : > { %2229 = vst.msk [vmem:[#allocation2 + $0xe0] sm:$0xff] %vm2200_vm1, %v2172_v21  ;;  %v1694_v57 = vadd.f32 %v1693_v30, %v1509_v17  ;;  %v1333_v21 = vadd.f32 %v5774_v55, %v1148_v60  ;;  %v321_v55 = vld [vmem:[#allocation2 + $0x100] sm:$0xff]  ;;  %v708_v60 = vld [vmem:[%s4997_s5 + $0xb58] sm:$0xff] }
 0x34b   : > { %v1879_v58 = vadd.f32 %v1878_v53, %v1694_v57  ;;  %1558 = vmatmul.f32.gmra.mxu3 %v670_v11  ;;  %v687_v53 = vld [vmem:[%s4997_s5 + $0xab0] sm:$0xff]  ;;  %v9299_v57 = vld [vmem:[#allocation75_spill] sm:$0xff] }
 0x34c   : > { %v1696_v6 = vpop.f32.mrf.mxu0  ;;  %2113 = vmatmul.f32.gmra.mxu2 %v673_v31  ;;  %v1881_v59 = vpop.f32.mrf.mxu1  ;;  %v1151_v31 = vadd.f32 %v9299_v57, %v5778_v27 }
 0x34d   : > { %v2064_v62 = vadd.f32 %v2063_v18, %v1879_v58 }
 0x34e   : > { %v1511_v43 = vpop.f32.mrf.mxu3 }
 0x34f   : > { %v2173_v54 = vadd.f32 %v2064_v62, %v318_v33  ;;  %v1512_v14 = vadd.f32 %v1511_v43, %v1327_v15  ;;  %1743 = vmatmul.f32.gmra.mxu0 %v671_v16  ;;  %v2066_v34 = vpop.f32.mrf.mxu2  ;;  %1928 = vmatmul.f32.gmra.mxu1 %v672_v48  ;;  %v694_v33 = vld [vmem:[%s4997_s5 + $0xae8] sm:$0xff]  ;;  %v692_v48 = vld [vmem:[%s4997_s5 + $0xad8] sm:$0xff]  ;;  %v693_v15 = vld [vmem:[%s4997_s5 + $0xae0] sm:$0xff]  ;;  %v1336_v62 = vadd.f32 %v5788_v0, %v1151_v31 }
 0x350   : > { %v322_v0 = vld [vmem:[#allocation2 + $0x108] sm:$0xff] }
 0x351   : > { %2230 = vst.msk [vmem:[#allocation2 + $0xe8] sm:$0xff] %vm2200_vm1, %v2173_v54  ;;  %v1697_v36 = vadd.f32 %v1696_v6, %v1512_v14 }
 0x353   : > { %v1882_v41 = vadd.f32 %v1881_v59, %v1697_v36  ;;  %1561 = vmatmul.f32.gmra.mxu3 %v677_v23  ;;  %v698_v23 = vld [vmem:[%s4997_s5 + $0xb08] sm:$0xff] }
 0x354   : > { %v1699_v24 = vpop.f32.mrf.mxu0  ;;  %2116 = vmatmul.f32.gmra.mxu2 %v680_v20  ;;  %v1884_v1 = vpop.f32.mrf.mxu1  ;;  %v701_v20 = vld [vmem:[%s4997_s5 + $0xb20] sm:$0xff] }
 0x355   : > { %v2067_v47 = vadd.f32 %v2066_v34, %v1882_v41 }
 0x356   : > { %v1514_v49 = vpop.f32.mrf.mxu3 }
 0x357   : > { %v2174_v5 = vadd.f32 %v2067_v47, %v319_v52  ;;  %v1515_v56 = vadd.f32 %v1514_v49, %v1330_v46  ;;  %1746 = vmatmul.f32.gmra.mxu0 %v678_v2  ;;  %v2069_v9 = vpop.f32.mrf.mxu2  ;;  %1931 = vmatmul.f32.gmra.mxu1 %v679_v63  ;;  %v700_v2 = vld [vmem:[%s4997_s5 + $0xb18] sm:$0xff]  ;;  %v1339_v63 = vadd.f32 %v5802_v44, %v1154_v3  ;;  %v323_v44 = vld [vmem:[#allocation2 + $0x110] sm:$0xff] }
 0x358   : > { %v720_v3 = vld [vmem:[%s4997_s5 + $0xbb8] sm:$0xff] }
 0x359   : > { %2231 = vst.msk [vmem:[#allocation2 + $0xf0] sm:$0xff] %vm2200_vm1, %v2174_v5  ;;  %v1700_v30 = vadd.f32 %v1699_v24, %v1515_v56  ;;  %v705_v56 = vld [vmem:[%s4997_s5 + $0xb40] sm:$0xff] }
 0x35b   : > { %v1885_v10 = vadd.f32 %v1884_v1, %v1700_v30  ;;  %1564 = vmatmul.f32.gmra.mxu3 %v684_v32  ;;  %v699_v1 = vld [vmem:[%s4997_s5 + $0xb10] sm:$0xff] }
 0x35c   : > { %v1702_v37 = vpop.f32.mrf.mxu0  ;;  %2119 = vmatmul.f32.gmra.mxu2 %v687_v53  ;;  %v1887_v8 = vpop.f32.mrf.mxu1 }
 0x35d   : > { %v2070_v17 = vadd.f32 %v2069_v9, %v1885_v10  ;;  %v9301_v9 = vld [vmem:[#allocation79_spill] sm:$0xff] }
 0x35e   : > { %v1517_v18 = vpop.f32.mrf.mxu3  ;;  %v1157_v32 = vadd.f32 %v9301_v9, %v5806_v7  ;;  %v728_v9 = vld [vmem:[%s4997_s5 + $0xbf8] sm:$0xff] }
 0x35f   : > { %v2175_v11 = vadd.f32 %v2070_v17, %v320_v51  ;;  %v1518_v45 = vadd.f32 %v1517_v18, %v1333_v21  ;;  %1749 = vmatmul.f32.gmra.mxu0 %v685_v40  ;;  %v2072_v38 = vpop.f32.mrf.mxu2  ;;  %1934 = vmatmul.f32.gmra.mxu1 %v686_v19  ;;  %v706_v51 = vld [vmem:[%s4997_s5 + $0xb48] sm:$0xff]  ;;  %v712_v18 = vld [vmem:[%s4997_s5 + $0xb78] sm:$0xff] }
 0x361   : > { %2232 = vst.msk [vmem:[#allocation2 + $0xf8] sm:$0xff] %vm2200_vm1, %v2175_v11  ;;  %v1703_v58 = vadd.f32 %v1702_v37, %v1518_v45  ;;  %v707_v37 = vld [vmem:[%s4997_s5 + $0xb50] sm:$0xff]  ;;  %v9302_v11 = vld [vmem:[#allocation81_spill] sm:$0xff] }
 0x362   : > { %v1160_v45 = vadd.f32 %v9302_v11, %v5820_v29 }
 0x363   : > { %v1888_v6 = vadd.f32 %v1887_v8, %v1703_v58  ;;  %1567 = vmatmul.f32.gmra.mxu3 %v691_v39  ;;  %v1342_v8 = vadd.f32 %v5816_v4, %v1157_v32  ;;  %v715_v39 = vld [vmem:[%s4997_s5 + $0xb90] sm:$0xff]  ;;  %v324_v4 = vld [vmem:[#allocation2 + $0x118] sm:$0xff] }
 0x364   : > { %v1705_v59 = vpop.f32.mrf.mxu0  ;;  %2122 = vmatmul.f32.gmra.mxu2 %v694_v33  ;;  %v1890_v16 = vpop.f32.mrf.mxu1  ;;  %v713_v33 = vld [vmem:[%s4997_s5 + $0xb80] sm:$0xff] }
 0x365   : > { %v2073_v43 = vadd.f32 %v2072_v38, %v1888_v6  ;;  %v714_v6 = vld [vmem:[%s4997_s5 + $0xb88] sm:$0xff] }
 0x366   : > { %v1520_v54 = vpop.f32.mrf.mxu3 }
 0x367   : > { %v2176_v14 = vadd.f32 %v2073_v43, %v321_v55  ;;  %v1521_v27 = vadd.f32 %v1520_v54, %v1336_v62  ;;  %1752 = vmatmul.f32.gmra.mxu0 %v692_v48  ;;  %v2075_v34 = vpop.f32.mrf.mxu2  ;;  %1937 = vmatmul.f32.gmra.mxu1 %v693_v15  ;;  %v1345_v55 = vadd.f32 %v5830_v35, %v1160_v45  ;;  %v719_v62 = vld [vmem:[%s4997_s5 + $0xbb0] sm:$0xff]  ;;  %v9303_v43 = vld [vmem:[#allocation83_spill] sm:$0xff]  ;;  %v325_v35 = vld [vmem:[#allocation2 + $0x120] sm:$0xff] }
 0x368   : > { %v1163_v54 = vadd.f32 %v9303_v43, %v5834_v42 }
 0x369   : > { %2233 = vst.msk [vmem:[#allocation2 + $0x100] sm:$0xff] %vm2200_vm1, %v2176_v14  ;;  %v1706_v36 = vadd.f32 %v1705_v59, %v1521_v27  ;;  %v722_v27 = vld [vmem:[%s4997_s5 + $0xbc8] sm:$0xff] }
 0x36b   : > { %v1891_v41 = vadd.f32 %v1890_v16, %v1706_v36  ;;  %1570 = vmatmul.f32.gmra.mxu3 %v698_v23  ;;  %v721_v36 = vld [vmem:[%s4997_s5 + $0xbc0] sm:$0xff] }
 0x36c   : > { %v1708_v52 = vpop.f32.mrf.mxu0  ;;  %2125 = vmatmul.f32.gmra.mxu2 %v701_v20  ;;  %v1893_v24 = vpop.f32.mrf.mxu1  ;;  %v1348_v20 = vadd.f32 %v5844_v12, %v1163_v54  ;;  %v326_v12 = vld [vmem:[#allocation2 + $0x128] sm:$0xff]  ;;  %v9309_v54 = vld [vmem:[#allocation93_spill] sm:$0xff] }
 0x36d   : > { %v2076_v46 = vadd.f32 %v2075_v34, %v1891_v41 }
 0x36e   : > { %v1523_v47 = vpop.f32.mrf.mxu3 }
 0x36f   : > { %v2177_v49 = vadd.f32 %v2076_v46, %v322_v0  ;;  %v1524_v22 = vadd.f32 %v1523_v47, %v1339_v63  ;;  %1755 = vmatmul.f32.gmra.mxu0 %v699_v1  ;;  %v2078_v5 = vpop.f32.mrf.mxu2  ;;  %1940 = vmatmul.f32.gmra.mxu1 %v700_v2  ;;  %v726_v1 = vld [vmem:[%s4997_s5 + $0xbe8] sm:$0xff]  ;;  %v9304_v2 = vld [vmem:[#allocation85_spill] sm:$0xff]  ;;  %v729_v47 = vld [vmem:[%s4997_s5 + $0xc00] sm:$0xff] }
 0x370   : > { %v1166_v63 = vadd.f32 %v9304_v2, %v5848_v50 }
 0x371   : > { %2234 = vst.msk [vmem:[#allocation2 + $0x108] sm:$0xff] %vm2200_vm1, %v2177_v49  ;;  %v1709_v28 = vadd.f32 %v1708_v52, %v1524_v22 }
 0x372   : > { %v1351_v32 = vadd.f32 %v5858_v26, %v1166_v63  ;;  %v327_v26 = vld [vmem:[#allocation2 + $0x130] sm:$0xff]  ;;  %v330_v63 = vld [vmem:[#allocation2 + $0x148] sm:$0xff] }
 0x373   : > { %v1894_v30 = vadd.f32 %v1893_v24, %v1709_v28  ;;  %1573 = vmatmul.f32.gmra.mxu3 %v705_v56  ;;  %v727_v56 = vld [vmem:[%s4997_s5 + $0xbf0] sm:$0xff] }
 0x374   : > { %v1711_v53 = vpop.f32.mrf.mxu0  ;;  %2128 = vmatmul.f32.gmra.mxu2 %v708_v60  ;;  %v1896_v10 = vpop.f32.mrf.mxu1 }
 0x375   : > { %v2079_v40 = vadd.f32 %v2078_v5, %v1894_v30 }
 0x376   : > { %v1526_v19 = vpop.f32.mrf.mxu3 }
 0x377   : > { %v2178_v21 = vadd.f32 %v2079_v40, %v323_v44  ;;  %v1527_v7 = vadd.f32 %v1526_v19, %v1342_v8  ;;  %1758 = vmatmul.f32.gmra.mxu0 %v706_v51  ;;  %v2081_v17 = vpop.f32.mrf.mxu2  ;;  %1943 = vmatmul.f32.gmra.mxu1 %v707_v37  ;;  %v736_v8 = vld [vmem:[%s4997_s5 + $0xc38] sm:$0xff] }
 0x379   : > { %2235 = vst.msk [vmem:[#allocation2 + $0x110] sm:$0xff] %vm2200_vm1, %v2178_v21  ;;  %v1712_v38 = vadd.f32 %v1711_v53, %v1527_v7  ;;  %v733_v53 = vld [vmem:[%s4997_s5 + $0xc20] sm:$0xff]  ;;  %v734_v7 = vld [vmem:[%s4997_s5 + $0xc28] sm:$0xff] }
 0x37b   : > { %v1897_v57 = vadd.f32 %v1896_v10, %v1712_v38  ;;  %1576 = vmatmul.f32.gmra.mxu3 %v712_v18  ;;  %v9305_v10 = vld [vmem:[#allocation87_spill] sm:$0xff] }
 0x37c   : > { %v1714_v31 = vpop.f32.mrf.mxu0  ;;  %2131 = vmatmul.f32.gmra.mxu2 %v715_v39  ;;  %v1899_v58 = vpop.f32.mrf.mxu1  ;;  %v1169_v51 = vadd.f32 %v9305_v10, %v5862_v61 }
 0x37d   : > { %v2082_v59 = vadd.f32 %v2081_v17, %v1897_v57  ;;  %v735_v17 = vld [vmem:[%s4997_s5 + $0xc30] sm:$0xff]  ;;  %v9306_v57 = vld [vmem:[#allocation89_spill] sm:$0xff] }
 0x37e   : > { %v1529_v16 = vpop.f32.mrf.mxu3  ;;  %v1354_v18 = vadd.f32 %v5872_v25, %v1169_v51  ;;  %v9313_v51 = vld [vmem:[#allocation68_spill] sm:$0xff] }
 0x37f   : > { %v2179_v48 = vadd.f32 %v2082_v59, %v324_v4  ;;  %v1530_v29 = vadd.f32 %v1529_v16, %v1345_v55  ;;  %1761 = vmatmul.f32.gmra.mxu0 %v713_v33  ;;  %v2084_v15 = vpop.f32.mrf.mxu2  ;;  %1946 = vmatmul.f32.gmra.mxu1 %v714_v6  ;;  %v9307_v4 = vld [vmem:[#allocation90_spill] sm:$0xff]  ;;  %v328_v6 = vld [vmem:[#allocation2 + $0x138] sm:$0xff]  ;;  %v9308_v16 = vld [vmem:[#allocation92_spill] sm:$0xff] }
 0x381   : > { %2236 = vst.msk [vmem:[#allocation2 + $0x118] sm:$0xff] %vm2200_vm1, %v2179_v48  ;;  %v1715_v14 = vadd.f32 %v1714_v31, %v1530_v29  ;;  %v1172_v31 = vadd.f32 %v9307_v4, %v9306_v57  ;;  %v333_v4 = vld [vmem:[#allocation2 + $0x160] sm:$0xff] }
 0x383   : > { %v1900_v34 = vadd.f32 %v1899_v58, %v1715_v14  ;;  %1579 = vmatmul.f32.gmra.mxu3 %v719_v62  ;;  %v1357_v48 = vadd.f32 %v9308_v16, %v1172_v31  ;;  %v9310_v14 = vld [vmem:[#allocation94_spill] sm:$0xff] }
 0x384   : > { %v1717_v23 = vpop.f32.mrf.mxu0  ;;  %2134 = vmatmul.f32.gmra.mxu2 %v722_v27  ;;  %v1902_v13 = vpop.f32.mrf.mxu1  ;;  %v1175_v27 = vadd.f32 %v9310_v14, %v9309_v54 }
 0x385   : > { %v2085_v41 = vadd.f32 %v2084_v15, %v1900_v34 }
 0x386   : > { %v1532_v0 = vpop.f32.mrf.mxu3 }
 0x387   : > { %v2180_v52 = vadd.f32 %v2085_v41, %v325_v35  ;;  %v1533_v42 = vadd.f32 %v1532_v0, %v1348_v20  ;;  %1764 = vmatmul.f32.gmra.mxu0 %v720_v3  ;;  %v2087_v24 = vpop.f32.mrf.mxu2  ;;  %1949 = vmatmul.f32.gmra.mxu1 %v721_v36  ;;  %v9311_v36 = vld [vmem:[#allocation96_spill] sm:$0xff] }
 0x388   : > { %v1360_v20 = vadd.f32 %v9311_v36, %v1175_v27  ;;  %v335_v36 = vld [vmem:[#allocation2 + $0x170] sm:$0xff] }
 0x389   : > { %2237 = vst.msk [vmem:[#allocation2 + $0x120] sm:$0xff] %vm2200_vm1, %v2180_v52  ;;  %v1718_v46 = vadd.f32 %v1717_v23, %v1533_v42  ;;  %v329_v23 = vld [vmem:[#allocation2 + $0x140] sm:$0xff] }
 0x38b   : > { %v1903_v49 = vadd.f32 %v1902_v13, %v1718_v46  ;;  %1582 = vmatmul.f32.gmra.mxu3 %v726_v1 }
 0x38c   : > { %v1720_v22 = vpop.f32.mrf.mxu0  ;;  %2137 = vmatmul.f32.gmra.mxu2 %v729_v47  ;;  %v1905_v5 = vpop.f32.mrf.mxu1 }
 0x38d   : > { %v2088_v28 = vadd.f32 %v2087_v24, %v1903_v49 }
 0x38e   : > { %v1535_v60 = vpop.f32.mrf.mxu3 }
 0x38f   : > { %v2181_v30 = vadd.f32 %v2088_v28, %v326_v12  ;;  %v1536_v50 = vadd.f32 %v1535_v60, %v1351_v32  ;;  %1767 = vmatmul.f32.gmra.mxu0 %v727_v56  ;;  %v2090_v44 = vpop.f32.mrf.mxu2  ;;  %1952 = vmatmul.f32.gmra.mxu1 %v728_v9  ;;  %v331_v60 = vld [vmem:[#allocation2 + $0x150] sm:$0xff] }
 0x391   : > { %2238 = vst.msk [vmem:[#allocation2 + $0x128] sm:$0xff] %vm2200_vm1, %v2181_v30  ;;  %v1721_v37 = vadd.f32 %v1720_v22, %v1536_v50 }
 0x393   : > { %v1906_v40 = vadd.f32 %v1905_v5, %v1721_v37  ;;  %1585 = vmatmul.f32.gmra.mxu3 %v733_v53  ;;  %v9312_v5 = vld [vmem:[#allocation66_spill] sm:$0xff] }
 0x394   : > { %v1723_v19 = vpop.f32.mrf.mxu0  ;;  %2140 = vmatmul.f32.gmra.mxu2 %v736_v8  ;;  %v1908_v21 = vpop.f32.mrf.mxu1 }
 0x395   : > { %v2091_v11 = vadd.f32 %v2090_v44, %v1906_v40 }
 0x396   : > { %v1538_v45 = vpop.f32.mrf.mxu3 }
 0x397   : > { %v2182_v38 = vadd.f32 %v2091_v11, %v327_v26  ;;  %v1539_v39 = vadd.f32 %v1538_v45, %v1354_v18  ;;  %1770 = vmatmul.f32.gmra.mxu0 %v734_v7  ;;  %v2093_v61 = vpop.f32.mrf.mxu2  ;;  %1955 = vmatmul.f32.gmra.mxu1 %v735_v17  ;;  %v9314_v45 = vld [vmem:[#allocation70_spill] sm:$0xff] }
 0x399   : > { %2239 = vst.msk [vmem:[#allocation2 + $0x130] sm:$0xff] %vm2200_vm1, %v2182_v38  ;;  %v1724_v58 = vadd.f32 %v1723_v19, %v1539_v39  ;;  %v332_v19 = vld [vmem:[#allocation2 + $0x158] sm:$0xff] }
 0x39b   : > { %v1909_v33 = vadd.f32 %v1908_v21, %v1724_v58 }
 0x39c   : > { %v1726_v55 = vpop.f32.mrf.mxu0  ;;  %v1911_v59 = vpop.f32.mrf.mxu1 }
 0x39d   : > { %v2094_v25 = vadd.f32 %v2093_v61, %v1909_v33 }
 0x39e   : > { %v1541_v29 = vpop.f32.mrf.mxu3 }
 0x39f   : > { %v2183_v15 = vadd.f32 %v2094_v25, %v328_v6  ;;  %v1542_v62 = vadd.f32 %v1541_v29, %v1357_v48  ;;  %v2096_v43 = vpop.f32.mrf.mxu2 }
 0x3a1   : > { %2240 = vst.msk [vmem:[#allocation2 + $0x138] sm:$0xff] %vm2200_vm1, %v2183_v15  ;;  %v1727_v34 = vadd.f32 %v1726_v55, %v1542_v62  ;;  %v334_v15 = vld [vmem:[#allocation2 + $0x168] sm:$0xff] }
 0x3a3   : > { %v1912_v35 = vadd.f32 %v1911_v59, %v1727_v34  ;;  %v9315_v59 = vld [vmem:[#allocation72_spill] sm:$0xff]  ;;  %v9316_v34 = vld [vmem:[#allocation74_spill] sm:$0xff] }
 0x3a4   : > { %v1729_v13 = vpop.f32.mrf.mxu0  ;;  %v1914_v3 = vpop.f32.mrf.mxu1 }
 0x3a5   : > { %v2097_v41 = vadd.f32 %v2096_v43, %v1912_v35 }
 0x3a6   : > { %v1544_v0 = vpop.f32.mrf.mxu3 }
 0x3a7   : > { %v2184_v52 = vadd.f32 %v2097_v41, %v329_v23  ;;  %v1545_v42 = vadd.f32 %v1544_v0, %v1360_v20  ;;  %v2099_v24 = vpop.f32.mrf.mxu2 }
 0x3a9   : > { %2241 = vst.msk [vmem:[#allocation2 + $0x140] sm:$0xff] %vm2200_vm1, %v2184_v52  ;;  %v1730_v1 = vadd.f32 %v1729_v13, %v1545_v42 }
 0x3ab   : > { %v1915_v2 = vadd.f32 %v1914_v3, %v1730_v1 }
 0x3ac   : > { %v1732_v46 = vpop.f32.mrf.mxu0  ;;  %v1917_v47 = vpop.f32.mrf.mxu1 }
 0x3ad   : > { %v2100_v49 = vadd.f32 %v2099_v24, %v1915_v2  ;;  %v9317_v24 = vld [vmem:[#allocation76_spill] sm:$0xff] }
 0x3ae   : > { %v1547_v12 = vpop.f32.mrf.mxu3 }
 0x3af   : > { %v2185_v22 = vadd.f32 %v2100_v49, %v330_v63  ;;  %v1548_v56 = vadd.f32 %v1547_v12, %v9312_v5  ;;  %v2102_v9 = vpop.f32.mrf.mxu2 }
 0x3b1   : > { %2242 = vst.msk [vmem:[#allocation2 + $0x148] sm:$0xff] %vm2200_vm1, %v2185_v22  ;;  %v1733_v32 = vadd.f32 %v1732_v46, %v1548_v56 }
 0x3b3   : > { %v1918_v28 = vadd.f32 %v1917_v47, %v1733_v32  ;;  %v336_v47 = vld [vmem:[#allocation2 + $0x178] sm:$0xff] }
 0x3b4   : > { %v1735_v30 = vpop.f32.mrf.mxu0  ;;  %v1920_v50 = vpop.f32.mrf.mxu1 }
 0x3b5   : > { %v2103_v44 = vadd.f32 %v2102_v9, %v1918_v28  ;;  %v9318_v9 = vld [vmem:[#allocation78_spill] sm:$0xff] }
 0x3b6   : > { %v1550_v53 = vpop.f32.mrf.mxu3 }
 0x3b7   : > { %v2186_v10 = vadd.f32 %v2103_v44, %v331_v60  ;;  %v1551_v37 = vadd.f32 %v1550_v53, %v9313_v51  ;;  %v2105_v8 = vpop.f32.mrf.mxu2 }
 0x3b9   : > { %2243 = vst.msk [vmem:[#allocation2 + $0x150] sm:$0xff] %vm2200_vm1, %v2186_v10  ;;  %v1736_v40 = vadd.f32 %v1735_v30, %v1551_v37 }
 0x3bb   : > { %v1921_v26 = vadd.f32 %v1920_v50, %v1736_v40  ;;  %v337_v50 = vld [vmem:[#allocation2 + $0x180] sm:$0xff] }
 0x3bc   : > { %v1738_v21 = vpop.f32.mrf.mxu0  ;;  %v1923_v7 = vpop.f32.mrf.mxu1 }
 0x3bd   : > { %v2106_v17 = vadd.f32 %v2105_v8, %v1921_v26  ;;  %v9319_v8 = vld [vmem:[#allocation80_spill] sm:$0xff] }
 0x3be   : > { %v1553_v18 = vpop.f32.mrf.mxu3 }
 0x3bf   : > { %v2187_v11 = vadd.f32 %v2106_v17, %v332_v19  ;;  %v1554_v38 = vadd.f32 %v1553_v18, %v9314_v45  ;;  %v2108_v39 = vpop.f32.mrf.mxu2 }
 0x3c1   : > { %2244 = vst.msk [vmem:[#allocation2 + $0x158] sm:$0xff] %vm2200_vm1, %v2187_v11  ;;  %v1739_v61 = vadd.f32 %v1738_v21, %v1554_v38 }
 0x3c3   : > { %v1924_v57 = vadd.f32 %v1923_v7, %v1739_v61  ;;  %v338_v7 = vld [vmem:[#allocation2 + $0x188] sm:$0xff] }
 0x3c4   : > { %v1741_v31 = vpop.f32.mrf.mxu0  ;;  %v1926_v58 = vpop.f32.mrf.mxu1 }
 0x3c5   : > { %v2109_v33 = vadd.f32 %v2108_v39, %v1924_v57  ;;  %v9320_v39 = vld [vmem:[#allocation82_spill] sm:$0xff] }
 0x3c6   : > { %v1556_v6 = vpop.f32.mrf.mxu3 }
 0x3c7   : > { %v2188_v55 = vadd.f32 %v2109_v33, %v333_v4  ;;  %v1557_v16 = vadd.f32 %v1556_v6, %v9315_v59  ;;  %v2111_v48 = vpop.f32.mrf.mxu2 }
 0x3c9   : > { %2245 = vst.msk [vmem:[#allocation2 + $0x160] sm:$0xff] %vm2200_vm1, %v2188_v55  ;;  %v1742_v25 = vadd.f32 %v1741_v31, %v1557_v16 }
 0x3cb   : > { %v1927_v29 = vadd.f32 %v1926_v58, %v1742_v25  ;;  %v339_v58 = vld [vmem:[#allocation2 + $0x190] sm:$0xff] }
 0x3cc   : > { %v1744_v62 = vpop.f32.mrf.mxu0  ;;  %v1929_v43 = vpop.f32.mrf.mxu1 }
 0x3cd   : > { %v2112_v54 = vadd.f32 %v2111_v48, %v1927_v29  ;;  %v9321_v48 = vld [vmem:[#allocation84_spill] sm:$0xff] }
 0x3ce   : > { %v1559_v14 = vpop.f32.mrf.mxu3 }
 0x3cf   : > { %v2189_v27 = vadd.f32 %v2112_v54, %v334_v15  ;;  %v1560_v35 = vadd.f32 %v1559_v14, %v9316_v34  ;;  %v2114_v23 = vpop.f32.mrf.mxu2 }
 0x3d1   : > { %2246 = vst.msk [vmem:[#allocation2 + $0x168] sm:$0xff] %vm2200_vm1, %v2189_v27  ;;  %v1745_v13 = vadd.f32 %v1744_v62, %v1560_v35 }
 0x3d3   : > { %v1930_v3 = vadd.f32 %v1929_v43, %v1745_v13  ;;  %v340_v43 = vld [vmem:[#allocation2 + $0x198] sm:$0xff] }
 0x3d4   : > { %v1747_v20 = vpop.f32.mrf.mxu0  ;;  %v1932_v41 = vpop.f32.mrf.mxu1 }
 0x3d5   : > { %v2115_v0 = vadd.f32 %v2114_v23, %v1930_v3  ;;  %v9322_v23 = vld [vmem:[#allocation86_spill] sm:$0xff] }
 0x3d6   : > { %v1562_v52 = vpop.f32.mrf.mxu3 }
 0x3d7   : > { %v2190_v42 = vadd.f32 %v2115_v0, %v335_v36  ;;  %v1563_v1 = vadd.f32 %v1562_v52, %v9317_v24  ;;  %v2117_v2 = vpop.f32.mrf.mxu2 }
 0x3d9   : > { %2247 = vst.msk [vmem:[#allocation2 + $0x170] sm:$0xff] %vm2200_vm1, %v2190_v42  ;;  %v1748_v63 = vadd.f32 %v1747_v20, %v1563_v1 }
 0x3db   : > { %v1933_v46 = vadd.f32 %v1932_v41, %v1748_v63  ;;  %v341_v41 = vld [vmem:[#allocation2 + $0x1a0] sm:$0xff] }
 0x3dc   : > { %v1750_v49 = vpop.f32.mrf.mxu0  ;;  %v1935_v12 = vpop.f32.mrf.mxu1 }
 0x3dd   : > { %v2118_v22 = vadd.f32 %v2117_v2, %v1933_v46  ;;  %v9323_v2 = vld [vmem:[#allocation88_spill] sm:$0xff] }
 0x3de   : > { %v1565_v5 = vpop.f32.mrf.mxu3 }
 0x3df   : > { %v2191_v56 = vadd.f32 %v2118_v22, %v336_v47  ;;  %v1566_v32 = vadd.f32 %v1565_v5, %v9318_v9  ;;  %v2120_v28 = vpop.f32.mrf.mxu2 }
 0x3e1   : > { %2248 = vst.msk [vmem:[#allocation2 + $0x178] sm:$0xff] %vm2200_vm1, %v2191_v56  ;;  %v1751_v60 = vadd.f32 %v1750_v49, %v1566_v32 }
 0x3e3   : > { %v1936_v30 = vadd.f32 %v1935_v12, %v1751_v60  ;;  %v342_v12 = vld [vmem:[#allocation2 + $0x1a8] sm:$0xff] }
 0x3e4   : > { %v1753_v44 = vpop.f32.mrf.mxu0  ;;  %v1938_v53 = vpop.f32.mrf.mxu1 }
 0x3e5   : > { %v2121_v10 = vadd.f32 %v2120_v28, %v1936_v30  ;;  %v9324_v28 = vld [vmem:[#allocation91_spill] sm:$0xff] }
 0x3e6   : > { %v1568_v51 = vpop.f32.mrf.mxu3 }
 0x3e7   : > { %v2192_v37 = vadd.f32 %v2121_v10, %v337_v50  ;;  %v1569_v40 = vadd.f32 %v1568_v51, %v9319_v8  ;;  %v2123_v26 = vpop.f32.mrf.mxu2 }
 0x3e9   : > { %2249 = vst.msk [vmem:[#allocation2 + $0x180] sm:$0xff] %vm2200_vm1, %v2192_v37  ;;  %v1754_v19 = vadd.f32 %v1753_v44, %v1569_v40  ;;  %v9325_v40 = vld [vmem:[#allocation95_spill] sm:$0xff] }
 0x3eb   : > { %v1939_v21 = vadd.f32 %v1938_v53, %v1754_v19  ;;  %v343_v53 = vld [vmem:[#allocation2 + $0x1b0] sm:$0xff] }
 0x3ec   : > { %v1756_v17 = vpop.f32.mrf.mxu0  ;;  %v1941_v18 = vpop.f32.mrf.mxu1 }
 0x3ed   : > { %v2124_v11 = vadd.f32 %v2123_v26, %v1939_v21 }
 0x3ee   : > { %v1571_v45 = vpop.f32.mrf.mxu3 }
 0x3ef   : > { %v2193_v38 = vadd.f32 %v2124_v11, %v338_v7  ;;  %v1572_v61 = vadd.f32 %v1571_v45, %v9320_v39  ;;  %v2126_v57 = vpop.f32.mrf.mxu2 }
 0x3f1   : > { %2250 = vst.msk [vmem:[#allocation2 + $0x188] sm:$0xff] %vm2200_vm1, %v2193_v38  ;;  %v1757_v4 = vadd.f32 %v1756_v17, %v1572_v61 }
 0x3f3   : > { %v1942_v31 = vadd.f32 %v1941_v18, %v1757_v4  ;;  %v344_v18 = vld [vmem:[#allocation2 + $0x1b8] sm:$0xff] }
 0x3f4   : > { %v1759_v33 = vpop.f32.mrf.mxu0  ;;  %v1944_v6 = vpop.f32.mrf.mxu1 }
 0x3f5   : > { %v2127_v55 = vadd.f32 %v2126_v57, %v1942_v31 }
 0x3f6   : > { %v1574_v59 = vpop.f32.mrf.mxu3 }
 0x3f7   : > { %v2194_v16 = vadd.f32 %v2127_v55, %v339_v58  ;;  %v1575_v25 = vadd.f32 %v1574_v59, %v9321_v48  ;;  %v2129_v29 = vpop.f32.mrf.mxu2 }
 0x3f9   : > { %2251 = vst.msk [vmem:[#allocation2 + $0x190] sm:$0xff] %vm2200_vm1, %v2194_v16  ;;  %v1760_v15 = vadd.f32 %v1759_v33, %v1575_v25 }
 0x3fb   : > { %v1945_v62 = vadd.f32 %v1944_v6, %v1760_v15 }
 0x3fc   : > { %v1762_v54 = vpop.f32.mrf.mxu0  ;;  %v1947_v14 = vpop.f32.mrf.mxu1 }
 0x3fd   : > { %v2130_v27 = vadd.f32 %v2129_v29, %v1945_v62 }
 0x3fe   : > { %v1577_v34 = vpop.f32.mrf.mxu3 }
 0x3ff   : > { %v2195_v35 = vadd.f32 %v2130_v27, %v340_v43  ;;  %v1578_v13 = vadd.f32 %v1577_v34, %v9322_v23  ;;  %v2132_v3 = vpop.f32.mrf.mxu2 }
 0x401   : > { %2252 = vst.msk [vmem:[#allocation2 + $0x198] sm:$0xff] %vm2200_vm1, %v2195_v35  ;;  %v1763_v36 = vadd.f32 %v1762_v54, %v1578_v13 }
 0x403   : > { %v1948_v20 = vadd.f32 %v1947_v14, %v1763_v36 }
 0x404   : > { %v1765_v0 = vpop.f32.mrf.mxu0  ;;  %v1950_v52 = vpop.f32.mrf.mxu1 }
 0x405   : > { %v2133_v42 = vadd.f32 %v2132_v3, %v1948_v20 }
 0x406   : > { %v1580_v24 = vpop.f32.mrf.mxu3 }
 0x407   : > { %v2196_v1 = vadd.f32 %v2133_v42, %v341_v41  ;;  %v1581_v63 = vadd.f32 %v1580_v24, %v9323_v2  ;;  %v2135_v46 = vpop.f32.mrf.mxu2 }
 0x409   : > { %2253 = vst.msk [vmem:[#allocation2 + $0x1a0] sm:$0xff] %vm2200_vm1, %v2196_v1  ;;  %v1766_v47 = vadd.f32 %v1765_v0, %v1581_v63 }
 0x40b   : > { %v1951_v49 = vadd.f32 %v1950_v52, %v1766_v47 }
 0x40c   : > { %v1768_v22 = vpop.f32.mrf.mxu0  ;;  %v1953_v9 = vpop.f32.mrf.mxu1 }
 0x40d   : > { %v2136_v5 = vadd.f32 %v2135_v46, %v1951_v49 }
 0x40e   : > { %v1583_v56 = vpop.f32.mrf.mxu3 }
 0x40f   : > { %v2197_v32 = vadd.f32 %v2136_v5, %v342_v12  ;;  %v1584_v60 = vadd.f32 %v1583_v56, %v9324_v28  ;;  %v2138_v30 = vpop.f32.mrf.mxu2 }
 0x411   : > { %2254 = vst.msk [vmem:[#allocation2 + $0x1a8] sm:$0xff] %vm2200_vm1, %v2197_v32  ;;  %v1769_v50 = vadd.f32 %v1768_v22, %v1584_v60 }
 0x413   : > { %v1954_v44 = vadd.f32 %v1953_v9, %v1769_v50 }
 0x414   : > { %v1771_v37 = vpop.f32.mrf.mxu0  ;;  %v1956_v19 = vpop.f32.mrf.mxu1 }
 0x415   : > { %v2139_v10 = vadd.f32 %v2138_v30, %v1954_v44 }
 0x416   : > { %v1586_v51 = vpop.f32.mrf.mxu3 }
 0x417   : > { %v2198_v8 = vadd.f32 %v2139_v10, %v343_v53  ;;  %v1587_v26 = vadd.f32 %v1586_v51, %v9325_v40  ;;  %v2141_v7 = vpop.f32.mrf.mxu2 }
 0x419   : > { %2255 = vst.msk [vmem:[#allocation2 + $0x1b0] sm:$0xff] %vm2200_vm1, %v2198_v8  ;;  %v1772_v21 = vadd.f32 %v1771_v37, %v1587_v26 }
 0x41b   : > { %v1957_v17 = vadd.f32 %v1956_v19, %v1772_v21 }
 0x41d   : > { %v2142_v11 = vadd.f32 %v2141_v7, %v1957_v17  ;;  %2260 = sbr.rel (%p4566_p7) target bundleno = 1800 (0x708), region = 48 }
 0x41f   : > { %v2199_v45 = vadd.f32 %v2142_v11, %v344_v18 }
 0x421   : > { %2256 = vst.msk [vmem:[#allocation2 + $0x1b8] sm:$0xff] %vm2200_vm1, %v2199_v45 }
 0x422   : > { %v6259_v38 = vld [vmem:[#allocation2 + $0x20] sm:$0xff]  ;;  %v6261_v39 = vld [vmem:[#allocation2 + $0x10] sm:$0xff]  ;;  %v6271_v58 = vld [vmem:[#allocation2 + $0x28] sm:$0xff] }
 0x423   : > { %v6263_v61 = vld [vmem:[#allocation2] sm:$0xff]  ;;  %v2329_v57 = vsel %vm2200_vm1, %v6259_v38, 0.0  ;;  %v2323_v4 = vsel %vm2200_vm1, %v6261_v39, 0.0  ;;  %v6273_v33 = vld [vmem:[#allocation2 + $0x18] sm:$0xff]  ;;  %v6275_v6 = vld [vmem:[#allocation2 + $0x8] sm:$0xff]  ;;  %v2332_v55 = vsel %vm2200_vm1, %v6271_v58, 0.0 }
 0x424   : > { %v2317_v31 = vsel %vm2200_vm1, %v6263_v61, 0.0  ;;  %2330 = vadd.xlane.f32.xlu2 %v2329_v57  ;;  %2324 = vadd.xlane.f32.xlu1 %v2323_v4  ;;  %v2326_v59 = vsel %vm2200_vm1, %v6273_v33, 0.0  ;;  %v2320_v16 = vsel %vm2200_vm1, %v6275_v6, 0.0  ;;  %v6283_v48 = vld [vmem:[#allocation2 + $0x40] sm:$0xff]  ;;  %v6285_v25 = vld [vmem:[#allocation2 + $0x38] sm:$0xff]  ;;  %v6287_v29 = vld [vmem:[#allocation2 + $0x30] sm:$0xff] }
 0x425   : > { %2318 = vadd.xlane.f32.xlu0 %v2317_v31  ;;  %v2341_v15 = vsel %vm2200_vm1, %v6283_v48, 0.0  ;;  %v2338_v62 = vsel %vm2200_vm1, %v6285_v25, 0.0  ;;  %v2335_v43 = vsel %vm2200_vm1, %v6287_v29, 0.0  ;;  %v6295_v54 = vld [vmem:[#allocation2 + $0x58] sm:$0xff]  ;;  %v6297_v14 = vld [vmem:[#allocation2 + $0x50] sm:$0xff]  ;;  %v6299_v27 = vld [vmem:[#allocation2 + $0x48] sm:$0xff] }
 0x426   : > { %v2350_v34 = vsel %vm2200_vm1, %v6295_v54, 0.0  ;;  %v2347_v35 = vsel %vm2200_vm1, %v6297_v14, 0.0  ;;  %v2344_v23 = vsel %vm2200_vm1, %v6299_v27, 0.0  ;;  %v6307_v13 = vld [vmem:[#allocation2 + $0x70] sm:$0xff]  ;;  %v6309_v3 = vld [vmem:[#allocation2 + $0x68] sm:$0xff]  ;;  %v6311_v36 = vld [vmem:[#allocation2 + $0x60] sm:$0xff] }
 0x427   : > { %v2359_v20 = vsel %vm2200_vm1, %v6307_v13, 0.0  ;;  %v2356_v41 = vsel %vm2200_vm1, %v6309_v3, 0.0  ;;  %v2353_v0 = vsel %vm2200_vm1, %v6311_v36, 0.0  ;;  %v6319_v52 = vld [vmem:[#allocation2 + $0x88] sm:$0xff]  ;;  %v6321_v42 = vld [vmem:[#allocation2 + $0x80] sm:$0xff]  ;;  %v6323_v24 = vld [vmem:[#allocation2 + $0x78] sm:$0xff] }
 0x428   : > { %v2368_v1 = vsel %vm2200_vm1, %v6319_v52, 0.0  ;;  %v2365_v2 = vsel %vm2200_vm1, %v6321_v42, 0.0  ;;  %v2362_v63 = vsel %vm2200_vm1, %v6323_v24, 0.0  ;;  %v6331_v46 = vld [vmem:[#allocation2 + $0xa0] sm:$0xff]  ;;  %v6333_v47 = vld [vmem:[#allocation2 + $0x98] sm:$0xff]  ;;  %v6335_v49 = vld [vmem:[#allocation2 + $0x90] sm:$0xff] }
 0x429   : > { %v2377_v12 = vsel %vm2200_vm1, %v6331_v46, 0.0  ;;  %v2374_v22 = vsel %vm2200_vm1, %v6333_v47, 0.0  ;;  %v2371_v5 = vsel %vm2200_vm1, %v6335_v49, 0.0  ;;  %v6343_v56 = vld [vmem:[#allocation2 + $0xb8] sm:$0xff]  ;;  %v6345_v9 = vld [vmem:[#allocation2 + $0xb0] sm:$0xff]  ;;  %v6347_v32 = vld [vmem:[#allocation2 + $0xa8] sm:$0xff] }
 0x42a   : > { %v2386_v28 = vsel %vm2200_vm1, %v6343_v56, 0.0  ;;  %v2383_v60 = vsel %vm2200_vm1, %v6345_v9, 0.0  ;;  %v2380_v30 = vsel %vm2200_vm1, %v6347_v32, 0.0  ;;  %v6355_v50 = vld [vmem:[#allocation2 + $0xd0] sm:$0xff]  ;;  %v6357_v44 = vld [vmem:[#allocation2 + $0xc8] sm:$0xff]  ;;  %v6359_v53 = vld [vmem:[#allocation2 + $0xc0] sm:$0xff] }
 0x42b   : > { %v2395_v10 = vsel %vm2200_vm1, %v6355_v50, 0.0  ;;  %v2392_v51 = vsel %vm2200_vm1, %v6357_v44, 0.0  ;;  %v2389_v37 = vsel %vm2200_vm1, %v6359_v53, 0.0  ;;  %v6367_v8 = vld [vmem:[#allocation2 + $0xe8] sm:$0xff]  ;;  %v6369_v40 = vld [vmem:[#allocation2 + $0xe0] sm:$0xff]  ;;  %v6371_v26 = vld [vmem:[#allocation2 + $0xd8] sm:$0xff] }
 0x42c   : > { %2333 = vadd.xlane.f32.xlu2 %v2332_v55  ;;  %2327 = vadd.xlane.f32.xlu1 %v2326_v59  ;;  %v2404_v19 = vsel %vm2200_vm1, %v6367_v8, 0.0  ;;  %v2401_v21 = vsel %vm2200_vm1, %v6369_v40, 0.0  ;;  %v2398_v7 = vsel %vm2200_vm1, %v6371_v26, 0.0  ;;  %v6379_v17 = vld [vmem:[#allocation2 + $0x100] sm:$0xff]  ;;  %v6381_v18 = vld [vmem:[#allocation2 + $0xf8] sm:$0xff]  ;;  %v6383_v11 = vld [vmem:[#allocation2 + $0xf0] sm:$0xff] }
 0x42d   : > { %2321 = vadd.xlane.f32.xlu0 %v2320_v16  ;;  %v2413_v45 = vsel %vm2200_vm1, %v6379_v17, 0.0  ;;  %v2410_v57 = vsel %vm2200_vm1, %v6381_v18, 0.0  ;;  %v2407_v4 = vsel %vm2200_vm1, %v6383_v11, 0.0  ;;  %v6391_v31 = vld [vmem:[#allocation2 + $0x118] sm:$0xff]  ;;  %v6393_v55 = vld [vmem:[#allocation2 + $0x110] sm:$0xff]  ;;  %v6395_v59 = vld [vmem:[#allocation2 + $0x108] sm:$0xff] }
 0x42e   : > { %v2422_v16 = vsel %vm2200_vm1, %v6391_v31, 0.0 }
 0x434   : > { %2342 = vadd.xlane.f32.xlu2 %v2341_v15  ;;  %2339 = vadd.xlane.f32.xlu1 %v2338_v62  ;;  %v2419_v15 = vsel %vm2200_vm1, %v6393_v55, 0.0  ;;  %v2416_v62 = vsel %vm2200_vm1, %v6395_v59, 0.0 }
 0x435   : > { %2336 = vadd.xlane.f32.xlu0 %v2335_v43  ;;  %v6403_v43 = vld [vmem:[#allocation2 + $0x130] sm:$0xff] }
 0x43c   : > { %2351 = vadd.xlane.f32.xlu2 %v2350_v34  ;;  %2348 = vadd.xlane.f32.xlu1 %v2347_v35  ;;  %v6405_v34 = vld [vmem:[#allocation2 + $0x128] sm:$0xff]  ;;  %v6407_v35 = vld [vmem:[#allocation2 + $0x120] sm:$0xff] }
 0x43d   : > { %2345 = vadd.xlane.f32.xlu0 %v2344_v23  ;;  %v2431_v23 = vsel %vm2200_vm1, %v6403_v43, 0.0 }
 0x444   : > { %2360 = vadd.xlane.f32.xlu2 %v2359_v20  ;;  %2357 = vadd.xlane.f32.xlu1 %v2356_v41  ;;  %v2428_v20 = vsel %vm2200_vm1, %v6405_v34, 0.0  ;;  %v2425_v41 = vsel %vm2200_vm1, %v6407_v35, 0.0 }
 0x445   : > { %2354 = vadd.xlane.f32.xlu0 %v2353_v0  ;;  %v6415_v0 = vld [vmem:[#allocation2 + $0x148] sm:$0xff] }
 0x44c   : > { %2369 = vadd.xlane.f32.xlu2 %v2368_v1  ;;  %2366 = vadd.xlane.f32.xlu1 %v2365_v2  ;;  %v6417_v1 = vld [vmem:[#allocation2 + $0x140] sm:$0xff]  ;;  %v6419_v2 = vld [vmem:[#allocation2 + $0x138] sm:$0xff] }
 0x44d   : > { %2363 = vadd.xlane.f32.xlu0 %v2362_v63  ;;  %9326 = vst [vmem:[#allocation97_spill] sm:$0xff] %v6417_v1  ;;  %v2440_v63 = vsel %vm2200_vm1, %v6415_v0, 0.0 }
 0x454   : > { %2378 = vadd.xlane.f32.xlu2 %v2377_v12  ;;  %2375 = vadd.xlane.f32.xlu1 %v2374_v22  ;;  %v2437_v12 = vsel %vm2200_vm1, %v6417_v1, 0.0  ;;  %v2434_v22 = vsel %vm2200_vm1, %v6419_v2, 0.0 }
 0x455   : > { %2372 = vadd.xlane.f32.xlu0 %v2371_v5  ;;  %v4908_v5 = vmov 49.0  }
 0x456   : > { %4668 = vrcp.f32 %v4908_v5 }
 0x45c   : > { %2387 = vadd.xlane.f32.xlu2 %v2386_v28  ;;  %2384 = vadd.xlane.f32.xlu1 %v2383_v60  ;;  %v6427_v28 = vld [vmem:[#allocation2 + $0x160] sm:$0xff]  ;;  %v6429_v60 = vld [vmem:[#allocation2 + $0x158] sm:$0xff] }
 0x45d   : > { %2381 = vadd.xlane.f32.xlu0 %v2380_v30  ;;  %9327 = vst [vmem:[#allocation98_spill] sm:$0xff] %v6427_v28  ;;  %v6431_v30 = vld [vmem:[#allocation2 + $0x150] sm:$0xff] }
 0x45e   : > { %9328 = vst [vmem:[#allocation99_spill] sm:$0xff] %v6429_v60 }
 0x45f   : > { %9329 = vst [vmem:[#allocation100_spill] sm:$0xff] %v6431_v30 }
 0x464   : > { %2396 = vadd.xlane.f32.xlu2 %v2395_v10  ;;  %2393 = vadd.xlane.f32.xlu1 %v2392_v51  ;;  %v2449_v10 = vsel %vm2200_vm1, %v6427_v28, 0.0  ;;  %v2446_v51 = vsel %vm2200_vm1, %v6429_v60, 0.0 }
 0x465   : > { %2390 = vadd.xlane.f32.xlu0 %v2389_v37  ;;  %v2443_v37 = vsel %vm2200_vm1, %v6431_v30, 0.0 }
 0x46c   : > { %2405 = vadd.xlane.f32.xlu2 %v2404_v19  ;;  %2402 = vadd.xlane.f32.xlu1 %v2401_v21  ;;  %v4669_v19 = vpop.eup %4668 }
 0x46d   : > { %2399 = vadd.xlane.f32.xlu0 %v2398_v7  ;;  %v2486_v21 = vmul.f32 49.0, %v4669_v19  ;;  %v6439_v7 = vld [vmem:[#allocation2 + $0x178] sm:$0xff]  ;;  %vm2490_vm2 = vweird.f32 %v4669_v19 }
 0x46e   : > { %9330 = vst [vmem:[#allocation101_spill] sm:$0xff] %v6439_v7 }
 0x474   : > { %2414 = vadd.xlane.f32.xlu2 %v2413_v45  ;;  %2411 = vadd.xlane.f32.xlu1 %v2410_v57  ;;  %v6441_v45 = vld [vmem:[#allocation2 + $0x170] sm:$0xff] }
 0x475   : > { %2408 = vadd.xlane.f32.xlu0 %v2407_v4  ;;  %9331 = vst [vmem:[#allocation102_spill] sm:$0xff] %v6441_v45 }
 0x47c   : > { %2423 = vadd.xlane.f32.xlu2 %v2422_v16  ;;  %2420 = vadd.xlane.f32.xlu1 %v2419_v15  ;;  %v6445_v16 = vld [vmem:[#allocation2 + $0x168] sm:$0xff] }
 0x47d   : > { %2417 = vadd.xlane.f32.xlu0 %v2416_v62  ;;  %9332 = vst [vmem:[#allocation103_spill] sm:$0xff] %v6445_v16  ;;  %v2458_v62 = vsel %vm2200_vm1, %v6439_v7, 0.0 }
 0x484   : > { %2432 = vadd.xlane.f32.xlu2 %v2431_v23  ;;  %2429 = vadd.xlane.f32.xlu1 %v2428_v20  ;;  %v2455_v23 = vsel %vm2200_vm1, %v6441_v45, 0.0  ;;  %v2487_v20 = vsub.f32 1.0, %v2486_v21 }
 0x485   : > { %2426 = vadd.xlane.f32.xlu0 %v2425_v41  ;;  %v2452_v41 = vsel %vm2200_vm1, %v6445_v16, 0.0 }
 0x48c   : > { %2441 = vadd.xlane.f32.xlu2 %v2440_v63  ;;  %2438 = vadd.xlane.f32.xlu1 %v2437_v12  ;;  %v2488_v63 = vmul.f32 %v4669_v19, %v2487_v20  ;;  %v6453_v12 = vld [vmem:[#allocation2 + $0x190] sm:$0xff]  ;;  %v6467_v20 = vld [vmem:[#allocation2 + $0x1a8] sm:$0xff] }
 0x48d   : > { %2435 = vadd.xlane.f32.xlu0 %v2434_v22  ;;  %9333 = vst [vmem:[#allocation104_spill] sm:$0xff] %v6453_v12  ;;  %v6455_v22 = vld [vmem:[#allocation2 + $0x188] sm:$0xff]  ;;  %v2467_v45 = vsel %vm2200_vm1, %v6453_v12, 0.0 }
 0x48e   : > { %9334 = vst [vmem:[#allocation105_spill] sm:$0xff] %v6455_v22  ;;  %v2464_v21 = vsel %vm2200_vm1, %v6455_v22, 0.0  ;;  %v2489_v7 = vadd.f32 %v4669_v19, %v2488_v63  ;;  %v6474_v22 = vld [vmem:[#allocation2 + $0x198] sm:$0xff] }
 0x48f   : > { %9336 = vst [vmem:[#allocation107_spill] sm:$0xff] %v6467_v20 }
 0x490   : > { %9339 = vst [vmem:[#allocation110_spill] sm:$0xff] %v6474_v22 }
 0x494   : > { %2450 = vadd.xlane.f32.xlu2 %v2449_v10  ;;  %2447 = vadd.xlane.f32.xlu1 %v2446_v51  ;;  %v6457_v51 = vld [vmem:[#allocation2 + $0x180] sm:$0xff] }
 0x495   : > { %2444 = vadd.xlane.f32.xlu0 %v2443_v37  ;;  %9335 = vst [vmem:[#allocation106_spill] sm:$0xff] %v6457_v51 }
 0x497   : > { %v6443_v57 = vpop.xlane.xlu2 %2330  ;;  %v2325_v4 = vpop.xlane.xlu1 %2324 }
 0x498   : > { %v2319_v15 = vpop.xlane.xlu0 %2318 }
 0x49c   : > { %2459 = vadd.xlane.f32.xlu2 %v2458_v62  ;;  %2456 = vadd.xlane.f32.xlu1 %v2455_v23  ;;  %v2461_v62 = vsel %vm2200_vm1, %v6457_v51, 0.0  ;;  %v6465_v23 = vsel %vm2490_vm2, %v4669_v19, %v2489_v7  ;;  %v2476_v51 = vsel %vm2200_vm1, %v6467_v20, 0.0  ;;  %v2470_v19 = vsel %vm2200_vm1, %v6474_v22, 0.0 }
 0x49d   : > { %2453 = vadd.xlane.f32.xlu0 %v2452_v41  ;;  %v6469_v41 = vld [vmem:[#allocation2 + $0x1a0] sm:$0xff]  ;;  %v6472_v60 = vmul.f32 %v6465_v23, %v2319_v15  ;;  %v6484_v15 = vld [vmem:[#allocation2 + $0x1b8] sm:$0xff] }
 0x49e   : > { %9337 = vst [vmem:[#allocation108_spill] sm:$0xff] %v6469_v41 }
 0x49f   : > { %v2334_v5 = vpop.xlane.xlu2 %2333  ;;  %v2328_v10 = vpop.xlane.xlu1 %2327  ;;  %9338 = vst [vmem:[#allocation109_spill] sm:$0xff] %v6472_v60  ;;  %v2548_v7 = vsub.f32 %v6263_v61, %v6472_v60 }
 0x4a0   : > { %v2322_v37 = vpop.xlane.xlu0 %2321  ;;  %9340 = vst [vmem:[#allocation111_spill] sm:$0xff] %v6484_v15 }
 0x4a1   : > { %v2604_v1 = vmul.f32 %v2548_v7, %v2548_v7  ;;  %v6495_v22 = vmul.f32 %v6465_v23, %v2322_v37  ;;  %v6509_v7 = vmul.f32 %v6465_v23, %v2334_v5 }
 0x4a3   : > { %v2549_v37 = vsub.f32 %v6275_v6, %v6495_v22  ;;  %9342 = vst [vmem:[#allocation113_spill] sm:$0xff] %v6509_v7  ;;  %v2553_v5 = vsub.f32 %v6271_v58, %v6509_v7 }
 0x4a4   : > { %2468 = vadd.xlane.f32.xlu2 %v2467_v45  ;;  %2465 = vadd.xlane.f32.xlu1 %v2464_v21  ;;  %v2473_v45 = vsel %vm2200_vm1, %v6469_v41, 0.0  ;;  %v6487_v21 = vmul.f32 %v6465_v23, %v2325_v4  ;;  %v6492_v41 = vld [vmem:[#allocation2 + $0x1b0] sm:$0xff]  ;;  %v2660_v4 = vsel %vm2200_vm1, %v2604_v1, 0.0 }
 0x4a5   : > { %2462 = vadd.xlane.f32.xlu0 %v2461_v62  ;;  %v6490_v62 = vmul.f32 %v6465_v23, %v2328_v10  ;;  %9341 = vst [vmem:[#allocation112_spill] sm:$0xff] %v6492_v41  ;;  %v2609_v58 = vmul.f32 %v2553_v5, %v2553_v5 }
 0x4a6   : > { %v2550_v10 = vsub.f32 %v6261_v39, %v6487_v21  ;;  %v6516_v39 = vmul.f32 %v6465_v23, %v6443_v57 }
 0x4a7   : > { %v2343_v12 = vpop.xlane.xlu2 %2342  ;;  %v2340_v16 = vpop.xlane.xlu1 %2339 }
 0x4a8   : > { %v2337_v63 = vpop.xlane.xlu0 %2336  ;;  %v2552_v57 = vsub.f32 %v6259_v38, %v6516_v39 }
 0x4a9   : > { %v6512_v60 = vmul.f32 %v6465_v23, %v2337_v63 }
 0x4ab   : > { %9343 = vst [vmem:[#allocation114_spill] sm:$0xff] %v6512_v60  ;;  %v2554_v63 = vsub.f32 %v6287_v29, %v6512_v60  ;;  %v6534_v29 = vmul.f32 %v6465_v23, %v2340_v16 }
 0x4ac   : > { %2477 = vadd.xlane.f32.xlu2 %v2476_v51  ;;  %2474 = vadd.xlane.f32.xlu1 %v2473_v45  ;;  %v2482_v51 = vsel %vm2200_vm1, %v6484_v15, 0.0  ;;  %v2479_v45 = vsel %vm2200_vm1, %v6492_v41, 0.0  ;;  %v2606_v41 = vmul.f32 %v2550_v10, %v2550_v10  ;;  %v6528_v10 = vmul.f32 %v6465_v23, %v2343_v12 }
 0x4ad   : > { %2471 = vadd.xlane.f32.xlu0 %v2470_v19  ;;  %v2551_v19 = vsub.f32 %v6273_v33, %v6490_v62  ;;  %v2555_v16 = vsub.f32 %v6285_v25, %v6534_v29 }
 0x4ae   : > { %9344 = vst [vmem:[#allocation115_spill] sm:$0xff] %v6528_v10  ;;  %v2556_v12 = vsub.f32 %v6283_v48, %v6528_v10 }
 0x4af   : > { %v2352_v20 = vpop.xlane.xlu2 %2351  ;;  %v2349_v28 = vpop.xlane.xlu1 %2348  ;;  %v2607_v30 = vmul.f32 %v2551_v19, %v2551_v19 }
 0x4b0   : > { %v2346_v61 = vpop.xlane.xlu0 %2345  ;;  %v6546_v5 = vmul.f32 %v6465_v23, %v2352_v20  ;;  %v2612_v48 = vmul.f32 %v2556_v12, %v2556_v12 }
 0x4b1   : > { %v2669_v6 = vsel %vm2200_vm1, %v2607_v30, 0.0 }
 0x4b2   : > { %9346 = vst [vmem:[#allocation117_spill] sm:$0xff] %v6546_v5  ;;  %v2559_v20 = vsub.f32 %v6295_v54, %v6546_v5 }
 0x4b4   : > { %2483 = vadd.xlane.f32.xlu1 %v2482_v51  ;;  %2661 = vadd.xlane.f32.xlu2 %v2660_v4  ;;  %v2605_v51 = vmul.f32 %v2549_v37, %v2549_v37  ;;  %v2666_v4 = vsel %vm2200_vm1, %v2606_v41, 0.0  ;;  %v6531_v41 = vmul.f32 %v6465_v23, %v2346_v61  ;;  %v2610_v37 = vmul.f32 %v2554_v63, %v2554_v63 }
 0x4b5   : > { %2480 = vadd.xlane.f32.xlu0 %v2479_v45  ;;  %v2615_v54 = vmul.f32 %v2559_v20, %v2559_v20 }
 0x4b6   : > { %v2663_v45 = vsel %vm2200_vm1, %v2605_v51, 0.0  ;;  %9345 = vst [vmem:[#allocation116_spill] sm:$0xff] %v6531_v41  ;;  %v2675_v51 = vsel %vm2200_vm1, %v2609_v58, 0.0  ;;  %v2678_v38 = vsel %vm2200_vm1, %v2610_v37, 0.0  ;;  %v2557_v61 = vsub.f32 %v6299_v27, %v6531_v41 }
 0x4b7   : > { %v2361_v15 = vpop.xlane.xlu2 %2360  ;;  %v2358_v1 = vpop.xlane.xlu1 %2357  ;;  %v6552_v27 = vmul.f32 %v6465_v23, %v2349_v28 }
 0x4b8   : > { %v2355_v33 = vpop.xlane.xlu0 %2354  ;;  %v2613_v37 = vmul.f32 %v2557_v61, %v2557_v61  ;;  %v6564_v12 = vmul.f32 %v6465_v23, %v2361_v15 }
 0x4b9   : > { %v6549_v63 = vmul.f32 %v6465_v23, %v2355_v33  ;;  %9348 = vst [vmem:[#allocation119_spill] sm:$0xff] %v6552_v27  ;;  %v2558_v28 = vsub.f32 %v6297_v14, %v6552_v27 }
 0x4ba   : > { %v2687_v25 = vsel %vm2200_vm1, %v2613_v37, 0.0  ;;  %9349 = vst [vmem:[#allocation120_spill] sm:$0xff] %v6564_v12  ;;  %v2562_v15 = vsub.f32 %v6307_v13, %v6564_v12 }
 0x4bb   : > { %9347 = vst [vmem:[#allocation118_spill] sm:$0xff] %v6549_v63  ;;  %v2560_v33 = vsub.f32 %v6311_v36, %v6549_v63  ;;  %v6570_v36 = vmul.f32 %v6465_v23, %v2358_v1 }
 0x4bc   : > { %2667 = vadd.xlane.f32.xlu1 %v2666_v4  ;;  %2670 = vadd.xlane.f32.xlu2 %v2669_v6  ;;  %v2608_v6 = vmul.f32 %v2552_v57, %v2552_v57  ;;  %v2618_v13 = vmul.f32 %v2562_v15, %v2562_v15 }
 0x4bd   : > { %2664 = vadd.xlane.f32.xlu0 %v2663_v45  ;;  %v2616_v37 = vmul.f32 %v2560_v33, %v2560_v33  ;;  %9351 = vst [vmem:[#allocation122_spill] sm:$0xff] %v6570_v36  ;;  %v2561_v1 = vsub.f32 %v6309_v3, %v6570_v36 }
 0x4be   : > { %v2672_v45 = vsel %vm2200_vm1, %v2608_v6, 0.0  ;;  %v2611_v6 = vmul.f32 %v2555_v16, %v2555_v16 }
 0x4bf   : > { %v2370_v30 = vpop.xlane.xlu2 %2369  ;;  %v2367_v19 = vpop.xlane.xlu1 %2366  ;;  %v2696_v14 = vsel %vm2200_vm1, %v2616_v37, 0.0 }
 0x4c0   : > { %v2364_v4 = vpop.xlane.xlu0 %2363  ;;  %v6582_v20 = vmul.f32 %v6465_v23, %v2370_v30 }
 0x4c1   : > { %v6567_v61 = vmul.f32 %v6465_v23, %v2364_v4 }
 0x4c2   : > { %9352 = vst [vmem:[#allocation123_spill] sm:$0xff] %v6582_v20  ;;  %v2565_v30 = vsub.f32 %v6319_v52, %v6582_v20 }
 0x4c3   : > { %9350 = vst [vmem:[#allocation121_spill] sm:$0xff] %v6567_v61  ;;  %v2563_v4 = vsub.f32 %v6323_v24, %v6567_v61  ;;  %v6588_v24 = vmul.f32 %v6465_v23, %v2367_v19 }
 0x4c4   : > { %2676 = vadd.xlane.f32.xlu1 %v2675_v51  ;;  %2679 = vadd.xlane.f32.xlu2 %v2678_v38  ;;  %v2684_v38 = vsel %vm2200_vm1, %v2612_v48, 0.0  ;;  %v2621_v52 = vmul.f32 %v2565_v30, %v2565_v30 }
 0x4c5   : > { %2673 = vadd.xlane.f32.xlu0 %v2672_v45  ;;  %v2681_v45 = vsel %vm2200_vm1, %v2611_v6, 0.0  ;;  %v2614_v6 = vmul.f32 %v2558_v28, %v2558_v28  ;;  %v2619_v37 = vmul.f32 %v2563_v4, %v2563_v4  ;;  %9354 = vst [vmem:[#allocation125_spill] sm:$0xff] %v6588_v24  ;;  %v2564_v19 = vsub.f32 %v6321_v42, %v6588_v24 }
 0x4c7   : > { %v2379_v57 = vpop.xlane.xlu2 %2378  ;;  %v2376_v58 = vpop.xlane.xlu1 %2375  ;;  %v2705_v3 = vsel %vm2200_vm1, %v2619_v37, 0.0 }
 0x4c8   : > { %v2373_v51 = vpop.xlane.xlu0 %2372  ;;  %v6600_v15 = vmul.f32 %v6465_v23, %v2379_v57 }
 0x4c9   : > { %v6585_v33 = vmul.f32 %v6465_v23, %v2373_v51 }
 0x4ca   : > { %9355 = vst [vmem:[#allocation126_spill] sm:$0xff] %v6600_v15  ;;  %v2568_v57 = vsub.f32 %v6331_v46, %v6600_v15 }
 0x4cb   : > { %9353 = vst [vmem:[#allocation124_spill] sm:$0xff] %v6585_v33  ;;  %v2566_v51 = vsub.f32 %v6335_v49, %v6585_v33  ;;  %v6606_v49 = vmul.f32 %v6465_v23, %v2376_v58 }
 0x4cc   : > { %2685 = vadd.xlane.f32.xlu1 %v2684_v38  ;;  %2688 = vadd.xlane.f32.xlu2 %v2687_v25  ;;  %v2693_v25 = vsel %vm2200_vm1, %v2615_v54, 0.0  ;;  %v2624_v46 = vmul.f32 %v2568_v57, %v2568_v57 }
 0x4cd   : > { %2682 = vadd.xlane.f32.xlu0 %v2681_v45  ;;  %v2690_v45 = vsel %vm2200_vm1, %v2614_v6, 0.0  ;;  %v2617_v6 = vmul.f32 %v2561_v1, %v2561_v1  ;;  %v2622_v37 = vmul.f32 %v2566_v51, %v2566_v51  ;;  %9357 = vst [vmem:[#allocation128_spill] sm:$0xff] %v6606_v49  ;;  %v2567_v58 = vsub.f32 %v6333_v47, %v6606_v49 }
 0x4cf   : > { %v2388_v16 = vpop.xlane.xlu2 %2387  ;;  %v2385_v48 = vpop.xlane.xlu1 %2384  ;;  %v2714_v42 = vsel %vm2200_vm1, %v2622_v37, 0.0 }
 0x4d0   : > { %v2382_v38 = vpop.xlane.xlu0 %2381  ;;  %v6618_v30 = vmul.f32 %v6465_v23, %v2388_v16 }
 0x4d1   : > { %v6603_v4 = vmul.f32 %v6465_v23, %v2382_v38 }
 0x4d2   : > { %9358 = vst [vmem:[#allocation129_spill] sm:$0xff] %v6618_v30  ;;  %v2571_v16 = vsub.f32 %v6343_v56, %v6618_v30 }
 0x4d3   : > { %9356 = vst [vmem:[#allocation127_spill] sm:$0xff] %v6603_v4  ;;  %v2569_v38 = vsub.f32 %v6347_v32, %v6603_v4  ;;  %v6624_v32 = vmul.f32 %v6465_v23, %v2385_v48 }
 0x4d4   : > { %2694 = vadd.xlane.f32.xlu1 %v2693_v25  ;;  %2697 = vadd.xlane.f32.xlu2 %v2696_v14  ;;  %v2702_v14 = vsel %vm2200_vm1, %v2618_v13, 0.0  ;;  %v2627_v56 = vmul.f32 %v2571_v16, %v2571_v16 }
 0x4d5   : > { %2691 = vadd.xlane.f32.xlu0 %v2690_v45  ;;  %v2699_v45 = vsel %vm2200_vm1, %v2617_v6, 0.0  ;;  %v2620_v6 = vmul.f32 %v2564_v19, %v2564_v19  ;;  %v2625_v37 = vmul.f32 %v2569_v38, %v2569_v38  ;;  %9360 = vst [vmem:[#allocation131_spill] sm:$0xff] %v6624_v32  ;;  %v2570_v48 = vsub.f32 %v6345_v9, %v6624_v32 }
 0x4d7   : > { %v2397_v28 = vpop.xlane.xlu2 %2396  ;;  %v2394_v54 = vpop.xlane.xlu1 %2393  ;;  %v2723_v47 = vsel %vm2200_vm1, %v2625_v37, 0.0 }
 0x4d8   : > { %v2391_v25 = vpop.xlane.xlu0 %2390  ;;  %v6636_v57 = vmul.f32 %v6465_v23, %v2397_v28 }
 0x4d9   : > { %v6621_v51 = vmul.f32 %v6465_v23, %v2391_v25 }
 0x4da   : > { %9361 = vst [vmem:[#allocation132_spill] sm:$0xff] %v6636_v57  ;;  %v2574_v28 = vsub.f32 %v6355_v50, %v6636_v57 }
 0x4db   : > { %9359 = vst [vmem:[#allocation130_spill] sm:$0xff] %v6621_v51  ;;  %v2572_v25 = vsub.f32 %v6359_v53, %v6621_v51  ;;  %v6642_v53 = vmul.f32 %v6465_v23, %v2394_v54 }
 0x4dc   : > { %2703 = vadd.xlane.f32.xlu1 %v2702_v14  ;;  %2706 = vadd.xlane.f32.xlu2 %v2705_v3  ;;  %v2711_v3 = vsel %vm2200_vm1, %v2621_v52, 0.0  ;;  %v2630_v50 = vmul.f32 %v2574_v28, %v2574_v28 }
 0x4dd   : > { %2700 = vadd.xlane.f32.xlu0 %v2699_v45  ;;  %v2708_v45 = vsel %vm2200_vm1, %v2620_v6, 0.0  ;;  %v2623_v6 = vmul.f32 %v2567_v58, %v2567_v58  ;;  %v2628_v37 = vmul.f32 %v2572_v25, %v2572_v25  ;;  %9363 = vst [vmem:[#allocation134_spill] sm:$0xff] %v6642_v53  ;;  %v2573_v54 = vsub.f32 %v6357_v44, %v6642_v53  ;;  %v3502_v53 = vld [vmem:[%s9046_s2 + $0x10] sm:$0xff] }
 0x4df   : > { %v2406_v1 = vpop.xlane.xlu2 %2405  ;;  %v2403_v13 = vpop.xlane.xlu1 %2402  ;;  %v2732_v9 = vsel %vm2200_vm1, %v2628_v37, 0.0 }
 0x4e0   : > { %v2400_v14 = vpop.xlane.xlu0 %2399  ;;  %v6654_v16 = vmul.f32 %v6465_v23, %v2406_v1 }
 0x4e1   : > { %v6639_v38 = vmul.f32 %v6465_v23, %v2400_v14 }
 0x4e2   : > { %9364 = vst [vmem:[#allocation135_spill] sm:$0xff] %v6654_v16  ;;  %v2577_v1 = vsub.f32 %v6367_v8, %v6654_v16 }
 0x4e3   : > { %9362 = vst [vmem:[#allocation133_spill] sm:$0xff] %v6639_v38  ;;  %v2575_v14 = vsub.f32 %v6371_v26, %v6639_v38  ;;  %v6660_v26 = vmul.f32 %v6465_v23, %v2403_v13 }
 0x4e4   : > { %2712 = vadd.xlane.f32.xlu1 %v2711_v3  ;;  %2715 = vadd.xlane.f32.xlu2 %v2714_v42  ;;  %v2720_v42 = vsel %vm2200_vm1, %v2624_v46, 0.0  ;;  %v2633_v8 = vmul.f32 %v2577_v1, %v2577_v1 }
 0x4e5   : > { %2709 = vadd.xlane.f32.xlu0 %v2708_v45  ;;  %v2717_v45 = vsel %vm2200_vm1, %v2623_v6, 0.0  ;;  %v2626_v6 = vmul.f32 %v2570_v48, %v2570_v48  ;;  %v2631_v37 = vmul.f32 %v2575_v14, %v2575_v14  ;;  %9366 = vst [vmem:[#allocation137_spill] sm:$0xff] %v6660_v26  ;;  %v2576_v13 = vsub.f32 %v6369_v40, %v6660_v26 }
 0x4e7   : > { %v2415_v19 = vpop.xlane.xlu2 %2414  ;;  %v2412_v52 = vpop.xlane.xlu1 %2411  ;;  %v2741_v44 = vsel %vm2200_vm1, %v2631_v37, 0.0 }
 0x4e8   : > { %v2409_v3 = vpop.xlane.xlu0 %2408  ;;  %v6672_v28 = vmul.f32 %v6465_v23, %v2415_v19 }
 0x4e9   : > { %v6657_v25 = vmul.f32 %v6465_v23, %v2409_v3 }
 0x4ea   : > { %9367 = vst [vmem:[#allocation138_spill] sm:$0xff] %v6672_v28  ;;  %v2580_v19 = vsub.f32 %v6379_v17, %v6672_v28 }
 0x4eb   : > { %9365 = vst [vmem:[#allocation136_spill] sm:$0xff] %v6657_v25  ;;  %v2578_v3 = vsub.f32 %v6383_v11, %v6657_v25  ;;  %v6678_v11 = vmul.f32 %v6465_v23, %v2412_v52 }
 0x4ec   : > { %2721 = vadd.xlane.f32.xlu1 %v2720_v42  ;;  %2724 = vadd.xlane.f32.xlu2 %v2723_v47  ;;  %v2729_v47 = vsel %vm2200_vm1, %v2627_v56, 0.0  ;;  %v2636_v17 = vmul.f32 %v2580_v19, %v2580_v19 }
 0x4ed   : > { %2718 = vadd.xlane.f32.xlu0 %v2717_v45  ;;  %v2726_v45 = vsel %vm2200_vm1, %v2626_v6, 0.0  ;;  %v2629_v6 = vmul.f32 %v2573_v54, %v2573_v54  ;;  %v2634_v37 = vmul.f32 %v2578_v3, %v2578_v3  ;;  %9369 = vst [vmem:[#allocation140_spill] sm:$0xff] %v6678_v11  ;;  %v2579_v52 = vsub.f32 %v6381_v18, %v6678_v11 }
 0x4ef   : > { %v2424_v58 = vpop.xlane.xlu2 %2423  ;;  %v2421_v46 = vpop.xlane.xlu1 %2420  ;;  %v2750_v40 = vsel %vm2200_vm1, %v2634_v37, 0.0 }
 0x4f0   : > { %v2418_v42 = vpop.xlane.xlu0 %2417  ;;  %v6690_v1 = vmul.f32 %v6465_v23, %v2424_v58 }
 0x4f1   : > { %v6675_v14 = vmul.f32 %v6465_v23, %v2418_v42 }
 0x4f2   : > { %9370 = vst [vmem:[#allocation141_spill] sm:$0xff] %v6690_v1  ;;  %v2583_v58 = vsub.f32 %v6391_v31, %v6690_v1 }
 0x4f3   : > { %9368 = vst [vmem:[#allocation139_spill] sm:$0xff] %v6675_v14  ;;  %v2581_v42 = vsub.f32 %v6395_v59, %v6675_v14  ;;  %v6696_v59 = vmul.f32 %v6465_v23, %v2421_v46 }
 0x4f4   : > { %2730 = vadd.xlane.f32.xlu1 %v2729_v47  ;;  %2733 = vadd.xlane.f32.xlu2 %v2732_v9  ;;  %v2738_v9 = vsel %vm2200_vm1, %v2630_v50, 0.0  ;;  %v2639_v31 = vmul.f32 %v2583_v58, %v2583_v58 }
 0x4f5   : > { %2727 = vadd.xlane.f32.xlu0 %v2726_v45  ;;  %v2735_v45 = vsel %vm2200_vm1, %v2629_v6, 0.0  ;;  %v2632_v6 = vmul.f32 %v2576_v13, %v2576_v13  ;;  %v2637_v37 = vmul.f32 %v2581_v42, %v2581_v42  ;;  %9372 = vst [vmem:[#allocation143_spill] sm:$0xff] %v6696_v59  ;;  %v2582_v46 = vsub.f32 %v6393_v55, %v6696_v59 }
 0x4f7   : > { %v2433_v48 = vpop.xlane.xlu2 %2432  ;;  %v2430_v56 = vpop.xlane.xlu1 %2429  ;;  %v2759_v18 = vsel %vm2200_vm1, %v2637_v37, 0.0 }
 0x4f8   : > { %v2427_v47 = vpop.xlane.xlu0 %2426  ;;  %v6708_v19 = vmul.f32 %v6465_v23, %v2433_v48 }
 0x4f9   : > { %v6693_v3 = vmul.f32 %v6465_v23, %v2427_v47 }
 0x4fa   : > { %9373 = vst [vmem:[#allocation144_spill] sm:$0xff] %v6708_v19  ;;  %v2586_v48 = vsub.f32 %v6403_v43, %v6708_v19 }
 0x4fb   : > { %9371 = vst [vmem:[#allocation142_spill] sm:$0xff] %v6693_v3  ;;  %v2584_v47 = vsub.f32 %v6407_v35, %v6693_v3  ;;  %v6714_v35 = vmul.f32 %v6465_v23, %v2430_v56 }
 0x4fc   : > { %2739 = vadd.xlane.f32.xlu1 %v2738_v9  ;;  %2742 = vadd.xlane.f32.xlu2 %v2741_v44  ;;  %v2747_v44 = vsel %vm2200_vm1, %v2633_v8, 0.0  ;;  %v2642_v43 = vmul.f32 %v2586_v48, %v2586_v48  ;;  %v9380_v48 = vld [vmem:[#allocation97_spill] sm:$0xff] }
 0x4fd   : > { %2736 = vadd.xlane.f32.xlu0 %v2735_v45  ;;  %v2744_v45 = vsel %vm2200_vm1, %v2632_v6, 0.0  ;;  %v2635_v6 = vmul.f32 %v2579_v52, %v2579_v52  ;;  %v2640_v37 = vmul.f32 %v2584_v47, %v2584_v47  ;;  %9375 = vst [vmem:[#allocation146_spill] sm:$0xff] %v6714_v35  ;;  %v2585_v56 = vsub.f32 %v6405_v34, %v6714_v35 }
 0x4ff   : > { %v2442_v54 = vpop.xlane.xlu2 %2441  ;;  %v2439_v50 = vpop.xlane.xlu1 %2438  ;;  %v2768_v55 = vsel %vm2200_vm1, %v2640_v37, 0.0 }
 0x500   : > { %v2436_v9 = vpop.xlane.xlu0 %2435  ;;  %v6726_v58 = vmul.f32 %v6465_v23, %v2442_v54 }
 0x501   : > { %v6711_v42 = vmul.f32 %v6465_v23, %v2436_v9 }
 0x502   : > { %9376 = vst [vmem:[#allocation147_spill] sm:$0xff] %v6726_v58  ;;  %v2589_v54 = vsub.f32 %v6415_v0, %v6726_v58 }
 0x503   : > { %9374 = vst [vmem:[#allocation145_spill] sm:$0xff] %v6711_v42  ;;  %v2587_v9 = vsub.f32 %v6419_v2, %v6711_v42  ;;  %v6732_v2 = vmul.f32 %v6465_v23, %v2439_v50 }
 0x504   : > { %2748 = vadd.xlane.f32.xlu1 %v2747_v44  ;;  %2751 = vadd.xlane.f32.xlu2 %v2750_v40  ;;  %v2756_v40 = vsel %vm2200_vm1, %v2636_v17, 0.0  ;;  %v2645_v0 = vmul.f32 %v2589_v54, %v2589_v54  ;;  %v9386_v54 = vld [vmem:[#allocation99_spill] sm:$0xff] }
 0x505   : > { %2745 = vadd.xlane.f32.xlu0 %v2744_v45  ;;  %v2753_v45 = vsel %vm2200_vm1, %v2635_v6, 0.0  ;;  %v2638_v6 = vmul.f32 %v2582_v46, %v2582_v46  ;;  %v2643_v37 = vmul.f32 %v2587_v9, %v2587_v9  ;;  %9378 = vst [vmem:[#allocation149_spill] sm:$0xff] %v6732_v2  ;;  %v2588_v50 = vsub.f32 %v9380_v48, %v6732_v2 }
 0x507   : > { %v2451_v13 = vpop.xlane.xlu2 %2450  ;;  %v2448_v8 = vpop.xlane.xlu1 %2447  ;;  %v2777_v34 = vsel %vm2200_vm1, %v2643_v37, 0.0 }
 0x508   : > { %v2445_v44 = vpop.xlane.xlu0 %2444  ;;  %v6744_v9 = vmul.f32 %v6465_v23, %v2451_v13 }
 0x509   : > { %v6729_v47 = vmul.f32 %v6465_v23, %v2445_v44 }
 0x50b   : > { %9377 = vst [vmem:[#allocation148_spill] sm:$0xff] %v6729_v47 }
 0x50c   : > { %2757 = vadd.xlane.f32.xlu1 %v2756_v40  ;;  %2760 = vadd.xlane.f32.xlu2 %v2759_v18  ;;  %v2765_v18 = vsel %vm2200_vm1, %v2639_v31, 0.0 }
 0x50d   : > { %2754 = vadd.xlane.f32.xlu0 %v2753_v45  ;;  %v2762_v45 = vsel %vm2200_vm1, %v2638_v6, 0.0  ;;  %v2641_v6 = vmul.f32 %v2585_v56, %v2585_v56 }
 0x50f   : > { %v2460_v52 = vpop.xlane.xlu2 %2459  ;;  %v2457_v17 = vpop.xlane.xlu1 %2456  ;;  %v2771_v42 = vsel %vm2200_vm1, %v2641_v6, 0.0  ;;  %v2644_v6 = vmul.f32 %v2588_v50, %v2588_v50 }
 0x510   : > { %v2454_v40 = vpop.xlane.xlu0 %2453 }
 0x511   : > { %v6747_v56 = vmul.f32 %v6465_v23, %v2454_v40  ;;  %v2780_v19 = vsel %vm2200_vm1, %v2644_v6, 0.0 }
 0x513   : > { %9382 = vst [vmem:[#allocation97_spill] sm:$0xff] %v6747_v56 }
 0x514   : > { %2766 = vadd.xlane.f32.xlu1 %v2765_v18  ;;  %2769 = vadd.xlane.f32.xlu2 %v2768_v55  ;;  %v2774_v55 = vsel %vm2200_vm1, %v2642_v43, 0.0 }
 0x515   : > { %2763 = vadd.xlane.f32.xlu0 %v2762_v45  ;;  %v9379_v45 = vld [vmem:[#allocation100_spill] sm:$0xff] }
 0x516   : > { %v2590_v44 = vsub.f32 %v9379_v45, %v6729_v47  ;;  %9381 = vst [vmem:[#allocation100_spill] sm:$0xff] %v6744_v9  ;;  %v6750_v45 = vmul.f32 %v6465_v23, %v2448_v8  ;;  %v9385_v47 = vld [vmem:[#allocation103_spill] sm:$0xff] }
 0x517   : > { %v2469_v46 = vpop.xlane.xlu2 %2468  ;;  %v2466_v31 = vpop.xlane.xlu1 %2465  ;;  %v2593_v40 = vsub.f32 %v9385_v47, %v6747_v56  ;;  %v6770_v47 = vmul.f32 %v6465_v23, %v2457_v17 }
 0x518   : > { %v2463_v18 = vpop.xlane.xlu0 %2462  ;;  %v2646_v58 = vmul.f32 %v2590_v44, %v2590_v44  ;;  %9383 = vst [vmem:[#allocation150_spill] sm:$0xff] %v6750_v45  ;;  %v2591_v8 = vsub.f32 %v9386_v54, %v6750_v45  ;;  %v6762_v44 = vmul.f32 %v6465_v23, %v2460_v52  ;;  %v9390_v52 = vld [vmem:[#allocation101_spill] sm:$0xff] }
 0x519   : > { %v6765_v50 = vmul.f32 %v6465_v23, %v2463_v18  ;;  %9389 = vst [vmem:[#allocation99_spill] sm:$0xff] %v6770_v47  ;;  %v9391_v18 = vld [vmem:[#allocation106_spill] sm:$0xff] }
 0x51a   : > { %v2786_v48 = vsel %vm2200_vm1, %v2646_v58, 0.0  ;;  %v2595_v54 = vsub.f32 %v9390_v52, %v6762_v44 }
 0x51b   : > { %9388 = vst [vmem:[#allocation103_spill] sm:$0xff] %v6765_v50  ;;  %v2596_v56 = vsub.f32 %v9391_v18, %v6765_v50  ;;  %v6788_v18 = vmul.f32 %v6465_v23, %v2466_v31 }
 0x51c   : > { %2775 = vadd.xlane.f32.xlu1 %v2774_v55  ;;  %2778 = vadd.xlane.f32.xlu2 %v2777_v34  ;;  %v2783_v34 = vsel %vm2200_vm1, %v2645_v0, 0.0  ;;  %v2651_v52 = vmul.f32 %v2595_v54, %v2595_v54 }
 0x51d   : > { %2772 = vadd.xlane.f32.xlu0 %v2771_v42  ;;  %v9384_v42 = vld [vmem:[#allocation98_spill] sm:$0xff] }
 0x51e   : > { %v2592_v13 = vsub.f32 %v9384_v42, %v6744_v9  ;;  %9387 = vst [vmem:[#allocation98_spill] sm:$0xff] %v6762_v44  ;;  %v2649_v9 = vmul.f32 %v2593_v40, %v2593_v40  ;;  %v6782_v40 = vmul.f32 %v6465_v23, %v2469_v46  ;;  %v2652_v44 = vmul.f32 %v2596_v56, %v2596_v56 }
 0x51f   : > { %v2478_v43 = vpop.xlane.xlu2 %2477  ;;  %v2475_v37 = vpop.xlane.xlu1 %2474 }
 0x520   : > { %v2472_v55 = vpop.xlane.xlu0 %2471  ;;  %v2648_v42 = vmul.f32 %v2592_v13, %v2592_v13  ;;  %v9392_v13 = vld [vmem:[#allocation102_spill] sm:$0xff]  ;;  %9393 = vst [vmem:[#allocation101_spill] sm:$0xff] %v6782_v40  ;;  %v2804_v46 = vsel %vm2200_vm1, %v2652_v44, 0.0  ;;  %v6807_v44 = vmul.f32 %v6465_v23, %v2478_v43 }
 0x521   : > { %v2594_v17 = vsub.f32 %v9392_v13, %v6770_v47  ;;  %9395 = vst [vmem:[#allocation102_spill] sm:$0xff] %v6788_v18  ;;  %v9397_v47 = vld [vmem:[#allocation110_spill] sm:$0xff] }
 0x524   : > { %2784 = vadd.xlane.f32.xlu1 %v2783_v34  ;;  %2787 = vadd.xlane.f32.xlu2 %v2786_v48  ;;  %v2647_v34 = vmul.f32 %v2591_v8, %v2591_v8  ;;  %v2792_v48 = vsel %vm2200_vm1, %v2648_v42, 0.0  ;;  %v6785_v8 = vmul.f32 %v6465_v23, %v2472_v55  ;;  %v9396_v55 = vld [vmem:[#allocation104_spill] sm:$0xff] }
 0x525   : > { %2781 = vadd.xlane.f32.xlu0 %v2780_v19  ;;  %v2795_v19 = vsel %vm2200_vm1, %v2649_v9, 0.0  ;;  %v2598_v50 = vsub.f32 %v9396_v55, %v6782_v40  ;;  %9399 = vst [vmem:[#allocation104_spill] sm:$0xff] %v6807_v44 }
 0x526   : > { %v2789_v45 = vsel %vm2200_vm1, %v2647_v34, 0.0  ;;  %9394 = vst [vmem:[#allocation106_spill] sm:$0xff] %v6785_v8  ;;  %v2599_v54 = vsub.f32 %v9397_v47, %v6785_v8 }
 0x527   : > { %v6767_v58 = vpop.xlane.xlu1 %2483  ;;  %v2662_v0 = vpop.xlane.xlu2 %2661 }
 0x528   : > { %v2481_v6 = vpop.xlane.xlu0 %2480  ;;  %v2828_v34 = vmul.f32 %v2662_v0, %v6465_v23  ;;  %v9398_v0 = vld [vmem:[#allocation105_spill] sm:$0xff]  ;;  %v2655_v8 = vmul.f32 %v2599_v54, %v2599_v54  ;;  %v9402_v54 = vld [vmem:[#allocation107_spill] sm:$0xff] }
 0x529   : > { %v6810_v55 = vmul.f32 %v6465_v23, %v2481_v6 }
 0x52a   : > { %v6798_v56 = vadd.f32 1e-05, %v2828_v34 }
 0x52b   : > { %9400 = vst [vmem:[#allocation110_spill] sm:$0xff] %v6810_v55 }
 0x52c   : > { %2793 = vadd.xlane.f32.xlu1 %v2792_v48  ;;  %2796 = vadd.xlane.f32.xlu2 %v2795_v19  ;;  %v2650_v19 = vmul.f32 %v2594_v17, %v2594_v17  ;;  %v2597_v17 = vsub.f32 %v9398_v0, %v6788_v18  ;;  %4670 = vrsqrt.f32 %v6798_v56  ;;  %v9403_v0 = vld [vmem:[#allocation112_spill] sm:$0xff]  ;;  %vm2946_vm5 = vweird.f32 %v6798_v56 }
 0x52d   : > { %2790 = vadd.xlane.f32.xlu0 %v2789_v45  ;;  %v2801_v45 = vsel %vm2200_vm1, %v2651_v52, 0.0  ;;  %v2602_v40 = vsub.f32 %v9403_v0, %v6810_v55 }
 0x52e   : > { %v2798_v31 = vsel %vm2200_vm1, %v2650_v19, 0.0  ;;  %v6813_v19 = vmul.f32 %v6465_v23, %v2475_v37  ;;  %v2601_v37 = vsub.f32 %v9402_v54, %v6807_v44 }
 0x52f   : > { %v2668_v9 = vpop.xlane.xlu1 %2667  ;;  %v2671_v42 = vpop.xlane.xlu2 %2670  ;;  %v2658_v0 = vmul.f32 %v2602_v40, %v2602_v40 }
 0x530   : > { %v2665_v48 = vpop.xlane.xlu0 %2664  ;;  %9401 = vst [vmem:[#allocation105_spill] sm:$0xff] %v6813_v19  ;;  %v2657_v18 = vmul.f32 %v2601_v37, %v2601_v37 }
 0x531   : > { %v2829_v13 = vmul.f32 %v2665_v48, %v6465_v23  ;;  %v2830_v48 = vmul.f32 %v2668_v9, %v6465_v23  ;;  %v2653_v9 = vmul.f32 %v2597_v17, %v2597_v17 }
 0x533   : > { %v6804_v52 = vadd.f32 1e-05, %v2829_v13  ;;  %v2831_v13 = vmul.f32 %v2671_v42, %v6465_v23  ;;  %v2807_v17 = vsel %vm2200_vm1, %v2653_v9, 0.0  ;;  %v9404_v42 = vld [vmem:[#allocation108_spill] sm:$0xff] }
 0x534   : > { %2802 = vadd.xlane.f32.xlu1 %v2801_v45  ;;  %2805 = vadd.xlane.f32.xlu2 %v2804_v46  ;;  %v2654_v45 = vmul.f32 %v2598_v50, %v2598_v50  ;;  %v2813_v50 = vsel %vm2200_vm1, %v2655_v8, 0.0 }
 0x535   : > { %2799 = vadd.xlane.f32.xlu0 %v2798_v31  ;;  %v6816_v31 = vadd.f32 1e-05, %v2830_v48  ;;  %4672 = vrsqrt.f32 %v6804_v52  ;;  %v2600_v48 = vsub.f32 %v9404_v42, %v6813_v19  ;;  %vm2956_vm6 = vweird.f32 %v6804_v52 }
 0x536   : > { %v2810_v6 = vsel %vm2200_vm1, %v2654_v45, 0.0  ;;  %v6833_v45 = vpop.eup %4670 }
 0x537   : > { %v2677_v47 = vpop.xlane.xlu1 %2676  ;;  %v2680_v34 = vpop.xlane.xlu2 %2679  ;;  %4674 = vrsqrt.f32 %v6816_v31  ;;  %v2656_v42 = vmul.f32 %v2600_v48, %v2600_v48  ;;  %v2819_v48 = vsel %vm2200_vm1, %v2657_v18, 0.0  ;;  %vm2947_vm3 = vweird.f32 %v6833_v45 }
 0x538   : > { %v2674_v46 = vpop.xlane.xlu0 %2673  ;;  %v2833_v40 = vmul.f32 %v2677_v47, %v6465_v23  ;;  %v2834_v37 = vmul.f32 %v2680_v34, %v6465_v23  ;;  %v9406_v47 = vld [vmem:[#allocation111_spill] sm:$0xff]  ;;  %vm6928_vm7 = vmor %vm2946_vm5, %vm2947_vm3  ;;  %vm2966_vm10 = vweird.f32 %v6816_v31 }
 0x539   : > { %v2832_v43 = vmul.f32 %v2674_v46, %v6465_v23  ;;  %v6831_v46 = vadd.f32 1e-05, %v2831_v13  ;;  %v2816_v19 = vsel %vm2200_vm1, %v2656_v42, 0.0 }
 0x53a   : > { %v6862_v1 = vadd.f32 1e-05, %v2833_v40  ;;  %v6866_v2 = vadd.f32 1e-05, %v2834_v37 }
 0x53b   : > { %v6835_v8 = vadd.f32 1e-05, %v2832_v43  ;;  %v6837_v9 = vpop.eup %4672  ;;  %v2941_v43 = vmul.f32 %v6833_v45, %v6798_v56  ;;  %4676 = vrsqrt.f32 %v6831_v46  ;;  %vm2976_vm14 = vweird.f32 %v6831_v46 }
 0x53c   : > { %2811 = vadd.xlane.f32.xlu1 %v2810_v6  ;;  %2814 = vadd.xlane.f32.xlu2 %v2813_v50  ;;  %v4909_v6 = vmov 0   ;;  %v6841_v50 = vmul.f32 %v6465_v23, %v6767_v58  ;;  %v2951_v58 = vmul.f32 %v6837_v9, %v6804_v52  ;;  %vm2957_vm4 = vweird.f32 %v6837_v9  ;;  %v3500_v52 = vld [vmem:[%s9046_s2] sm:$0xff] }
 0x53d   : > { %2808 = vadd.xlane.f32.xlu0 %v2807_v17  ;;  %4666 = vset.pattern.permute.xlu2 %v4909_v6  ;;  %4678 = vrsqrt.f32 %v6835_v8  ;;  %v6850_v55 = vpop.eup %4674  ;;  %v2942_v3 = vmul.f32 %v6833_v45, %v2941_v43  ;;  %vm6933_vm8 = vmor %vm2956_vm6, %vm2957_vm4  ;;  %vm2986_vm15 = vweird.f32 %v6835_v8 }
 0x53e   : > { %4665 = vset.pattern.permute.xlu1 %v4909_v6  ;;  %9405 = vst [vmem:[#allocation107_spill] sm:$0xff] %v6841_v50  ;;  %4667 = vset.pattern.permute.xlu0 %v4909_v6  ;;  %v2822_v6 = vsel %vm2200_vm1, %v2658_v0, 0.0  ;;  %v2603_v34 = vsub.f32 %v9406_v47, %v6841_v50  ;;  %v2952_v0 = vmul.f32 %v6837_v9, %v2951_v58  ;;  %vm2967_vm9 = vweird.f32 %v6850_v55 }
 0x53f   : > { %v2686_v54 = vpop.xlane.xlu1 %2685  ;;  %v2689_v44 = vpop.xlane.xlu2 %2688  ;;  %v2943_v47 = vmul.f32 0.5, %v2942_v3  ;;  %vm6969_vm11 = vmor %vm2966_vm10, %vm2967_vm9  ;;  %vm3006_vm9 = vweird.f32 %v6866_v2 }
 0x540   : > { %v2837_v13 = vmul.f32 %v2689_v44, %v6465_v23  ;;  %v2683_v17 = vpop.xlane.xlu0 %2682  ;;  %v2953_v14 = vmul.f32 0.5, %v2952_v0 }
 0x541   : > { %v6868_v18 = vpop.eup %4676  ;;  %v2835_v58 = vmul.f32 %v2683_v17, %v6465_v23  ;;  %v2944_v35 = vsub.f32 1.5, %v2943_v47 }
 0x542   : > { %v6854_v44 = vadd.f32 1e-05, %v2837_v13  ;;  %v2961_v13 = vmul.f32 %v6850_v55, %v6816_v31  ;;  %v2971_v50 = vmul.f32 %v6868_v18, %v6831_v46  ;;  %v2954_v59 = vsub.f32 1.5, %v2953_v14 }
 0x543   : > { %v6893_v16 = vadd.f32 1e-05, %v2835_v58  ;;  %v2945_v58 = vmul.f32 %v6833_v45, %v2944_v35  ;;  %vm2977_vm12 = vweird.f32 %v6868_v18 }
 0x544   : > { %2820 = vadd.xlane.f32.xlu1 %v2819_v48  ;;  %2823 = vadd.xlane.f32.xlu2 %v2822_v6  ;;  %4680 = vrsqrt.f32 %v6854_v44  ;;  %v6874_v6 = vpop.eup %4678  ;;  %v2962_v37 = vmul.f32 %v6850_v55, %v2961_v13  ;;  %v2836_v13 = vmul.f32 %v2686_v54, %v6465_v23  ;;  %v2972_v0 = vmul.f32 %v6868_v18, %v2971_v50  ;;  %vm7007_vm0 = vmor %vm2976_vm14, %vm2977_vm12 }
 0x545   : > { %2817 = vadd.xlane.f32.xlu0 %v2816_v19  ;;  %v2659_v19 = vmul.f32 %v2603_v34, %v2603_v34  ;;  %4682 = vrsqrt.f32 %v6862_v1  ;;  %v2981_v28 = vmul.f32 %v6874_v6, %v6835_v8  ;;  %v2949_v56 = vsel %vm6928_vm7, %v6833_v45, %v2945_v58  ;;  %v3501_v58 = vld [vmem:[%s9046_s2 + $0x8] sm:$0xff] }
 0x546   : > { %4684 = vrsqrt.f32 %v6866_v2  ;;  %v2963_v25 = vmul.f32 0.5, %v2962_v37  ;;  %v6908_v37 = vadd.f32 1e-05, %v2836_v13  ;;  %v2973_v50 = vmul.f32 0.5, %v2972_v0 }
 0x547   : > { %v6872_v42 = vpop.xlane.xlu1 %2694  ;;  %v2698_v48 = vpop.xlane.xlu2 %2697  ;;  %v2825_v34 = vsel %vm2200_vm1, %v2659_v19, 0.0  ;;  %v2982_v38 = vmul.f32 %v6874_v6, %v2981_v28  ;;  %v2955_v13 = vmul.f32 %v6837_v9, %v2954_v59  ;;  %v6965_v15 = vmul.f32 %v3500_v52, %v2949_v56 }
 0x548   : > { %v2840_v43 = vmul.f32 %v2698_v48, %v6465_v23  ;;  %v6877_v40 = vpop.xlane.xlu0 %2691  ;;  %v2964_v14 = vsub.f32 1.5, %v2963_v25  ;;  %vm2987_vm13 = vweird.f32 %v6874_v6  ;;  %vm3036_vm4 = vweird.f32 %v6854_v44 }
 0x549   : > { %v2983_v11 = vmul.f32 0.5, %v2982_v38  ;;  %v2959_v45 = vsel %vm6933_vm8, %v6837_v9, %v2955_v13  ;;  %v2838_v31 = vmul.f32 %v6877_v40, %v6465_v23  ;;  %vm2988_vm2 = vmor %vm2986_vm15, %vm2987_vm13  ;;  %vm2996_vm8 = vweird.f32 %v6862_v1 }
 0x54a   : > { %v6887_v48 = vadd.f32 1e-05, %v2840_v43  ;;  %v6890_v3 = vpop.eup %4680 }
 0x54b   : > { %v6895_v17 = vpop.eup %4682  ;;  %v3031_v54 = vmul.f32 %v6890_v3, %v6854_v44  ;;  %vm3037_vm3 = vweird.f32 %v6890_v3 }
 0x54c   : > { %4686 = vrsqrt.f32 %v6887_v48  ;;  %v6902_v57 = vpop.eup %4684  ;;  %v2991_v28 = vmul.f32 %v6895_v17, %v6862_v1  ;;  %vm7044_vm5 = vmor %vm3036_vm4, %vm3037_vm3  ;;  %vm2997_vm6 = vweird.f32 %v6895_v17  ;;  %vm3066_vm13 = vweird.f32 %v6887_v48 }
 0x54d   : > { %2826 = vadd.xlane.f32.xlu0 %v2825_v34  ;;  %4688 = vrsqrt.f32 %v6893_v16  ;;  %v3001_v34 = vmul.f32 %v6902_v57, %v6866_v2  ;;  %v3032_v35 = vmul.f32 %v6890_v3, %v3031_v54  ;;  %v2974_v54 = vsub.f32 1.5, %v2973_v50  ;;  %vm7067_vm10 = vmor %vm2996_vm8, %vm2997_vm6  ;;  %v3505_v2 = vld [vmem:[%s9046_s2 + $0x28] sm:$0xff] }
 0x54e   : > { %4690 = vrsqrt.f32 %v6908_v37  ;;  %v2992_v38 = vmul.f32 %v6895_v17, %v2991_v28  ;;  %v2984_v28 = vsub.f32 1.5, %v2983_v11  ;;  %vm3007_vm7 = vweird.f32 %v6902_v57 }
 0x54f   : > { %v6900_v43 = vpop.xlane.xlu1 %2703  ;;  %v2707_v19 = vpop.xlane.xlu2 %2706  ;;  %v3002_v30 = vmul.f32 %v6902_v57, %v3001_v34 }
 0x550   : > { %v6906_v47 = vpop.xlane.xlu0 %2700  ;;  %v2843_v25 = vmul.f32 %v2707_v19, %v6465_v23  ;;  %v2965_v19 = vmul.f32 %v6850_v55, %v2964_v14  ;;  %v3033_v14 = vmul.f32 0.5, %v3032_v35  ;;  %v2993_v13 = vmul.f32 0.5, %v2992_v38 }
 0x551   : > { %v6976_v35 = vmul.f32 %v3501_v58, %v2959_v45  ;;  %v3003_v56 = vmul.f32 0.5, %v3002_v30  ;;  %v2975_v38 = vmul.f32 %v6868_v18, %v2974_v54  ;;  %v2985_v40 = vmul.f32 %v6874_v6, %v2984_v28 }
 0x552   : > { %v6922_v51 = vpop.eup %4686  ;;  %v6961_v50 = vadd.f32 1e-05, %v2843_v25  ;;  %v2969_v25 = vsel %vm6969_vm11, %v6850_v55, %v2965_v19  ;;  %v3034_v45 = vsub.f32 1.5, %v3033_v14  ;;  %v2839_v55 = vmul.f32 %v6872_v42, %v6465_v23  ;;  %vm7081_vm11 = vmor %vm3006_vm9, %vm3007_vm7 }
 0x553   : > { %v6956_v0 = vpop.eup %4688  ;;  %v3061_v11 = vmul.f32 %v6922_v51, %v6887_v48  ;;  %v7001_v19 = vadd.f32 1e-05, %v2838_v31  ;;  %v7003_v54 = vmul.f32 %v3502_v53, %v2969_v25  ;;  %v2994_v46 = vsub.f32 1.5, %v2993_v13  ;;  %v3503_v53 = vld [vmem:[%s9046_s2 + $0x18] sm:$0xff] }
 0x554   : > { %v6981_v59 = vpop.eup %4690  ;;  %v3011_v52 = vmul.f32 %v6956_v0, %v6893_v16  ;;  %4692 = vrsqrt.f32 %v6961_v50  ;;  %v3004_v8 = vsub.f32 1.5, %v3003_v56  ;;  %v2979_v42 = vsel %vm7007_vm0, %v6868_v18, %v2975_v38  ;;  %v3504_v56 = vld [vmem:[%s9046_s2 + $0x20] sm:$0xff] }
 0x555   : > { %v3062_v58 = vmul.f32 %v6922_v51, %v3061_v11  ;;  %v3021_v30 = vmul.f32 %v6981_v59, %v6908_v37  ;;  %v2989_v25 = vsel %vm2988_vm2, %v6874_v6, %v2985_v40  ;;  %4694 = vrsqrt.f32 %v7001_v19 }
 0x556   : > { %v3012_v14 = vmul.f32 %v6956_v0, %v3011_v52  ;;  %v3035_v52 = vmul.f32 %v6890_v3, %v3034_v45  ;;  %v7040_v6 = vmul.f32 %v3503_v53, %v2979_v42  ;;  %v7042_v28 = vmul.f32 %v3504_v56, %v2989_v25 }
 0x557   : > { %v6946_v26 = vpop.xlane.xlu1 %2712  ;;  %v6948_v4 = vpop.xlane.xlu2 %2715  ;;  %v3063_v31 = vmul.f32 0.5, %v3062_v58  ;;  %v3022_v38 = vmul.f32 %v6981_v59, %v3021_v30  ;;  %v7037_v58 = vadd.f32 1e-05, %v2839_v55  ;;  %v2995_v44 = vmul.f32 %v6895_v17, %v2994_v46  ;;  %v3509_v55 = vld [vmem:[%s9046_s2 + $0x48] sm:$0xff] }
 0x558   : > { %v6963_v34 = vpop.xlane.xlu0 %2709  ;;  %v3013_v40 = vmul.f32 0.5, %v3012_v14  ;;  %v3039_v30 = vsel %vm7044_vm5, %v6890_v3, %v3035_v52  ;;  %v3005_v14 = vmul.f32 %v6902_v57, %v3004_v8  ;;  %v2846_v3 = vmul.f32 %v6948_v4, %v6465_v23 }
 0x559   : > { %v3064_v33 = vsub.f32 1.5, %v3063_v31  ;;  %4696 = vrsqrt.f32 %v7037_v58  ;;  %v3023_v8 = vmul.f32 0.5, %v3022_v38  ;;  %v7073_v1 = vmul.f32 %v3509_v55, %v3039_v30 }
 0x55a   : > { %v7034_v18 = vpop.eup %4692  ;;  %v3014_v53 = vsub.f32 1.5, %v3013_v40  ;;  %v2999_v25 = vsel %vm7067_vm10, %v6895_v17, %v2995_v44  ;;  %v3009_v40 = vsel %vm7081_vm11, %v6902_v57, %v3005_v14  ;;  %v3506_v17 = vld [vmem:[%s9046_s2 + $0x30] sm:$0xff]  ;;  %vm3067_vm12 = vweird.f32 %v6922_v51 }
 0x55b   : > { %v3091_v46 = vmul.f32 %v7034_v18, %v6961_v50  ;;  %9419 = vst [vmem:[#allocation112_spill] sm:$0xff] %v7073_v1  ;;  %v7085_v56 = vpop.eup %4694  ;;  %v3065_v45 = vmul.f32 %v6922_v51, %v3064_v33  ;;  %v2841_v30 = vmul.f32 %v6906_v47, %v6465_v23  ;;  %v2842_v57 = vmul.f32 %v6900_v43, %v6465_v23  ;;  %vm7112_vm14 = vmor %vm3066_vm13, %vm3067_vm12  ;;  %v3512_v43 = vld [vmem:[%s9046_s2 + $0x60] sm:$0xff] }
 0x55c   : > { %3787 = vperm.xlu2 %4666, %v6976_v35   ;;  %v7106_v55 = vadd.f32 1e-05, %v2846_v3  ;;  %v7108_v14 = vmul.f32 %v3505_v2, %v2999_v25  ;;  %v3024_v42 = vsub.f32 1.5, %v3023_v8  ;;  %v7110_v33 = vmul.f32 %v3506_v17, %v3009_v40 }
 0x55d   : > { %3782 = vperm.xlu1 %4665, %v6965_v15   ;;  %v3092_v44 = vmul.f32 %v7034_v18, %v3091_v46  ;;  %v3015_v47 = vmul.f32 %v6956_v0, %v3014_v53  ;;  %vm3017_vm15 = vweird.f32 %v6956_v0  ;;  %v3069_v48 = vsel %vm7112_vm14, %v6922_v51, %v3065_v45 }
 0x55e   : > { %9422 = vst [vmem:[#allocation108_spill] sm:$0xff] %v7108_v14  ;;  %vm3016_vm0 = vweird.f32 %v6893_v16  ;;  %v3041_v3 = vmul.f32 %v7085_v56, %v7001_v19  ;;  %v7130_v53 = vadd.f32 1e-05, %v2841_v30  ;;  %vm3026_vm2 = vweird.f32 %v6908_v37  ;;  %v3507_v37 = vld [vmem:[%s9046_s2 + $0x38] sm:$0xff] }
 0x55f   : > { %v7012_v11 = vpop.xlane.xlu1 %2721  ;;  %v7014_v9 = vpop.xlane.xlu2 %2724  ;;  %9423 = vst [vmem:[#allocation111_spill] sm:$0xff] %v7110_v33  ;;  %v3093_v8 = vmul.f32 0.5, %v3092_v44  ;;  %v7134_v25 = vadd.f32 1e-05, %v2842_v57  ;;  %4698 = vrsqrt.f32 %v7106_v55  ;;  %vm7139_vm3 = vmor %vm3016_vm0, %vm3017_vm15  ;;  %v7145_v40 = vmul.f32 %v3512_v43, %v3069_v48 }
 0x560   : > { %v7024_v13 = vpop.xlane.xlu0 %2718  ;;  %v7118_v46 = vpop.eup %4696  ;;  %v2849_v51 = vmul.f32 %v7014_v9, %v6465_v23  ;;  %v3019_v17 = vsel %vm7139_vm3, %v6956_v0, %v3015_v47  ;;  %v3025_v45 = vmul.f32 %v6981_v59, %v3024_v42  ;;  %vm3027_vm4 = vweird.f32 %v6981_v59  ;;  %v3508_v0 = vld [vmem:[%s9046_s2 + $0x40] sm:$0xff] }
 0x561   : > { %3792 = vperm.xlu0 %4667, %v7003_v54   ;;  %9428 = vst [vmem:[#allocation151_spill] sm:$0xff] %v7145_v40  ;;  %v3051_v9 = vmul.f32 %v7118_v46, %v7037_v58  ;;  %v2844_v44 = vmul.f32 %v6963_v34, %v6465_v23  ;;  %vm3028_vm5 = vmor %vm3026_vm2, %vm3027_vm4  ;;  %v3042_v57 = vmul.f32 %v7085_v56, %v3041_v3  ;;  %v3094_v4 = vsub.f32 1.5, %v3093_v8 }
 0x562   : > { %4700 = vrsqrt.f32 %v7130_v53  ;;  %v3029_v42 = vsel %vm3028_vm5, %v6981_v59, %v3025_v45  ;;  %v7168_v47 = vadd.f32 1e-05, %v2849_v51  ;;  %v7172_v34 = vmul.f32 %v3507_v37, %v3019_v17 }
 0x563   : > { %4702 = vrsqrt.f32 %v7134_v25  ;;  %v2845_v43 = vmul.f32 %v6946_v26, %v6465_v23  ;;  %v7177_v2 = vmul.f32 %v3508_v0, %v3029_v42  ;;  %v3052_v8 = vmul.f32 %v7118_v46, %v3051_v9  ;;  %v3515_v9 = vld [vmem:[%s9046_s2 + $0x78] sm:$0xff] }
 0x564   : > { %3797 = vperm.xlu2 %4666, %v7040_v6   ;;  %v7182_v20 = vadd.f32 1e-05, %v2844_v44  ;;  %v3043_v59 = vmul.f32 0.5, %v3042_v57  ;;  %v3095_v51 = vmul.f32 %v7034_v18, %v3094_v4  ;;  %4704 = vrsqrt.f32 %v7168_v47 }
 0x565   : > { %3802 = vperm.xlu1 %4665, %v7042_v28   ;;  %9429 = vst [vmem:[#allocation152_spill] sm:$0xff] %v7177_v2  ;;  %v7179_v3 = vpop.eup %4698  ;;  %vm3096_vm6 = vweird.f32 %v6961_v50  ;;  %v7191_v26 = vadd.f32 1e-05, %v2845_v43  ;;  %vm3097_vm7 = vweird.f32 %v7034_v18  ;;  %v3053_v44 = vmul.f32 0.5, %v3052_v8 }
 0x566   : > { %v3121_v37 = vmul.f32 %v7179_v3, %v7106_v55  ;;  %4706 = vrsqrt.f32 %v7182_v20  ;;  %vm3098_vm8 = vmor %vm3096_vm6, %vm3097_vm7  ;;  %v3044_v57 = vsub.f32 1.5, %v3043_v59  ;;  %vm3056_vm9 = vweird.f32 %v7037_v58 }
 0x567   : > { %v7071_v31 = vpop.xlane.xlu2 %2733  ;;  %v7087_v52 = vpop.xlane.xlu1 %2730  ;;  %v3099_v4 = vsel %vm3098_vm8, %v7034_v18, %v3095_v51  ;;  %4708 = vrsqrt.f32 %v7191_v26  ;;  %v3054_v12 = vsub.f32 1.5, %v3053_v44  ;;  %v2848_v18 = vmul.f32 %v7012_v11, %v6465_v23 }
 0x568   : > { %v7089_v38 = vpop.xlane.xlu0 %2727  ;;  %v7188_v17 = vpop.eup %4700  ;;  %v2852_v43 = vmul.f32 %v7071_v31, %v6465_v23  ;;  %v7211_v32 = vmul.f32 %v3515_v9, %v3099_v4  ;;  %v3122_v8 = vmul.f32 %v7179_v3, %v3121_v37  ;;  %v2847_v31 = vmul.f32 %v7024_v13, %v6465_v23  ;;  %v3510_v13 = vld [vmem:[%s9046_s2 + $0x50] sm:$0xff] }
 0x569   : > { %3827 = vperm.xlu0 %4667, %v7073_v1   ;;  %v7204_v50 = vpop.eup %4702  ;;  %v3071_v42 = vmul.f32 %v7188_v17, %v7130_v53  ;;  %v3045_v9 = vmul.f32 %v7085_v56, %v3044_v57  ;;  %vm3046_vm10 = vweird.f32 %v7001_v19  ;;  %vm3047_vm11 = vweird.f32 %v7085_v56  ;;  %v3511_v19 = vld [vmem:[%s9046_s2 + $0x58] sm:$0xff] }
 0x56a   : > { %9430 = vst [vmem:[#allocation153_spill] sm:$0xff] %v7211_v32  ;;  %v7215_v61 = vpop.eup %4704  ;;  %v3081_v59 = vmul.f32 %v7204_v50, %v7134_v25  ;;  %v7231_v44 = vadd.f32 1e-05, %v2852_v43  ;;  %v3123_v11 = vmul.f32 0.5, %v3122_v8  ;;  %vm3048_vm12 = vmor %vm3046_vm10, %vm3047_vm11  ;;  %vm3057_vm13 = vweird.f32 %v7118_v46 }
 0x56b   : > { %v3072_v37 = vmul.f32 %v7188_v17, %v3071_v42  ;;  %v3151_v49 = vmul.f32 %v7215_v61, %v7168_v47  ;;  %v3055_v42 = vmul.f32 %v7118_v46, %v3054_v12  ;;  %v7254_v63 = vadd.f32 1e-05, %v2847_v31  ;;  %vm3058_vm14 = vmor %vm3056_vm9, %vm3057_vm13 }
 0x56c   : > { %3807 = vperm.xlu2 %4666, %v7108_v14   ;;  %v7227_v4 = vpop.eup %4706  ;;  %4710 = vrsqrt.f32 %v7231_v44  ;;  %v3124_v1 = vsub.f32 1.5, %v3123_v11  ;;  %vm3126_vm15 = vweird.f32 %v7106_v55  ;;  %vm3127_vm0 = vweird.f32 %v7179_v3  ;;  %v3518_v11 = vld [vmem:[%s9046_s2 + $0x90] sm:$0xff] }
 0x56d   : > { %3812 = vperm.xlu1 %4665, %v7110_v33   ;;  %v7250_v43 = vpop.eup %4708  ;;  %v3101_v8 = vmul.f32 %v7227_v4, %v7182_v20  ;;  %v3059_v5 = vsel %vm3058_vm14, %v7118_v46, %v3055_v42  ;;  %v3152_v41 = vmul.f32 %v7215_v61, %v3151_v49  ;;  %v2850_v46 = vmul.f32 %v7089_v38, %v6465_v23  ;;  %vm3128_vm2 = vmor %vm3126_vm15, %vm3127_vm0 }
 0x56e   : > { %vm3086_vm3 = vweird.f32 %v7134_v25  ;;  %vm3076_vm4 = vweird.f32 %v7130_v53  ;;  %vm3077_vm5 = vweird.f32 %v7188_v17  ;;  %vm3087_vm6 = vweird.f32 %v7204_v50  ;;  %v3514_v53 = vld [vmem:[%s9046_s2 + $0x70] sm:$0xff] }
 0x56f   : > { %v7143_v16 = vpop.xlane.xlu2 %2742  ;;  %v7170_v48 = vpop.xlane.xlu1 %2739  ;;  %v3102_v58 = vmul.f32 %v7227_v4, %v3101_v8  ;;  %v7294_v55 = vadd.f32 1e-05, %v2850_v46  ;;  %vm3078_vm7 = vmor %vm3076_vm4, %vm3077_vm5  ;;  %vm3157_vm9 = vweird.f32 %v7215_v61  ;;  %vm3156_vm10 = vweird.f32 %v7168_v47 }
 0x570   : > { %v7159_v30 = vpop.xlane.xlu0 %2736  ;;  %vm7339_vm8 = vmor %vm3086_vm3, %vm3087_vm6  ;;  %vm3107_vm13 = vweird.f32 %v7227_v4  ;;  %vm3116_vm14 = vweird.f32 %v7191_v26  ;;  %vm3117_vm0 = vweird.f32 %v7250_v43  ;;  %vm3186_vm5 = vweird.f32 %v7231_v44 }
 0x571   : > { %3842 = vperm.xlu0 %4667, %v7145_v40   ;;  %v7243_v40 = vadd.f32 1e-05, %v2848_v18  ;;  %v3073_v18 = vmul.f32 0.5, %v3072_v37  ;;  %v3125_v37 = vmul.f32 %v7179_v3, %v3124_v1  ;;  %vm3158_vm11 = vmor %vm3156_vm10, %vm3157_vm9 }
 0x573   : > { %4712 = vrsqrt.f32 %v7243_v40  ;;  %v3074_v49 = vsub.f32 1.5, %v3073_v18  ;;  %v3129_v1 = vsel %vm3128_vm2, %v7179_v3, %v3125_v37  ;;  %vm3118_vm2 = vmor %vm3116_vm14, %vm3117_vm0  ;;  %vm3146_vm6 = vweird.f32 %v7243_v40 }
 0x574   : > { %3817 = vperm.xlu2 %4666, %v7172_v34   ;;  %4714 = vrsqrt.f32 %v7254_v63  ;;  %v7302_v18 = vmul.f32 %v3518_v11, %v3129_v1 }
 0x575   : > { %3822 = vperm.xlu1 %4665, %v7177_v2   ;;  %v7266_v2 = vmul.f32 %v3511_v19, %v3059_v5  ;;  %v2855_v5 = vmul.f32 %v7143_v16, %v6465_v23  ;;  %v2851_v19 = vmul.f32 %v7087_v52, %v6465_v23  ;;  %4716 = vrsqrt.f32 %v7294_v55 }
 0x576   : > { %9433 = vst [vmem:[#allocation156_spill] sm:$0xff] %v7302_v18 }
 0x577   : > { %v7195_v45 = vpop.xlane.xlu2 %2751  ;;  %v7221_v51 = vpop.xlane.xlu1 %2748  ;;  %9432 = vst [vmem:[#allocation155_spill] sm:$0xff] %v7266_v2  ;;  %v7311_v46 = vadd.f32 1e-05, %v2851_v19 }
 0x578   : > { %v7202_v0 = vpop.xlane.xlu0 %2745 }
 0x579   : > { %3857 = vperm.xlu0 %4667, %v7211_v32   ;;  %v3082_v32 = vmul.f32 %v7204_v50, %v3081_v59  ;;  %v3049_v59 = vsel %vm3048_vm12, %v7085_v56, %v3045_v9  ;;  %v3111_v56 = vmul.f32 %v7250_v43, %v7191_v26  ;;  %v3153_v9 = vmul.f32 0.5, %v3152_v41 }
 0x57a   : > { %v7260_v12 = vmul.f32 %v3510_v13, %v3049_v59  ;;  %v7289_v13 = vpop.eup %4710  ;;  %v3103_v41 = vmul.f32 0.5, %v3102_v58  ;;  %v7300_v59 = vadd.f32 1e-05, %v2855_v5  ;;  %v3513_v5 = vld [vmem:[%s9046_s2 + $0x68] sm:$0xff]  ;;  %vm3106_vm12 = vweird.f32 %v7182_v20 }
 0x57b   : > { %v3083_v31 = vmul.f32 0.5, %v3082_v32  ;;  %v3112_v16 = vmul.f32 %v7250_v43, %v3111_v56  ;;  %v7297_v8 = vpop.eup %4712  ;;  %v3154_v52 = vsub.f32 1.5, %v3153_v9  ;;  %v3181_v58 = vmul.f32 %v7289_v13, %v7231_v44  ;;  %vm3108_vm15 = vmor %vm3106_vm12, %vm3107_vm13 }
 0x57c   : > { %9431 = vst [vmem:[#allocation154_spill] sm:$0xff] %v7260_v12  ;;  %3832 = vperm.xlu2 %4666, %v7260_v12   ;;  %v7305_v56 = vpop.eup %4714  ;;  %v3104_v9 = vsub.f32 1.5, %v3103_v41  ;;  %v3141_v11 = vmul.f32 %v7297_v8, %v7243_v40  ;;  %4718 = vrsqrt.f32 %v7300_v59  ;;  %vm3187_vm3 = vweird.f32 %v7289_v13 }
 0x57d   : > { %3837 = vperm.xlu1 %4665, %v7266_v2   ;;  %v3084_v42 = vsub.f32 1.5, %v3083_v31  ;;  %v3075_v31 = vmul.f32 %v7188_v17, %v3074_v49  ;;  %v3113_v3 = vmul.f32 0.5, %v3112_v16  ;;  %v2858_v16 = vmul.f32 %v7195_v45, %v6465_v23 }
 0x57e   : > { %v3131_v19 = vmul.f32 %v7305_v56, %v7254_v63  ;;  %v3182_v1 = vmul.f32 %v7289_v13, %v3181_v58  ;;  %4720 = vrsqrt.f32 %v7311_v46  ;;  %v3142_v58 = vmul.f32 %v7297_v8, %v3141_v11  ;;  %v7370_v11 = vpop.eup %4716 }
 0x57f   : > { %v7240_v57 = vpop.xlane.xlu2 %2760  ;;  %v7279_v32 = vpop.xlane.xlu1 %2757  ;;  %v3085_v49 = vmul.f32 %v7204_v50, %v3084_v42  ;;  %v2854_v42 = vmul.f32 %v7170_v48, %v6465_v23  ;;  %v3079_v41 = vsel %vm3078_vm7, %v7188_v17, %v3075_v31  ;;  %v3155_v48 = vmul.f32 %v7215_v61, %v3154_v52 }
 0x580   : > { %v7263_v24 = vpop.xlane.xlu0 %2754  ;;  %v3114_v17 = vsub.f32 1.5, %v3113_v3  ;;  %v2853_v52 = vmul.f32 %v7159_v30, %v6465_v23  ;;  %v3521_v3 = vld [vmem:[%s9046_s2 + $0xa8] sm:$0xff]  ;;  %v3183_v47 = vmul.f32 0.5, %v3182_v1  ;;  %vm3137_vm4 = vweird.f32 %v7305_v56 }
 0x581   : > { %3872 = vperm.xlu0 %4667, %v7302_v18   ;;  %v7335_v18 = vmul.f32 %v3513_v5, %v3079_v41  ;;  %v3089_v25 = vsel %vm7339_vm8, %v7204_v50, %v3085_v49  ;;  %v7360_v5 = vadd.f32 1e-05, %v2858_v16  ;;  %v3132_v41 = vmul.f32 %v7305_v56, %v3131_v19  ;;  %vm3188_vm8 = vmor %vm3186_vm5, %vm3187_vm3 }
 0x582   : > { %v7367_v50 = vmul.f32 %v3514_v53, %v3089_v25  ;;  %v3105_v49 = vmul.f32 %v7227_v4, %v3104_v9  ;;  %v7372_v45 = vadd.f32 1e-05, %v2854_v42  ;;  %v3159_v30 = vsel %vm3158_vm11, %v7215_v61, %v3155_v48  ;;  %v7375_v16 = vpop.eup %4718  ;;  %v3516_v9 = vld [vmem:[%s9046_s2 + $0x80] sm:$0xff] }
 0x583   : > { %9434 = vst [vmem:[#allocation157_spill] sm:$0xff] %v7335_v18  ;;  %v7379_v10 = vmul.f32 %v3521_v3, %v3159_v30  ;;  %v3115_v19 = vmul.f32 %v7250_v43, %v3114_v17  ;;  %v3143_v42 = vmul.f32 0.5, %v3142_v58  ;;  %v7387_v61 = vadd.f32 1e-05, %v2853_v52  ;;  %v3517_v3 = vld [vmem:[%s9046_s2 + $0x88] sm:$0xff] }
 0x584   : > { %3847 = vperm.xlu2 %4666, %v7335_v18   ;;  %9437 = vst [vmem:[#allocation158_spill] sm:$0xff] %v7367_v50  ;;  %4722 = vrsqrt.f32 %v7360_v5  ;;  %v7390_v20 = vpop.eup %4720  ;;  %v3133_v1 = vmul.f32 0.5, %v3132_v41  ;;  %v3161_v53 = vmul.f32 %v7370_v11, %v7294_v55  ;;  %v3109_v48 = vsel %vm3108_vm15, %v7227_v4, %v3105_v49 }
 0x585   : > { %3852 = vperm.xlu1 %4665, %v7367_v50   ;;  %9438 = vst [vmem:[#allocation159_spill] sm:$0xff] %v7379_v10  ;;  %v3184_v25 = vsub.f32 1.5, %v3183_v47  ;;  %4724 = vrsqrt.f32 %v7372_v45  ;;  %v3211_v58 = vmul.f32 %v7375_v16, %v7300_v59  ;;  %v7402_v52 = vmul.f32 %v3516_v9, %v3109_v48 }
 0x586   : > { %v3119_v41 = vsel %vm3118_vm2, %v7250_v43, %v3115_v19  ;;  %v3171_v49 = vmul.f32 %v7390_v20, %v7311_v46  ;;  %4726 = vrsqrt.f32 %v7387_v61  ;;  %v2857_v47 = vmul.f32 %v7221_v51, %v6465_v23 }
 0x587   : > { %v7287_v38 = vpop.xlane.xlu2 %2769  ;;  %v7354_v31 = vpop.xlane.xlu1 %2766  ;;  %9439 = vst [vmem:[#allocation160_spill] sm:$0xff] %v7402_v52  ;;  %v3134_v26 = vsub.f32 1.5, %v3133_v1  ;;  %v3162_v30 = vmul.f32 %v7370_v11, %v3161_v53  ;;  %v7420_v9 = vmul.f32 %v3517_v3, %v3119_v41  ;;  %v3144_v19 = vsub.f32 1.5, %v3143_v42  ;;  %v3524_v42 = vld [vmem:[%s9046_s2 + $0xc0] sm:$0xff]  ;;  %v3519_v41 = vld [vmem:[%s9046_s2 + $0x98] sm:$0xff] }
 0x588   : > { %v7319_v37 = vpop.xlane.xlu0 %2763  ;;  %v2856_v50 = vmul.f32 %v7202_v0, %v6465_v23  ;;  %v3185_v51 = vmul.f32 %v7289_v13, %v3184_v25  ;;  %v2861_v1 = vmul.f32 %v7240_v57, %v6465_v23  ;;  %vm3136_vm7 = vweird.f32 %v7254_v63 }
 0x589   : > { %3887 = vperm.xlu0 %4667, %v7379_v10   ;;  %9440 = vst [vmem:[#allocation161_spill] sm:$0xff] %v7420_v9  ;;  %v3212_v10 = vmul.f32 %v7375_v16, %v3211_v58  ;;  %v3172_v0 = vmul.f32 %v7390_v20, %v3171_v49  ;;  %v7445_v44 = vadd.f32 1e-05, %v2857_v47  ;;  %v3163_v57 = vmul.f32 0.5, %v3162_v30  ;;  %vm3138_vm9 = vmor %vm3136_vm7, %vm3137_vm4 }
 0x58a   : > { %v7424_v43 = vpop.eup %4722  ;;  %v3189_v58 = vsel %vm3188_vm8, %v7289_v13, %v3185_v51  ;;  %v3135_v3 = vmul.f32 %v7305_v56, %v3134_v26  ;;  %v7458_v47 = vadd.f32 1e-05, %v2856_v50  ;;  %v7465_v26 = vadd.f32 1e-05, %v2861_v1 }
 0x58b   : > { %v7438_v53 = vpop.eup %4724  ;;  %v3241_v25 = vmul.f32 %v7424_v43, %v7360_v5  ;;  %v3213_v49 = vmul.f32 0.5, %v3212_v10  ;;  %v7460_v30 = vmul.f32 %v3524_v42, %v3189_v58  ;;  %vm3147_vm10 = vweird.f32 %v7297_v8 }
 0x58c   : > { %3862 = vperm.xlu2 %4666, %v7402_v52   ;;  %v7454_v63 = vpop.eup %4726  ;;  %v3201_v13 = vmul.f32 %v7438_v53, %v7372_v45  ;;  %v3139_v51 = vsel %vm3138_vm9, %v7305_v56, %v3135_v3  ;;  %v3173_v18 = vmul.f32 0.5, %v3172_v0  ;;  %4728 = vrsqrt.f32 %v7445_v44  ;;  %vm3148_vm11 = vmor %vm3146_vm6, %vm3147_vm10  ;;  %v3520_v56 = vld [vmem:[%s9046_s2 + $0xa0] sm:$0xff] }
 0x58d   : > { %3867 = vperm.xlu1 %4665, %v7420_v9   ;;  %9441 = vst [vmem:[#allocation162_spill] sm:$0xff] %v7460_v30  ;;  %v3145_v9 = vmul.f32 %v7297_v8, %v3144_v19  ;;  %v2860_v10 = vmul.f32 %v7279_v32, %v6465_v23  ;;  %v7475_v50 = vmul.f32 %v3519_v41, %v3139_v51  ;;  %v3164_v58 = vsub.f32 1.5, %v3163_v57 }
 0x58e   : > { %v3191_v1 = vmul.f32 %v7454_v63, %v7387_v61  ;;  %v3242_v42 = vmul.f32 %v7424_v43, %v3241_v25  ;;  %v2859_v32 = vmul.f32 %v7263_v24, %v6465_v23  ;;  %v3214_v3 = vsub.f32 1.5, %v3213_v49 }
 0x58f   : > { %v7348_v2 = vpop.xlane.xlu2 %2778  ;;  %v7422_v48 = vpop.xlane.xlu1 %2775  ;;  %9442 = vst [vmem:[#allocation163_spill] sm:$0xff] %v7475_v50  ;;  %v3149_v0 = vsel %vm3148_vm11, %v7297_v8, %v3145_v9  ;;  %4730 = vrsqrt.f32 %v7458_v47  ;;  %v2864_v40 = vmul.f32 %v7287_v38, %v6465_v23  ;;  %vm3167_vm12 = vweird.f32 %v7370_v11 }
 0x590   : > { %v7397_v17 = vpop.xlane.xlu0 %2772  ;;  %v3202_v41 = vmul.f32 %v7438_v53, %v3201_v13  ;;  %4732 = vrsqrt.f32 %v7465_v26  ;;  %v7497_v25 = vmul.f32 %v3520_v56, %v3149_v0  ;;  %vm3166_vm13 = vweird.f32 %v7294_v55  ;;  %v3527_v56 = vld [vmem:[%s9046_s2 + $0xd8] sm:$0xff] }
 0x591   : > { %3902 = vperm.xlu0 %4667, %v7460_v30   ;;  %vm3217_vm14 = vweird.f32 %v7375_v16  ;;  %v7503_v8 = vadd.f32 1e-05, %v2860_v10  ;;  %vm3216_vm15 = vweird.f32 %v7300_v59  ;;  %v3192_v38 = vmul.f32 %v7454_v63, %v3191_v1  ;;  %vm7514_vm0 = vmor %vm3166_vm13, %vm3167_vm12 }
 0x592   : > { %9443 = vst [vmem:[#allocation164_spill] sm:$0xff] %v7497_v25  ;;  %v3243_v9 = vmul.f32 0.5, %v3242_v42  ;;  %v7507_v57 = vadd.f32 1e-05, %v2859_v32  ;;  %v7510_v49 = vpop.eup %4728  ;;  %v3174_v13 = vsub.f32 1.5, %v3173_v18  ;;  %v3215_v10 = vmul.f32 %v7375_v16, %v3214_v3  ;;  %vm3218_vm4 = vmor %vm3216_vm15, %vm3217_vm14  ;;  %v3522_v32 = vld [vmem:[%s9046_s2 + $0xb0] sm:$0xff] }
 0x593   : > { %v7518_v51 = vadd.f32 1e-05, %v2864_v40  ;;  %v3165_v1 = vmul.f32 %v7370_v11, %v3164_v58  ;;  %vm3176_vm2 = vweird.f32 %v7311_v46  ;;  %vm3177_vm3 = vweird.f32 %v7390_v20 }
 0x594   : > { %3877 = vperm.xlu2 %4666, %v7475_v50   ;;  %v7527_v18 = vmul.f32 0.5, %v3202_v41  ;;  %v2863_v42 = vmul.f32 %v7354_v31, %v6465_v23  ;;  %4734 = vrsqrt.f32 %v7503_v8  ;;  %v2862_v58 = vmul.f32 %v7319_v37, %v6465_v23  ;;  %vm3178_vm5 = vmor %vm3176_vm2, %vm3177_vm3 }
 0x595   : > { %3882 = vperm.xlu1 %4665, %v7497_v25   ;;  %v7538_v0 = vpop.eup %4730  ;;  %v3219_v3 = vsel %vm3218_vm4, %v7375_v16, %v3215_v10  ;;  %v3169_v59 = vsel %vm7514_vm0, %v7370_v11, %v3165_v1  ;;  %v3193_v31 = vmul.f32 0.5, %v3192_v38  ;;  %v3244_v41 = vsub.f32 1.5, %v3243_v9  ;;  %v3523_v11 = vld [vmem:[%s9046_s2 + $0xb8] sm:$0xff] }
 0x596   : > { %v7547_v40 = vpop.eup %4732  ;;  %4736 = vrsqrt.f32 %v7507_v57  ;;  %v7550_v30 = vmul.f32 %v3527_v56, %v3219_v3  ;;  %v3231_v50 = vmul.f32 %v7510_v49, %v7445_v44  ;;  %v7557_v37 = vmul.f32 %v3522_v32, %v3169_v59 }
 0x597   : > { %v7409_v4 = vpop.xlane.xlu2 %2787  ;;  %v7499_v24 = vpop.xlane.xlu1 %2784  ;;  %4738 = vrsqrt.f32 %v7518_v51  ;;  %v3175_v16 = vmul.f32 %v7390_v20, %v3174_v13  ;;  %vm3247_vm6 = vweird.f32 %v7424_v43  ;;  %v3221_v9 = vmul.f32 %v7538_v0, %v7458_v47 }
 0x598   : > { %v7469_v52 = vpop.xlane.xlu0 %2781  ;;  %9446 = vst [vmem:[#allocation165_spill] sm:$0xff] %v7550_v30  ;;  %v7572_v55 = vadd.f32 1e-05, %v2863_v42  ;;  %v2867_v13 = vmul.f32 %v7348_v2, %v6465_v23  ;;  %v3271_v10 = vmul.f32 %v7547_v40, %v7465_v26  ;;  %v7579_v56 = vadd.f32 1e-05, %v2862_v58 }
 0x599   : > { %9447 = vst [vmem:[#allocation166_spill] sm:$0xff] %v7557_v37  ;;  %3917 = vperm.xlu0 %4667, %v7550_v30   ;;  %v2865_v46 = vmul.f32 %v7397_v17, %v6465_v23  ;;  %v3179_v1 = vsel %vm3178_vm5, %v7390_v20, %v3175_v16  ;;  %vm3207_vm7 = vweird.f32 %v7438_v53  ;;  %v3245_v2 = vmul.f32 %v7424_v43, %v3244_v41  ;;  %v3526_v16 = vld [vmem:[%s9046_s2 + $0xd0] sm:$0xff] }
 0x59a   : > { %v7586_v42 = vmul.f32 %v3523_v11, %v3179_v1  ;;  %v7591_v3 = vpop.eup %4734  ;;  %v3204_v58 = vsub.f32 1.5, %v7527_v18  ;;  %v3194_v59 = vsub.f32 1.5, %v3193_v31  ;;  %vm3246_vm8 = vweird.f32 %v7360_v5  ;;  %v3530_v5 = vld [vmem:[%s9046_s2 + $0xf0] sm:$0xff] }
 0x59b   : > { %v2866_v17 = vmul.f32 %v7422_v48, %v6465_v23  ;;  %v3232_v20 = vmul.f32 %v7510_v49, %v3231_v50  ;;  %vm7602_vm9 = vmor %vm3246_vm8, %vm3247_vm6  ;;  %v3222_v41 = vmul.f32 %v7538_v0, %v3221_v9  ;;  %4740 = vrsqrt.f32 %v7572_v55 }
 0x59c   : > { %3892 = vperm.xlu2 %4666, %v7557_v37   ;;  %9448 = vst [vmem:[#allocation167_spill] sm:$0xff] %v7586_v42  ;;  %v7597_v30 = vpop.eup %4736  ;;  %v7608_v18 = vadd.f32 1e-05, %v2867_v13  ;;  %v3272_v50 = vmul.f32 %v7547_v40, %v3271_v10  ;;  %4742 = vrsqrt.f32 %v7579_v56  ;;  %v7618_v31 = vadd.f32 1e-05, %v2865_v46 }
 0x59d   : > { %3897 = vperm.xlu1 %4665, %v7586_v42   ;;  %v7614_v48 = vpop.eup %4738  ;;  %v3249_v11 = vsel %vm7602_vm9, %v7424_v43, %v3245_v2  ;;  %vm3206_vm10 = vweird.f32 %v7372_v45  ;;  %vm3196_vm11 = vweird.f32 %v7387_v61  ;;  %vm3197_vm12 = vweird.f32 %v7454_v63  ;;  %v3525_v2 = vld [vmem:[%s9046_s2 + $0xc8] sm:$0xff] }
 0x59e   : > { %v2870_v9 = vmul.f32 %v7409_v4, %v6465_v23  ;;  %v3261_v13 = vmul.f32 %v7591_v3, %v7503_v8  ;;  %v3251_v10 = vmul.f32 %v7597_v30, %v7507_v57  ;;  %v7632_v46 = vadd.f32 1e-05, %v2866_v17  ;;  %vm7638_vm13 = vmor %vm3206_vm10, %vm3207_vm7 }
 0x59f   : > { %v7482_v19 = vpop.xlane.xlu2 %2796  ;;  %v7588_v32 = vpop.xlane.xlu1 %2793  ;;  %v7634_v1 = vmul.f32 %v3530_v5, %v3249_v11  ;;  %v3301_v43 = vmul.f32 %v7614_v48, %v7518_v51  ;;  %4744 = vrsqrt.f32 %v7608_v18  ;;  %v3195_v4 = vmul.f32 %v7454_v63, %v3194_v59  ;;  %vm3198_vm14 = vmor %vm3196_vm11, %vm3197_vm12 }
 0x5a0   : > { %v7552_v25 = vpop.xlane.xlu0 %2790  ;;  %v3205_v17 = vmul.f32 %v7438_v53, %v3204_v58  ;;  %v3233_v11 = vmul.f32 0.5, %v3232_v20  ;;  %v3223_v42 = vmul.f32 0.5, %v3222_v41  ;;  %v3273_v37 = vmul.f32 0.5, %v3272_v50 }
 0x5a1   : > { %9451 = vst [vmem:[#allocation168_spill] sm:$0xff] %v7634_v1  ;;  %4746 = vrsqrt.f32 %v7618_v31  ;;  %3932 = vperm.xlu0 %4667, %v7634_v1   ;;  %v7661_v36 = vpop.eup %4740  ;;  %vm3236_vm15 = vweird.f32 %v7445_v44  ;;  %v7664_v58 = vadd.f32 1e-05, %v2870_v9  ;;  %v3199_v33 = vsel %vm3198_vm14, %v7454_v63, %v3195_v4 }
 0x5a2   : > { %v3209_v61 = vsel %vm7638_vm13, %v7438_v53, %v3205_v17  ;;  %v7670_v20 = vpop.eup %4742  ;;  %vm3237_vm0 = vweird.f32 %v7510_v49  ;;  %4748 = vrsqrt.f32 %v7632_v46  ;;  %v7674_v41 = vmul.f32 %v3525_v2, %v3199_v33 }
 0x5a3   : > { %v7676_v50 = vmul.f32 %v3526_v16, %v3209_v61  ;;  %v3262_v1 = vmul.f32 %v7591_v3, %v3261_v13  ;;  %v3252_v9 = vmul.f32 %v7597_v30, %v3251_v10  ;;  %v3302_v63 = vmul.f32 %v7614_v48, %v3301_v43  ;;  %vm7708_vm6 = vmor %vm3236_vm15, %vm3237_vm0 }
 0x5a4   : > { %9454 = vst [vmem:[#allocation169_spill] sm:$0xff] %v7674_v41  ;;  %v2869_v45 = vmul.f32 %v7499_v24, %v6465_v23  ;;  %v3234_v4 = vsub.f32 1.5, %v3233_v11  ;;  %v3224_v17 = vsub.f32 1.5, %v3223_v42  ;;  %vm3227_vm2 = vweird.f32 %v7538_v0  ;;  %3907 = vperm.xlu2 %4666, %v7674_v41  }
 0x5a5   : > { %9455 = vst [vmem:[#allocation170_spill] sm:$0xff] %v7676_v50  ;;  %v3274_v60 = vsub.f32 1.5, %v3273_v37  ;;  %3912 = vperm.xlu1 %4665, %v7676_v50   ;;  %v7688_v33 = vpop.eup %4744  ;;  %v3291_v13 = vmul.f32 %v7661_v36, %v7572_v55  ;;  %v3281_v10 = vmul.f32 %v7670_v20, %v7579_v56  ;;  %4750 = vrsqrt.f32 %v7664_v58 }
 0x5a6   : > { %v2873_v24 = vmul.f32 %v7482_v19, %v6465_v23  ;;  %vm3226_vm3 = vweird.f32 %v7458_v47  ;;  %vm3276_vm4 = vweird.f32 %v7465_v26  ;;  %vm3277_vm5 = vweird.f32 %v7547_v40 }
 0x5a7   : > { %v7563_v38 = vpop.xlane.xlu2 %2805  ;;  %v7683_v53 = vpop.xlane.xlu1 %2802  ;;  %v2868_v37 = vmul.f32 %v7469_v52, %v6465_v23  ;;  %v7712_v19 = vmul.f32 0.5, %v3262_v1  ;;  %v7714_v2 = vmul.f32 0.5, %v3252_v9  ;;  %v3303_v47 = vmul.f32 0.5, %v3302_v63  ;;  %vm7722_vm7 = vmor %vm3226_vm3, %vm3227_vm2  ;;  %v3533_v1 = vld [vmem:[%s9046_s2 + $0x108] sm:$0xff]  ;;  %v3528_v63 = vld [vmem:[%s9046_s2 + $0xe0] sm:$0xff] }
 0x5a8   : > { %v7653_v5 = vpop.xlane.xlu0 %2799  ;;  %v7697_v42 = vpop.eup %4746  ;;  %v7716_v16 = vadd.f32 1e-05, %v2869_v45  ;;  %v3331_v44 = vmul.f32 %v7688_v33, %v7608_v18  ;;  %v3275_v61 = vmul.f32 %v7547_v40, %v3274_v60  ;;  %v3225_v9 = vmul.f32 %v7538_v0, %v3224_v17  ;;  %vm7743_vm8 = vmor %vm3276_vm4, %vm3277_vm5 }
 0x5a9   : > { %v7718_v11 = vpop.eup %4748  ;;  %v3235_v45 = vmul.f32 %v7510_v49, %v3234_v4  ;;  %v3292_v41 = vmul.f32 %v7661_v36, %v3291_v13  ;;  %v3282_v17 = vmul.f32 %v7670_v20, %v3281_v10  ;;  %v3311_v14 = vmul.f32 %v7697_v42, %v7618_v31  ;;  %v3529_v4 = vld [vmem:[%s9046_s2 + $0xe8] sm:$0xff] }
 0x5aa   : > { %v7751_v7 = vadd.f32 1e-05, %v2873_v24  ;;  %v7758_v26 = vadd.f32 1e-05, %v2868_v37  ;;  %v3279_v27 = vsel %vm7743_vm8, %v7547_v40, %v3275_v61  ;;  %v3229_v13 = vsel %vm7722_vm7, %v7538_v0, %v3225_v9 }
 0x5ab   : > { %v3239_v10 = vsel %vm7708_vm6, %v7510_v49, %v3235_v45  ;;  %v7769_v24 = vpop.eup %4750  ;;  %vm3267_vm9 = vweird.f32 %v7591_v3  ;;  %vm3256_vm10 = vweird.f32 %v7507_v57  ;;  %v3321_v37 = vmul.f32 %v7718_v11, %v7632_v46 }
 0x5ac   : > { %4752 = vrsqrt.f32 %v7716_v16  ;;  %v7776_v40 = vmul.f32 %v3533_v1, %v3279_v27  ;;  %v7778_v61 = vmul.f32 %v3528_v63, %v3229_v13  ;;  %v3264_v0 = vsub.f32 1.5, %v7712_v19 }
 0x5ad   : > { %v3304_v52 = vsub.f32 1.5, %v3303_v47  ;;  %v3332_v49 = vmul.f32 %v7688_v33, %v3331_v44  ;;  %v7782_v43 = vmul.f32 %v3529_v4, %v3239_v10  ;;  %vm3266_vm11 = vweird.f32 %v7503_v8 }
 0x5ae   : > { %9462 = vst [vmem:[#allocation171_spill] sm:$0xff] %v7776_v40  ;;  %v7785_v9 = vmul.f32 0.5, %v3292_v41  ;;  %v3312_v45 = vmul.f32 %v7697_v42, %v3311_v14  ;;  %4754 = vrsqrt.f32 %v7751_v7  ;;  %v2876_v27 = vmul.f32 %v7563_v38, %v6465_v23  ;;  %3947 = vperm.xlu0 %4667, %v7776_v40   ;;  %3922 = vperm.xlu2 %4666, %v7778_v61   ;;  %vm7870_vm7 = vmor %vm3266_vm11, %vm3267_vm9 }
 0x5af   : > { %v7659_v59 = vpop.xlane.xlu2 %2814  ;;  %v7793_v19 = vpop.xlane.xlu1 %2811  ;;  %v7795_v47 = vmul.f32 0.5, %v3282_v17  ;;  %v3361_v44 = vmul.f32 %v7769_v24, %v7664_v58  ;;  %4756 = vrsqrt.f32 %v7758_v26  ;;  %v2872_v14 = vmul.f32 %v7588_v32, %v6465_v23  ;;  %3927 = vperm.xlu1 %4665, %v7782_v43  }
 0x5b0   : > { %v7756_v12 = vpop.xlane.xlu0 %2808  ;;  %v3254_v38 = vsub.f32 1.5, %v7714_v2  ;;  %vm3307_vm12 = vweird.f32 %v7614_v48  ;;  %v3322_v41 = vmul.f32 %v7718_v11, %v3321_v37  ;;  %v2871_v1 = vmul.f32 %v7552_v25, %v6465_v23  ;;  %v3536_v25 = vld [vmem:[%s9046_s2 + $0x120] sm:$0xff] }
 0x5b1   : > { %vm3257_vm13 = vweird.f32 %v7597_v30  ;;  %vm3306_vm14 = vweird.f32 %v7518_v51  ;;  %v3333_v63 = vmul.f32 0.5, %v3332_v49  ;;  %v3305_v60 = vmul.f32 %v7614_v48, %v3304_v52 }
 0x5b2   : > { %v7813_v32 = vpop.eup %4752  ;;  %v3294_v2 = vsub.f32 1.5, %v7785_v9  ;;  %vm3287_vm15 = vweird.f32 %v7670_v20  ;;  %v3313_v4 = vmul.f32 0.5, %v3312_v45  ;;  %v7817_v13 = vadd.f32 1e-05, %v2876_v27  ;;  %vm7825_vm2 = vmor %vm3306_vm14, %vm3307_vm12 }
 0x5b3   : > { %vm3297_vm0 = vweird.f32 %v7661_v36  ;;  %v3284_v10 = vsub.f32 1.5, %v7795_v47  ;;  %vm3336_vm3 = vweird.f32 %v7608_v18  ;;  %v3362_v37 = vmul.f32 %v7769_v24, %v3361_v44  ;;  %v3531_v44 = vld [vmem:[%s9046_s2 + $0xf8] sm:$0xff]  ;;  %vm3258_vm5 = vmor %vm3256_vm10, %vm3257_vm13 }
 0x5b4   : > { %v7832_v52 = vadd.f32 1e-05, %v2872_v14  ;;  %v7834_v49 = vpop.eup %4754  ;;  %vm3286_vm4 = vweird.f32 %v7579_v56  ;;  %v7837_v9 = vmul.f32 0.5, %v3322_v41  ;;  %v7839_v45 = vadd.f32 1e-05, %v2871_v1  ;;  %v3534_v56 = vld [vmem:[%s9046_s2 + $0x110] sm:$0xff] }
 0x5b5   : > { %v3309_v27 = vsel %vm7825_vm2, %v7614_v48, %v3305_v60  ;;  %v3255_v47 = vmul.f32 %v7597_v30, %v3254_v38  ;;  %vm3296_vm6 = vweird.f32 %v7572_v55  ;;  %v3334_v41 = vsub.f32 1.5, %v3333_v63  ;;  %vm7938_vm13 = vmor %vm3286_vm4, %vm3287_vm15 }
 0x5b6   : > { %v3351_v48 = vmul.f32 %v7813_v32, %v7716_v16  ;;  %v7859_v38 = vmul.f32 %v3536_v25, %v3309_v27  ;;  %v3265_v1 = vmul.f32 %v7591_v3, %v3264_v0  ;;  %v3314_v60 = vsub.f32 1.5, %v3313_v4  ;;  %vm7960_vm15 = vmor %vm3296_vm6, %vm3297_vm0 }
 0x5b7   : > { %v7737_v50 = vpop.xlane.xlu2 %2823  ;;  %4758 = vrsqrt.f32 %v7817_v13  ;;  %v2879_v51 = vmul.f32 %v7659_v59, %v6465_v23  ;;  %v3259_v40 = vsel %vm3258_vm5, %v7597_v30, %v3255_v47  ;;  %v3363_v63 = vmul.f32 0.5, %v3362_v37  ;;  %v3532_v30 = vld [vmem:[%s9046_s2 + $0x100] sm:$0xff]  ;;  %v7891_v37 = vpop.xlane.xlu1 %2820 }
 0x5b8   : > { %v7848_v14 = vpop.xlane.xlu0 %2817  ;;  %9466 = vst [vmem:[#allocation173_spill] sm:$0xff] %v7859_v38  ;;  %4760 = vrsqrt.f32 %v7832_v52  ;;  %v3391_v0 = vmul.f32 %v7834_v49, %v7751_v7  ;;  %3962 = vperm.xlu0 %4667, %v7859_v38   ;;  %v7878_v4 = vmul.f32 %v3531_v44, %v3259_v40  ;;  %v2874_v59 = vmul.f32 %v7653_v5, %v6465_v23 }
 0x5b9   : > { %4762 = vrsqrt.f32 %v7839_v45  ;;  %v3269_v25 = vsel %vm7870_vm7, %v7591_v3, %v3265_v1  ;;  %v3335_v40 = vmul.f32 %v7688_v33, %v3334_v41  ;;  %vm3337_vm8 = vweird.f32 %v7688_v33 }
 0x5ba   : > { %v3352_v27 = vmul.f32 %v7813_v32, %v3351_v48  ;;  %v2875_v47 = vmul.f32 %v7683_v53, %v6465_v23  ;;  %3937 = vperm.xlu2 %4666, %v7878_v4   ;;  %v3295_v5 = vmul.f32 %v7661_v36, %v3294_v2  ;;  %v3285_v57 = vmul.f32 %v7670_v20, %v3284_v10  ;;  %vm7920_vm11 = vmor %vm3336_vm3, %vm3337_vm8 }
 0x5bb   : > { %v7903_v3 = vadd.f32 1e-05, %v2879_v51  ;;  %v7905_v1 = vmul.f32 %v3532_v30, %v3269_v25  ;;  %v3324_v41 = vsub.f32 1.5, %v7837_v9  ;;  %vm3316_vm9 = vweird.f32 %v7618_v31 }
 0x5bc   : > { %vm3317_vm10 = vweird.f32 %v7697_v42  ;;  %v3364_v48 = vsub.f32 1.5, %v3363_v63  ;;  %v3392_v53 = vmul.f32 %v7834_v49, %v3391_v0  ;;  %v7925_v9 = vmul.f32 %v7697_v42, %v3314_v60 }
 0x5bd   : > { %9470 = vst [vmem:[#allocation175_spill] sm:$0xff] %v7905_v1  ;;  %vm3366_vm12 = vweird.f32 %v7664_v58  ;;  %v7929_v63 = vadd.f32 1e-05, %v2874_v59  ;;  %3942 = vperm.xlu1 %4665, %v7905_v1   ;;  %vm3326_vm14 = vweird.f32 %v7632_v46  ;;  %v7943_v60 = vmul.f32 0.5, %v3352_v27  ;;  %v3542_v58 = vld [vmem:[%s9046_s2 + $0x150] sm:$0xff]  ;;  %vm8029_vm5 = vmor %vm3316_vm9, %vm3317_vm10 }
 0x5be   : > { %vm3367_vm2 = vweird.f32 %v7769_v24  ;;  %v7946_v30 = vadd.f32 1e-05, %v2875_v47  ;;  %4764 = vrsqrt.f32 %v7903_v3  ;;  %v2882_v27 = vmul.f32 %v7737_v50, %v6465_v23  ;;  %v3535_v50 = vld [vmem:[%s9046_s2 + $0x118] sm:$0xff] }
 0x5bf   : > { %v7811_v17 = vpop.permute.xlu2 %3787  ;;  %v3365_v10 = vmul.f32 %v7769_v24, %v3364_v48  ;;  %v3393_v55 = vmul.f32 0.5, %v3392_v53  ;;  %v3299_v1 = vsel %vm7960_vm15, %v7661_v36, %v3295_v5  ;;  %4766 = vrsqrt.f32 %v7929_v63  ;;  %vm8006_vm3 = vmor %vm3366_vm12, %vm3367_vm2 }
 0x5c0   : > { %9463 = vst [vmem:[#allocation172_spill] sm:$0xff] %v7811_v17  ;;  %v7850_v17 = vpop.eup %4756  ;;  %v7972_v47 = vpop.xlane.xlu0 %2826  ;;  %4768 = vrsqrt.f32 %v7946_v30  ;;  %v2878_v5 = vmul.f32 %v7793_v19, %v6465_v23  ;;  %vm3327_vm0 = vweird.f32 %v7718_v11  ;;  %vm3346_vm4 = vweird.f32 %v7758_v26 }
 0x5c1   : > { %v3341_v8 = vmul.f32 %v7850_v17, %v7758_v26  ;;  %v7914_v2 = vpop.eup %4758  ;;  %v3394_v19 = vsub.f32 1.5, %v3393_v55  ;;  %v3369_v25 = vsel %vm8006_vm3, %v7769_v24, %v3365_v10  ;;  %vm3347_vm6 = vweird.f32 %v7850_v17  ;;  %vm8055_vm7 = vmor %vm3326_vm14, %vm3327_vm0 }
 0x5c2   : > { %v7932_v0 = vpop.eup %4760  ;;  %v3421_v38 = vmul.f32 %v7914_v2, %v7817_v13  ;;  %v3319_v31 = vsel %vm8029_vm5, %v7697_v42, %v7925_v9  ;;  %vm3396_vm8 = vweird.f32 %v7751_v7  ;;  %vm3397_vm9 = vweird.f32 %v7834_v49 }
 0x5c3   : > { %v3342_v51 = vmul.f32 %v7850_v17, %v3341_v8  ;;  %v3339_v8 = vsel %vm7920_vm11, %v7688_v33, %v3335_v40  ;;  %v7954_v59 = vpop.eup %4762  ;;  %v3289_v40 = vsel %vm7938_vm13, %v7670_v20, %v3285_v57  ;;  %v2877_v20 = vmul.f32 %v7756_v12, %v6465_v23  ;;  %vm8094_vm11 = vmor %vm3396_vm8, %vm3397_vm9 }
 0x5c4   : > { %v7987_v57 = vmul.f32 %v3534_v56, %v3289_v40  ;;  %v3381_v53 = vmul.f32 %v7932_v0, %v7832_v52  ;;  %v3371_v36 = vmul.f32 %v7954_v59, %v7839_v45  ;;  %v3325_v12 = vmul.f32 %v7718_v11, %v3324_v41  ;;  %v8023_v40 = vpop.eup %4764  ;;  %vm8122_vm13 = vmor %vm3346_vm4, %vm3347_vm6 }
 0x5c5   : > { %v8013_v56 = vmul.f32 %v3535_v50, %v3299_v1  ;;  %v3422_v41 = vmul.f32 %v7914_v2, %v3421_v38  ;;  %v3354_v38 = vsub.f32 1.5, %v7943_v60  ;;  %v8035_v24 = vadd.f32 1e-05, %v2877_v20  ;;  %v3537_v60 = vld [vmem:[%s9046_s2 + $0x128] sm:$0xff]  ;;  %v3538_v1 = vld [vmem:[%s9046_s2 + $0x130] sm:$0xff] }
 0x5c6   : > { %3952 = vperm.xlu2 %4666, %v7987_v57   ;;  %v3382_v10 = vmul.f32 %v7932_v0, %v3381_v53  ;;  %v3372_v55 = vmul.f32 %v7954_v59, %v3371_v36  ;;  %v8040_v50 = vadd.f32 1e-05, %v2878_v5  ;;  %v8062_v42 = vmul.f32 %v3542_v58, %v3369_v25 }
 0x5c7   : > { %v7899_v44 = vpop.permute.xlu2 %3797  ;;  %3957 = vperm.xlu1 %4665, %v8013_v56   ;;  %v3395_v36 = vmul.f32 %v7834_v49, %v3394_v19  ;;  %v3423_v5 = vmul.f32 0.5, %v3422_v41  ;;  %v3451_v46 = vmul.f32 %v8023_v40, %v7903_v3  ;;  %v3329_v18 = vsel %vm8055_vm7, %v7718_v11, %v3325_v12 }
 0x5c8   : > { %9469 = vst [vmem:[#allocation174_spill] sm:$0xff] %v7899_v44  ;;  %v3539_v44 = vld [vmem:[%s9046_s2 + $0x138] sm:$0xff]  ;;  %v2880_v58 = vmul.f32 %v7848_v14, %v6465_v23  ;;  %v8082_v19 = vmul.f32 %v3537_v60, %v3319_v31  ;;  %v3383_v41 = vmul.f32 0.5, %v3382_v10  ;;  %vm3357_vm10 = vweird.f32 %v7813_v32 }
 0x5c9   : > { %v7967_v33 = vmul.f32 %v3539_v44, %v3339_v8  ;;  %v3343_v44 = vmul.f32 0.5, %v3342_v51  ;;  %v8010_v8 = vadd.f32 1e-05, %v2882_v27  ;;  %9484 = vst [vmem:[#allocation177_spill] sm:$0xff] %v8062_v42  ;;  %v2881_v10 = vmul.f32 %v7891_v37, %v6465_v23 }
 0x5ca   : > { %v3355_v60 = vmul.f32 %v7813_v32, %v3354_v38  ;;  %v3424_v20 = vsub.f32 1.5, %v3423_v5  ;;  %v3452_v7 = vmul.f32 %v8023_v40, %v3451_v46  ;;  %vm3356_vm12 = vweird.f32 %v7716_v16  ;;  %v3540_v46 = vld [vmem:[%s9046_s2 + $0x140] sm:$0xff] }
 0x5cb   : > { %3977 = vperm.xlu0 %4667, %v7967_v33   ;;  %v3344_v27 = vsub.f32 1.5, %v3343_v44  ;;  %v8049_v44 = vpop.eup %4766  ;;  %4770 = vrsqrt.f32 %v8010_v8  ;;  %vm3387_vm14 = vweird.f32 %v7932_v0  ;;  %vm3376_vm2 = vweird.f32 %v7839_v45  ;;  %vm8142_vm15 = vmor %vm3356_vm12, %vm3357_vm10  ;;  %v3543_v45 = vld [vmem:[%s9046_s2 + $0x158] sm:$0xff] }
 0x5cc   : > { %v8066_v53 = vpop.eup %4768  ;;  %4772 = vrsqrt.f32 %v8035_v24  ;;  %v3401_v11 = vmul.f32 %v8049_v44, %v7929_v63  ;;  %vm3427_vm0 = vweird.f32 %v7914_v2  ;;  %v3359_v38 = vsel %vm8142_vm15, %v7813_v32, %v3355_v60 }
 0x5cd   : > { %v3345_v25 = vmul.f32 %v7850_v17, %v3344_v27  ;;  %4774 = vrsqrt.f32 %v8040_v50  ;;  %v3411_v27 = vmul.f32 %v8066_v53, %v7946_v30  ;;  %vm3377_vm3 = vweird.f32 %v7954_v59 }
 0x5ce   : > { %3967 = vperm.xlu2 %4666, %v8082_v19   ;;  %v3402_v16 = vmul.f32 %v8049_v44, %v3401_v11  ;;  %v3453_v11 = vmul.f32 0.5, %v3452_v7  ;;  %vm3426_vm4 = vweird.f32 %v7817_v13  ;;  %vm8202_vm6 = vmor %vm3376_vm2, %vm3377_vm3  ;;  %vm3386_vm7 = vweird.f32 %v7832_v52 }
 0x5cf   : > { %v7989_v48 = vpop.permute.xlu1 %3782  ;;  %v7998_v51 = vpop.permute.xlu2 %3807  ;;  %v3349_v26 = vsel %vm8122_vm13, %v7850_v17, %v3345_v25  ;;  %v3425_v25 = vmul.f32 %v7914_v2, %v3424_v20  ;;  %vm8180_vm5 = vmor %vm3426_vm4, %vm3427_vm0  ;;  %vm3457_vm9 = vweird.f32 %v8023_v40  ;;  %vm3407_vm10 = vweird.f32 %v8049_v44 }
 0x5d0   : > { %9477 = vst [vmem:[#allocation176_spill] sm:$0xff] %v7989_v48  ;;  %v3373_v48 = vmul.f32 0.5, %v3372_v55  ;;  %v8103_v55 = vmul.f32 %v3538_v1, %v3329_v18  ;;  %v3403_v32 = vmul.f32 0.5, %v3402_v16  ;;  %v3454_v16 = vsub.f32 1.5, %v3453_v11  ;;  %vm8223_vm8 = vmor %vm3386_vm7, %vm3387_vm14 }
 0x5d1   : > { %v8115_v37 = vpop.eup %4770  ;;  %vm3417_vm12 = vweird.f32 %v8066_v53  ;;  %vm3406_vm13 = vweird.f32 %v7929_v63  ;;  %vm3416_vm15 = vweird.f32 %v7946_v30 }
 0x5d2   : > { %3972 = vperm.xlu1 %4665, %v8103_v55   ;;  %v3374_v5 = vsub.f32 1.5, %v3373_v48  ;;  %v8138_v18 = vpop.eup %4772  ;;  %v3412_v48 = vmul.f32 %v8066_v53, %v3411_v27  ;;  %v3481_v14 = vmul.f32 %v8115_v37, %v8010_v8  ;;  %v3541_v27 = vld [vmem:[%s9046_s2 + $0x148] sm:$0xff]  ;;  %vm8275_vm2 = vmor %vm3406_vm13, %vm3407_vm10  ;;  %vm3487_vm3 = vweird.f32 %v8115_v37 }
 0x5d3   : > { %v8064_v9 = vpop.permute.xlu0 %3792  ;;  %3992 = vperm.xlu0 %4667, %v8062_v42   ;;  %v3545_v42 = vld [vmem:[%s9046_s2 + $0x168] sm:$0xff]  ;;  %v8152_v17 = vpop.eup %4774  ;;  %v3431_v60 = vmul.f32 %v8138_v18, %v8035_v24  ;;  %v8188_v13 = vmul.f32 %v3541_v27, %v3359_v38  ;;  %v3544_v38 = vld [vmem:[%s9046_s2 + $0x160] sm:$0xff]  ;;  %vm8292_vm0 = vmor %vm3416_vm15, %vm3417_vm12  ;;  %vm3437_vm4 = vweird.f32 %v8138_v18  ;;  %vm3446_vm10 = vweird.f32 %v8040_v50 }
 0x5d4   : > { %v3375_v20 = vmul.f32 %v7954_v59, %v3374_v5  ;;  %v3413_v1 = vmul.f32 0.5, %v3412_v48  ;;  %v3548_v48 = vld [vmem:[%s9046_s2 + $0x180] sm:$0xff] }
 0x5d6   : > { %v3414_v52 = vsub.f32 1.5, %v3413_v1 }
 0x5d7   : > { %v8087_v12 = vpop.permute.xlu2 %3817  ;;  %v8105_v31 = vpop.permute.xlu1 %3802 }
 0x5d8   : > { %9485 = vst [vmem:[#allocation178_spill] sm:$0xff] %v8087_v12  ;;  %v3399_v12 = vsel %vm8094_vm11, %v7834_v49, %v3395_v36  ;;  %v8128_v49 = vadd.f32 1e-05, %v2880_v58  ;;  %v3384_v36 = vsub.f32 1.5, %v3383_v41  ;;  %v8148_v58 = vadd.f32 1e-05, %v2881_v10 }
 0x5d9   : > { %v8150_v41 = vmul.f32 %v3545_v42, %v3399_v12  ;;  %v2883_v42 = vmul.f32 %v7972_v47, %v6465_v23  ;;  %v8168_v12 = vmul.f32 %v3540_v46, %v3349_v26  ;;  %v3441_v47 = vmul.f32 %v8152_v17, %v8040_v50 }
 0x5da   : > { %4776 = vrsqrt.f32 %v8128_v49  ;;  %v3385_v5 = vmul.f32 %v7932_v0, %v3384_v36  ;;  %v3482_v26 = vmul.f32 %v8115_v37, %v3481_v14  ;;  %v3429_v46 = vsel %vm8180_vm5, %v7914_v2, %v3425_v25  ;;  %3987 = vperm.xlu1 %4665, %v8188_v13  }
 0x5db   : > { %4007 = vperm.xlu0 %4667, %v8150_v41   ;;  %v8170_v10 = vpop.permute.xlu0 %3827  ;;  %4778 = vrsqrt.f32 %v8148_v58  ;;  %3982 = vperm.xlu2 %4666, %v8168_v12   ;;  %v8206_v36 = vadd.f32 1e-05, %v2883_v42  ;;  %v3404_v2 = vsub.f32 1.5, %v3403_v32  ;;  %v3432_v25 = vmul.f32 %v8138_v18, %v3431_v60 }
 0x5dc   : > { %9492 = vst [vmem:[#allocation179_spill] sm:$0xff] %v8170_v10  ;;  %v3379_v14 = vsel %vm8202_vm6, %v7954_v59, %v3375_v20  ;;  %v3442_v32 = vmul.f32 %v8152_v17, %v3441_v47  ;;  %v8228_v60 = vmul.f32 %v3548_v48, %v3429_v46  ;;  %v3455_v23 = vmul.f32 %v8023_v40, %v3454_v16  ;;  %v3547_v46 = vld [vmem:[%s9046_s2 + $0x178] sm:$0xff] }
 0x5dd   : > { %v3483_v59 = vmul.f32 0.5, %v3482_v26  ;;  %v3389_v20 = vsel %vm8223_vm8, %v7932_v0, %v3385_v5  ;;  %4780 = vrsqrt.f32 %v8206_v36  ;;  %v8243_v1 = vmul.f32 %v3543_v45, %v3379_v14  ;;  %v3551_v45 = vld [vmem:[%s9046_s2 + $0x198] sm:$0xff] }
 0x5de   : > { %v3405_v47 = vmul.f32 %v8049_v44, %v3404_v2  ;;  %vm3456_vm11 = vweird.f32 %v7903_v3  ;;  %v3433_v16 = vmul.f32 0.5, %v3432_v25  ;;  %v3443_v26 = vmul.f32 0.5, %v3442_v32 }
 0x5df   : > { %v8176_v7 = vpop.permute.xlu2 %3832  ;;  %v8209_v11 = vpop.permute.xlu1 %3812  ;;  %vm8255_vm14 = vmor %vm3456_vm11, %vm3457_vm9  ;;  %v8260_v3 = vmul.f32 %v3544_v38, %v3389_v20  ;;  %v3415_v2 = vmul.f32 %v8066_v53, %v3414_v52  ;;  %v3484_v14 = vsub.f32 1.5, %v3483_v59  ;;  %vm3486_vm5 = vweird.f32 %v8010_v8 }
 0x5e0   : > { %v8219_v27 = vpop.eup %4776  ;;  %v3459_v63 = vsel %vm8255_vm14, %v8023_v40, %v3455_v23  ;;  %v3434_v52 = vsub.f32 1.5, %v3433_v16  ;;  %v3409_v40 = vsel %vm8275_vm2, %v8049_v44, %v3405_v47  ;;  %v3546_v23 = vld [vmem:[%s9046_s2 + $0x170] sm:$0xff]  ;;  %v3444_v30 = vsub.f32 1.5, %v3443_v26  ;;  %vm8320_vm7 = vmor %vm3486_vm5, %vm3487_vm3 }
 0x5e1   : > { %v8238_v10 = vpop.eup %4778  ;;  %v3461_v0 = vmul.f32 %v8219_v27, %v8128_v49  ;;  %v8296_v38 = vmul.f32 %v3551_v45, %v3459_v63  ;;  %v3485_v44 = vmul.f32 %v8115_v37, %v3484_v14  ;;  %v3419_v47 = vsel %vm8292_vm0, %v8066_v53, %v3415_v2  ;;  %v3613_v53 = vld [vmem:[%s9047_s3 + $0x8] sm:$0xff] }
 0x5e2   : > { %v3471_v25 = vmul.f32 %v8238_v10, %v8148_v58  ;;  %4002 = vperm.xlu1 %4665, %v8260_v3   ;;  %v8311_v26 = vmul.f32 %v3546_v23, %v3409_v40  ;;  %vm3436_vm6 = vweird.f32 %v8035_v24  ;;  %v8325_v2 = vmul.f32 %v3547_v46, %v3419_v47  ;;  %v3554_v24 = vld [vmem:[%s9046_s2 + $0x1b0] sm:$0xff] }
 0x5e3   : > { %4022 = vperm.xlu0 %4667, %v8228_v60   ;;  %3997 = vperm.xlu2 %4666, %v8243_v1   ;;  %v8262_v48 = vpop.permute.xlu0 %3842  ;;  %v3462_v32 = vmul.f32 %v8219_v27, %v3461_v0  ;;  %v8288_v59 = vpop.eup %4780  ;;  %v3445_v42 = vmul.f32 %v8152_v17, %v3444_v30  ;;  %vm3447_vm8 = vweird.f32 %v8152_v17  ;;  %vm3438_vm9 = vmor %vm3436_vm6, %vm3437_vm4  ;;  %v3550_v47 = vld [vmem:[%s9046_s2 + $0x190] sm:$0xff]  ;;  %vm3467_vm12 = vweird.f32 %v8219_v27 }
 0x5e4   : > { %v3472_v0 = vmul.f32 %v8238_v10, %v3471_v25  ;;  %v3435_v25 = vmul.f32 %v8138_v18, %v3434_v52  ;;  %v3491_v63 = vmul.f32 %v8288_v59, %v8206_v36  ;;  %v3489_v52 = vsel %vm8320_vm7, %v8115_v37, %v3485_v44  ;;  %v3549_v37 = vld [vmem:[%s9046_s2 + $0x188] sm:$0xff]  ;;  %vm3448_vm11 = vmor %vm3446_vm10, %vm3447_vm8 }
 0x5e5   : > { %v3463_v14 = vmul.f32 0.5, %v3462_v32  ;;  %v8346_v30 = vmul.f32 %v3554_v24, %v3489_v52  ;;  %v3449_v44 = vsel %vm3448_vm11, %v8152_v17, %v3445_v42  ;;  %vm3477_vm13 = vweird.f32 %v8238_v10 }
 0x5e6   : > { %v3473_v8 = vmul.f32 0.5, %v3472_v0  ;;  %v3492_v23 = vmul.f32 %v8288_v59, %v3491_v63  ;;  %v3439_v20 = vsel %vm3438_vm9, %v8138_v18, %v3435_v25  ;;  %v8362_v17 = vmul.f32 %v3550_v47, %v3449_v44  ;;  %v9507_v44 = vld [vmem:[#allocation109_spill] sm:$0xff] }
 0x5e7   : > { %v8249_v5 = vpop.permute.xlu2 %3847  ;;  %v8298_v16 = vpop.permute.xlu1 %3822  ;;  %v3464_v40 = vsub.f32 1.5, %v3463_v14  ;;  %v8353_v50 = vmul.f32 %v3549_v37, %v3439_v20  ;;  %v3669_v14 = vmul.f32 %v6976_v35, %v6495_v22  ;;  %vm3466_vm14 = vweird.f32 %v8128_v49 }
 0x5e8   : > { %v3474_v0 = vsub.f32 1.5, %v3473_v8  ;;  %v3493_v25 = vmul.f32 0.5, %v3492_v23  ;;  %vm3468_vm2 = vmor %vm3466_vm14, %vm3467_vm12  ;;  %vm3476_vm15 = vweird.f32 %v8148_v58  ;;  %v3552_v8 = vld [vmem:[%s9046_s2 + $0x1a0] sm:$0xff]  ;;  %vm3497_vm3 = vweird.f32 %v8288_v59 }
 0x5e9   : > { %v3465_v18 = vmul.f32 %v8219_v27, %v3464_v40  ;;  %vm3478_vm0 = vmor %vm3476_vm15, %vm3477_vm13  ;;  %v3725_v49 = vsub.f32 %v3613_v53, %v3669_v14  ;;  %v3553_v40 = vld [vmem:[%s9046_s2 + $0x1a8] sm:$0xff]  ;;  %vm3496_vm4 = vweird.f32 %v8206_v36  ;;  %v3668_v47 = vmul.f32 %v6965_v15, %v9507_v44  ;;  %v3612_v36 = vld [vmem:[%s9047_s3] sm:$0xff] }
 0x5ea   : > { %4017 = vperm.xlu1 %4665, %v8325_v2   ;;  %v3475_v63 = vmul.f32 %v8238_v10, %v3474_v0  ;;  %v3494_v22 = vsub.f32 1.5, %v3493_v25  ;;  %vm3498_vm5 = vmor %vm3496_vm4, %vm3497_vm3  ;;  %v3619_v15 = vld [vmem:[%s9047_s3 + $0x38] sm:$0xff]  ;;  %v3670_v53 = vmul.f32 %v7003_v54, %v6487_v21  ;;  %v9508_v21 = vld [vmem:[#allocation119_spill] sm:$0xff] }
 0x5eb   : > { %4037 = vperm.xlu0 %4667, %v8296_v38   ;;  %4012 = vperm.xlu2 %4666, %v8311_v26   ;;  %v8338_v32 = vpop.permute.xlu0 %3857  ;;  %v3469_v35 = vsel %vm3468_vm2, %v8219_v27, %v3465_v18  ;;  %v3672_v27 = vmul.f32 %v7042_v28, %v6516_v39  ;;  %v3555_v39 = vld [vmem:[%s9046_s2 + $0x1b8] sm:$0xff]  ;;  %v9509_v54 = vld [vmem:[#allocation154_spill] sm:$0xff] }
 0x5ec   : > { %v3479_v24 = vsel %vm3478_vm0, %v8238_v10, %v3475_v63  ;;  %v8384_v23 = vmul.f32 %v3552_v8, %v3469_v35  ;;  %v3495_v58 = vmul.f32 %v8288_v59, %v3494_v22  ;;  %v3616_v10 = vld [vmem:[%s9047_s3 + $0x20] sm:$0xff]  ;;  %v3724_v63 = vsub.f32 %v3612_v36, %v3668_v47  ;;  %v3614_v35 = vld [vmem:[%s9047_s3 + $0x10] sm:$0xff]  ;;  %v3615_v8 = vld [vmem:[%s9047_s3 + $0x18] sm:$0xff] }
 0x5ed   : > { %v8391_v20 = vmul.f32 %v3553_v40, %v3479_v24  ;;  %v3728_v18 = vsub.f32 %v3616_v10, %v3672_v27  ;;  %v3726_v24 = vsub.f32 %v3614_v35, %v3670_v53  ;;  %v3678_v40 = vmul.f32 %v9509_v54, %v9508_v21  ;;  %v9511_v10 = vld [vmem:[#allocation108_spill] sm:$0xff]  ;;  %v9512_v44 = vld [vmem:[#allocation114_spill] sm:$0xff]  ;;  %v9513_v47 = vld [vmem:[#allocation111_spill] sm:$0xff] }
 0x5ee   : > { %v3499_v0 = vsel %vm3498_vm5, %v8288_v59, %v3495_v58  ;;  %v3675_v59 = vmul.f32 %v7172_v34, %v6534_v29  ;;  %v3671_v29 = vmul.f32 %v7040_v6, %v6490_v62  ;;  %v3622_v62 = vld [vmem:[%s9047_s3 + $0x50] sm:$0xff]  ;;  %v9510_v6 = vld [vmem:[#allocation113_spill] sm:$0xff]  ;;  %v9514_v35 = vld [vmem:[#allocation122_spill] sm:$0xff] }
 0x5ef   : > { %v8317_v45 = vpop.permute.xlu2 %3862  ;;  %v8355_v46 = vpop.permute.xlu1 %3837  ;;  %v8411_v25 = vmul.f32 %v3555_v39, %v3499_v0  ;;  %v3673_v0 = vmul.f32 %v9511_v10, %v9510_v6  ;;  %v3617_v39 = vld [vmem:[%s9047_s3 + $0x28] sm:$0xff]  ;;  %v3734_v36 = vsub.f32 %v3622_v62, %v3678_v40  ;;  %v9517_v54 = vld [vmem:[#allocation152_spill] sm:$0xff]  ;;  %v3620_v62 = vld [vmem:[%s9047_s3 + $0x40] sm:$0xff] }
 0x5f0   : > { %v3731_v34 = vsub.f32 %v3619_v15, %v3675_v59  ;;  %v3727_v58 = vsub.f32 %v3615_v8, %v3671_v29  ;;  %v9515_v29 = vld [vmem:[#allocation157_spill] sm:$0xff]  ;;  %v9516_v21 = vld [vmem:[#allocation115_spill] sm:$0xff]  ;;  %v9519_v6 = vld [vmem:[#allocation116_spill] sm:$0xff] }
 0x5f1   : > { %v3729_v15 = vsub.f32 %v3617_v39, %v3673_v0  ;;  %v3676_v40 = vmul.f32 %v9517_v54, %v9516_v21  ;;  %v9520_v10 = vld [vmem:[#allocation112_spill] sm:$0xff]  ;;  %v3623_v54 = vld [vmem:[%s9047_s3 + $0x58] sm:$0xff] }
 0x5f2   : > { %4032 = vperm.xlu1 %4665, %v8362_v17   ;;  %v3677_v0 = vmul.f32 %v9520_v10, %v9519_v6 }
 0x5f3   : > { %4052 = vperm.xlu0 %4667, %v8346_v30   ;;  %4027 = vperm.xlu2 %4666, %v8353_v50   ;;  %v8378_v52 = vpop.permute.xlu0 %3872 }
 0x5f7   : > { %v8370_v42 = vpop.permute.xlu2 %3877  ;;  %v8393_v37 = vpop.permute.xlu1 %3852 }
 0x5fa   : > { %4047 = vperm.xlu1 %4665, %v8391_v20  }
 0x5fb   : > { %4123 = vperm.xlu0 %4667, %v3725_v49   ;;  %4042 = vperm.xlu2 %4666, %v8384_v23   ;;  %v8413_v14 = vpop.permute.xlu0 %3887 }
 0x5ff   : > { %v8404_v28 = vpop.permute.xlu2 %3892  ;;  %v8423_v22 = vpop.permute.xlu1 %3867 }
 0x602   : > { %4118 = vperm.xlu1 %4665, %v3724_v63   ;;  %v3618_v63 = vld [vmem:[%s9047_s3 + $0x30] sm:$0xff] }
 0x603   : > { %4138 = vperm.xlu0 %4667, %v3728_v18   ;;  %4057 = vperm.xlu2 %4666, %v8411_v25   ;;  %v8437_v27 = vpop.permute.xlu0 %3902  ;;  %v3674_v18 = vmul.f32 %v9513_v47, %v9512_v44  ;;  %v3621_v44 = vld [vmem:[%s9047_s3 + $0x48] sm:$0xff]  ;;  %v3732_v47 = vsub.f32 %v3620_v62, %v3676_v40  ;;  %v9526_v40 = vld [vmem:[#allocation118_spill] sm:$0xff] }
 0x604   : > { %v9527_v62 = vld [vmem:[#allocation151_spill] sm:$0xff] }
 0x605   : > { %v3730_v8 = vsub.f32 %v3618_v63, %v3674_v18  ;;  %v9522_v63 = vld [vmem:[#allocation160_spill] sm:$0xff]  ;;  %v3680_v6 = vmul.f32 %v9527_v62, %v9526_v40 }
 0x607   : > { %v8433_v49 = vpop.permute.xlu2 %3907  ;;  %v8449_v59 = vpop.permute.xlu1 %3882 }
 0x60a   : > { %4133 = vperm.xlu1 %4665, %v3727_v58  }
 0x60b   : > { %4153 = vperm.xlu0 %4667, %v3731_v34   ;;  %4128 = vperm.xlu2 %4666, %v3726_v24   ;;  %v3681_v34 = vmul.f32 %v9515_v29, %v9514_v35  ;;  %v3625_v24 = vld [vmem:[%s9047_s3 + $0x68] sm:$0xff]  ;;  %v8463_v58 = vpop.permute.xlu0 %3917  ;;  %v3733_v35 = vsub.f32 %v3621_v44, %v3677_v0  ;;  %v3628_v29 = vld [vmem:[%s9047_s3 + $0x80] sm:$0xff] }
 0x60c   : > { %9518 = vst [vmem:[#allocation109_spill] sm:$0xff] %v8463_v58  ;;  %v3624_v0 = vld [vmem:[%s9047_s3 + $0x60] sm:$0xff]  ;;  %v9539_v58 = vld [vmem:[#allocation123_spill] sm:$0xff] }
 0x60d   : > { %v3737_v39 = vsub.f32 %v3625_v24, %v3681_v34  ;;  %v9524_v34 = vld [vmem:[#allocation117_spill] sm:$0xff]  ;;  %v9525_v24 = vld [vmem:[#allocation155_spill] sm:$0xff] }
 0x60e   : > { %v3679_v21 = vmul.f32 %v9525_v24, %v9524_v34  ;;  %v3631_v24 = vld [vmem:[%s9047_s3 + $0x98] sm:$0xff] }
 0x60f   : > { %v8454_v53 = vpop.permute.xlu2 %3922  ;;  %v8473_v18 = vpop.permute.xlu1 %3897 }
 0x610   : > { %v3735_v44 = vsub.f32 %v3623_v54, %v3679_v21  ;;  %v3626_v21 = vld [vmem:[%s9047_s3 + $0x70] sm:$0xff]  ;;  %v9534_v54 = vld [vmem:[#allocation121_spill] sm:$0xff] }
 0x612   : > { %4148 = vperm.xlu1 %4665, %v3730_v8  }
 0x613   : > { %4168 = vperm.xlu0 %4667, %v3734_v36   ;;  %4143 = vperm.xlu2 %4666, %v3729_v15   ;;  %v9521_v36 = vld [vmem:[#allocation125_spill] sm:$0xff] }
 0x614   : > { %v3684_v15 = vmul.f32 %v9522_v63, %v9521_v36  ;;  %v9530_v36 = vld [vmem:[#allocation163_spill] sm:$0xff] }
 0x616   : > { %v3740_v10 = vsub.f32 %v3628_v29, %v3684_v15  ;;  %v9531_v15 = vld [vmem:[#allocation120_spill] sm:$0xff]  ;;  %v9532_v29 = vld [vmem:[#allocation158_spill] sm:$0xff] }
 0x617   : > { %v8480_v8 = vpop.permute.xlu2 %3937  ;;  %v8496_v34 = vpop.permute.xlu1 %3912  ;;  %v3682_v40 = vmul.f32 %v9532_v29, %v9531_v15  ;;  %v9537_v15 = vld [vmem:[#allocation131_spill] sm:$0xff] }
 0x618   : > { %9523 = vst [vmem:[#allocation119_spill] sm:$0xff] %v8480_v8  ;;  %v9547_v8 = vld [vmem:[#allocation126_spill] sm:$0xff] }
 0x61a   : > { %4163 = vperm.xlu1 %4665, %v3733_v35   ;;  %v3736_v35 = vsub.f32 %v3624_v0, %v3680_v6  ;;  %v3627_v0 = vld [vmem:[%s9047_s3 + $0x78] sm:$0xff] }
 0x61b   : > { %4183 = vperm.xlu0 %4667, %v3737_v39   ;;  %4158 = vperm.xlu2 %4666, %v3732_v47   ;;  %v8489_v39 = vpop.permute.xlu0 %3932  ;;  %v9529_v47 = vld [vmem:[#allocation128_spill] sm:$0xff] }
 0x61c   : > { %9528 = vst [vmem:[#allocation154_spill] sm:$0xff] %v8489_v39  ;;  %v3687_v63 = vmul.f32 %v9530_v36, %v9529_v47  ;;  %v3738_v36 = vsub.f32 %v3626_v21, %v3682_v40  ;;  %v3629_v40 = vld [vmem:[%s9047_s3 + $0x88] sm:$0xff]  ;;  %v9542_v21 = vld [vmem:[#allocation124_spill] sm:$0xff] }
 0x61e   : > { %v3743_v6 = vsub.f32 %v3631_v24, %v3687_v63 }
 0x620   : > { %v8503_v62 = vpop.permute.xlu2 %3952 }
 0x621   : > { %9533 = vst [vmem:[#allocation113_spill] sm:$0xff] %v8503_v62  ;;  %v3634_v62 = vld [vmem:[%s9047_s3 + $0xb0] sm:$0xff]  ;;  %v8522_v24 = vpop.permute.xlu1 %3927 }
 0x622   : > { %4178 = vperm.xlu1 %4665, %v3736_v35   ;;  %v9538_v35 = vld [vmem:[#allocation166_spill] sm:$0xff] }
 0x623   : > { %4198 = vperm.xlu0 %4667, %v3740_v10   ;;  %4173 = vperm.xlu2 %4666, %v3735_v44   ;;  %v9535_v10 = vld [vmem:[#allocation153_spill] sm:$0xff]  ;;  %v8513_v47 = vpop.permute.xlu0 %3947  ;;  %v3690_v29 = vmul.f32 %v9538_v35, %v9537_v15 }
 0x624   : > { %v3683_v44 = vmul.f32 %v9535_v10, %v9534_v54  ;;  %9536 = vst [vmem:[#allocation108_spill] sm:$0xff] %v8513_v47  ;;  %v9540_v54 = vld [vmem:[#allocation161_spill] sm:$0xff] }
 0x625   : > { %v3685_v63 = vmul.f32 %v9540_v54, %v9539_v58  ;;  %v9546_v35 = vld [vmem:[#allocation169_spill] sm:$0xff] }
 0x626   : > { %v3739_v39 = vsub.f32 %v3627_v0, %v3683_v44  ;;  %v3746_v44 = vsub.f32 %v3634_v62, %v3690_v29  ;;  %v3630_v0 = vld [vmem:[%s9047_s3 + $0x90] sm:$0xff] }
 0x627   : > { %v3741_v15 = vsub.f32 %v3629_v40, %v3685_v63  ;;  %v3632_v63 = vld [vmem:[%s9047_s3 + $0xa0] sm:$0xff]  ;;  %v9549_v40 = vld [vmem:[#allocation127_spill] sm:$0xff] }
 0x628   : > { %v8524_v10 = vpop.permute.xlu2 %3967 }
 0x629   : > { %9541 = vst [vmem:[#allocation114_spill] sm:$0xff] %v8524_v10  ;;  %v3637_v10 = vld [vmem:[%s9047_s3 + $0xc8] sm:$0xff] }
 0x62a   : > { %4193 = vperm.xlu1 %4665, %v3739_v39   ;;  %v9545_v39 = vld [vmem:[#allocation134_spill] sm:$0xff] }
 0x62b   : > { %4213 = vperm.xlu0 %4667, %v3743_v6   ;;  %4188 = vperm.xlu2 %4666, %v3738_v36   ;;  %v9543_v6 = vld [vmem:[#allocation156_spill] sm:$0xff]  ;;  %v8534_v58 = vpop.permute.xlu0 %3962  ;;  %v3693_v54 = vmul.f32 %v9546_v35, %v9545_v39 }
 0x62c   : > { %v3686_v36 = vmul.f32 %v9543_v6, %v9542_v21  ;;  %9544 = vst [vmem:[#allocation111_spill] sm:$0xff] %v8534_v58  ;;  %v9548_v21 = vld [vmem:[#allocation164_spill] sm:$0xff]  ;;  %v9550_v6 = vld [vmem:[#allocation159_spill] sm:$0xff] }
 0x62d   : > { %v3688_v62 = vmul.f32 %v9548_v21, %v9547_v8  ;;  %v9551_v8 = vld [vmem:[#allocation137_spill] sm:$0xff]  ;;  %v9554_v58 = vld [vmem:[#allocation167_spill] sm:$0xff] }
 0x62e   : > { %v3742_v47 = vsub.f32 %v3630_v0, %v3686_v36  ;;  %v3749_v36 = vsub.f32 %v3637_v10, %v3693_v54  ;;  %v3633_v0 = vld [vmem:[%s9047_s3 + $0xa8] sm:$0xff] }
 0x62f   : > { %v8550_v39 = vpop.permute.xlu1 %3942 }
 0x632   : > { %4208 = vperm.xlu1 %4665, %v3742_v47   ;;  %v3696_v47 = vmul.f32 %v7778_v61, %v9551_v8  ;;  %v9557_v61 = vld [vmem:[#allocation162_spill] sm:$0xff] }
 0x633   : > { %4228 = vperm.xlu0 %4667, %v3746_v44   ;;  %4203 = vperm.xlu2 %4666, %v3741_v15   ;;  %v3689_v44 = vmul.f32 %v9550_v6, %v9549_v40  ;;  %v3744_v15 = vsub.f32 %v3632_v63, %v3688_v62  ;;  %v3640_v40 = vld [vmem:[%s9047_s3 + $0xe0] sm:$0xff]  ;;  %v9553_v6 = vld [vmem:[#allocation129_spill] sm:$0xff] }
 0x634   : > { %v3691_v10 = vmul.f32 %v9554_v58, %v9553_v6  ;;  %v3635_v62 = vld [vmem:[%s9047_s3 + $0xb8] sm:$0xff]  ;;  %v9556_v63 = vld [vmem:[#allocation130_spill] sm:$0xff]  ;;  %v9558_v58 = vld [vmem:[#allocation140_spill] sm:$0xff] }
 0x635   : > { %v8543_v29 = vpop.permute.xlu2 %3982  ;;  %v3745_v21 = vsub.f32 %v3633_v0, %v3689_v44  ;;  %v3752_v44 = vsub.f32 %v3640_v40, %v3696_v47  ;;  %v3636_v0 = vld [vmem:[%s9047_s3 + $0xc0] sm:$0xff] }
 0x639   : > { %v8571_v8 = vpop.permute.xlu1 %3957 }
 0x63a   : > { %4223 = vperm.xlu1 %4665, %v3745_v21   ;;  %v3699_v21 = vmul.f32 %v7878_v4, %v9558_v58  ;;  %v9563_v4 = vld [vmem:[#allocation165_spill] sm:$0xff] }
 0x63b   : > { %4243 = vperm.xlu0 %4667, %v3749_v36   ;;  %4218 = vperm.xlu2 %4666, %v3744_v15   ;;  %v3692_v36 = vmul.f32 %v9557_v61, %v9556_v63  ;;  %v3747_v15 = vsub.f32 %v3635_v62, %v3691_v10  ;;  %v3643_v63 = vld [vmem:[%s9047_s3 + $0xf8] sm:$0xff]  ;;  %v9560_v61 = vld [vmem:[#allocation132_spill] sm:$0xff] }
 0x63c   : > { %v3638_v10 = vld [vmem:[%s9047_s3 + $0xd0] sm:$0xff]  ;;  %v9562_v62 = vld [vmem:[#allocation133_spill] sm:$0xff] }
 0x63d   : > { %v8557_v35 = vpop.permute.xlu0 %3977  ;;  %v8564_v54 = vpop.permute.xlu2 %3997 }
 0x63e   : > { %9552 = vst [vmem:[#allocation122_spill] sm:$0xff] %v8557_v35  ;;  %v3748_v35 = vsub.f32 %v3636_v0, %v3692_v36  ;;  %v3755_v36 = vsub.f32 %v3643_v63, %v3699_v21  ;;  %v3639_v0 = vld [vmem:[%s9047_s3 + $0xd8] sm:$0xff] }
 0x63f   : > { %9555 = vst [vmem:[#allocation157_spill] sm:$0xff] %v8564_v54  ;;  %v9561_v54 = vld [vmem:[#allocation170_spill] sm:$0xff] }
 0x640   : > { %v3694_v47 = vmul.f32 %v9561_v54, %v9560_v61  ;;  %v9565_v61 = vld [vmem:[#allocation143_spill] sm:$0xff] }
 0x642   : > { %4238 = vperm.xlu1 %4665, %v3748_v35  }
 0x643   : > { %4258 = vperm.xlu0 %4667, %v3752_v44   ;;  %4233 = vperm.xlu2 %4666, %v3747_v15   ;;  %v3695_v44 = vmul.f32 %v9563_v4, %v9562_v62  ;;  %v3750_v15 = vsub.f32 %v3638_v10, %v3694_v47  ;;  %v3646_v62 = vld [vmem:[%s9047_s3 + $0x110] sm:$0xff]  ;;  %v9566_v4 = vld [vmem:[#allocation135_spill] sm:$0xff] }
 0x644   : > { %v8592_v58 = vpop.permute.xlu1 %3972  ;;  %v3697_v21 = vmul.f32 %v7782_v43, %v9566_v4  ;;  %v3641_v47 = vld [vmem:[%s9047_s3 + $0xe8] sm:$0xff]  ;;  %v9568_v10 = vld [vmem:[#allocation136_spill] sm:$0xff]  ;;  %v9571_v4 = vld [vmem:[#allocation146_spill] sm:$0xff] }
 0x645   : > { %v8578_v6 = vpop.permute.xlu0 %3992  ;;  %v8585_v40 = vpop.permute.xlu2 %4012  ;;  %v3751_v35 = vsub.f32 %v3639_v0, %v3695_v44 }
 0x646   : > { %9559 = vst [vmem:[#allocation115_spill] sm:$0xff] %v8578_v6  ;;  %v3702_v6 = vmul.f32 %v7987_v57, %v9565_v61  ;;  %v3753_v61 = vsub.f32 %v3641_v47, %v3697_v21  ;;  %v3644_v21 = vld [vmem:[%s9047_s3 + $0x100] sm:$0xff]  ;;  %v9575_v47 = vld [vmem:[#allocation139_spill] sm:$0xff] }
 0x648   : > { %v3758_v57 = vsub.f32 %v3646_v62, %v3702_v6 }
 0x64a   : > { %4253 = vperm.xlu1 %4665, %v3751_v35  }
 0x64b   : > { %4273 = vperm.xlu0 %4667, %v3755_v36   ;;  %4248 = vperm.xlu2 %4666, %v3750_v15   ;;  %v9569_v36 = vld [vmem:[#allocation168_spill] sm:$0xff] }
 0x64c   : > { %v3698_v44 = vmul.f32 %v9569_v36, %v9568_v10  ;;  %v8613_v0 = vpop.permute.xlu1 %3987  ;;  %v3642_v15 = vld [vmem:[%s9047_s3 + $0xf0] sm:$0xff]  ;;  %v3649_v10 = vld [vmem:[%s9047_s3 + $0x128] sm:$0xff]  ;;  %v9572_v36 = vld [vmem:[#allocation138_spill] sm:$0xff] }
 0x64d   : > { %v8597_v54 = vpop.permute.xlu0 %4007  ;;  %v8606_v63 = vpop.permute.xlu2 %4027 }
 0x64e   : > { %9564 = vst [vmem:[#allocation152_spill] sm:$0xff] %v8597_v54  ;;  %v3754_v35 = vsub.f32 %v3642_v15, %v3698_v44  ;;  %v3705_v54 = vmul.f32 %v8082_v19, %v9571_v4 }
 0x64f   : > { %9567 = vst [vmem:[#allocation116_spill] sm:$0xff] %v8606_v63  ;;  %v9573_v63 = vld [vmem:[#allocation175_spill] sm:$0xff] }
 0x650   : > { %v3700_v6 = vmul.f32 %v9573_v63, %v9572_v36  ;;  %v3761_v19 = vsub.f32 %v3649_v10, %v3705_v54  ;;  %v9578_v36 = vld [vmem:[#allocation149_spill] sm:$0xff] }
 0x652   : > { %4268 = vperm.xlu1 %4665, %v3754_v35   ;;  %v3756_v4 = vsub.f32 %v3644_v21, %v3700_v6  ;;  %v3647_v6 = vld [vmem:[%s9047_s3 + $0x118] sm:$0xff]  ;;  %v9581_v21 = vld [vmem:[#allocation142_spill] sm:$0xff] }
 0x653   : > { %4288 = vperm.xlu0 %4667, %v3758_v57   ;;  %4263 = vperm.xlu2 %4666, %v3753_v61   ;;  %v9576_v57 = vld [vmem:[#allocation171_spill] sm:$0xff] }
 0x654   : > { %v3701_v44 = vmul.f32 %v9576_v57, %v9575_v47  ;;  %v8634_v15 = vpop.permute.xlu1 %4002  ;;  %v3645_v61 = vld [vmem:[%s9047_s3 + $0x108] sm:$0xff]  ;;  %v3652_v47 = vld [vmem:[%s9047_s3 + $0x140] sm:$0xff]  ;;  %v9579_v57 = vld [vmem:[#allocation141_spill] sm:$0xff] }
 0x655   : > { %v8618_v43 = vpop.permute.xlu0 %4022  ;;  %v8627_v62 = vpop.permute.xlu2 %4042  ;;  %v3703_v54 = vmul.f32 %v8013_v56, %v9579_v57  ;;  %v9583_v57 = vld [vmem:[#allocation150_spill] sm:$0xff] }
 0x656   : > { %9570 = vst [vmem:[#allocation112_spill] sm:$0xff] %v8618_v43  ;;  %v3757_v35 = vsub.f32 %v3645_v61, %v3701_v44  ;;  %v3708_v43 = vmul.f32 %v8168_v12, %v9578_v36 }
 0x657   : > { %9574 = vst [vmem:[#allocation125_spill] sm:$0xff] %v8627_v62 }
 0x658   : > { %v3764_v12 = vsub.f32 %v3652_v47, %v3708_v43  ;;  %v3655_v43 = vld [vmem:[%s9047_s3 + $0x158] sm:$0xff]  ;;  %v9584_v47 = vld [vmem:[#allocation144_spill] sm:$0xff] }
 0x65a   : > { %4283 = vperm.xlu1 %4665, %v3757_v35   ;;  %v3759_v35 = vsub.f32 %v3647_v6, %v3703_v54  ;;  %v3650_v54 = vld [vmem:[%s9047_s3 + $0x130] sm:$0xff] }
 0x65b   : > { %4303 = vperm.xlu0 %4667, %v3761_v19   ;;  %4278 = vperm.xlu2 %4666, %v3756_v4   ;;  %v9582_v19 = vld [vmem:[#allocation173_spill] sm:$0xff]  ;;  %v3648_v4 = vld [vmem:[%s9047_s3 + $0x120] sm:$0xff] }
 0x65c   : > { %v3704_v44 = vmul.f32 %v9582_v19, %v9581_v21  ;;  %v8655_v61 = vpop.permute.xlu1 %4017  ;;  %v3706_v21 = vmul.f32 %v8103_v55, %v9584_v47 }
 0x65d   : > { %v8639_v63 = vpop.permute.xlu0 %4037  ;;  %v8648_v10 = vpop.permute.xlu2 %4057 }
 0x65e   : > { %9577 = vst [vmem:[#allocation160_spill] sm:$0xff] %v8639_v63  ;;  %v3760_v56 = vsub.f32 %v3648_v4, %v3704_v44  ;;  %v3711_v63 = vmul.f32 %v8243_v1, %v9583_v57  ;;  %v3762_v55 = vsub.f32 %v3650_v54, %v3706_v21  ;;  %v4783_v4 = vld [vmem:[#allocation2 + $0x8] sm:$0xff] }
 0x65f   : > { %9580 = vst [vmem:[#allocation117_spill] sm:$0xff] %v8648_v10  ;;  %v4782_v10 = vld [vmem:[#allocation2 + $0x10] sm:$0xff]  ;;  %v9587_v57 = vld [vmem:[#allocation99_spill] sm:$0xff] }
 0x660   : > { %v4062_v62 = vmul.f32 %v4782_v10, %v8064_v9  ;;  %v3767_v1 = vsub.f32 %v3655_v43, %v3711_v63  ;;  %v3651_v10 = vld [vmem:[%s9047_s3 + $0x138] sm:$0xff]  ;;  %v4784_v43 = vld [vmem:[#allocation2 + $0x28] sm:$0xff] }
 0x661   : > { %v4065_v47 = vmul.f32 %v4784_v43, %v7998_v51 }
 0x662   : > { %4298 = vperm.xlu1 %4665, %v3760_v56  }
 0x663   : > { %4318 = vperm.xlu0 %4667, %v3764_v12   ;;  %4293 = vperm.xlu2 %4666, %v3759_v35   ;;  %v9585_v12 = vld [vmem:[#allocation145_spill] sm:$0xff]  ;;  %v9586_v35 = vld [vmem:[#allocation172_spill] sm:$0xff] }
 0x664   : > { %v8673_v44 = vpop.permute.xlu1 %4032  ;;  %v3707_v9 = vmul.f32 %v7967_v33, %v9585_v12  ;;  %v3714_v33 = vmul.f32 %v8311_v26, %v9587_v57  ;;  %v3658_v12 = vld [vmem:[%s9047_s3 + $0x170] sm:$0xff]  ;;  %v3653_v26 = vld [vmem:[%s9047_s3 + $0x148] sm:$0xff] }
 0x665   : > { %v8660_v36 = vpop.permute.xlu0 %4052  ;;  %v4129_v19 = vpop.permute.xlu2 %4128 }
 0x666   : > { %v4398_v6 = vadd.f32 %v4129_v19, %v4062_v62  ;;  %v4061_v62 = vmul.f32 %v4783_v4, %v9586_v35  ;;  %v3763_v63 = vsub.f32 %v3651_v10, %v3707_v9  ;;  %v3770_v9 = vsub.f32 %v3658_v12, %v3714_v33  ;;  %v9589_v10 = vld [vmem:[#allocation148_spill] sm:$0xff]  ;;  %v9591_v33 = vld [vmem:[#allocation102_spill] sm:$0xff] }
 0x667   : > { %v3717_v43 = vmul.f32 %v8353_v50, %v9591_v33 }
 0x668   : > { %4454 = vst.msk [vmem:[%s9048_s4 + $0x10] sm:$0xff] %vm2200_vm1, %v4398_v6  ;;  %v9588_v6 = vld [vmem:[#allocation147_spill] sm:$0xff] }
 0x669   : > { %v3709_v21 = vmul.f32 %v8188_v13, %v9588_v6  ;;  %v3654_v13 = vld [vmem:[%s9047_s3 + $0x150] sm:$0xff]  ;;  %v3661_v6 = vld [vmem:[%s9047_s3 + $0x188] sm:$0xff] }
 0x66a   : > { %4313 = vperm.xlu1 %4665, %v3763_v63  }
 0x66b   : > { %4333 = vperm.xlu0 %4667, %v3767_v1   ;;  %4308 = vperm.xlu2 %4666, %v3762_v55   ;;  %v9590_v55 = vld [vmem:[#allocation177_spill] sm:$0xff]  ;;  %v3765_v35 = vsub.f32 %v3653_v26, %v3709_v21 }
 0x66c   : > { %v8700_v1 = vpop.permute.xlu1 %4047  ;;  %v3710_v4 = vmul.f32 %v9590_v55, %v9589_v10  ;;  %v3773_v55 = vsub.f32 %v3661_v6, %v3717_v43  ;;  %v9596_v43 = vld [vmem:[#allocation105_spill] sm:$0xff] }
 0x66d   : > { %v4124_v56 = vpop.permute.xlu0 %4123  ;;  %v4144_v54 = vpop.permute.xlu2 %4143 }
 0x66e   : > { %v4397_v19 = vadd.f32 %v4124_v56, %v4061_v62  ;;  %v4401_v51 = vadd.f32 %v4144_v54, %v4065_v47  ;;  %v4785_v62 = vld [vmem:[#allocation2 + $0x20] sm:$0xff]  ;;  %v3766_v57 = vsub.f32 %v3654_v13, %v3710_v4  ;;  %v9592_v54 = vld [vmem:[#allocation100_spill] sm:$0xff]  ;;  %v9594_v4 = vld [vmem:[#allocation97_spill] sm:$0xff] }
 0x66f   : > { %v4064_v56 = vmul.f32 %v4785_v62, %v8105_v31  ;;  %v4786_v47 = vld [vmem:[#allocation2 + $0x40] sm:$0xff]  ;;  %v3712_v21 = vmul.f32 %v8260_v3, %v9592_v54  ;;  %v3713_v13 = vmul.f32 %v8150_v41, %v9594_v4 }
 0x670   : > { %4453 = vst.msk [vmem:[%s9048_s4 + $0x8] sm:$0xff] %vm2200_vm1, %v4397_v19  ;;  %v4068_v19 = vmul.f32 %v4786_v47, %v8298_v16  ;;  %v4787_v31 = vld [vmem:[#allocation2] sm:$0xff]  ;;  %v3720_v47 = vmul.f32 %v8384_v23, %v9596_v43 }
 0x671   : > { %4457 = vst.msk [vmem:[%s9048_s4 + $0x28] sm:$0xff] %vm2200_vm1, %v4401_v51  ;;  %v9593_v51 = vld [vmem:[#allocation176_spill] sm:$0xff]  ;;  %v3656_v16 = vld [vmem:[%s9047_s3 + $0x160] sm:$0xff] }
 0x672   : > { %4328 = vperm.xlu1 %4665, %v3766_v57   ;;  %v3768_v62 = vsub.f32 %v3656_v16, %v3712_v21  ;;  %v3664_v54 = vld [vmem:[%s9047_s3 + $0x1a0] sm:$0xff] }
 0x673   : > { %4348 = vperm.xlu0 %4667, %v3770_v9   ;;  %4323 = vperm.xlu2 %4666, %v3765_v35   ;;  %v4060_v9 = vmul.f32 %v4787_v31, %v9593_v51  ;;  %v3657_v35 = vld [vmem:[%s9047_s3 + $0x168] sm:$0xff]  ;;  %v9597_v21 = vld [vmem:[#allocation98_spill] sm:$0xff]  ;;  %v4790_v51 = vld [vmem:[#allocation2 + $0x18] sm:$0xff] }
 0x674   : > { %v4119_v10 = vpop.permute.xlu1 %4118  ;;  %v3769_v33 = vsub.f32 %v3657_v35, %v3713_v13  ;;  %v3660_v13 = vld [vmem:[%s9047_s3 + $0x180] sm:$0xff]  ;;  %v4791_v35 = vld [vmem:[#allocation2 + $0x50] sm:$0xff] }
 0x675   : > { %v4139_v63 = vpop.permute.xlu0 %4138  ;;  %v4159_v26 = vpop.permute.xlu2 %4158  ;;  %v4396_v3 = vadd.f32 %v4119_v10, %v4060_v9  ;;  %v9598_v9 = vld [vmem:[#allocation174_spill] sm:$0xff]  ;;  %v3776_v10 = vsub.f32 %v3664_v54, %v3720_v47  ;;  %v3667_v47 = vld [vmem:[%s9047_s3 + $0x1b8] sm:$0xff] }
 0x676   : > { %v4400_v12 = vadd.f32 %v4139_v63, %v4064_v56  ;;  %v4404_v50 = vadd.f32 %v4159_v26, %v4068_v19  ;;  %v4788_v56 = vld [vmem:[#allocation2 + $0x38] sm:$0xff]  ;;  %v9595_v63 = vld [vmem:[#allocation178_spill] sm:$0xff]  ;;  %v3715_v26 = vmul.f32 %v8325_v2, %v9597_v21  ;;  %v4063_v16 = vmul.f32 %v4790_v51, %v9598_v9 }
 0x677   : > { %v4067_v57 = vmul.f32 %v4788_v56, %v9595_v63  ;;  %4452 = vst.msk [vmem:[%s9048_s4] sm:$0xff] %vm2200_vm1, %v4396_v3  ;;  %v4789_v19 = vld [vmem:[#allocation2 + $0x58] sm:$0xff]  ;;  %v9600_v63 = vld [vmem:[#allocation107_spill] sm:$0xff] }
 0x678   : > { %4456 = vst.msk [vmem:[%s9048_s4 + $0x20] sm:$0xff] %vm2200_vm1, %v4400_v12  ;;  %v4071_v12 = vmul.f32 %v4789_v19, %v8355_v46  ;;  %v3659_v46 = vld [vmem:[%s9047_s3 + $0x178] sm:$0xff] }
 0x679   : > { %4460 = vst.msk [vmem:[%s9048_s4 + $0x40] sm:$0xff] %vm2200_vm1, %v4404_v50  ;;  %v3771_v3 = vsub.f32 %v3659_v46, %v3715_v26 }
 0x67a   : > { %4343 = vperm.xlu1 %4665, %v3769_v33  }
 0x67b   : > { %4363 = vperm.xlu0 %4667, %v3773_v55   ;;  %4338 = vperm.xlu2 %4666, %v3768_v62   ;;  %v9599_v55 = vld [vmem:[#allocation103_spill] sm:$0xff]  ;;  %v4070_v62 = vmul.f32 %v4791_v35, %v8176_v7  ;;  %v9601_v7 = vld [vmem:[#allocation101_spill] sm:$0xff] }
 0x67c   : > { %v4134_v50 = vpop.permute.xlu1 %4133  ;;  %v3716_v4 = vmul.f32 %v8228_v60, %v9599_v55  ;;  %v3718_v19 = vmul.f32 %v8362_v17, %v9601_v7  ;;  %v9604_v35 = vld [vmem:[#allocation179_spill] sm:$0xff]  ;;  %v4798_v7 = vld [vmem:[#allocation2 + $0xa0] sm:$0xff] }
 0x67d   : > { %v4154_v41 = vpop.permute.xlu0 %4153  ;;  %v4174_v31 = vpop.permute.xlu2 %4173  ;;  %v4399_v2 = vadd.f32 %v4134_v50, %v4063_v16  ;;  %v4794_v16 = vld [vmem:[#allocation2 + $0x68] sm:$0xff] }
 0x67e   : > { %v4403_v6 = vadd.f32 %v4154_v41, %v4067_v57  ;;  %v4407_v23 = vadd.f32 %v4174_v31, %v4071_v12  ;;  %v3772_v56 = vsub.f32 %v3660_v13, %v3716_v4  ;;  %v3723_v57 = vmul.f32 %v8411_v25, %v9600_v63  ;;  %v4792_v41 = vld [vmem:[#allocation2 + $0x70] sm:$0xff]  ;;  %v9602_v31 = vld [vmem:[#allocation106_spill] sm:$0xff]  ;;  %v4795_v50 = vld [vmem:[#allocation2 + $0x88] sm:$0xff] }
 0x67f   : > { %4455 = vst.msk [vmem:[%s9048_s4 + $0x18] sm:$0xff] %vm2200_vm1, %v4399_v2  ;;  %v4074_v33 = vmul.f32 %v4792_v41, %v8393_v37  ;;  %v3662_v37 = vld [vmem:[%s9047_s3 + $0x190] sm:$0xff]  ;;  %v3719_v51 = vmul.f32 %v8296_v38, %v9602_v31  ;;  %v4073_v46 = vmul.f32 %v4794_v16, %v8249_v5  ;;  %v4801_v31 = vld [vmem:[#allocation2 + $0xb8] sm:$0xff] }
 0x680   : > { %4459 = vst.msk [vmem:[%s9048_s4 + $0x38] sm:$0xff] %vm2200_vm1, %v4403_v6  ;;  %v4793_v6 = vld [vmem:[#allocation2 + $0x30] sm:$0xff]  ;;  %v3779_v26 = vsub.f32 %v3667_v47, %v3723_v57  ;;  %v3774_v9 = vsub.f32 %v3662_v37, %v3718_v19  ;;  %v4080_v19 = vmul.f32 %v4798_v7, %v8449_v59  ;;  %v4800_v59 = vld [vmem:[#allocation2 + $0x98] sm:$0xff] }
 0x681   : > { %4463 = vst.msk [vmem:[%s9048_s4 + $0x58] sm:$0xff] %vm2200_vm1, %v4407_v23  ;;  %v4066_v54 = vmul.f32 %v4793_v6, %v8209_v11  ;;  %v3663_v11 = vld [vmem:[%s9047_s3 + $0x198] sm:$0xff]  ;;  %v9603_v4 = vld [vmem:[#allocation104_spill] sm:$0xff] }
 0x682   : > { %4358 = vperm.xlu1 %4665, %v3772_v56   ;;  %v3775_v23 = vsub.f32 %v3663_v11, %v3719_v51  ;;  %v3721_v2 = vmul.f32 %v8391_v20, %v9603_v4  ;;  %v9605_v56 = vld [vmem:[#allocation110_spill] sm:$0xff]  ;;  %v3666_v20 = vld [vmem:[%s9047_s3 + $0x1b0] sm:$0xff]  ;;  %v4083_v51 = vmul.f32 %v4801_v31, %v8473_v18  ;;  %v9607_v31 = vld [vmem:[#allocation109_spill] sm:$0xff] }
 0x683   : > { %4378 = vperm.xlu0 %4667, %v3776_v10   ;;  %4353 = vperm.xlu2 %4666, %v3771_v3   ;;  %v4077_v10 = vmul.f32 %v4795_v50, %v8423_v22  ;;  %v4796_v3 = vld [vmem:[#allocation2 + $0x48] sm:$0xff]  ;;  %v3722_v63 = vmul.f32 %v8346_v30, %v9605_v56  ;;  %v4804_v50 = vld [vmem:[#allocation2 + $0xd0] sm:$0xff] }
 0x684   : > { %v4149_v21 = vpop.permute.xlu1 %4148  ;;  %v4069_v5 = vmul.f32 %v4796_v3, %v9604_v35 }
 0x685   : > { %v4169_v60 = vpop.permute.xlu0 %4168  ;;  %v4189_v12 = vpop.permute.xlu2 %4188  ;;  %v4402_v17 = vadd.f32 %v4149_v21, %v4066_v54  ;;  %v3778_v47 = vsub.f32 %v3666_v20, %v3722_v63  ;;  %v4799_v54 = vld [vmem:[#allocation2 + $0x60] sm:$0xff]  ;;  %v4808_v63 = vld [vmem:[#allocation2 + $0xa8] sm:$0xff] }
 0x686   : > { %v4406_v43 = vadd.f32 %v4169_v60, %v4070_v62  ;;  %v4410_v25 = vadd.f32 %v4189_v12, %v4074_v33  ;;  %v3665_v62 = vld [vmem:[%s9047_s3 + $0x1a8] sm:$0xff]  ;;  %v4797_v33 = vld [vmem:[#allocation2 + $0x80] sm:$0xff]  ;;  %v4072_v37 = vmul.f32 %v4799_v54, %v8262_v48 }
 0x687   : > { %4458 = vst.msk [vmem:[%s9048_s4 + $0x30] sm:$0xff] %vm2200_vm1, %v4402_v17  ;;  %v3777_v41 = vsub.f32 %v3665_v62, %v3721_v2  ;;  %v4805_v2 = vld [vmem:[#allocation2 + $0x90] sm:$0xff]  ;;  %v4807_v62 = vld [vmem:[#allocation2 + $0xe8] sm:$0xff] }
 0x688   : > { %4462 = vst.msk [vmem:[%s9048_s4 + $0x50] sm:$0xff] %vm2200_vm1, %v4406_v43  ;;  %v4076_v43 = vmul.f32 %v4797_v33, %v8317_v45  ;;  %v4809_v33 = vld [vmem:[#allocation2 + $0xe0] sm:$0xff] }
 0x689   : > { %4466 = vst.msk [vmem:[%s9048_s4 + $0x70] sm:$0xff] %vm2200_vm1, %v4410_v25 }
 0x68a   : > { %4373 = vperm.xlu1 %4665, %v3775_v23   ;;  %v4803_v23 = vld [vmem:[#allocation2 + $0xb0] sm:$0xff] }
 0x68b   : > { %4393 = vperm.xlu0 %4667, %v3779_v26   ;;  %4368 = vperm.xlu2 %4666, %v3774_v9   ;;  %v4079_v26 = vmul.f32 %v4800_v59, %v8370_v42  ;;  %v4802_v9 = vld [vmem:[#allocation2 + $0x78] sm:$0xff]  ;;  %v4082_v18 = vmul.f32 %v4803_v23, %v8404_v28 }
 0x68c   : > { %v4164_v22 = vpop.permute.xlu1 %4163  ;;  %v4075_v16 = vmul.f32 %v4802_v9, %v8338_v32 }
 0x68d   : > { %v4184_v38 = vpop.permute.xlu0 %4183  ;;  %v4204_v13 = vpop.permute.xlu2 %4203  ;;  %v4405_v57 = vadd.f32 %v4164_v22, %v4069_v5  ;;  %v4806_v5 = vld [vmem:[#allocation2 + $0xc8] sm:$0xff] }
 0x68e   : > { %v4409_v55 = vadd.f32 %v4184_v38, %v4073_v46  ;;  %v4413_v60 = vadd.f32 %v4204_v13, %v4077_v10  ;;  %v4086_v10 = vmul.f32 %v4804_v50, %v8496_v34  ;;  %v4078_v13 = vmul.f32 %v4805_v2, %v8378_v52  ;;  %v4817_v50 = vld [vmem:[#allocation2 + $0xf0] sm:$0xff] }
 0x68f   : > { %4461 = vst.msk [vmem:[%s9048_s4 + $0x48] sm:$0xff] %vm2200_vm1, %v4405_v57  ;;  %v4085_v34 = vmul.f32 %v4806_v5, %v8433_v49  ;;  %v4081_v57 = vmul.f32 %v4808_v63, %v8413_v14  ;;  %v4819_v5 = vld [vmem:[#allocation2 + $0x148] sm:$0xff] }
 0x690   : > { %4465 = vst.msk [vmem:[%s9048_s4 + $0x68] sm:$0xff] %vm2200_vm1, %v4409_v55 }
 0x691   : > { %4469 = vst.msk [vmem:[%s9048_s4 + $0x88] sm:$0xff] %vm2200_vm1, %v4413_v60  ;;  %v4089_v60 = vmul.f32 %v4807_v62, %v8522_v24  ;;  %v4088_v24 = vmul.f32 %v4809_v33, %v8454_v53  ;;  %v4822_v33 = vld [vmem:[#allocation2 + $0x160] sm:$0xff] }
 0x692   : > { %4388 = vperm.xlu1 %4665, %v3778_v47  }
 0x693   : > { %4383 = vperm.xlu2 %4666, %v3777_v41  }
 0x694   : > { %v4179_v25 = vpop.permute.xlu1 %4178 }
 0x695   : > { %v4199_v30 = vpop.permute.xlu0 %4198  ;;  %v4219_v6 = vpop.permute.xlu2 %4218  ;;  %v4408_v21 = vadd.f32 %v4179_v25, %v4072_v37  ;;  %v4812_v37 = vld [vmem:[#allocation2 + $0xf8] sm:$0xff] }
 0x696   : > { %v4412_v12 = vadd.f32 %v4199_v30, %v4076_v43  ;;  %v4416_v45 = vadd.f32 %v4219_v6, %v4080_v19  ;;  %v4810_v43 = vld [vmem:[#allocation2 + $0x100] sm:$0xff]  ;;  %v4813_v25 = vld [vmem:[#allocation2 + $0x118] sm:$0xff] }
 0x697   : > { %4464 = vst.msk [vmem:[%s9048_s4 + $0x60] sm:$0xff] %vm2200_vm1, %v4408_v21  ;;  %v4092_v30 = vmul.f32 %v4810_v43, %v8550_v39  ;;  %v4811_v19 = vld [vmem:[#allocation2 + $0xc0] sm:$0xff]  ;;  %v9606_v39 = vld [vmem:[#allocation119_spill] sm:$0xff]  ;;  %v4095_v21 = vmul.f32 %v4813_v25, %v8571_v8  ;;  %v9608_v8 = vld [vmem:[#allocation113_spill] sm:$0xff] }
 0x698   : > { %4468 = vst.msk [vmem:[%s9048_s4 + $0x80] sm:$0xff] %vm2200_vm1, %v4412_v12  ;;  %v4084_v12 = vmul.f32 %v4811_v19, %v8437_v27  ;;  %v4826_v25 = vld [vmem:[#allocation2 + $0x138] sm:$0xff] }
 0x699   : > { %4472 = vst.msk [vmem:[%s9048_s4 + $0xa0] sm:$0xff] %vm2200_vm1, %v4416_v45  ;;  %v4091_v45 = vmul.f32 %v4812_v37, %v9606_v39  ;;  %v4825_v37 = vld [vmem:[#allocation2 + $0x178] sm:$0xff] }
 0x69a   : > { %v4107_v39 = vmul.f32 %v4825_v37, %v8655_v61 }
 0x69c   : > { %v4194_v46 = vpop.permute.xlu1 %4193 }
 0x69d   : > { %v4214_v48 = vpop.permute.xlu0 %4213  ;;  %v4234_v11 = vpop.permute.xlu2 %4233  ;;  %v4411_v38 = vadd.f32 %v4194_v46, %v4075_v16  ;;  %v4815_v16 = vld [vmem:[#allocation2 + $0x110] sm:$0xff] }
 0x69e   : > { %v4415_v17 = vadd.f32 %v4214_v48, %v4079_v26  ;;  %v4419_v42 = vadd.f32 %v4234_v11, %v4083_v51  ;;  %v4814_v48 = vld [vmem:[#allocation2 + $0xd8] sm:$0xff] }
 0x69f   : > { %4467 = vst.msk [vmem:[%s9048_s4 + $0x78] sm:$0xff] %vm2200_vm1, %v4411_v38  ;;  %v4087_v51 = vmul.f32 %v4814_v48, %v9607_v31  ;;  %v4816_v38 = vld [vmem:[#allocation2 + $0x130] sm:$0xff] }
 0x6a0   : > { %4471 = vst.msk [vmem:[%s9048_s4 + $0x98] sm:$0xff] %vm2200_vm1, %v4415_v17  ;;  %v4098_v23 = vmul.f32 %v4816_v38, %v8592_v58  ;;  %v9610_v58 = vld [vmem:[#allocation114_spill] sm:$0xff] }
 0x6a1   : > { %4475 = vst.msk [vmem:[%s9048_s4 + $0xb8] sm:$0xff] %vm2200_vm1, %v4419_v42  ;;  %v4094_v42 = vmul.f32 %v4815_v16, %v9608_v8 }
 0x6a4   : > { %v4209_v3 = vpop.permute.xlu1 %4208 }
 0x6a5   : > { %v4229_v32 = vpop.permute.xlu0 %4228  ;;  %v4249_v4 = vpop.permute.xlu2 %4248  ;;  %v4414_v35 = vadd.f32 %v4209_v3, %v4078_v13 }
 0x6a6   : > { %v4418_v55 = vadd.f32 %v4229_v32, %v4082_v18  ;;  %v4422_v28 = vadd.f32 %v4249_v4, %v4086_v10  ;;  %v9609_v10 = vld [vmem:[#allocation154_spill] sm:$0xff] }
 0x6a7   : > { %4470 = vst.msk [vmem:[%s9048_s4 + $0x90] sm:$0xff] %vm2200_vm1, %v4414_v35 }
 0x6a8   : > { %4474 = vst.msk [vmem:[%s9048_s4 + $0xb0] sm:$0xff] %vm2200_vm1, %v4418_v55  ;;  %v4090_v55 = vmul.f32 %v4817_v50, %v9609_v10 }
 0x6a9   : > { %4478 = vst.msk [vmem:[%s9048_s4 + $0xd0] sm:$0xff] %vm2200_vm1, %v4422_v28  ;;  %v4818_v28 = vld [vmem:[#allocation2 + $0x128] sm:$0xff] }
 0x6aa   : > { %v4097_v3 = vmul.f32 %v4818_v28, %v9610_v58  ;;  %v4832_v28 = vld [vmem:[#allocation2 + $0x168] sm:$0xff]  ;;  %v9617_v58 = vld [vmem:[#allocation152_spill] sm:$0xff] }
 0x6ac   : > { %v4224_v20 = vpop.permute.xlu1 %4223 }
 0x6ad   : > { %v4244_v52 = vpop.permute.xlu0 %4243  ;;  %v4264_v56 = vpop.permute.xlu2 %4263  ;;  %v4417_v41 = vadd.f32 %v4224_v20, %v4081_v57  ;;  %v4821_v20 = vld [vmem:[#allocation2 + $0x140] sm:$0xff] }
 0x6ae   : > { %v4421_v22 = vadd.f32 %v4244_v52, %v4085_v34  ;;  %v4425_v49 = vadd.f32 %v4264_v56, %v4089_v60  ;;  %v4101_v34 = vmul.f32 %v4819_v5, %v8613_v0  ;;  %v4820_v60 = vld [vmem:[#allocation2 + $0x108] sm:$0xff]  ;;  %v4100_v0 = vmul.f32 %v4821_v20, %v8543_v29 }
 0x6af   : > { %4473 = vst.msk [vmem:[%s9048_s4 + $0xa8] sm:$0xff] %vm2200_vm1, %v4417_v41 }
 0x6b0   : > { %4477 = vst.msk [vmem:[%s9048_s4 + $0xc8] sm:$0xff] %vm2200_vm1, %v4421_v22  ;;  %v9611_v22 = vld [vmem:[#allocation108_spill] sm:$0xff] }
 0x6b1   : > { %4481 = vst.msk [vmem:[%s9048_s4 + $0xe8] sm:$0xff] %vm2200_vm1, %v4425_v49  ;;  %v4093_v56 = vmul.f32 %v4820_v60, %v9611_v22 }
 0x6b4   : > { %v4239_v6 = vpop.permute.xlu1 %4238 }
 0x6b5   : > { %v4259_v14 = vpop.permute.xlu0 %4258  ;;  %v4279_v7 = vpop.permute.xlu2 %4278  ;;  %v4420_v54 = vadd.f32 %v4239_v6, %v4084_v12 }
 0x6b6   : > { %v4424_v47 = vadd.f32 %v4259_v14, %v4088_v24  ;;  %v4428_v53 = vadd.f32 %v4279_v7, %v4092_v30  ;;  %v4104_v24 = vmul.f32 %v4822_v33, %v8634_v15  ;;  %v4823_v30 = vld [vmem:[#allocation2 + $0x120] sm:$0xff]  ;;  %v9613_v15 = vld [vmem:[#allocation157_spill] sm:$0xff] }
 0x6b7   : > { %4476 = vst.msk [vmem:[%s9048_s4 + $0xc0] sm:$0xff] %vm2200_vm1, %v4420_v54 }
 0x6b8   : > { %4480 = vst.msk [vmem:[%s9048_s4 + $0xe0] sm:$0xff] %vm2200_vm1, %v4424_v47  ;;  %v9612_v47 = vld [vmem:[#allocation111_spill] sm:$0xff] }
 0x6b9   : > { %4484 = vst.msk [vmem:[%s9048_s4 + $0x100] sm:$0xff] %vm2200_vm1, %v4428_v53  ;;  %v4096_v7 = vmul.f32 %v4823_v30, %v9612_v47  ;;  %v4824_v53 = vld [vmem:[#allocation2 + $0x158] sm:$0xff]  ;;  %v9621_v30 = vld [vmem:[#allocation160_spill] sm:$0xff] }
 0x6ba   : > { %v4103_v6 = vmul.f32 %v4824_v53, %v9613_v15 }
 0x6bc   : > { %v4254_v11 = vpop.permute.xlu1 %4253 }
 0x6bd   : > { %v4274_v27 = vpop.permute.xlu0 %4273  ;;  %v4294_v26 = vpop.permute.xlu2 %4293  ;;  %v4423_v9 = vadd.f32 %v4254_v11, %v4087_v51  ;;  %v4827_v51 = vld [vmem:[#allocation2 + $0x170] sm:$0xff] }
 0x6be   : > { %v4427_v59 = vadd.f32 %v4274_v27, %v4091_v45  ;;  %v4431_v17 = vadd.f32 %v4294_v26, %v4095_v21  ;;  %v9614_v21 = vld [vmem:[#allocation122_spill] sm:$0xff]  ;;  %v4106_v61 = vmul.f32 %v4827_v51, %v8585_v40  ;;  %v4828_v11 = vld [vmem:[#allocation2 + $0x190] sm:$0xff] }
 0x6bf   : > { %4479 = vst.msk [vmem:[%s9048_s4 + $0xd8] sm:$0xff] %vm2200_vm1, %v4423_v9  ;;  %v4110_v9 = vmul.f32 %v4828_v11, %v8673_v44  ;;  %v9616_v44 = vld [vmem:[#allocation116_spill] sm:$0xff] }
 0x6c0   : > { %4483 = vst.msk [vmem:[%s9048_s4 + $0xf8] sm:$0xff] %vm2200_vm1, %v4427_v59  ;;  %v4099_v59 = vmul.f32 %v4826_v25, %v9614_v21 }
 0x6c1   : > { %4487 = vst.msk [vmem:[%s9048_s4 + $0x118] sm:$0xff] %vm2200_vm1, %v4431_v17 }
 0x6c4   : > { %v4269_v2 = vpop.permute.xlu1 %4268 }
 0x6c5   : > { %v4289_v46 = vpop.permute.xlu0 %4288  ;;  %v4309_v32 = vpop.permute.xlu2 %4308  ;;  %v4426_v13 = vadd.f32 %v4269_v2, %v4090_v55  ;;  %v4831_v55 = vld [vmem:[#allocation2 + $0x1a8] sm:$0xff] }
 0x6c6   : > { %v4430_v18 = vadd.f32 %v4289_v46, %v4094_v42  ;;  %v4434_v4 = vadd.f32 %v4309_v32, %v4098_v23  ;;  %v4829_v42 = vld [vmem:[#allocation2 + $0x150] sm:$0xff]  ;;  %v9615_v46 = vld [vmem:[#allocation115_spill] sm:$0xff] }
 0x6c7   : > { %4482 = vst.msk [vmem:[%s9048_s4 + $0xf0] sm:$0xff] %vm2200_vm1, %v4426_v13  ;;  %v4102_v38 = vmul.f32 %v4829_v42, %v9615_v46  ;;  %v4830_v32 = vld [vmem:[#allocation2 + $0x188] sm:$0xff] }
 0x6c8   : > { %4486 = vst.msk [vmem:[%s9048_s4 + $0x110] sm:$0xff] %vm2200_vm1, %v4430_v18  ;;  %v4109_v50 = vmul.f32 %v4830_v32, %v9616_v44 }
 0x6c9   : > { %4490 = vst.msk [vmem:[%s9048_s4 + $0x130] sm:$0xff] %vm2200_vm1, %v4434_v4  ;;  %v4113_v4 = vmul.f32 %v4831_v55, %v8700_v1  ;;  %v9618_v1 = vld [vmem:[#allocation125_spill] sm:$0xff] }
 0x6cc   : > { %v4284_v57 = vpop.permute.xlu1 %4283 }
 0x6cd   : > { %v4304_v35 = vpop.permute.xlu0 %4303  ;;  %v4324_v62 = vpop.permute.xlu2 %4323  ;;  %v4429_v49 = vadd.f32 %v4284_v57, %v4093_v56  ;;  %v4834_v56 = vld [vmem:[#allocation2 + $0x180] sm:$0xff] }
 0x6ce   : > { %v4433_v52 = vadd.f32 %v4304_v35, %v4097_v3  ;;  %v4437_v63 = vadd.f32 %v4324_v62, %v4101_v34  ;;  %v4105_v3 = vmul.f32 %v4832_v28, %v9617_v58 }
 0x6cf   : > { %4485 = vst.msk [vmem:[%s9048_s4 + $0x108] sm:$0xff] %vm2200_vm1, %v4429_v49 }
 0x6d0   : > { %4489 = vst.msk [vmem:[%s9048_s4 + $0x128] sm:$0xff] %vm2200_vm1, %v4433_v52  ;;  %v4833_v52 = vld [vmem:[#allocation2 + $0x1a0] sm:$0xff] }
 0x6d1   : > { %4493 = vst.msk [vmem:[%s9048_s4 + $0x148] sm:$0xff] %vm2200_vm1, %v4437_v63  ;;  %v4112_v62 = vmul.f32 %v4833_v52, %v9618_v1  ;;  %v9619_v63 = vld [vmem:[#allocation112_spill] sm:$0xff] }
 0x6d2   : > { %v4108_v57 = vmul.f32 %v4834_v56, %v9619_v63 }
 0x6d4   : > { %v4299_v19 = vpop.permute.xlu1 %4298 }
 0x6d5   : > { %v4319_v41 = vpop.permute.xlu0 %4318  ;;  %v4339_v43 = vpop.permute.xlu2 %4338  ;;  %v4432_v12 = vadd.f32 %v4299_v19, %v4096_v7  ;;  %v4837_v19 = vld [vmem:[#allocation2 + $0x1b0] sm:$0xff] }
 0x6d6   : > { %v4436_v14 = vadd.f32 %v4319_v41, %v4100_v0  ;;  %v4440_v29 = vadd.f32 %v4339_v43, %v4104_v24  ;;  %v4835_v0 = vld [vmem:[#allocation2 + $0x1b8] sm:$0xff] }
 0x6d7   : > { %4488 = vst.msk [vmem:[%s9048_s4 + $0x120] sm:$0xff] %vm2200_vm1, %v4432_v12  ;;  %v9620_v41 = vld [vmem:[#allocation117_spill] sm:$0xff]  ;;  %v4114_v12 = vmul.f32 %v4837_v19, %v8660_v36 }
 0x6d8   : > { %4492 = vst.msk [vmem:[%s9048_s4 + $0x140] sm:$0xff] %vm2200_vm1, %v4436_v14  ;;  %v4115_v33 = vmul.f32 %v4835_v0, %v9620_v41  ;;  %v4836_v43 = vld [vmem:[#allocation2 + $0x198] sm:$0xff] }
 0x6d9   : > { %4496 = vst.msk [vmem:[%s9048_s4 + $0x160] sm:$0xff] %vm2200_vm1, %v4440_v29  ;;  %v4111_v47 = vmul.f32 %v4836_v43, %v9621_v30 }
 0x6dc   : > { %v4314_v48 = vpop.permute.xlu1 %4313 }
 0x6dd   : > { %v4334_v54 = vpop.permute.xlu0 %4333  ;;  %v4354_v27 = vpop.permute.xlu2 %4353  ;;  %v4435_v31 = vadd.f32 %v4314_v48, %v4099_v59 }
 0x6de   : > { %v4439_v45 = vadd.f32 %v4334_v54, %v4103_v6  ;;  %v4443_v26 = vadd.f32 %v4354_v27, %v4107_v39 }
 0x6df   : > { %4491 = vst.msk [vmem:[%s9048_s4 + $0x138] sm:$0xff] %vm2200_vm1, %v4435_v31 }
 0x6e0   : > { %4495 = vst.msk [vmem:[%s9048_s4 + $0x158] sm:$0xff] %vm2200_vm1, %v4439_v45 }
 0x6e1   : > { %4499 = vst.msk [vmem:[%s9048_s4 + $0x178] sm:$0xff] %vm2200_vm1, %v4443_v26 }
 0x6e4   : > { %v4329_v23 = vpop.permute.xlu1 %4328 }
 0x6e5   : > { %v4349_v17 = vpop.permute.xlu0 %4348  ;;  %v4369_v8 = vpop.permute.xlu2 %4368  ;;  %v4438_v18 = vadd.f32 %v4329_v23, %v4102_v38 }
 0x6e6   : > { %v4442_v16 = vadd.f32 %v4349_v17, %v4106_v61  ;;  %v4446_v40 = vadd.f32 %v4369_v8, %v4110_v9 }
 0x6e7   : > { %4494 = vst.msk [vmem:[%s9048_s4 + $0x150] sm:$0xff] %vm2200_vm1, %v4438_v18 }
 0x6e8   : > { %4498 = vst.msk [vmem:[%s9048_s4 + $0x170] sm:$0xff] %vm2200_vm1, %v4442_v16 }
 0x6e9   : > { %4502 = vst.msk [vmem:[%s9048_s4 + $0x190] sm:$0xff] %vm2200_vm1, %v4446_v40 }
 0x6ec   : > { %v4344_v5 = vpop.permute.xlu1 %4343 }
 0x6ed   : > { %v4364_v10 = vpop.permute.xlu0 %4363  ;;  %v4384_v13 = vpop.permute.xlu2 %4383  ;;  %v4441_v34 = vadd.f32 %v4344_v5, %v4105_v3 }
 0x6ee   : > { %v4445_v2 = vadd.f32 %v4364_v10, %v4109_v50  ;;  %v4449_v35 = vadd.f32 %v4384_v13, %v4113_v4 }
 0x6ef   : > { %4497 = vst.msk [vmem:[%s9048_s4 + $0x168] sm:$0xff] %vm2200_vm1, %v4441_v34 }
 0x6f0   : > { %4501 = vst.msk [vmem:[%s9048_s4 + $0x188] sm:$0xff] %vm2200_vm1, %v4445_v2 }
 0x6f1   : > { %4505 = vst.msk [vmem:[%s9048_s4 + $0x1a8] sm:$0xff] %vm2200_vm1, %v4449_v35 }
 0x6f4   : > { %v4359_v49 = vpop.permute.xlu1 %4358 }
 0x6f5   : > { %v4379_v60 = vpop.permute.xlu0 %4378  ;;  %v4444_v20 = vadd.f32 %v4359_v49, %v4108_v57 }
 0x6f6   : > { %v4448_v22 = vadd.f32 %v4379_v60, %v4112_v62 }
 0x6f7   : > { %4500 = vst.msk [vmem:[%s9048_s4 + $0x180] sm:$0xff] %vm2200_vm1, %v4444_v20 }
 0x6f8   : > { %4504 = vst.msk [vmem:[%s9048_s4 + $0x1a0] sm:$0xff] %vm2200_vm1, %v4448_v22 }
 0x6fc   : > { %v4374_v7 = vpop.permute.xlu1 %4373 }
 0x6fd   : > { %v4394_v24 = vpop.permute.xlu0 %4393  ;;  %v4447_v29 = vadd.f32 %v4374_v7, %v4111_v47 }
 0x6fe   : > { %v4451_v14 = vadd.f32 %v4394_v24, %v4115_v33 }
 0x6ff   : > { %4503 = vst.msk [vmem:[%s9048_s4 + $0x198] sm:$0xff] %vm2200_vm1, %v4447_v29 }
 0x700   : > { %4507 = vst.msk [vmem:[%s9048_s4 + $0x1b8] sm:$0xff] %vm2200_vm1, %v4451_v14 }
 0x704   : > { %v4389_v53 = vpop.permute.xlu1 %4388 }
 0x705   : > { %v4450_v15 = vadd.f32 %v4389_v53, %v4114_v12 }
 0x707   : > { %4506 = vst.msk [vmem:[%s9048_s4 + $0x1b0] sm:$0xff] %vm2200_vm1, %v4450_v15 }
 0x708 PF: > { %p14_p9 = scmp.ge.s32.totalorder %s4957_s20, 5   ;;  %s9622_s15 = smov %s4894_s16 }
 0x709   : > { %s9623_s16 = smov %s4898_s17  ;;  %s9624_s17 = smov %s4967_s23 }
 0x70a   : > { %s9625_s18 = smov %s4957_s20  ;;  %16 = sbr.rel (!%p14_p9) target bundleno = 3 (0x3), region = 83 }
 0x70f   :  { %4519 = vsyncpa [#allocation4], 1 }
 0x710   :  { %4521 = vsyncpa [#allocation4 + $0x1], 1 }

</bundles_post_ra>
